<compile_context>
chip_gen: v7x
topology: tpu7x:2x2x1
jax: 0.10.0
libtpu: 0.0.40
codegen_flags: <defaults>
</compile_context>

<pallas_src>
import numpy as np
import jax
import jax.numpy as jnp
from jax import lax
from jax.experimental import pallas as pl
from jax.experimental.pallas import tpu as pltpu

OUT_PAD = 128  # lane-dense channel padding for the 3-channel final conv


# ----------------------------- fused Pallas kernel ---------------------------

def _make_fused_kernel(H, W):
    Hh, Wh = H // 2, W // 2          # resolution after pool 1
    Hq, Wq = H // 4, W // 4          # resolution after pool 2
    Wq_c = max(8, Wq)                # quarter-res compute width (8-aligned)
    f32 = jnp.float32

    # (h, w, C) <-> (h*w, C) reshapes stay layout-preserving only when the
    # second-minor (sublane) dim is a multiple of 8.
    assert W % 8 == 0 and Wh % 8 == 0 and Wq_c % 8 == 0 and H % 4 == 0

    def conv3x3(src_ref, w_ref, b_ref, hs, ws, relu):
        """3x3 'same' conv over the (hs, ws) interior of a zero-padded ref.

        src_ref: (hs+2, >=ws+2, Cin) VMEM ref (data at [1:, 1:], zero border).
        w_ref: (3, 3, Cin, Cout) VMEM ref.  b_ref: (1, Cout) VMEM ref.
        Returns (hs, ws, Cout) f32.  Nine accumulated MXU matmuls, K = Cin.
        """
        cin = src_ref.shape[-1]
        cout = w_ref.shape[-1]
        acc = jnp.zeros((hs * ws, cout), f32)
        for dy in range(3):
            for dx in range(3):
                patch = src_ref[dy:dy + hs, dx:dx + ws, :].reshape(hs * ws, cin)
                acc = acc + jnp.dot(patch, w_ref[dy, dx],
                                    preferred_element_type=f32)
        acc = acc + b_ref[...]
        if relu:
            acc = jnp.maximum(acc, 0.0)
        return acc.reshape(hs, ws, cout)

    def pool2x2_into(src_ref, dst_ref, ho, wo):
        """2x2 / stride-2 max pool of src_ref (2ho, 2wo, C) into the interior
        [1:1+ho, 1:1+wo] of the zero-padded dst_ref."""
        m = jnp.maximum(src_ref[:, pl.ds(0, wo, stride=2), :],
                        src_ref[:, pl.ds(1, wo, stride=2), :])    # (2ho, wo, C)
        dst_ref[1:1 + ho, 1:1 + wo, :] = jnp.stack(
            [jnp.maximum(m[2 * i], m[2 * i + 1]) for i in range(ho)], axis=0)

    def upsample2x_into(a, dst_ref, h, w):
        """Nearest 2x upsample of value a (h, w, C) into the interior
        [1:1+2h, 1:1+2w] of the zero-padded dst_ref."""
        c = a.shape[-1]
        rows2 = jnp.stack([a, a], axis=1).reshape(2 * h, w, c)  # duplicate rows
        # source column j feeds upsampled columns 2j (even) and 2j+1 (odd)
        dst_ref[1:1 + 2 * h, pl.ds(1, w, stride=2), :] = rows2
        dst_ref[1:1 + 2 * h, pl.ds(2, w, stride=2), :] = rows2

    def kernel(x_ref,
               w1, b1, w2, b2, w3, b3, w4, b4, w5, b5, w6, b6,
               o_ref,
               tmp1, pad1, tmp2, pad2, pad3, pad4, pad5):
        # Zero the padded scratch buffers every step: their borders (and the
        # unused wide columns of the quarter-res stage) supply the conv
        # zero-padding.  (Scratch is per-core and persists across grid steps,
        # so a program_id==0 guard would be unsafe under "parallel".)
        for buf in (pad1, pad2, pad3, pad4, pad5):
            buf[...] = jnp.zeros(buf.shape, f32)

        # ---- conv1 (Cin=1) + ReLU: 9 broadcast multiply-adds on the VPU ----
        # (a K=1 matmul would waste the MXU).
        y1 = jnp.zeros((H, W, 64), f32)
        for dy in range(3):
            for dx in range(3):
                # (H, W, 1) * (1, 64) -> (H, W, 64)
                y1 = y1 + x_ref[0, dy:dy + H, dx:dx + W, :] * w1[dy, dx]
        tmp1[...] = jnp.maximum(y1 + b1[...], 0.0)

        # ---- max_pool2d(2) -> pad1 interior ----
        pool2x2_into(tmp1, pad1, Hh, Wh)

        # ---- conv2 + ReLU ----
        tmp2[...] = conv3x3(pad1, w2, b2, Hh, Wh, relu=True)

        # ---- max_pool2d(2) -> pad2 interior ----
        pool2x2_into(tmp2, pad2, Hq, Wq)

        # ---- conv3 + ReLU (computed on an 8-wide tile; columns >= Wq are fed
        #      by zero columns and simply not written back) ----
        y3 = conv3x3(pad2, w3, b3, Hq, Wq_c, relu=True)
        pad3[1:1 + Hq, 1:1 + Wq, :] = y3[:, :Wq, :]

        # ---- deconv1 (conv with flipped/swapped kernel) + ReLU ----
        y4 = conv3x3(pad3, w4, b4, Hq, Wq_c, relu=True)

        # ---- nearest 2x upsample -> pad4 interior ----
        upsample2x_into(y4[:, :Wq, :], pad4, Hq, Wq)

        # ---- deconv2 + ReLU ----
        y5 = conv3x3(pad4, w5, b5, Hh, Wh, relu=True)

        # ---- nearest 2x upsample -> pad5 interior ----
        upsample2x_into(y5, pad5, Hh, Wh)

        # ---- deconv3 (no ReLU), lane-dense Cout padded to 128 ----
        o_ref[0] = conv3x3(pad5, w6, b6, H, W, relu=False)

    scratch_shapes = [
        pltpu.VMEM((H, W, 64), f32),                       # tmp1: conv1 pre-pool
        pltpu.VMEM((Hh + 2, Wh + 2, 64), f32),             # pad1: conv2 input
        pltpu.VMEM((Hh, Wh, 128), f32),                    # tmp2: conv2 pre-pool
        pltpu.VMEM((Hq + 2, Wq_c + 2, 128), f32),          # pad2: conv3 input
        pltpu.VMEM((Hq + 2, Wq_c + 2, 256), f32),          # pad3: deconv1 input
        pltpu.VMEM((2 * Hq + 2, 2 * Wq + 2, 128), f32),    # pad4: deconv2 input
        pltpu.VMEM((H + 2, W + 2, 64), f32),               # pad5: deconv3 input
    ]
    return kernel, scratch_shapes


# --------------------------- weight conversions -------------------------------

def conv_oihw_to_hwio(w):
    # nn.Conv2d weight (Cout, Cin, kH, kW) -> HWIO
    return jnp.transpose(w, (2, 3, 1, 0))


def convtranspose_to_equiv_hwio(wt):
    # ConvTranspose2d(k=3, stride=1, padding=1) == Conv2d(padding=1) with the
    # kernel spatially flipped and in/out channels swapped.
    # wt: (Cin, Cout, kH, kW) -> HWIO of the equivalent forward conv.
    return jnp.transpose(wt[:, :, ::-1, ::-1], (2, 3, 0, 1))


# ------------------------------ model forward ---------------------------------

def colorization_cnn_forward(x_nchw, p):
    x = jnp.transpose(x_nchw, (0, 2, 3, 1)).astype(jnp.float32)  # NCHW -> NHWC
    N, H, W, _ = x.shape
    xpad = jnp.pad(x, ((0, 0), (1, 1), (1, 1), (0, 0)))          # conv1 zero pad

    w1 = conv_oihw_to_hwio(p["conv1_w"]);             b1 = p["conv1_b"].reshape(1, -1)
    w2 = conv_oihw_to_hwio(p["conv2_w"]);             b2 = p["conv2_b"].reshape(1, -1)
    w3 = conv_oihw_to_hwio(p["conv3_w"]);             b3 = p["conv3_b"].reshape(1, -1)
    w4 = convtranspose_to_equiv_hwio(p["deconv1_w"]); b4 = p["deconv1_b"].reshape(1, -1)
    w5 = convtranspose_to_equiv_hwio(p["deconv2_w"]); b5 = p["deconv2_b"].reshape(1, -1)
    w6 = convtranspose_to_equiv_hwio(p["deconv3_w"])              # (3, 3, 64, 3)
    w6 = jnp.pad(w6, ((0, 0), (0, 0), (0, 0), (0, OUT_PAD - 3)))  # lane-dense Cout
    b6 = jnp.pad(p["deconv3_b"], (0, OUT_PAD - 3)).reshape(1, -1)

    kernel, scratch_shapes = _make_fused_kernel(H, W)

    c4 = lambda n: (0, 0, 0, 0)
    c2 = lambda n: (0, 0)
    full = lambda a: pl.BlockSpec(a.shape, c4 if a.ndim == 4 else c2)

    out128 = pl.pallas_call(
        kernel,
        out_shape=jax.ShapeDtypeStruct((N, H, W, OUT_PAD), jnp.float32),
        grid=(N,),
        in_specs=[pl.BlockSpec((1, H + 2, W + 2, 1), lambda n: (n, 0, 0, 0)),
                  full(w1), full(b1), full(w2), full(b2), full(w3), full(b3),
                  full(w4), full(b4), full(w5), full(b5), full(w6), full(b6)],
        out_specs=pl.BlockSpec((1, H, W, OUT_PAD), lambda n: (n, 0, 0, 0)),
        scratch_shapes=scratch_shapes,
        compiler_params=pltpu.CompilerParams(
            dimension_semantics=("parallel",)),
    )(xpad, w1, b1, w2, b2, w3, b3, w4, b4, w5, b5, w6, b6)

    out = out128[:, :, :, :3]                                    # drop lane pad
    return jnp.transpose(out, (0, 3, 1, 2))                      # NHWC -> NCHW


# ----------------------- deterministic parameter init -------------------------

def init_params(key):
    def rnd(k, shape, scale=0.05):
        return scale * jax.random.normal(k, shape, dtype=jnp.float32)

    ks = jax.random.split(key, 12)
    p = {}
    # nn.Conv2d weights: (Cout, Cin, 3, 3)
    p["conv1_w"] = rnd(ks[0], (64, 1, 3, 3));      p["conv1_b"] = rnd(ks[1], (64,))
    p["conv2_w"] = rnd(ks[2], (128, 64, 3, 3));    p["conv2_b"] = rnd(ks[3], (128,))
    p["conv3_w"] = rnd(ks[4], (256, 128, 3, 3));   p["conv3_b"] = rnd(ks[5], (256,))
    # nn.ConvTranspose2d weights: (Cin, Cout, 3, 3)
    p["deconv1_w"] = rnd(ks[6], (256, 128, 3, 3)); p["deconv1_b"] = rnd(ks[7], (128,))
    p["deconv2_w"] = rnd(ks[8], (128, 64, 3, 3));  p["deconv2_b"] = rnd(ks[9], (64,))
    p["deconv3_w"] = rnd(ks[10], (64, 3, 3, 3));   p["deconv3_b"] = rnd(ks[11], (3,))
    return p


# --------------------------- pure-JAX reference --------------------------------

def upsample2x_nearest(x):
    return jnp.repeat(jnp.repeat(x, 2, axis=1), 2, axis=2)


def ref_forward(x_nchw, p):
    dn = ("NHWC", "HWIO", "NHWC")

    def conv(x, w_hwio, b):
        return lax.conv_general_dilated(x, w_hwio, (1, 1), "SAME",
                                        dimension_numbers=dn) + b

    def pool(x):
        return lax.reduce_window(x, -jnp.inf, lax.max,
                                 (1, 2, 2, 1), (1, 2, 2, 1), "VALID")

    x = jnp.transpose(x_nchw, (0, 2, 3, 1))
    x = jax.nn.relu(conv(x, conv_oihw_to_hwio(p["conv1_w"]), p["conv1_b"]))
    x = pool(x)
    x = jax.nn.relu(conv(x, conv_oihw_to_hwio(p["conv2_w"]), p["conv2_b"]))
    x = pool(x)
    x = jax.nn.relu(conv(x, conv_oihw_to_hwio(p["conv3_w"]), p["conv3_b"]))
    x = jax.nn.relu(conv(x, convtranspose_to_equiv_hwio(p["deconv1_w"]), p["deconv1_b"]))
    x = upsample2x_nearest(x)
    x = jax.nn.relu(conv(x, convtranspose_to_equiv_hwio(p["deconv2_w"]), p["deconv2_b"]))
    x = upsample2x_nearest(x)
    x = conv(x, convtranspose_to_equiv_hwio(p["deconv3_w"]), p["deconv3_b"])
    return jnp.transpose(x, (0, 3, 1, 2))


# ----------------------------------- main --------------------------------------

if __name__ == "__main__":
    key = jax.random.PRNGKey(0)
    kx, kp = jax.random.split(key)
    # Grayscale input, PyTorch NCHW convention: (batch=2, channels=1, 16, 16)
    x = jax.random.normal(kx, (2, 1, 16, 16), dtype=jnp.float32)
    params = init_params(kp)

    out = jax.jit(colorization_cnn_forward)(x, params)
    out = jax.block_until_ready(out)
    assert out.shape == (2, 3, 16, 16), out.shape

    ref = jax.block_until_ready(ref_forward(x, params))
    np.testing.assert_allclose(np.asarray(out), np.asarray(ref),
                               rtol=1e-3, atol=1e-3)
    print("KERNEL_OK")
</pallas_src>

<mosaic_0001>
module attributes {stable_mosaic.version = 11 : i64} {
  func.func @kernel(%arg0: i32, %arg1: memref<1x18x18x1xf32, #tpu.memory_space<vmem>>, %arg2: memref<3x3x1x64xf32, #tpu.memory_space<vmem>>, %arg3: memref<1x64xf32, #tpu.memory_space<vmem>>, %arg4: memref<3x3x64x128xf32, #tpu.memory_space<vmem>>, %arg5: memref<1x128xf32, #tpu.memory_space<vmem>>, %arg6: memref<3x3x128x256xf32, #tpu.memory_space<vmem>>, %arg7: memref<1x256xf32, #tpu.memory_space<vmem>>, %arg8: memref<3x3x256x128xf32, #tpu.memory_space<vmem>>, %arg9: memref<1x128xf32, #tpu.memory_space<vmem>>, %arg10: memref<3x3x128x64xf32, #tpu.memory_space<vmem>>, %arg11: memref<1x64xf32, #tpu.memory_space<vmem>>, %arg12: memref<3x3x64x128xf32, #tpu.memory_space<vmem>>, %arg13: memref<1x128xf32, #tpu.memory_space<vmem>>, %arg14: memref<1x16x16x128xf32, #tpu.memory_space<vmem>>, %arg15: memref<16x16x64xf32, #tpu.memory_space<vmem>>, %arg16: memref<10x10x64xf32, #tpu.memory_space<vmem>>, %arg17: memref<8x8x128xf32, #tpu.memory_space<vmem>>, %arg18: memref<6x10x128xf32, #tpu.memory_space<vmem>>, %arg19: memref<6x10x256xf32, #tpu.memory_space<vmem>>, %arg20: memref<10x10x128xf32, #tpu.memory_space<vmem>>, %arg21: memref<18x18x64xf32, #tpu.memory_space<vmem>>) attributes {dimension_semantics = [#tpu.dimension_semantics<parallel>], iteration_bounds = array<i64: 2>, scalar_prefetch = 0 : i64, scratch_operands = 7 : i64, tpu.core_type = #tpu.core_type<tc>, window_params = [{transform_indices = @transform_0, window_bounds = array<i64: 1, 18, 18, 1>}, {pipeline_mode = #tpu.pipeline_mode<synchronous>, transform_indices = @transform_1, window_bounds = array<i64: 3, 3, 1, 64>}, {pipeline_mode = #tpu.pipeline_mode<synchronous>, transform_indices = @transform_2, window_bounds = array<i64: 1, 64>}, {pipeline_mode = #tpu.pipeline_mode<synchronous>, transform_indices = @transform_3, window_bounds = array<i64: 3, 3, 64, 128>}, {pipeline_mode = #tpu.pipeline_mode<synchronous>, transform_indices = @transform_4, window_bounds = array<i64: 1, 128>}, {pipeline_mode = #tpu.pipeline_mode<synchronous>, transform_indices = @transform_5, window_bounds = array<i64: 3, 3, 128, 256>}, {pipeline_mode = #tpu.pipeline_mode<synchronous>, transform_indices = @transform_6, window_bounds = array<i64: 1, 256>}, {pipeline_mode = #tpu.pipeline_mode<synchronous>, transform_indices = @transform_7, window_bounds = array<i64: 3, 3, 256, 128>}, {pipeline_mode = #tpu.pipeline_mode<synchronous>, transform_indices = @transform_8, window_bounds = array<i64: 1, 128>}, {pipeline_mode = #tpu.pipeline_mode<synchronous>, transform_indices = @transform_9, window_bounds = array<i64: 3, 3, 128, 64>}, {pipeline_mode = #tpu.pipeline_mode<synchronous>, transform_indices = @transform_10, window_bounds = array<i64: 1, 64>}, {pipeline_mode = #tpu.pipeline_mode<synchronous>, transform_indices = @transform_11, window_bounds = array<i64: 3, 3, 64, 128>}, {pipeline_mode = #tpu.pipeline_mode<synchronous>, transform_indices = @transform_12, window_bounds = array<i64: 1, 128>}, {transform_indices = @transform_13, window_bounds = array<i64: 1, 16, 16, 128>}]} {
    %cst = arith.constant 0.000000e+00 : f32
    %0 = vector.broadcast %cst : f32 to vector<10x10x64xf32>
    %c0 = arith.constant 0 : index
    %c0_0 = arith.constant 0 : index
    %c0_1 = arith.constant 0 : index
    %1 = vector.load %arg16[%c0, %c0_0, %c0_1] : memref<10x10x64xf32, #tpu.memory_space<vmem>>, vector<10x10x64xf32>
    tpu.vector_store %arg16[%c0, %c0_0, %c0_1], %0 {strides = array<i32>} : memref<10x10x64xf32, #tpu.memory_space<vmem>>, vector<10x10x64xf32>,
    %cst_2 = arith.constant 0.000000e+00 : f32
    %2 = vector.broadcast %cst_2 : f32 to vector<6x10x128xf32>
    %c0_3 = arith.constant 0 : index
    %c0_4 = arith.constant 0 : index
    %c0_5 = arith.constant 0 : index
    %3 = vector.load %arg18[%c0_3, %c0_4, %c0_5] : memref<6x10x128xf32, #tpu.memory_space<vmem>>, vector<6x10x128xf32>
    tpu.vector_store %arg18[%c0_3, %c0_4, %c0_5], %2 {strides = array<i32>} : memref<6x10x128xf32, #tpu.memory_space<vmem>>, vector<6x10x128xf32>,
    %cst_6 = arith.constant 0.000000e+00 : f32
    %4 = vector.broadcast %cst_6 : f32 to vector<6x10x256xf32>
    %c0_7 = arith.constant 0 : index
    %c0_8 = arith.constant 0 : index
    %c0_9 = arith.constant 0 : index
    %5 = vector.load %arg19[%c0_7, %c0_8, %c0_9] : memref<6x10x256xf32, #tpu.memory_space<vmem>>, vector<6x10x256xf32>
    tpu.vector_store %arg19[%c0_7, %c0_8, %c0_9], %4 {strides = array<i32>} : memref<6x10x256xf32, #tpu.memory_space<vmem>>, vector<6x10x256xf32>,
    %cst_10 = arith.constant 0.000000e+00 : f32
    %6 = vector.broadcast %cst_10 : f32 to vector<10x10x128xf32>
    %c0_11 = arith.constant 0 : index
    %c0_12 = arith.constant 0 : index
    %c0_13 = arith.constant 0 : index
    %7 = vector.load %arg20[%c0_11, %c0_12, %c0_13] : memref<10x10x128xf32, #tpu.memory_space<vmem>>, vector<10x10x128xf32>
    tpu.vector_store %arg20[%c0_11, %c0_12, %c0_13], %6 {strides = array<i32>} : memref<10x10x128xf32, #tpu.memory_space<vmem>>, vector<10x10x128xf32>,
    %cst_14 = arith.constant 0.000000e+00 : f32
    %8 = vector.broadcast %cst_14 : f32 to vector<18x18x64xf32>
    %c0_15 = arith.constant 0 : index
    %c0_16 = arith.constant 0 : index
    %c0_17 = arith.constant 0 : index
    %9 = vector.load %arg21[%c0_15, %c0_16, %c0_17] : memref<18x18x64xf32, #tpu.memory_space<vmem>>, vector<18x18x64xf32>
    tpu.vector_store %arg21[%c0_15, %c0_16, %c0_17], %8 {strides = array<i32>} : memref<18x18x64xf32, #tpu.memory_space<vmem>>, vector<18x18x64xf32>,
    %cst_18 = arith.constant 0.000000e+00 : f32
    %10 = vector.broadcast %cst_18 : f32 to vector<16x16x64xf32>
    %c0_19 = arith.constant 0 : index
    %c0_20 = arith.constant 0 : index
    %c0_21 = arith.constant 0 : index
    %c0_22 = arith.constant 0 : index
    %11 = vector.load %arg1[%c0_19, %c0_20, %c0_21, %c0_22] : memref<1x18x18x1xf32, #tpu.memory_space<vmem>>, vector<1x16x16x1xf32>
    %12 = vector.shape_cast %11 : vector<1x16x16x1xf32> to vector<16x16x1xf32>
    %c0_23 = arith.constant 0 : index
    %c0_24 = arith.constant 0 : index
    %c0_25 = arith.constant 0 : index
    %c0_26 = arith.constant 0 : index
    %13 = vector.load %arg2[%c0_23, %c0_24, %c0_25, %c0_26] : memref<3x3x1x64xf32, #tpu.memory_space<vmem>>, vector<1x1x1x64xf32>
    %14 = vector.shape_cast %13 : vector<1x1x1x64xf32> to vector<1x64xf32>
    %15 = vector.shape_cast %14 : vector<1x64xf32> to vector<1x1x64xf32>
    %16 = vector.broadcast %12 : vector<16x16x1xf32> to vector<16x16x64xf32>
    %17 = vector.broadcast %15 : vector<1x1x64xf32> to vector<16x16x64xf32>
    %18 = arith.mulf %16, %17 : vector<16x16x64xf32>
    %19 = arith.addf %10, %18 : vector<16x16x64xf32>
    %c0_27 = arith.constant 0 : index
    %c0_28 = arith.constant 0 : index
    %c1 = arith.constant 1 : index
    %c0_29 = arith.constant 0 : index
    %20 = vector.load %arg1[%c0_27, %c0_28, %c1, %c0_29] : memref<1x18x18x1xf32, #tpu.memory_space<vmem>>, vector<1x16x16x1xf32>
    %21 = vector.shape_cast %20 : vector<1x16x16x1xf32> to vector<16x16x1xf32>
    %c0_30 = arith.constant 0 : index
    %c1_31 = arith.constant 1 : index
    %c0_32 = arith.constant 0 : index
    %c0_33 = arith.constant 0 : index
    %22 = vector.load %arg2[%c0_30, %c1_31, %c0_32, %c0_33] : memref<3x3x1x64xf32, #tpu.memory_space<vmem>>, vector<1x1x1x64xf32>
    %23 = vector.shape_cast %22 : vector<1x1x1x64xf32> to vector<1x64xf32>
    %24 = vector.shape_cast %23 : vector<1x64xf32> to vector<1x1x64xf32>
    %25 = vector.broadcast %21 : vector<16x16x1xf32> to vector<16x16x64xf32>
    %26 = vector.broadcast %24 : vector<1x1x64xf32> to vector<16x16x64xf32>
    %27 = arith.mulf %25, %26 : vector<16x16x64xf32>
    %28 = arith.addf %19, %27 : vector<16x16x64xf32>
    %c0_34 = arith.constant 0 : index
    %c0_35 = arith.constant 0 : index
    %c2 = arith.constant 2 : index
    %c0_36 = arith.constant 0 : index
    %29 = vector.load %arg1[%c0_34, %c0_35, %c2, %c0_36] : memref<1x18x18x1xf32, #tpu.memory_space<vmem>>, vector<1x16x16x1xf32>
    %30 = vector.shape_cast %29 : vector<1x16x16x1xf32> to vector<16x16x1xf32>
    %c0_37 = arith.constant 0 : index
    %c2_38 = arith.constant 2 : index
    %c0_39 = arith.constant 0 : index
    %c0_40 = arith.constant 0 : index
    %31 = vector.load %arg2[%c0_37, %c2_38, %c0_39, %c0_40] : memref<3x3x1x64xf32, #tpu.memory_space<vmem>>, vector<1x1x1x64xf32>
    %32 = vector.shape_cast %31 : vector<1x1x1x64xf32> to vector<1x64xf32>
    %33 = vector.shape_cast %32 : vector<1x64xf32> to vector<1x1x64xf32>
    %34 = vector.broadcast %30 : vector<16x16x1xf32> to vector<16x16x64xf32>
    %35 = vector.broadcast %33 : vector<1x1x64xf32> to vector<16x16x64xf32>
    %36 = arith.mulf %34, %35 : vector<16x16x64xf32>
    %37 = arith.addf %28, %36 : vector<16x16x64xf32>
    %c0_41 = arith.constant 0 : index
    %c1_42 = arith.constant 1 : index
    %c0_43 = arith.constant 0 : index
    %c0_44 = arith.constant 0 : index
    %38 = vector.load %arg1[%c0_41, %c1_42, %c0_43, %c0_44] : memref<1x18x18x1xf32, #tpu.memory_space<vmem>>, vector<1x16x16x1xf32>
    %39 = vector.shape_cast %38 : vector<1x16x16x1xf32> to vector<16x16x1xf32>
    %c1_45 = arith.constant 1 : index
    %c0_46 = arith.constant 0 : index
    %c0_47 = arith.constant 0 : index
    %c0_48 = arith.constant 0 : index
    %40 = vector.load %arg2[%c1_45, %c0_46, %c0_47, %c0_48] : memref<3x3x1x64xf32, #tpu.memory_space<vmem>>, vector<1x1x1x64xf32>
    %41 = vector.shape_cast %40 : vector<1x1x1x64xf32> to vector<1x64xf32>
    %42 = vector.shape_cast %41 : vector<1x64xf32> to vector<1x1x64xf32>
    %43 = vector.broadcast %39 : vector<16x16x1xf32> to vector<16x16x64xf32>
    %44 = vector.broadcast %42 : vector<1x1x64xf32> to vector<16x16x64xf32>
    %45 = arith.mulf %43, %44 : vector<16x16x64xf32>
    %46 = arith.addf %37, %45 : vector<16x16x64xf32>
    %c0_49 = arith.constant 0 : index
    %c1_50 = arith.constant 1 : index
    %c1_51 = arith.constant 1 : index
    %c0_52 = arith.constant 0 : index
    %47 = vector.load %arg1[%c0_49, %c1_50, %c1_51, %c0_52] : memref<1x18x18x1xf32, #tpu.memory_space<vmem>>, vector<1x16x16x1xf32>
    %48 = vector.shape_cast %47 : vector<1x16x16x1xf32> to vector<16x16x1xf32>
    %c1_53 = arith.constant 1 : index
    %c1_54 = arith.constant 1 : index
    %c0_55 = arith.constant 0 : index
    %c0_56 = arith.constant 0 : index
    %49 = vector.load %arg2[%c1_53, %c1_54, %c0_55, %c0_56] : memref<3x3x1x64xf32, #tpu.memory_space<vmem>>, vector<1x1x1x64xf32>
    %50 = vector.shape_cast %49 : vector<1x1x1x64xf32> to vector<1x64xf32>
    %51 = vector.shape_cast %50 : vector<1x64xf32> to vector<1x1x64xf32>
    %52 = vector.broadcast %48 : vector<16x16x1xf32> to vector<16x16x64xf32>
    %53 = vector.broadcast %51 : vector<1x1x64xf32> to vector<16x16x64xf32>
    %54 = arith.mulf %52, %53 : vector<16x16x64xf32>
    %55 = arith.addf %46, %54 : vector<16x16x64xf32>
    %c0_57 = arith.constant 0 : index
    %c1_58 = arith.constant 1 : index
    %c2_59 = arith.constant 2 : index
    %c0_60 = arith.constant 0 : index
    %56 = vector.load %arg1[%c0_57, %c1_58, %c2_59, %c0_60] : memref<1x18x18x1xf32, #tpu.memory_space<vmem>>, vector<1x16x16x1xf32>
    %57 = vector.shape_cast %56 : vector<1x16x16x1xf32> to vector<16x16x1xf32>
    %c1_61 = arith.constant 1 : index
    %c2_62 = arith.constant 2 : index
    %c0_63 = arith.constant 0 : index
    %c0_64 = arith.constant 0 : index
    %58 = vector.load %arg2[%c1_61, %c2_62, %c0_63, %c0_64] : memref<3x3x1x64xf32, #tpu.memory_space<vmem>>, vector<1x1x1x64xf32>
    %59 = vector.shape_cast %58 : vector<1x1x1x64xf32> to vector<1x64xf32>
    %60 = vector.shape_cast %59 : vector<1x64xf32> to vector<1x1x64xf32>
    %61 = vector.broadcast %57 : vector<16x16x1xf32> to vector<16x16x64xf32>
    %62 = vector.broadcast %60 : vector<1x1x64xf32> to vector<16x16x64xf32>
    %63 = arith.mulf %61, %62 : vector<16x16x64xf32>
    %64 = arith.addf %55, %63 : vector<16x16x64xf32>
    %c0_65 = arith.constant 0 : index
    %c2_66 = arith.constant 2 : index
    %c0_67 = arith.constant 0 : index
    %c0_68 = arith.constant 0 : index
    %65 = vector.load %arg1[%c0_65, %c2_66, %c0_67, %c0_68] : memref<1x18x18x1xf32, #tpu.memory_space<vmem>>, vector<1x16x16x1xf32>
    %66 = vector.shape_cast %65 : vector<1x16x16x1xf32> to vector<16x16x1xf32>
    %c2_69 = arith.constant 2 : index
    %c0_70 = arith.constant 0 : index
    %c0_71 = arith.constant 0 : index
    %c0_72 = arith.constant 0 : index
    %67 = vector.load %arg2[%c2_69, %c0_70, %c0_71, %c0_72] : memref<3x3x1x64xf32, #tpu.memory_space<vmem>>, vector<1x1x1x64xf32>
    %68 = vector.shape_cast %67 : vector<1x1x1x64xf32> to vector<1x64xf32>
    %69 = vector.shape_cast %68 : vector<1x64xf32> to vector<1x1x64xf32>
    %70 = vector.broadcast %66 : vector<16x16x1xf32> to vector<16x16x64xf32>
    %71 = vector.broadcast %69 : vector<1x1x64xf32> to vector<16x16x64xf32>
    %72 = arith.mulf %70, %71 : vector<16x16x64xf32>
    %73 = arith.addf %64, %72 : vector<16x16x64xf32>
    %c0_73 = arith.constant 0 : index
    %c2_74 = arith.constant 2 : index
    %c1_75 = arith.constant 1 : index
    %c0_76 = arith.constant 0 : index
    %74 = vector.load %arg1[%c0_73, %c2_74, %c1_75, %c0_76] : memref<1x18x18x1xf32, #tpu.memory_space<vmem>>, vector<1x16x16x1xf32>
    %75 = vector.shape_cast %74 : vector<1x16x16x1xf32> to vector<16x16x1xf32>
    %c2_77 = arith.constant 2 : index
    %c1_78 = arith.constant 1 : index
    %c0_79 = arith.constant 0 : index
    %c0_80 = arith.constant 0 : index
    %76 = vector.load %arg2[%c2_77, %c1_78, %c0_79, %c0_80] : memref<3x3x1x64xf32, #tpu.memory_space<vmem>>, vector<1x1x1x64xf32>
    %77 = vector.shape_cast %76 : vector<1x1x1x64xf32> to vector<1x64xf32>
    %78 = vector.shape_cast %77 : vector<1x64xf32> to vector<1x1x64xf32>
    %79 = vector.broadcast %75 : vector<16x16x1xf32> to vector<16x16x64xf32>
    %80 = vector.broadcast %78 : vector<1x1x64xf32> to vector<16x16x64xf32>
    %81 = arith.mulf %79, %80 : vector<16x16x64xf32>
    %82 = arith.addf %73, %81 : vector<16x16x64xf32>
    %c0_81 = arith.constant 0 : index
    %c2_82 = arith.constant 2 : index
    %c2_83 = arith.constant 2 : index
    %c0_84 = arith.constant 0 : index
    %83 = vector.load %arg1[%c0_81, %c2_82, %c2_83, %c0_84] : memref<1x18x18x1xf32, #tpu.memory_space<vmem>>, vector<1x16x16x1xf32>
    %84 = vector.shape_cast %83 : vector<1x16x16x1xf32> to vector<16x16x1xf32>
    %c2_85 = arith.constant 2 : index
    %c2_86 = arith.constant 2 : index
    %c0_87 = arith.constant 0 : index
    %c0_88 = arith.constant 0 : index
    %85 = vector.load %arg2[%c2_85, %c2_86, %c0_87, %c0_88] : memref<3x3x1x64xf32, #tpu.memory_space<vmem>>, vector<1x1x1x64xf32>
    %86 = vector.shape_cast %85 : vector<1x1x1x64xf32> to vector<1x64xf32>
    %87 = vector.shape_cast %86 : vector<1x64xf32> to vector<1x1x64xf32>
    %88 = vector.broadcast %84 : vector<16x16x1xf32> to vector<16x16x64xf32>
    %89 = vector.broadcast %87 : vector<1x1x64xf32> to vector<16x16x64xf32>
    %90 = arith.mulf %88, %89 : vector<16x16x64xf32>
    %91 = arith.addf %82, %90 : vector<16x16x64xf32>
    %c0_89 = arith.constant 0 : index
    %c0_90 = arith.constant 0 : index
    %92 = vector.load %arg3[%c0_89, %c0_90] : memref<1x64xf32, #tpu.memory_space<vmem>>, vector<1x64xf32>
    %93 = vector.shape_cast %92 : vector<1x64xf32> to vector<1x1x64xf32>
    %94 = vector.broadcast %93 : vector<1x1x64xf32> to vector<16x16x64xf32>
    %95 = arith.addf %91, %94 : vector<16x16x64xf32>
    %cst_91 = arith.constant 0.000000e+00 : f32
    %96 = vector.broadcast %cst_91 : f32 to vector<16x16x64xf32>
    %97 = arith.maximumf %95, %96 : vector<16x16x64xf32>
    %c0_92 = arith.constant 0 : index
    %c0_93 = arith.constant 0 : index
    %c0_94 = arith.constant 0 : index
    %98 = vector.load %arg15[%c0_92, %c0_93, %c0_94] : memref<16x16x64xf32, #tpu.memory_space<vmem>>, vector<16x16x64xf32>
    tpu.vector_store %arg15[%c0_92, %c0_93, %c0_94], %97 {strides = array<i32>} : memref<16x16x64xf32, #tpu.memory_space<vmem>>, vector<16x16x64xf32>,
    %c0_95 = arith.constant 0 : index
    %c0_96 = arith.constant 0 : index
    %c0_97 = arith.constant 0 : index
    %99 = tpu.strided_load %arg15[%c0_95, %c0_96, %c0_97] {strides = array<i32: 1, 2, 1>} : memref<16x16x64xf32, #tpu.memory_space<vmem>>, vector<16x8x64xf32>
    %c0_98 = arith.constant 0 : index
    %c1_99 = arith.constant 1 : index
    %c0_100 = arith.constant 0 : index
    %100 = tpu.strided_load %arg15[%c0_98, %c1_99, %c0_100] {strides = array<i32: 1, 2, 1>} : memref<16x16x64xf32, #tpu.memory_space<vmem>>, vector<16x8x64xf32>
    %101 = arith.maximumf %99, %100 : vector<16x8x64xf32>
    %102 = vector.extract_strided_slice %101 {offsets = [0, 0, 0], sizes = [1, 8, 64], strides = [1, 1, 1]} : vector<16x8x64xf32> to vector<1x8x64xf32>
    %103 = vector.shape_cast %102 : vector<1x8x64xf32> to vector<8x64xf32>
    %104 = vector.extract_strided_slice %101 {offsets = [1, 0, 0], sizes = [1, 8, 64], strides = [1, 1, 1]} : vector<16x8x64xf32> to vector<1x8x64xf32>
    %105 = vector.shape_cast %104 : vector<1x8x64xf32> to vector<8x64xf32>
    %106 = arith.maximumf %103, %105 : vector<8x64xf32>
    %107 = vector.extract_strided_slice %101 {offsets = [2, 0, 0], sizes = [1, 8, 64], strides = [1, 1, 1]} : vector<16x8x64xf32> to vector<1x8x64xf32>
    %108 = vector.shape_cast %107 : vector<1x8x64xf32> to vector<8x64xf32>
    %109 = vector.extract_strided_slice %101 {offsets = [3, 0, 0], sizes = [1, 8, 64], strides = [1, 1, 1]} : vector<16x8x64xf32> to vector<1x8x64xf32>
    %110 = vector.shape_cast %109 : vector<1x8x64xf32> to vector<8x64xf32>
    %111 = arith.maximumf %108, %110 : vector<8x64xf32>
    %112 = vector.extract_strided_slice %101 {offsets = [4, 0, 0], sizes = [1, 8, 64], strides = [1, 1, 1]} : vector<16x8x64xf32> to vector<1x8x64xf32>
    %113 = vector.shape_cast %112 : vector<1x8x64xf32> to vector<8x64xf32>
    %114 = vector.extract_strided_slice %101 {offsets = [5, 0, 0], sizes = [1, 8, 64], strides = [1, 1, 1]} : vector<16x8x64xf32> to vector<1x8x64xf32>
    %115 = vector.shape_cast %114 : vector<1x8x64xf32> to vector<8x64xf32>
    %116 = arith.maximumf %113, %115 : vector<8x64xf32>
    %117 = vector.extract_strided_slice %101 {offsets = [6, 0, 0], sizes = [1, 8, 64], strides = [1, 1, 1]} : vector<16x8x64xf32> to vector<1x8x64xf32>
    %118 = vector.shape_cast %117 : vector<1x8x64xf32> to vector<8x64xf32>
    %119 = vector.extract_strided_slice %101 {offsets = [7, 0, 0], sizes = [1, 8, 64], strides = [1, 1, 1]} : vector<16x8x64xf32> to vector<1x8x64xf32>
    %120 = vector.shape_cast %119 : vector<1x8x64xf32> to vector<8x64xf32>
    %121 = arith.maximumf %118, %120 : vector<8x64xf32>
    %122 = vector.extract_strided_slice %101 {offsets = [8, 0, 0], sizes = [1, 8, 64], strides = [1, 1, 1]} : vector<16x8x64xf32> to vector<1x8x64xf32>
    %123 = vector.shape_cast %122 : vector<1x8x64xf32> to vector<8x64xf32>
    %124 = vector.extract_strided_slice %101 {offsets = [9, 0, 0], sizes = [1, 8, 64], strides = [1, 1, 1]} : vector<16x8x64xf32> to vector<1x8x64xf32>
    %125 = vector.shape_cast %124 : vector<1x8x64xf32> to vector<8x64xf32>
    %126 = arith.maximumf %123, %125 : vector<8x64xf32>
    %127 = vector.extract_strided_slice %101 {offsets = [10, 0, 0], sizes = [1, 8, 64], strides = [1, 1, 1]} : vector<16x8x64xf32> to vector<1x8x64xf32>
    %128 = vector.shape_cast %127 : vector<1x8x64xf32> to vector<8x64xf32>
    %129 = vector.extract_strided_slice %101 {offsets = [11, 0, 0], sizes = [1, 8, 64], strides = [1, 1, 1]} : vector<16x8x64xf32> to vector<1x8x64xf32>
    %130 = vector.shape_cast %129 : vector<1x8x64xf32> to vector<8x64xf32>
    %131 = arith.maximumf %128, %130 : vector<8x64xf32>
    %132 = vector.extract_strided_slice %101 {offsets = [12, 0, 0], sizes = [1, 8, 64], strides = [1, 1, 1]} : vector<16x8x64xf32> to vector<1x8x64xf32>
    %133 = vector.shape_cast %132 : vector<1x8x64xf32> to vector<8x64xf32>
    %134 = vector.extract_strided_slice %101 {offsets = [13, 0, 0], sizes = [1, 8, 64], strides = [1, 1, 1]} : vector<16x8x64xf32> to vector<1x8x64xf32>
    %135 = vector.shape_cast %134 : vector<1x8x64xf32> to vector<8x64xf32>
    %136 = arith.maximumf %133, %135 : vector<8x64xf32>
    %137 = vector.extract_strided_slice %101 {offsets = [14, 0, 0], sizes = [1, 8, 64], strides = [1, 1, 1]} : vector<16x8x64xf32> to vector<1x8x64xf32>
    %138 = vector.shape_cast %137 : vector<1x8x64xf32> to vector<8x64xf32>
    %139 = vector.extract_strided_slice %101 {offsets = [15, 0, 0], sizes = [1, 8, 64], strides = [1, 1, 1]} : vector<16x8x64xf32> to vector<1x8x64xf32>
    %140 = vector.shape_cast %139 : vector<1x8x64xf32> to vector<8x64xf32>
    %141 = arith.maximumf %138, %140 : vector<8x64xf32>
    %142 = vector.shape_cast %106 : vector<8x64xf32> to vector<1x8x64xf32>
    %143 = vector.shape_cast %111 : vector<8x64xf32> to vector<1x8x64xf32>
    %144 = vector.shape_cast %116 : vector<8x64xf32> to vector<1x8x64xf32>
    %145 = vector.shape_cast %121 : vector<8x64xf32> to vector<1x8x64xf32>
    %146 = vector.shape_cast %126 : vector<8x64xf32> to vector<1x8x64xf32>
    %147 = vector.shape_cast %131 : vector<8x64xf32> to vector<1x8x64xf32>
    %148 = vector.shape_cast %136 : vector<8x64xf32> to vector<1x8x64xf32>
    %149 = vector.shape_cast %141 : vector<8x64xf32> to vector<1x8x64xf32>
    %150 = tpu.concatenate %142, %143, %144, %145, %146, %147, %148, %149 in 0 : vector<1x8x64xf32>, vector<1x8x64xf32>, vector<1x8x64xf32>, vector<1x8x64xf32>, vector<1x8x64xf32>, vector<1x8x64xf32>, vector<1x8x64xf32>, vector<1x8x64xf32> -> vector<8x8x64xf32>
    %c1_101 = arith.constant 1 : index
    %c1_102 = arith.constant 1 : index
    %c0_103 = arith.constant 0 : index
    %151 = vector.load %arg16[%c1_101, %c1_102, %c0_103] : memref<10x10x64xf32, #tpu.memory_space<vmem>>, vector<8x8x64xf32>
    tpu.vector_store %arg16[%c1_101, %c1_102, %c0_103], %150 {strides = array<i32>} : memref<10x10x64xf32, #tpu.memory_space<vmem>>, vector<8x8x64xf32>,
    %cst_104 = arith.constant 0.000000e+00 : f32
    %152 = vector.broadcast %cst_104 : f32 to vector<64x128xf32>
    %c0_105 = arith.constant 0 : index
    %c0_106 = arith.constant 0 : index
    %c0_107 = arith.constant 0 : index
    %153 = vector.load %arg16[%c0_105, %c0_106, %c0_107] : memref<10x10x64xf32, #tpu.memory_space<vmem>>, vector<8x8x64xf32>
    %154 = vector.shape_cast %153 : vector<8x8x64xf32> to vector<64x64xf32>
    %c0_108 = arith.constant 0 : index
    %c0_109 = arith.constant 0 : index
    %c0_110 = arith.constant 0 : index
    %c0_111 = arith.constant 0 : index
    %155 = vector.load %arg4[%c0_108, %c0_109, %c0_110, %c0_111] : memref<3x3x64x128xf32, #tpu.memory_space<vmem>>, vector<1x1x64x128xf32>
    %156 = vector.shape_cast %155 : vector<1x1x64x128xf32> to vector<64x128xf32>
    %cst_112 = arith.constant dense<0.000000e+00> : vector<64x128xf32>
    %157 = tpu.matmul %154, %156, %cst_112 {dimension_numbers = #tpu.dot_dimension_numbers<[1], [0], [0], [1], [0, 0, 1, 1], [], []>} : vector<64x64xf32>, vector<64x128xf32>, vector<64x128xf32> -> vector<64x128xf32>
    %158 = arith.addf %152, %157 : vector<64x128xf32>
    %c0_113 = arith.constant 0 : index
    %c1_114 = arith.constant 1 : index
    %c0_115 = arith.constant 0 : index
    %159 = vector.load %arg16[%c0_113, %c1_114, %c0_115] : memref<10x10x64xf32, #tpu.memory_space<vmem>>, vector<8x8x64xf32>
    %160 = vector.shape_cast %159 : vector<8x8x64xf32> to vector<64x64xf32>
    %c0_116 = arith.constant 0 : index
    %c1_117 = arith.constant 1 : index
    %c0_118 = arith.constant 0 : index
    %c0_119 = arith.constant 0 : index
    %161 = vector.load %arg4[%c0_116, %c1_117, %c0_118, %c0_119] : memref<3x3x64x128xf32, #tpu.memory_space<vmem>>, vector<1x1x64x128xf32>
    %162 = vector.shape_cast %161 : vector<1x1x64x128xf32> to vector<64x128xf32>
    %cst_120 = arith.constant dense<0.000000e+00> : vector<64x128xf32>
    %163 = tpu.matmul %160, %162, %cst_120 {dimension_numbers = #tpu.dot_dimension_numbers<[1], [0], [0], [1], [0, 0, 1, 1], [], []>} : vector<64x64xf32>, vector<64x128xf32>, vector<64x128xf32> -> vector<64x128xf32>
    %164 = arith.addf %158, %163 : vector<64x128xf32>
    %c0_121 = arith.constant 0 : index
    %c2_122 = arith.constant 2 : index
    %c0_123 = arith.constant 0 : index
    %165 = vector.load %arg16[%c0_121, %c2_122, %c0_123] : memref<10x10x64xf32, #tpu.memory_space<vmem>>, vector<8x8x64xf32>
    %166 = vector.shape_cast %165 : vector<8x8x64xf32> to vector<64x64xf32>
    %c0_124 = arith.constant 0 : index
    %c2_125 = arith.constant 2 : index
    %c0_126 = arith.constant 0 : index
    %c0_127 = arith.constant 0 : index
    %167 = vector.load %arg4[%c0_124, %c2_125, %c0_126, %c0_127] : memref<3x3x64x128xf32, #tpu.memory_space<vmem>>, vector<1x1x64x128xf32>
    %168 = vector.shape_cast %167 : vector<1x1x64x128xf32> to vector<64x128xf32>
    %cst_128 = arith.constant dense<0.000000e+00> : vector<64x128xf32>
    %169 = tpu.matmul %166, %168, %cst_128 {dimension_numbers = #tpu.dot_dimension_numbers<[1], [0], [0], [1], [0, 0, 1, 1], [], []>} : vector<64x64xf32>, vector<64x128xf32>, vector<64x128xf32> -> vector<64x128xf32>
    %170 = arith.addf %164, %169 : vector<64x128xf32>
    %c1_129 = arith.constant 1 : index
    %c0_130 = arith.constant 0 : index
    %c0_131 = arith.constant 0 : index
    %171 = vector.load %arg16[%c1_129, %c0_130, %c0_131] : memref<10x10x64xf32, #tpu.memory_space<vmem>>, vector<8x8x64xf32>
    %172 = vector.shape_cast %171 : vector<8x8x64xf32> to vector<64x64xf32>
    %c1_132 = arith.constant 1 : index
    %c0_133 = arith.constant 0 : index
    %c0_134 = arith.constant 0 : index
    %c0_135 = arith.constant 0 : index
    %173 = vector.load %arg4[%c1_132, %c0_133, %c0_134, %c0_135] : memref<3x3x64x128xf32, #tpu.memory_space<vmem>>, vector<1x1x64x128xf32>
    %174 = vector.shape_cast %173 : vector<1x1x64x128xf32> to vector<64x128xf32>
    %cst_136 = arith.constant dense<0.000000e+00> : vector<64x128xf32>
    %175 = tpu.matmul %172, %174, %cst_136 {dimension_numbers = #tpu.dot_dimension_numbers<[1], [0], [0], [1], [0, 0, 1, 1], [], []>} : vector<64x64xf32>, vector<64x128xf32>, vector<64x128xf32> -> vector<64x128xf32>
    %176 = arith.addf %170, %175 : vector<64x128xf32>
    %c1_137 = arith.constant 1 : index
    %c1_138 = arith.constant 1 : index
    %c0_139 = arith.constant 0 : index
    %177 = vector.load %arg16[%c1_137, %c1_138, %c0_139] : memref<10x10x64xf32, #tpu.memory_space<vmem>>, vector<8x8x64xf32>
    %178 = vector.shape_cast %177 : vector<8x8x64xf32> to vector<64x64xf32>
    %c1_140 = arith.constant 1 : index
    %c1_141 = arith.constant 1 : index
    %c0_142 = arith.constant 0 : index
    %c0_143 = arith.constant 0 : index
    %179 = vector.load %arg4[%c1_140, %c1_141, %c0_142, %c0_143] : memref<3x3x64x128xf32, #tpu.memory_space<vmem>>, vector<1x1x64x128xf32>
    %180 = vector.shape_cast %179 : vector<1x1x64x128xf32> to vector<64x128xf32>
    %cst_144 = arith.constant dense<0.000000e+00> : vector<64x128xf32>
    %181 = tpu.matmul %178, %180, %cst_144 {dimension_numbers = #tpu.dot_dimension_numbers<[1], [0], [0], [1], [0, 0, 1, 1], [], []>} : vector<64x64xf32>, vector<64x128xf32>, vector<64x128xf32> -> vector<64x128xf32>
    %182 = arith.addf %176, %181 : vector<64x128xf32>
    %c1_145 = arith.constant 1 : index
    %c2_146 = arith.constant 2 : index
    %c0_147 = arith.constant 0 : index
    %183 = vector.load %arg16[%c1_145, %c2_146, %c0_147] : memref<10x10x64xf32, #tpu.memory_space<vmem>>, vector<8x8x64xf32>
    %184 = vector.shape_cast %183 : vector<8x8x64xf32> to vector<64x64xf32>
    %c1_148 = arith.constant 1 : index
    %c2_149 = arith.constant 2 : index
    %c0_150 = arith.constant 0 : index
    %c0_151 = arith.constant 0 : index
    %185 = vector.load %arg4[%c1_148, %c2_149, %c0_150, %c0_151] : memref<3x3x64x128xf32, #tpu.memory_space<vmem>>, vector<1x1x64x128xf32>
    %186 = vector.shape_cast %185 : vector<1x1x64x128xf32> to vector<64x128xf32>
    %cst_152 = arith.constant dense<0.000000e+00> : vector<64x128xf32>
    %187 = tpu.matmul %184, %186, %cst_152 {dimension_numbers = #tpu.dot_dimension_numbers<[1], [0], [0], [1], [0, 0, 1, 1], [], []>} : vector<64x64xf32>, vector<64x128xf32>, vector<64x128xf32> -> vector<64x128xf32>
    %188 = arith.addf %182, %187 : vector<64x128xf32>
    %c2_153 = arith.constant 2 : index
    %c0_154 = arith.constant 0 : index
    %c0_155 = arith.constant 0 : index
    %189 = vector.load %arg16[%c2_153, %c0_154, %c0_155] : memref<10x10x64xf32, #tpu.memory_space<vmem>>, vector<8x8x64xf32>
    %190 = vector.shape_cast %189 : vector<8x8x64xf32> to vector<64x64xf32>
    %c2_156 = arith.constant 2 : index
    %c0_157 = arith.constant 0 : index
    %c0_158 = arith.constant 0 : index
    %c0_159 = arith.constant 0 : index
    %191 = vector.load %arg4[%c2_156, %c0_157, %c0_158, %c0_159] : memref<3x3x64x128xf32, #tpu.memory_space<vmem>>, vector<1x1x64x128xf32>
    %192 = vector.shape_cast %191 : vector<1x1x64x128xf32> to vector<64x128xf32>
    %cst_160 = arith.constant dense<0.000000e+00> : vector<64x128xf32>
    %193 = tpu.matmul %190, %192, %cst_160 {dimension_numbers = #tpu.dot_dimension_numbers<[1], [0], [0], [1], [0, 0, 1, 1], [], []>} : vector<64x64xf32>, vector<64x128xf32>, vector<64x128xf32> -> vector<64x128xf32>
    %194 = arith.addf %188, %193 : vector<64x128xf32>
    %c2_161 = arith.constant 2 : index
    %c1_162 = arith.constant 1 : index
    %c0_163 = arith.constant 0 : index
    %195 = vector.load %arg16[%c2_161, %c1_162, %c0_163] : memref<10x10x64xf32, #tpu.memory_space<vmem>>, vector<8x8x64xf32>
    %196 = vector.shape_cast %195 : vector<8x8x64xf32> to vector<64x64xf32>
    %c2_164 = arith.constant 2 : index
    %c1_165 = arith.constant 1 : index
    %c0_166 = arith.constant 0 : index
    %c0_167 = arith.constant 0 : index
    %197 = vector.load %arg4[%c2_164, %c1_165, %c0_166, %c0_167] : memref<3x3x64x128xf32, #tpu.memory_space<vmem>>, vector<1x1x64x128xf32>
    %198 = vector.shape_cast %197 : vector<1x1x64x128xf32> to vector<64x128xf32>
    %cst_168 = arith.constant dense<0.000000e+00> : vector<64x128xf32>
    %199 = tpu.matmul %196, %198, %cst_168 {dimension_numbers = #tpu.dot_dimension_numbers<[1], [0], [0], [1], [0, 0, 1, 1], [], []>} : vector<64x64xf32>, vector<64x128xf32>, vector<64x128xf32> -> vector<64x128xf32>
    %200 = arith.addf %194, %199 : vector<64x128xf32>
    %c2_169 = arith.constant 2 : index
    %c2_170 = arith.constant 2 : index
    %c0_171 = arith.constant 0 : index
    %201 = vector.load %arg16[%c2_169, %c2_170, %c0_171] : memref<10x10x64xf32, #tpu.memory_space<vmem>>, vector<8x8x64xf32>
    %202 = vector.shape_cast %201 : vector<8x8x64xf32> to vector<64x64xf32>
    %c2_172 = arith.constant 2 : index
    %c2_173 = arith.constant 2 : index
    %c0_174 = arith.constant 0 : index
    %c0_175 = arith.constant 0 : index
    %203 = vector.load %arg4[%c2_172, %c2_173, %c0_174, %c0_175] : memref<3x3x64x128xf32, #tpu.memory_space<vmem>>, vector<1x1x64x128xf32>
    %204 = vector.shape_cast %203 : vector<1x1x64x128xf32> to vector<64x128xf32>
    %cst_176 = arith.constant dense<0.000000e+00> : vector<64x128xf32>
    %205 = tpu.matmul %202, %204, %cst_176 {dimension_numbers = #tpu.dot_dimension_numbers<[1], [0], [0], [1], [0, 0, 1, 1], [], []>} : vector<64x64xf32>, vector<64x128xf32>, vector<64x128xf32> -> vector<64x128xf32>
    %206 = arith.addf %200, %205 : vector<64x128xf32>
    %c0_177 = arith.constant 0 : index
    %c0_178 = arith.constant 0 : index
    %207 = vector.load %arg5[%c0_177, %c0_178] : memref<1x128xf32, #tpu.memory_space<vmem>>, vector<1x128xf32>
    %208 = vector.broadcast %207 : vector<1x128xf32> to vector<64x128xf32>
    %209 = arith.addf %206, %208 : vector<64x128xf32>
    %cst_179 = arith.constant 0.000000e+00 : f32
    %210 = vector.broadcast %cst_179 : f32 to vector<64x128xf32>
    %211 = arith.maximumf %209, %210 : vector<64x128xf32>
    %212 = vector.shape_cast %211 : vector<64x128xf32> to vector<8x8x128xf32>
    %c0_180 = arith.constant 0 : index
    %c0_181 = arith.constant 0 : index
    %c0_182 = arith.constant 0 : index
    %213 = vector.load %arg17[%c0_180, %c0_181, %c0_182] : memref<8x8x128xf32, #tpu.memory_space<vmem>>, vector<8x8x128xf32>
    tpu.vector_store %arg17[%c0_180, %c0_181, %c0_182], %212 {strides = array<i32>} : memref<8x8x128xf32, #tpu.memory_space<vmem>>, vector<8x8x128xf32>,
    %c0_183 = arith.constant 0 : index
    %c0_184 = arith.constant 0 : index
    %c0_185 = arith.constant 0 : index
    %214 = tpu.strided_load %arg17[%c0_183, %c0_184, %c0_185] {strides = array<i32: 1, 2, 1>} : memref<8x8x128xf32, #tpu.memory_space<vmem>>, vector<8x4x128xf32>
    %c0_186 = arith.constant 0 : index
    %c1_187 = arith.constant 1 : index
    %c0_188 = arith.constant 0 : index
    %215 = tpu.strided_load %arg17[%c0_186, %c1_187, %c0_188] {strides = array<i32: 1, 2, 1>} : memref<8x8x128xf32, #tpu.memory_space<vmem>>, vector<8x4x128xf32>
    %216 = arith.maximumf %214, %215 : vector<8x4x128xf32>
    %217 = vector.extract_strided_slice %216 {offsets = [0, 0, 0], sizes = [1, 4, 128], strides = [1, 1, 1]} : vector<8x4x128xf32> to vector<1x4x128xf32>
    %218 = vector.shape_cast %217 : vector<1x4x128xf32> to vector<4x128xf32>
    %219 = vector.extract_strided_slice %216 {offsets = [1, 0, 0], sizes = [1, 4, 128], strides = [1, 1, 1]} : vector<8x4x128xf32> to vector<1x4x128xf32>
    %220 = vector.shape_cast %219 : vector<1x4x128xf32> to vector<4x128xf32>
    %221 = arith.maximumf %218, %220 : vector<4x128xf32>
    %222 = vector.extract_strided_slice %216 {offsets = [2, 0, 0], sizes = [1, 4, 128], strides = [1, 1, 1]} : vector<8x4x128xf32> to vector<1x4x128xf32>
    %223 = vector.shape_cast %222 : vector<1x4x128xf32> to vector<4x128xf32>
    %224 = vector.extract_strided_slice %216 {offsets = [3, 0, 0], sizes = [1, 4, 128], strides = [1, 1, 1]} : vector<8x4x128xf32> to vector<1x4x128xf32>
    %225 = vector.shape_cast %224 : vector<1x4x128xf32> to vector<4x128xf32>
    %226 = arith.maximumf %223, %225 : vector<4x128xf32>
    %227 = vector.extract_strided_slice %216 {offsets = [4, 0, 0], sizes = [1, 4, 128], strides = [1, 1, 1]} : vector<8x4x128xf32> to vector<1x4x128xf32>
    %228 = vector.shape_cast %227 : vector<1x4x128xf32> to vector<4x128xf32>
    %229 = vector.extract_strided_slice %216 {offsets = [5, 0, 0], sizes = [1, 4, 128], strides = [1, 1, 1]} : vector<8x4x128xf32> to vector<1x4x128xf32>
    %230 = vector.shape_cast %229 : vector<1x4x128xf32> to vector<4x128xf32>
    %231 = arith.maximumf %228, %230 : vector<4x128xf32>
    %232 = vector.extract_strided_slice %216 {offsets = [6, 0, 0], sizes = [1, 4, 128], strides = [1, 1, 1]} : vector<8x4x128xf32> to vector<1x4x128xf32>
    %233 = vector.shape_cast %232 : vector<1x4x128xf32> to vector<4x128xf32>
    %234 = vector.extract_strided_slice %216 {offsets = [7, 0, 0], sizes = [1, 4, 128], strides = [1, 1, 1]} : vector<8x4x128xf32> to vector<1x4x128xf32>
    %235 = vector.shape_cast %234 : vector<1x4x128xf32> to vector<4x128xf32>
    %236 = arith.maximumf %233, %235 : vector<4x128xf32>
    %237 = vector.shape_cast %221 : vector<4x128xf32> to vector<1x4x128xf32>
    %238 = vector.shape_cast %226 : vector<4x128xf32> to vector<1x4x128xf32>
    %239 = vector.shape_cast %231 : vector<4x128xf32> to vector<1x4x128xf32>
    %240 = vector.shape_cast %236 : vector<4x128xf32> to vector<1x4x128xf32>
    %241 = tpu.concatenate %237, %238, %239, %240 in 0 : vector<1x4x128xf32>, vector<1x4x128xf32>, vector<1x4x128xf32>, vector<1x4x128xf32> -> vector<4x4x128xf32>
    %c1_189 = arith.constant 1 : index
    %c1_190 = arith.constant 1 : index
    %c0_191 = arith.constant 0 : index
    %242 = vector.load %arg18[%c1_189, %c1_190, %c0_191] : memref<6x10x128xf32, #tpu.memory_space<vmem>>, vector<4x4x128xf32>
    tpu.vector_store %arg18[%c1_189, %c1_190, %c0_191], %241 {strides = array<i32>} : memref<6x10x128xf32, #tpu.memory_space<vmem>>, vector<4x4x128xf32>,
    %cst_192 = arith.constant 0.000000e+00 : f32
    %243 = vector.broadcast %cst_192 : f32 to vector<32x256xf32>
    %c0_193 = arith.constant 0 : index
    %c0_194 = arith.constant 0 : index
    %c0_195 = arith.constant 0 : index
    %244 = vector.load %arg18[%c0_193, %c0_194, %c0_195] : memref<6x10x128xf32, #tpu.memory_space<vmem>>, vector<4x8x128xf32>
    %245 = vector.shape_cast %244 : vector<4x8x128xf32> to vector<32x128xf32>
    %c0_196 = arith.constant 0 : index
    %c0_197 = arith.constant 0 : index
    %c0_198 = arith.constant 0 : index
    %c0_199 = arith.constant 0 : index
    %246 = vector.load %arg6[%c0_196, %c0_197, %c0_198, %c0_199] : memref<3x3x128x256xf32, #tpu.memory_space<vmem>>, vector<1x1x128x256xf32>
    %247 = vector.shape_cast %246 : vector<1x1x128x256xf32> to vector<128x256xf32>
    %cst_200 = arith.constant dense<0.000000e+00> : vector<32x256xf32>
    %248 = tpu.matmul %245, %247, %cst_200 {dimension_numbers = #tpu.dot_dimension_numbers<[1], [0], [0], [1], [0, 0, 1, 1], [], []>} : vector<32x128xf32>, vector<128x256xf32>, vector<32x256xf32> -> vector<32x256xf32>
    %249 = arith.addf %243, %248 : vector<32x256xf32>
    %c0_201 = arith.constant 0 : index
    %c1_202 = arith.constant 1 : index
    %c0_203 = arith.constant 0 : index
    %250 = vector.load %arg18[%c0_201, %c1_202, %c0_203] : memref<6x10x128xf32, #tpu.memory_space<vmem>>, vector<4x8x128xf32>
    %251 = vector.shape_cast %250 : vector<4x8x128xf32> to vector<32x128xf32>
    %c0_204 = arith.constant 0 : index
    %c1_205 = arith.constant 1 : index
    %c0_206 = arith.constant 0 : index
    %c0_207 = arith.constant 0 : index
    %252 = vector.load %arg6[%c0_204, %c1_205, %c0_206, %c0_207] : memref<3x3x128x256xf32, #tpu.memory_space<vmem>>, vector<1x1x128x256xf32>
    %253 = vector.shape_cast %252 : vector<1x1x128x256xf32> to vector<128x256xf32>
    %cst_208 = arith.constant dense<0.000000e+00> : vector<32x256xf32>
    %254 = tpu.matmul %251, %253, %cst_208 {dimension_numbers = #tpu.dot_dimension_numbers<[1], [0], [0], [1], [0, 0, 1, 1], [], []>} : vector<32x128xf32>, vector<128x256xf32>, vector<32x256xf32> -> vector<32x256xf32>
    %255 = arith.addf %249, %254 : vector<32x256xf32>
    %c0_209 = arith.constant 0 : index
    %c2_210 = arith.constant 2 : index
    %c0_211 = arith.constant 0 : index
    %256 = vector.load %arg18[%c0_209, %c2_210, %c0_211] : memref<6x10x128xf32, #tpu.memory_space<vmem>>, vector<4x8x128xf32>
    %257 = vector.shape_cast %256 : vector<4x8x128xf32> to vector<32x128xf32>
    %c0_212 = arith.constant 0 : index
    %c2_213 = arith.constant 2 : index
    %c0_214 = arith.constant 0 : index
    %c0_215 = arith.constant 0 : index
    %258 = vector.load %arg6[%c0_212, %c2_213, %c0_214, %c0_215] : memref<3x3x128x256xf32, #tpu.memory_space<vmem>>, vector<1x1x128x256xf32>
    %259 = vector.shape_cast %258 : vector<1x1x128x256xf32> to vector<128x256xf32>
    %cst_216 = arith.constant dense<0.000000e+00> : vector<32x256xf32>
    %260 = tpu.matmul %257, %259, %cst_216 {dimension_numbers = #tpu.dot_dimension_numbers<[1], [0], [0], [1], [0, 0, 1, 1], [], []>} : vector<32x128xf32>, vector<128x256xf32>, vector<32x256xf32> -> vector<32x256xf32>
    %261 = arith.addf %255, %260 : vector<32x256xf32>
    %c1_217 = arith.constant 1 : index
    %c0_218 = arith.constant 0 : index
    %c0_219 = arith.constant 0 : index
    %262 = vector.load %arg18[%c1_217, %c0_218, %c0_219] : memref<6x10x128xf32, #tpu.memory_space<vmem>>, vector<4x8x128xf32>
    %263 = vector.shape_cast %262 : vector<4x8x128xf32> to vector<32x128xf32>
    %c1_220 = arith.constant 1 : index
    %c0_221 = arith.constant 0 : index
    %c0_222 = arith.constant 0 : index
    %c0_223 = arith.constant 0 : index
    %264 = vector.load %arg6[%c1_220, %c0_221, %c0_222, %c0_223] : memref<3x3x128x256xf32, #tpu.memory_space<vmem>>, vector<1x1x128x256xf32>
    %265 = vector.shape_cast %264 : vector<1x1x128x256xf32> to vector<128x256xf32>
    %cst_224 = arith.constant dense<0.000000e+00> : vector<32x256xf32>
    %266 = tpu.matmul %263, %265, %cst_224 {dimension_numbers = #tpu.dot_dimension_numbers<[1], [0], [0], [1], [0, 0, 1, 1], [], []>} : vector<32x128xf32>, vector<128x256xf32>, vector<32x256xf32> -> vector<32x256xf32>
    %267 = arith.addf %261, %266 : vector<32x256xf32>
    %c1_225 = arith.constant 1 : index
    %c1_226 = arith.constant 1 : index
    %c0_227 = arith.constant 0 : index
    %268 = vector.load %arg18[%c1_225, %c1_226, %c0_227] : memref<6x10x128xf32, #tpu.memory_space<vmem>>, vector<4x8x128xf32>
    %269 = vector.shape_cast %268 : vector<4x8x128xf32> to vector<32x128xf32>
    %c1_228 = arith.constant 1 : index
    %c1_229 = arith.constant 1 : index
    %c0_230 = arith.constant 0 : index
    %c0_231 = arith.constant 0 : index
    %270 = vector.load %arg6[%c1_228, %c1_229, %c0_230, %c0_231] : memref<3x3x128x256xf32, #tpu.memory_space<vmem>>, vector<1x1x128x256xf32>
    %271 = vector.shape_cast %270 : vector<1x1x128x256xf32> to vector<128x256xf32>
    %cst_232 = arith.constant dense<0.000000e+00> : vector<32x256xf32>
    %272 = tpu.matmul %269, %271, %cst_232 {dimension_numbers = #tpu.dot_dimension_numbers<[1], [0], [0], [1], [0, 0, 1, 1], [], []>} : vector<32x128xf32>, vector<128x256xf32>, vector<32x256xf32> -> vector<32x256xf32>
    %273 = arith.addf %267, %272 : vector<32x256xf32>
    %c1_233 = arith.constant 1 : index
    %c2_234 = arith.constant 2 : index
    %c0_235 = arith.constant 0 : index
    %274 = vector.load %arg18[%c1_233, %c2_234, %c0_235] : memref<6x10x128xf32, #tpu.memory_space<vmem>>, vector<4x8x128xf32>
    %275 = vector.shape_cast %274 : vector<4x8x128xf32> to vector<32x128xf32>
    %c1_236 = arith.constant 1 : index
    %c2_237 = arith.constant 2 : index
    %c0_238 = arith.constant 0 : index
    %c0_239 = arith.constant 0 : index
    %276 = vector.load %arg6[%c1_236, %c2_237, %c0_238, %c0_239] : memref<3x3x128x256xf32, #tpu.memory_space<vmem>>, vector<1x1x128x256xf32>
    %277 = vector.shape_cast %276 : vector<1x1x128x256xf32> to vector<128x256xf32>
    %cst_240 = arith.constant dense<0.000000e+00> : vector<32x256xf32>
    %278 = tpu.matmul %275, %277, %cst_240 {dimension_numbers = #tpu.dot_dimension_numbers<[1], [0], [0], [1], [0, 0, 1, 1], [], []>} : vector<32x128xf32>, vector<128x256xf32>, vector<32x256xf32> -> vector<32x256xf32>
    %279 = arith.addf %273, %278 : vector<32x256xf32>
    %c2_241 = arith.constant 2 : index
    %c0_242 = arith.constant 0 : index
    %c0_243 = arith.constant 0 : index
    %280 = vector.load %arg18[%c2_241, %c0_242, %c0_243] : memref<6x10x128xf32, #tpu.memory_space<vmem>>, vector<4x8x128xf32>
    %281 = vector.shape_cast %280 : vector<4x8x128xf32> to vector<32x128xf32>
    %c2_244 = arith.constant 2 : index
    %c0_245 = arith.constant 0 : index
    %c0_246 = arith.constant 0 : index
    %c0_247 = arith.constant 0 : index
    %282 = vector.load %arg6[%c2_244, %c0_245, %c0_246, %c0_247] : memref<3x3x128x256xf32, #tpu.memory_space<vmem>>, vector<1x1x128x256xf32>
    %283 = vector.shape_cast %282 : vector<1x1x128x256xf32> to vector<128x256xf32>
    %cst_248 = arith.constant dense<0.000000e+00> : vector<32x256xf32>
    %284 = tpu.matmul %281, %283, %cst_248 {dimension_numbers = #tpu.dot_dimension_numbers<[1], [0], [0], [1], [0, 0, 1, 1], [], []>} : vector<32x128xf32>, vector<128x256xf32>, vector<32x256xf32> -> vector<32x256xf32>
    %285 = arith.addf %279, %284 : vector<32x256xf32>
    %c2_249 = arith.constant 2 : index
    %c1_250 = arith.constant 1 : index
    %c0_251 = arith.constant 0 : index
    %286 = vector.load %arg18[%c2_249, %c1_250, %c0_251] : memref<6x10x128xf32, #tpu.memory_space<vmem>>, vector<4x8x128xf32>
    %287 = vector.shape_cast %286 : vector<4x8x128xf32> to vector<32x128xf32>
    %c2_252 = arith.constant 2 : index
    %c1_253 = arith.constant 1 : index
    %c0_254 = arith.constant 0 : index
    %c0_255 = arith.constant 0 : index
    %288 = vector.load %arg6[%c2_252, %c1_253, %c0_254, %c0_255] : memref<3x3x128x256xf32, #tpu.memory_space<vmem>>, vector<1x1x128x256xf32>
    %289 = vector.shape_cast %288 : vector<1x1x128x256xf32> to vector<128x256xf32>
    %cst_256 = arith.constant dense<0.000000e+00> : vector<32x256xf32>
    %290 = tpu.matmul %287, %289, %cst_256 {dimension_numbers = #tpu.dot_dimension_numbers<[1], [0], [0], [1], [0, 0, 1, 1], [], []>} : vector<32x128xf32>, vector<128x256xf32>, vector<32x256xf32> -> vector<32x256xf32>
    %291 = arith.addf %285, %290 : vector<32x256xf32>
    %c2_257 = arith.constant 2 : index
    %c2_258 = arith.constant 2 : index
    %c0_259 = arith.constant 0 : index
    %292 = vector.load %arg18[%c2_257, %c2_258, %c0_259] : memref<6x10x128xf32, #tpu.memory_space<vmem>>, vector<4x8x128xf32>
    %293 = vector.shape_cast %292 : vector<4x8x128xf32> to vector<32x128xf32>
    %c2_260 = arith.constant 2 : index
    %c2_261 = arith.constant 2 : index
    %c0_262 = arith.constant 0 : index
    %c0_263 = arith.constant 0 : index
    %294 = vector.load %arg6[%c2_260, %c2_261, %c0_262, %c0_263] : memref<3x3x128x256xf32, #tpu.memory_space<vmem>>, vector<1x1x128x256xf32>
    %295 = vector.shape_cast %294 : vector<1x1x128x256xf32> to vector<128x256xf32>
    %cst_264 = arith.constant dense<0.000000e+00> : vector<32x256xf32>
    %296 = tpu.matmul %293, %295, %cst_264 {dimension_numbers = #tpu.dot_dimension_numbers<[1], [0], [0], [1], [0, 0, 1, 1], [], []>} : vector<32x128xf32>, vector<128x256xf32>, vector<32x256xf32> -> vector<32x256xf32>
    %297 = arith.addf %291, %296 : vector<32x256xf32>
    %c0_265 = arith.constant 0 : index
    %c0_266 = arith.constant 0 : index
    %298 = vector.load %arg7[%c0_265, %c0_266] : memref<1x256xf32, #tpu.memory_space<vmem>>, vector<1x256xf32>
    %299 = vector.broadcast %298 : vector<1x256xf32> to vector<32x256xf32>
    %300 = arith.addf %297, %299 : vector<32x256xf32>
    %cst_267 = arith.constant 0.000000e+00 : f32
    %301 = vector.broadcast %cst_267 : f32 to vector<32x256xf32>
    %302 = arith.maximumf %300, %301 : vector<32x256xf32>
    %303 = vector.shape_cast %302 : vector<32x256xf32> to vector<4x8x256xf32>
    %304 = vector.extract_strided_slice %303 {offsets = [0, 0, 0], sizes = [4, 4, 256], strides = [1, 1, 1]} : vector<4x8x256xf32> to vector<4x4x256xf32>
    %c1_268 = arith.constant 1 : index
    %c1_269 = arith.constant 1 : index
    %c0_270 = arith.constant 0 : index
    %305 = vector.load %arg19[%c1_268, %c1_269, %c0_270] : memref<6x10x256xf32, #tpu.memory_space<vmem>>, vector<4x4x256xf32>
    tpu.vector_store %arg19[%c1_268, %c1_269, %c0_270], %304 {strides = array<i32>} : memref<6x10x256xf32, #tpu.memory_space<vmem>>, vector<4x4x256xf32>,
    %cst_271 = arith.constant 0.000000e+00 : f32
    %306 = vector.broadcast %cst_271 : f32 to vector<32x128xf32>
    %c0_272 = arith.constant 0 : index
    %c0_273 = arith.constant 0 : index
    %c0_274 = arith.constant 0 : index
    %307 = vector.load %arg19[%c0_272, %c0_273, %c0_274] : memref<6x10x256xf32, #tpu.memory_space<vmem>>, vector<4x8x256xf32>
    %308 = vector.shape_cast %307 : vector<4x8x256xf32> to vector<32x256xf32>
    %c0_275 = arith.constant 0 : index
    %c0_276 = arith.constant 0 : index
    %c0_277 = arith.constant 0 : index
    %c0_278 = arith.constant 0 : index
    %309 = vector.load %arg8[%c0_275, %c0_276, %c0_277, %c0_278] : memref<3x3x256x128xf32, #tpu.memory_space<vmem>>, vector<1x1x256x128xf32>
    %310 = vector.shape_cast %309 : vector<1x1x256x128xf32> to vector<256x128xf32>
    %cst_279 = arith.constant dense<0.000000e+00> : vector<32x128xf32>
    %311 = tpu.matmul %308, %310, %cst_279 {dimension_numbers = #tpu.dot_dimension_numbers<[1], [0], [0], [1], [0, 0, 1, 1], [], []>} : vector<32x256xf32>, vector<256x128xf32>, vector<32x128xf32> -> vector<32x128xf32>
    %312 = arith.addf %306, %311 : vector<32x128xf32>
    %c0_280 = arith.constant 0 : index
    %c1_281 = arith.constant 1 : index
    %c0_282 = arith.constant 0 : index
    %313 = vector.load %arg19[%c0_280, %c1_281, %c0_282] : memref<6x10x256xf32, #tpu.memory_space<vmem>>, vector<4x8x256xf32>
    %314 = vector.shape_cast %313 : vector<4x8x256xf32> to vector<32x256xf32>
    %c0_283 = arith.constant 0 : index
    %c1_284 = arith.constant 1 : index
    %c0_285 = arith.constant 0 : index
    %c0_286 = arith.constant 0 : index
    %315 = vector.load %arg8[%c0_283, %c1_284, %c0_285, %c0_286] : memref<3x3x256x128xf32, #tpu.memory_space<vmem>>, vector<1x1x256x128xf32>
    %316 = vector.shape_cast %315 : vector<1x1x256x128xf32> to vector<256x128xf32>
    %cst_287 = arith.constant dense<0.000000e+00> : vector<32x128xf32>
    %317 = tpu.matmul %314, %316, %cst_287 {dimension_numbers = #tpu.dot_dimension_numbers<[1], [0], [0], [1], [0, 0, 1, 1], [], []>} : vector<32x256xf32>, vector<256x128xf32>, vector<32x128xf32> -> vector<32x128xf32>
    %318 = arith.addf %312, %317 : vector<32x128xf32>
    %c0_288 = arith.constant 0 : index
    %c2_289 = arith.constant 2 : index
    %c0_290 = arith.constant 0 : index
    %319 = vector.load %arg19[%c0_288, %c2_289, %c0_290] : memref<6x10x256xf32, #tpu.memory_space<vmem>>, vector<4x8x256xf32>
    %320 = vector.shape_cast %319 : vector<4x8x256xf32> to vector<32x256xf32>
    %c0_291 = arith.constant 0 : index
    %c2_292 = arith.constant 2 : index
    %c0_293 = arith.constant 0 : index
    %c0_294 = arith.constant 0 : index
    %321 = vector.load %arg8[%c0_291, %c2_292, %c0_293, %c0_294] : memref<3x3x256x128xf32, #tpu.memory_space<vmem>>, vector<1x1x256x128xf32>
    %322 = vector.shape_cast %321 : vector<1x1x256x128xf32> to vector<256x128xf32>
    %cst_295 = arith.constant dense<0.000000e+00> : vector<32x128xf32>
    %323 = tpu.matmul %320, %322, %cst_295 {dimension_numbers = #tpu.dot_dimension_numbers<[1], [0], [0], [1], [0, 0, 1, 1], [], []>} : vector<32x256xf32>, vector<256x128xf32>, vector<32x128xf32> -> vector<32x128xf32>
    %324 = arith.addf %318, %323 : vector<32x128xf32>
    %c1_296 = arith.constant 1 : index
    %c0_297 = arith.constant 0 : index
    %c0_298 = arith.constant 0 : index
    %325 = vector.load %arg19[%c1_296, %c0_297, %c0_298] : memref<6x10x256xf32, #tpu.memory_space<vmem>>, vector<4x8x256xf32>
    %326 = vector.shape_cast %325 : vector<4x8x256xf32> to vector<32x256xf32>
    %c1_299 = arith.constant 1 : index
    %c0_300 = arith.constant 0 : index
    %c0_301 = arith.constant 0 : index
    %c0_302 = arith.constant 0 : index
    %327 = vector.load %arg8[%c1_299, %c0_300, %c0_301, %c0_302] : memref<3x3x256x128xf32, #tpu.memory_space<vmem>>, vector<1x1x256x128xf32>
    %328 = vector.shape_cast %327 : vector<1x1x256x128xf32> to vector<256x128xf32>
    %cst_303 = arith.constant dense<0.000000e+00> : vector<32x128xf32>
    %329 = tpu.matmul %326, %328, %cst_303 {dimension_numbers = #tpu.dot_dimension_numbers<[1], [0], [0], [1], [0, 0, 1, 1], [], []>} : vector<32x256xf32>, vector<256x128xf32>, vector<32x128xf32> -> vector<32x128xf32>
    %330 = arith.addf %324, %329 : vector<32x128xf32>
    %c1_304 = arith.constant 1 : index
    %c1_305 = arith.constant 1 : index
    %c0_306 = arith.constant 0 : index
    %331 = vector.load %arg19[%c1_304, %c1_305, %c0_306] : memref<6x10x256xf32, #tpu.memory_space<vmem>>, vector<4x8x256xf32>
    %332 = vector.shape_cast %331 : vector<4x8x256xf32> to vector<32x256xf32>
    %c1_307 = arith.constant 1 : index
    %c1_308 = arith.constant 1 : index
    %c0_309 = arith.constant 0 : index
    %c0_310 = arith.constant 0 : index
    %333 = vector.load %arg8[%c1_307, %c1_308, %c0_309, %c0_310] : memref<3x3x256x128xf32, #tpu.memory_space<vmem>>, vector<1x1x256x128xf32>
    %334 = vector.shape_cast %333 : vector<1x1x256x128xf32> to vector<256x128xf32>
    %cst_311 = arith.constant dense<0.000000e+00> : vector<32x128xf32>
    %335 = tpu.matmul %332, %334, %cst_311 {dimension_numbers = #tpu.dot_dimension_numbers<[1], [0], [0], [1], [0, 0, 1, 1], [], []>} : vector<32x256xf32>, vector<256x128xf32>, vector<32x128xf32> -> vector<32x128xf32>
    %336 = arith.addf %330, %335 : vector<32x128xf32>
    %c1_312 = arith.constant 1 : index
    %c2_313 = arith.constant 2 : index
    %c0_314 = arith.constant 0 : index
    %337 = vector.load %arg19[%c1_312, %c2_313, %c0_314] : memref<6x10x256xf32, #tpu.memory_space<vmem>>, vector<4x8x256xf32>
    %338 = vector.shape_cast %337 : vector<4x8x256xf32> to vector<32x256xf32>
    %c1_315 = arith.constant 1 : index
    %c2_316 = arith.constant 2 : index
    %c0_317 = arith.constant 0 : index
    %c0_318 = arith.constant 0 : index
    %339 = vector.load %arg8[%c1_315, %c2_316, %c0_317, %c0_318] : memref<3x3x256x128xf32, #tpu.memory_space<vmem>>, vector<1x1x256x128xf32>
    %340 = vector.shape_cast %339 : vector<1x1x256x128xf32> to vector<256x128xf32>
    %cst_319 = arith.constant dense<0.000000e+00> : vector<32x128xf32>
    %341 = tpu.matmul %338, %340, %cst_319 {dimension_numbers = #tpu.dot_dimension_numbers<[1], [0], [0], [1], [0, 0, 1, 1], [], []>} : vector<32x256xf32>, vector<256x128xf32>, vector<32x128xf32> -> vector<32x128xf32>
    %342 = arith.addf %336, %341 : vector<32x128xf32>
    %c2_320 = arith.constant 2 : index
    %c0_321 = arith.constant 0 : index
    %c0_322 = arith.constant 0 : index
    %343 = vector.load %arg19[%c2_320, %c0_321, %c0_322] : memref<6x10x256xf32, #tpu.memory_space<vmem>>, vector<4x8x256xf32>
    %344 = vector.shape_cast %343 : vector<4x8x256xf32> to vector<32x256xf32>
    %c2_323 = arith.constant 2 : index
    %c0_324 = arith.constant 0 : index
    %c0_325 = arith.constant 0 : index
    %c0_326 = arith.constant 0 : index
    %345 = vector.load %arg8[%c2_323, %c0_324, %c0_325, %c0_326] : memref<3x3x256x128xf32, #tpu.memory_space<vmem>>, vector<1x1x256x128xf32>
    %346 = vector.shape_cast %345 : vector<1x1x256x128xf32> to vector<256x128xf32>
    %cst_327 = arith.constant dense<0.000000e+00> : vector<32x128xf32>
    %347 = tpu.matmul %344, %346, %cst_327 {dimension_numbers = #tpu.dot_dimension_numbers<[1], [0], [0], [1], [0, 0, 1, 1], [], []>} : vector<32x256xf32>, vector<256x128xf32>, vector<32x128xf32> -> vector<32x128xf32>
    %348 = arith.addf %342, %347 : vector<32x128xf32>
    %c2_328 = arith.constant 2 : index
    %c1_329 = arith.constant 1 : index
    %c0_330 = arith.constant 0 : index
    %349 = vector.load %arg19[%c2_328, %c1_329, %c0_330] : memref<6x10x256xf32, #tpu.memory_space<vmem>>, vector<4x8x256xf32>
    %350 = vector.shape_cast %349 : vector<4x8x256xf32> to vector<32x256xf32>
    %c2_331 = arith.constant 2 : index
    %c1_332 = arith.constant 1 : index
    %c0_333 = arith.constant 0 : index
    %c0_334 = arith.constant 0 : index
    %351 = vector.load %arg8[%c2_331, %c1_332, %c0_333, %c0_334] : memref<3x3x256x128xf32, #tpu.memory_space<vmem>>, vector<1x1x256x128xf32>
    %352 = vector.shape_cast %351 : vector<1x1x256x128xf32> to vector<256x128xf32>
    %cst_335 = arith.constant dense<0.000000e+00> : vector<32x128xf32>
    %353 = tpu.matmul %350, %352, %cst_335 {dimension_numbers = #tpu.dot_dimension_numbers<[1], [0], [0], [1], [0, 0, 1, 1], [], []>} : vector<32x256xf32>, vector<256x128xf32>, vector<32x128xf32> -> vector<32x128xf32>
    %354 = arith.addf %348, %353 : vector<32x128xf32>
    %c2_336 = arith.constant 2 : index
    %c2_337 = arith.constant 2 : index
    %c0_338 = arith.constant 0 : index
    %355 = vector.load %arg19[%c2_336, %c2_337, %c0_338] : memref<6x10x256xf32, #tpu.memory_space<vmem>>, vector<4x8x256xf32>
    %356 = vector.shape_cast %355 : vector<4x8x256xf32> to vector<32x256xf32>
    %c2_339 = arith.constant 2 : index
    %c2_340 = arith.constant 2 : index
    %c0_341 = arith.constant 0 : index
    %c0_342 = arith.constant 0 : index
    %357 = vector.load %arg8[%c2_339, %c2_340, %c0_341, %c0_342] : memref<3x3x256x128xf32, #tpu.memory_space<vmem>>, vector<1x1x256x128xf32>
    %358 = vector.shape_cast %357 : vector<1x1x256x128xf32> to vector<256x128xf32>
    %cst_343 = arith.constant dense<0.000000e+00> : vector<32x128xf32>
    %359 = tpu.matmul %356, %358, %cst_343 {dimension_numbers = #tpu.dot_dimension_numbers<[1], [0], [0], [1], [0, 0, 1, 1], [], []>} : vector<32x256xf32>, vector<256x128xf32>, vector<32x128xf32> -> vector<32x128xf32>
    %360 = arith.addf %354, %359 : vector<32x128xf32>
    %c0_344 = arith.constant 0 : index
    %c0_345 = arith.constant 0 : index
    %361 = vector.load %arg9[%c0_344, %c0_345] : memref<1x128xf32, #tpu.memory_space<vmem>>, vector<1x128xf32>
    %362 = vector.broadcast %361 : vector<1x128xf32> to vector<32x128xf32>
    %363 = arith.addf %360, %362 : vector<32x128xf32>
    %cst_346 = arith.constant 0.000000e+00 : f32
    %364 = vector.broadcast %cst_346 : f32 to vector<32x128xf32>
    %365 = arith.maximumf %363, %364 : vector<32x128xf32>
    %366 = vector.shape_cast %365 : vector<32x128xf32> to vector<4x8x128xf32>
    %367 = vector.extract_strided_slice %366 {offsets = [0, 0, 0], sizes = [4, 4, 128], strides = [1, 1, 1]} : vector<4x8x128xf32> to vector<4x4x128xf32>
    %368 = vector.shape_cast %367 : vector<4x4x128xf32> to vector<4x1x4x128xf32>
    %369 = vector.shape_cast %367 : vector<4x4x128xf32> to vector<4x1x4x128xf32>
    %370 = tpu.concatenate %368, %369 in 1 : vector<4x1x4x128xf32>, vector<4x1x4x128xf32> -> vector<4x2x4x128xf32>
    %371 = vector.shape_cast %370 : vector<4x2x4x128xf32> to vector<8x4x128xf32>
    %c1_347 = arith.constant 1 : index
    %c1_348 = arith.constant 1 : index
    %c0_349 = arith.constant 0 : index
    %372 = tpu.strided_load %arg20[%c1_347, %c1_348, %c0_349] {strides = array<i32: 1, 2, 1>} : memref<10x10x128xf32, #tpu.memory_space<vmem>>, vector<8x4x128xf32>
    tpu.strided_store %arg20[%c1_347, %c1_348, %c0_349], %371 {strides = array<i32: 1, 2, 1>} : memref<10x10x128xf32, #tpu.memory_space<vmem>>, vector<8x4x128xf32>
    %c1_350 = arith.constant 1 : index
    %c2_351 = arith.constant 2 : index
    %c0_352 = arith.constant 0 : index
    %373 = tpu.strided_load %arg20[%c1_350, %c2_351, %c0_352] {strides = array<i32: 1, 2, 1>} : memref<10x10x128xf32, #tpu.memory_space<vmem>>, vector<8x4x128xf32>
    tpu.strided_store %arg20[%c1_350, %c2_351, %c0_352], %371 {strides = array<i32: 1, 2, 1>} : memref<10x10x128xf32, #tpu.memory_space<vmem>>, vector<8x4x128xf32>
    %cst_353 = arith.constant 0.000000e+00 : f32
    %374 = vector.broadcast %cst_353 : f32 to vector<64x64xf32>
    %c0_354 = arith.constant 0 : index
    %c0_355 = arith.constant 0 : index
    %c0_356 = arith.constant 0 : index
    %375 = vector.load %arg20[%c0_354, %c0_355, %c0_356] : memref<10x10x128xf32, #tpu.memory_space<vmem>>, vector<8x8x128xf32>
    %376 = vector.shape_cast %375 : vector<8x8x128xf32> to vector<64x128xf32>
    %c0_357 = arith.constant 0 : index
    %c0_358 = arith.constant 0 : index
    %c0_359 = arith.constant 0 : index
    %c0_360 = arith.constant 0 : index
    %377 = vector.load %arg10[%c0_357, %c0_358, %c0_359, %c0_360] : memref<3x3x128x64xf32, #tpu.memory_space<vmem>>, vector<1x1x128x64xf32>
    %378 = vector.shape_cast %377 : vector<1x1x128x64xf32> to vector<128x64xf32>
    %cst_361 = arith.constant dense<0.000000e+00> : vector<64x64xf32>
    %379 = tpu.matmul %376, %378, %cst_361 {dimension_numbers = #tpu.dot_dimension_numbers<[1], [0], [0], [1], [0, 0, 1, 1], [], []>} : vector<64x128xf32>, vector<128x64xf32>, vector<64x64xf32> -> vector<64x64xf32>
    %380 = arith.addf %374, %379 : vector<64x64xf32>
    %c0_362 = arith.constant 0 : index
    %c1_363 = arith.constant 1 : index
    %c0_364 = arith.constant 0 : index
    %381 = vector.load %arg20[%c0_362, %c1_363, %c0_364] : memref<10x10x128xf32, #tpu.memory_space<vmem>>, vector<8x8x128xf32>
    %382 = vector.shape_cast %381 : vector<8x8x128xf32> to vector<64x128xf32>
    %c0_365 = arith.constant 0 : index
    %c1_366 = arith.constant 1 : index
    %c0_367 = arith.constant 0 : index
    %c0_368 = arith.constant 0 : index
    %383 = vector.load %arg10[%c0_365, %c1_366, %c0_367, %c0_368] : memref<3x3x128x64xf32, #tpu.memory_space<vmem>>, vector<1x1x128x64xf32>
    %384 = vector.shape_cast %383 : vector<1x1x128x64xf32> to vector<128x64xf32>
    %cst_369 = arith.constant dense<0.000000e+00> : vector<64x64xf32>
    %385 = tpu.matmul %382, %384, %cst_369 {dimension_numbers = #tpu.dot_dimension_numbers<[1], [0], [0], [1], [0, 0, 1, 1], [], []>} : vector<64x128xf32>, vector<128x64xf32>, vector<64x64xf32> -> vector<64x64xf32>
    %386 = arith.addf %380, %385 : vector<64x64xf32>
    %c0_370 = arith.constant 0 : index
    %c2_371 = arith.constant 2 : index
    %c0_372 = arith.constant 0 : index
    %387 = vector.load %arg20[%c0_370, %c2_371, %c0_372] : memref<10x10x128xf32, #tpu.memory_space<vmem>>, vector<8x8x128xf32>
    %388 = vector.shape_cast %387 : vector<8x8x128xf32> to vector<64x128xf32>
    %c0_373 = arith.constant 0 : index
    %c2_374 = arith.constant 2 : index
    %c0_375 = arith.constant 0 : index
    %c0_376 = arith.constant 0 : index
    %389 = vector.load %arg10[%c0_373, %c2_374, %c0_375, %c0_376] : memref<3x3x128x64xf32, #tpu.memory_space<vmem>>, vector<1x1x128x64xf32>
    %390 = vector.shape_cast %389 : vector<1x1x128x64xf32> to vector<128x64xf32>
    %cst_377 = arith.constant dense<0.000000e+00> : vector<64x64xf32>
    %391 = tpu.matmul %388, %390, %cst_377 {dimension_numbers = #tpu.dot_dimension_numbers<[1], [0], [0], [1], [0, 0, 1, 1], [], []>} : vector<64x128xf32>, vector<128x64xf32>, vector<64x64xf32> -> vector<64x64xf32>
    %392 = arith.addf %386, %391 : vector<64x64xf32>
    %c1_378 = arith.constant 1 : index
    %c0_379 = arith.constant 0 : index
    %c0_380 = arith.constant 0 : index
    %393 = vector.load %arg20[%c1_378, %c0_379, %c0_380] : memref<10x10x128xf32, #tpu.memory_space<vmem>>, vector<8x8x128xf32>
    %394 = vector.shape_cast %393 : vector<8x8x128xf32> to vector<64x128xf32>
    %c1_381 = arith.constant 1 : index
    %c0_382 = arith.constant 0 : index
    %c0_383 = arith.constant 0 : index
    %c0_384 = arith.constant 0 : index
    %395 = vector.load %arg10[%c1_381, %c0_382, %c0_383, %c0_384] : memref<3x3x128x64xf32, #tpu.memory_space<vmem>>, vector<1x1x128x64xf32>
    %396 = vector.shape_cast %395 : vector<1x1x128x64xf32> to vector<128x64xf32>
    %cst_385 = arith.constant dense<0.000000e+00> : vector<64x64xf32>
    %397 = tpu.matmul %394, %396, %cst_385 {dimension_numbers = #tpu.dot_dimension_numbers<[1], [0], [0], [1], [0, 0, 1, 1], [], []>} : vector<64x128xf32>, vector<128x64xf32>, vector<64x64xf32> -> vector<64x64xf32>
    %398 = arith.addf %392, %397 : vector<64x64xf32>
    %c1_386 = arith.constant 1 : index
    %c1_387 = arith.constant 1 : index
    %c0_388 = arith.constant 0 : index
    %399 = vector.load %arg20[%c1_386, %c1_387, %c0_388] : memref<10x10x128xf32, #tpu.memory_space<vmem>>, vector<8x8x128xf32>
    %400 = vector.shape_cast %399 : vector<8x8x128xf32> to vector<64x128xf32>
    %c1_389 = arith.constant 1 : index
    %c1_390 = arith.constant 1 : index
    %c0_391 = arith.constant 0 : index
    %c0_392 = arith.constant 0 : index
    %401 = vector.load %arg10[%c1_389, %c1_390, %c0_391, %c0_392] : memref<3x3x128x64xf32, #tpu.memory_space<vmem>>, vector<1x1x128x64xf32>
    %402 = vector.shape_cast %401 : vector<1x1x128x64xf32> to vector<128x64xf32>
    %cst_393 = arith.constant dense<0.000000e+00> : vector<64x64xf32>
    %403 = tpu.matmul %400, %402, %cst_393 {dimension_numbers = #tpu.dot_dimension_numbers<[1], [0], [0], [1], [0, 0, 1, 1], [], []>} : vector<64x128xf32>, vector<128x64xf32>, vector<64x64xf32> -> vector<64x64xf32>
    %404 = arith.addf %398, %403 : vector<64x64xf32>
    %c1_394 = arith.constant 1 : index
    %c2_395 = arith.constant 2 : index
    %c0_396 = arith.constant 0 : index
    %405 = vector.load %arg20[%c1_394, %c2_395, %c0_396] : memref<10x10x128xf32, #tpu.memory_space<vmem>>, vector<8x8x128xf32>
    %406 = vector.shape_cast %405 : vector<8x8x128xf32> to vector<64x128xf32>
    %c1_397 = arith.constant 1 : index
    %c2_398 = arith.constant 2 : index
    %c0_399 = arith.constant 0 : index
    %c0_400 = arith.constant 0 : index
    %407 = vector.load %arg10[%c1_397, %c2_398, %c0_399, %c0_400] : memref<3x3x128x64xf32, #tpu.memory_space<vmem>>, vector<1x1x128x64xf32>
    %408 = vector.shape_cast %407 : vector<1x1x128x64xf32> to vector<128x64xf32>
    %cst_401 = arith.constant dense<0.000000e+00> : vector<64x64xf32>
    %409 = tpu.matmul %406, %408, %cst_401 {dimension_numbers = #tpu.dot_dimension_numbers<[1], [0], [0], [1], [0, 0, 1, 1], [], []>} : vector<64x128xf32>, vector<128x64xf32>, vector<64x64xf32> -> vector<64x64xf32>
    %410 = arith.addf %404, %409 : vector<64x64xf32>
    %c2_402 = arith.constant 2 : index
    %c0_403 = arith.constant 0 : index
    %c0_404 = arith.constant 0 : index
    %411 = vector.load %arg20[%c2_402, %c0_403, %c0_404] : memref<10x10x128xf32, #tpu.memory_space<vmem>>, vector<8x8x128xf32>
    %412 = vector.shape_cast %411 : vector<8x8x128xf32> to vector<64x128xf32>
    %c2_405 = arith.constant 2 : index
    %c0_406 = arith.constant 0 : index
    %c0_407 = arith.constant 0 : index
    %c0_408 = arith.constant 0 : index
    %413 = vector.load %arg10[%c2_405, %c0_406, %c0_407, %c0_408] : memref<3x3x128x64xf32, #tpu.memory_space<vmem>>, vector<1x1x128x64xf32>
    %414 = vector.shape_cast %413 : vector<1x1x128x64xf32> to vector<128x64xf32>
    %cst_409 = arith.constant dense<0.000000e+00> : vector<64x64xf32>
    %415 = tpu.matmul %412, %414, %cst_409 {dimension_numbers = #tpu.dot_dimension_numbers<[1], [0], [0], [1], [0, 0, 1, 1], [], []>} : vector<64x128xf32>, vector<128x64xf32>, vector<64x64xf32> -> vector<64x64xf32>
    %416 = arith.addf %410, %415 : vector<64x64xf32>
    %c2_410 = arith.constant 2 : index
    %c1_411 = arith.constant 1 : index
    %c0_412 = arith.constant 0 : index
    %417 = vector.load %arg20[%c2_410, %c1_411, %c0_412] : memref<10x10x128xf32, #tpu.memory_space<vmem>>, vector<8x8x128xf32>
    %418 = vector.shape_cast %417 : vector<8x8x128xf32> to vector<64x128xf32>
    %c2_413 = arith.constant 2 : index
    %c1_414 = arith.constant 1 : index
    %c0_415 = arith.constant 0 : index
    %c0_416 = arith.constant 0 : index
    %419 = vector.load %arg10[%c2_413, %c1_414, %c0_415, %c0_416] : memref<3x3x128x64xf32, #tpu.memory_space<vmem>>, vector<1x1x128x64xf32>
    %420 = vector.shape_cast %419 : vector<1x1x128x64xf32> to vector<128x64xf32>
    %cst_417 = arith.constant dense<0.000000e+00> : vector<64x64xf32>
    %421 = tpu.matmul %418, %420, %cst_417 {dimension_numbers = #tpu.dot_dimension_numbers<[1], [0], [0], [1], [0, 0, 1, 1], [], []>} : vector<64x128xf32>, vector<128x64xf32>, vector<64x64xf32> -> vector<64x64xf32>
    %422 = arith.addf %416, %421 : vector<64x64xf32>
    %c2_418 = arith.constant 2 : index
    %c2_419 = arith.constant 2 : index
    %c0_420 = arith.constant 0 : index
    %423 = vector.load %arg20[%c2_418, %c2_419, %c0_420] : memref<10x10x128xf32, #tpu.memory_space<vmem>>, vector<8x8x128xf32>
    %424 = vector.shape_cast %423 : vector<8x8x128xf32> to vector<64x128xf32>
    %c2_421 = arith.constant 2 : index
    %c2_422 = arith.constant 2 : index
    %c0_423 = arith.constant 0 : index
    %c0_424 = arith.constant 0 : index
    %425 = vector.load %arg10[%c2_421, %c2_422, %c0_423, %c0_424] : memref<3x3x128x64xf32, #tpu.memory_space<vmem>>, vector<1x1x128x64xf32>
    %426 = vector.shape_cast %425 : vector<1x1x128x64xf32> to vector<128x64xf32>
    %cst_425 = arith.constant dense<0.000000e+00> : vector<64x64xf32>
    %427 = tpu.matmul %424, %426, %cst_425 {dimension_numbers = #tpu.dot_dimension_numbers<[1], [0], [0], [1], [0, 0, 1, 1], [], []>} : vector<64x128xf32>, vector<128x64xf32>, vector<64x64xf32> -> vector<64x64xf32>
    %428 = arith.addf %422, %427 : vector<64x64xf32>
    %c0_426 = arith.constant 0 : index
    %c0_427 = arith.constant 0 : index
    %429 = vector.load %arg11[%c0_426, %c0_427] : memref<1x64xf32, #tpu.memory_space<vmem>>, vector<1x64xf32>
    %430 = vector.broadcast %429 : vector<1x64xf32> to vector<64x64xf32>
    %431 = arith.addf %428, %430 : vector<64x64xf32>
    %cst_428 = arith.constant 0.000000e+00 : f32
    %432 = vector.broadcast %cst_428 : f32 to vector<64x64xf32>
    %433 = arith.maximumf %431, %432 : vector<64x64xf32>
    %434 = vector.shape_cast %433 : vector<64x64xf32> to vector<8x8x64xf32>
    %435 = vector.shape_cast %434 : vector<8x8x64xf32> to vector<8x1x8x64xf32>
    %436 = vector.shape_cast %434 : vector<8x8x64xf32> to vector<8x1x8x64xf32>
    %437 = tpu.concatenate %435, %436 in 1 : vector<8x1x8x64xf32>, vector<8x1x8x64xf32> -> vector<8x2x8x64xf32>
    %438 = vector.shape_cast %437 : vector<8x2x8x64xf32> to vector<16x8x64xf32>
    %c1_429 = arith.constant 1 : index
    %c1_430 = arith.constant 1 : index
    %c0_431 = arith.constant 0 : index
    %439 = tpu.strided_load %arg21[%c1_429, %c1_430, %c0_431] {strides = array<i32: 1, 2, 1>} : memref<18x18x64xf32, #tpu.memory_space<vmem>>, vector<16x8x64xf32>
    tpu.strided_store %arg21[%c1_429, %c1_430, %c0_431], %438 {strides = array<i32: 1, 2, 1>} : memref<18x18x64xf32, #tpu.memory_space<vmem>>, vector<16x8x64xf32>
    %c1_432 = arith.constant 1 : index
    %c2_433 = arith.constant 2 : index
    %c0_434 = arith.constant 0 : index
    %440 = tpu.strided_load %arg21[%c1_432, %c2_433, %c0_434] {strides = array<i32: 1, 2, 1>} : memref<18x18x64xf32, #tpu.memory_space<vmem>>, vector<16x8x64xf32>
    tpu.strided_store %arg21[%c1_432, %c2_433, %c0_434], %438 {strides = array<i32: 1, 2, 1>} : memref<18x18x64xf32, #tpu.memory_space<vmem>>, vector<16x8x64xf32>
    %cst_435 = arith.constant 0.000000e+00 : f32
    %441 = vector.broadcast %cst_435 : f32 to vector<256x128xf32>
    %c0_436 = arith.constant 0 : index
    %c0_437 = arith.constant 0 : index
    %c0_438 = arith.constant 0 : index
    %442 = vector.load %arg21[%c0_436, %c0_437, %c0_438] : memref<18x18x64xf32, #tpu.memory_space<vmem>>, vector<16x16x64xf32>
    %443 = vector.shape_cast %442 : vector<16x16x64xf32> to vector<256x64xf32>
    %c0_439 = arith.constant 0 : index
    %c0_440 = arith.constant 0 : index
    %c0_441 = arith.constant 0 : index
    %c0_442 = arith.constant 0 : index
    %444 = vector.load %arg12[%c0_439, %c0_440, %c0_441, %c0_442] : memref<3x3x64x128xf32, #tpu.memory_space<vmem>>, vector<1x1x64x128xf32>
    %445 = vector.shape_cast %444 : vector<1x1x64x128xf32> to vector<64x128xf32>
    %cst_443 = arith.constant dense<0.000000e+00> : vector<256x128xf32>
    %446 = tpu.matmul %443, %445, %cst_443 {dimension_numbers = #tpu.dot_dimension_numbers<[1], [0], [0], [1], [0, 0, 1, 1], [], []>} : vector<256x64xf32>, vector<64x128xf32>, vector<256x128xf32> -> vector<256x128xf32>
    %447 = arith.addf %441, %446 : vector<256x128xf32>
    %c0_444 = arith.constant 0 : index
    %c1_445 = arith.constant 1 : index
    %c0_446 = arith.constant 0 : index
    %448 = vector.load %arg21[%c0_444, %c1_445, %c0_446] : memref<18x18x64xf32, #tpu.memory_space<vmem>>, vector<16x16x64xf32>
    %449 = vector.shape_cast %448 : vector<16x16x64xf32> to vector<256x64xf32>
    %c0_447 = arith.constant 0 : index
    %c1_448 = arith.constant 1 : index
    %c0_449 = arith.constant 0 : index
    %c0_450 = arith.constant 0 : index
    %450 = vector.load %arg12[%c0_447, %c1_448, %c0_449, %c0_450] : memref<3x3x64x128xf32, #tpu.memory_space<vmem>>, vector<1x1x64x128xf32>
    %451 = vector.shape_cast %450 : vector<1x1x64x128xf32> to vector<64x128xf32>
    %cst_451 = arith.constant dense<0.000000e+00> : vector<256x128xf32>
    %452 = tpu.matmul %449, %451, %cst_451 {dimension_numbers = #tpu.dot_dimension_numbers<[1], [0], [0], [1], [0, 0, 1, 1], [], []>} : vector<256x64xf32>, vector<64x128xf32>, vector<256x128xf32> -> vector<256x128xf32>
    %453 = arith.addf %447, %452 : vector<256x128xf32>
    %c0_452 = arith.constant 0 : index
    %c2_453 = arith.constant 2 : index
    %c0_454 = arith.constant 0 : index
    %454 = vector.load %arg21[%c0_452, %c2_453, %c0_454] : memref<18x18x64xf32, #tpu.memory_space<vmem>>, vector<16x16x64xf32>
    %455 = vector.shape_cast %454 : vector<16x16x64xf32> to vector<256x64xf32>
    %c0_455 = arith.constant 0 : index
    %c2_456 = arith.constant 2 : index
    %c0_457 = arith.constant 0 : index
    %c0_458 = arith.constant 0 : index
    %456 = vector.load %arg12[%c0_455, %c2_456, %c0_457, %c0_458] : memref<3x3x64x128xf32, #tpu.memory_space<vmem>>, vector<1x1x64x128xf32>
    %457 = vector.shape_cast %456 : vector<1x1x64x128xf32> to vector<64x128xf32>
    %cst_459 = arith.constant dense<0.000000e+00> : vector<256x128xf32>
    %458 = tpu.matmul %455, %457, %cst_459 {dimension_numbers = #tpu.dot_dimension_numbers<[1], [0], [0], [1], [0, 0, 1, 1], [], []>} : vector<256x64xf32>, vector<64x128xf32>, vector<256x128xf32> -> vector<256x128xf32>
    %459 = arith.addf %453, %458 : vector<256x128xf32>
    %c1_460 = arith.constant 1 : index
    %c0_461 = arith.constant 0 : index
    %c0_462 = arith.constant 0 : index
    %460 = vector.load %arg21[%c1_460, %c0_461, %c0_462] : memref<18x18x64xf32, #tpu.memory_space<vmem>>, vector<16x16x64xf32>
    %461 = vector.shape_cast %460 : vector<16x16x64xf32> to vector<256x64xf32>
    %c1_463 = arith.constant 1 : index
    %c0_464 = arith.constant 0 : index
    %c0_465 = arith.constant 0 : index
    %c0_466 = arith.constant 0 : index
    %462 = vector.load %arg12[%c1_463, %c0_464, %c0_465, %c0_466] : memref<3x3x64x128xf32, #tpu.memory_space<vmem>>, vector<1x1x64x128xf32>
    %463 = vector.shape_cast %462 : vector<1x1x64x128xf32> to vector<64x128xf32>
    %cst_467 = arith.constant dense<0.000000e+00> : vector<256x128xf32>
    %464 = tpu.matmul %461, %463, %cst_467 {dimension_numbers = #tpu.dot_dimension_numbers<[1], [0], [0], [1], [0, 0, 1, 1], [], []>} : vector<256x64xf32>, vector<64x128xf32>, vector<256x128xf32> -> vector<256x128xf32>
    %465 = arith.addf %459, %464 : vector<256x128xf32>
    %c1_468 = arith.constant 1 : index
    %c1_469 = arith.constant 1 : index
    %c0_470 = arith.constant 0 : index
    %466 = vector.load %arg21[%c1_468, %c1_469, %c0_470] : memref<18x18x64xf32, #tpu.memory_space<vmem>>, vector<16x16x64xf32>
    %467 = vector.shape_cast %466 : vector<16x16x64xf32> to vector<256x64xf32>
    %c1_471 = arith.constant 1 : index
    %c1_472 = arith.constant 1 : index
    %c0_473 = arith.constant 0 : index
    %c0_474 = arith.constant 0 : index
    %468 = vector.load %arg12[%c1_471, %c1_472, %c0_473, %c0_474] : memref<3x3x64x128xf32, #tpu.memory_space<vmem>>, vector<1x1x64x128xf32>
    %469 = vector.shape_cast %468 : vector<1x1x64x128xf32> to vector<64x128xf32>
    %cst_475 = arith.constant dense<0.000000e+00> : vector<256x128xf32>
    %470 = tpu.matmul %467, %469, %cst_475 {dimension_numbers = #tpu.dot_dimension_numbers<[1], [0], [0], [1], [0, 0, 1, 1], [], []>} : vector<256x64xf32>, vector<64x128xf32>, vector<256x128xf32> -> vector<256x128xf32>
    %471 = arith.addf %465, %470 : vector<256x128xf32>
    %c1_476 = arith.constant 1 : index
    %c2_477 = arith.constant 2 : index
    %c0_478 = arith.constant 0 : index
    %472 = vector.load %arg21[%c1_476, %c2_477, %c0_478] : memref<18x18x64xf32, #tpu.memory_space<vmem>>, vector<16x16x64xf32>
    %473 = vector.shape_cast %472 : vector<16x16x64xf32> to vector<256x64xf32>
    %c1_479 = arith.constant 1 : index
    %c2_480 = arith.constant 2 : index
    %c0_481 = arith.constant 0 : index
    %c0_482 = arith.constant 0 : index
    %474 = vector.load %arg12[%c1_479, %c2_480, %c0_481, %c0_482] : memref<3x3x64x128xf32, #tpu.memory_space<vmem>>, vector<1x1x64x128xf32>
    %475 = vector.shape_cast %474 : vector<1x1x64x128xf32> to vector<64x128xf32>
    %cst_483 = arith.constant dense<0.000000e+00> : vector<256x128xf32>
    %476 = tpu.matmul %473, %475, %cst_483 {dimension_numbers = #tpu.dot_dimension_numbers<[1], [0], [0], [1], [0, 0, 1, 1], [], []>} : vector<256x64xf32>, vector<64x128xf32>, vector<256x128xf32> -> vector<256x128xf32>
    %477 = arith.addf %471, %476 : vector<256x128xf32>
    %c2_484 = arith.constant 2 : index
    %c0_485 = arith.constant 0 : index
    %c0_486 = arith.constant 0 : index
    %478 = vector.load %arg21[%c2_484, %c0_485, %c0_486] : memref<18x18x64xf32, #tpu.memory_space<vmem>>, vector<16x16x64xf32>
    %479 = vector.shape_cast %478 : vector<16x16x64xf32> to vector<256x64xf32>
    %c2_487 = arith.constant 2 : index
    %c0_488 = arith.constant 0 : index
    %c0_489 = arith.constant 0 : index
    %c0_490 = arith.constant 0 : index
    %480 = vector.load %arg12[%c2_487, %c0_488, %c0_489, %c0_490] : memref<3x3x64x128xf32, #tpu.memory_space<vmem>>, vector<1x1x64x128xf32>
    %481 = vector.shape_cast %480 : vector<1x1x64x128xf32> to vector<64x128xf32>
    %cst_491 = arith.constant dense<0.000000e+00> : vector<256x128xf32>
    %482 = tpu.matmul %479, %481, %cst_491 {dimension_numbers = #tpu.dot_dimension_numbers<[1], [0], [0], [1], [0, 0, 1, 1], [], []>} : vector<256x64xf32>, vector<64x128xf32>, vector<256x128xf32> -> vector<256x128xf32>
    %483 = arith.addf %477, %482 : vector<256x128xf32>
    %c2_492 = arith.constant 2 : index
    %c1_493 = arith.constant 1 : index
    %c0_494 = arith.constant 0 : index
    %484 = vector.load %arg21[%c2_492, %c1_493, %c0_494] : memref<18x18x64xf32, #tpu.memory_space<vmem>>, vector<16x16x64xf32>
    %485 = vector.shape_cast %484 : vector<16x16x64xf32> to vector<256x64xf32>
    %c2_495 = arith.constant 2 : index
    %c1_496 = arith.constant 1 : index
    %c0_497 = arith.constant 0 : index
    %c0_498 = arith.constant 0 : index
    %486 = vector.load %arg12[%c2_495, %c1_496, %c0_497, %c0_498] : memref<3x3x64x128xf32, #tpu.memory_space<vmem>>, vector<1x1x64x128xf32>
    %487 = vector.shape_cast %486 : vector<1x1x64x128xf32> to vector<64x128xf32>
    %cst_499 = arith.constant dense<0.000000e+00> : vector<256x128xf32>
    %488 = tpu.matmul %485, %487, %cst_499 {dimension_numbers = #tpu.dot_dimension_numbers<[1], [0], [0], [1], [0, 0, 1, 1], [], []>} : vector<256x64xf32>, vector<64x128xf32>, vector<256x128xf32> -> vector<256x128xf32>
    %489 = arith.addf %483, %488 : vector<256x128xf32>
    %c2_500 = arith.constant 2 : index
    %c2_501 = arith.constant 2 : index
    %c0_502 = arith.constant 0 : index
    %490 = vector.load %arg21[%c2_500, %c2_501, %c0_502] : memref<18x18x64xf32, #tpu.memory_space<vmem>>, vector<16x16x64xf32>
    %491 = vector.shape_cast %490 : vector<16x16x64xf32> to vector<256x64xf32>
    %c2_503 = arith.constant 2 : index
    %c2_504 = arith.constant 2 : index
    %c0_505 = arith.constant 0 : index
    %c0_506 = arith.constant 0 : index
    %492 = vector.load %arg12[%c2_503, %c2_504, %c0_505, %c0_506] : memref<3x3x64x128xf32, #tpu.memory_space<vmem>>, vector<1x1x64x128xf32>
    %493 = vector.shape_cast %492 : vector<1x1x64x128xf32> to vector<64x128xf32>
    %cst_507 = arith.constant dense<0.000000e+00> : vector<256x128xf32>
    %494 = tpu.matmul %491, %493, %cst_507 {dimension_numbers = #tpu.dot_dimension_numbers<[1], [0], [0], [1], [0, 0, 1, 1], [], []>} : vector<256x64xf32>, vector<64x128xf32>, vector<256x128xf32> -> vector<256x128xf32>
    %495 = arith.addf %489, %494 : vector<256x128xf32>
    %c0_508 = arith.constant 0 : index
    %c0_509 = arith.constant 0 : index
    %496 = vector.load %arg13[%c0_508, %c0_509] : memref<1x128xf32, #tpu.memory_space<vmem>>, vector<1x128xf32>
    %497 = vector.broadcast %496 : vector<1x128xf32> to vector<256x128xf32>
    %498 = arith.addf %495, %497 : vector<256x128xf32>
    %499 = vector.shape_cast %498 : vector<256x128xf32> to vector<16x16x128xf32>
    %c0_510 = arith.constant 0 : index
    %c0_511 = arith.constant 0 : index
    %c0_512 = arith.constant 0 : index
    %c0_513 = arith.constant 0 : index
    %500 = vector.load %arg14[%c0_510, %c0_511, %c0_512, %c0_513] : memref<1x16x16x128xf32, #tpu.memory_space<vmem>>, vector<1x16x16x128xf32>
    %501 = vector.shape_cast %500 : vector<1x16x16x128xf32> to vector<16x16x128xf32>
    %502 = vector.shape_cast %499 : vector<16x16x128xf32> to vector<1x16x16x128xf32>
    tpu.vector_store %arg14[%c0_510, %c0_511, %c0_512, %c0_513], %502 {strides = array<i32>} : memref<1x16x16x128xf32, #tpu.memory_space<vmem>>, vector<1x16x16x128xf32>,
    return
  }
  func.func @transform_0(%arg0: i32) -> (i32, i32, i32, i32) {
    %c0_i32 = arith.constant 0 : i32
    %c0_i32_0 = arith.constant 0 : i32
    %c0_i32_1 = arith.constant 0 : i32
    %c0_i32_2 = arith.constant 0 : i32
    return %arg0, %c0_i32, %c0_i32_0, %c0_i32_1 : i32, i32, i32, i32
  }
  func.func @transform_1(%arg0: i32) -> (i32, i32, i32, i32) {
    %c0_i32 = arith.constant 0 : i32
    %c0_i32_0 = arith.constant 0 : i32
    %c0_i32_1 = arith.constant 0 : i32
    %c0_i32_2 = arith.constant 0 : i32
    %c0_i32_3 = arith.constant 0 : i32
    return %c0_i32, %c0_i32_0, %c0_i32_1, %c0_i32_2 : i32, i32, i32, i32
  }
  func.func @transform_2(%arg0: i32) -> (i32, i32) {
    %c0_i32 = arith.constant 0 : i32
    %c0_i32_0 = arith.constant 0 : i32
    %c0_i32_1 = arith.constant 0 : i32
    return %c0_i32, %c0_i32_0 : i32, i32
  }
  func.func @transform_3(%arg0: i32) -> (i32, i32, i32, i32) {
    %c0_i32 = arith.constant 0 : i32
    %c0_i32_0 = arith.constant 0 : i32
    %c0_i32_1 = arith.constant 0 : i32
    %c0_i32_2 = arith.constant 0 : i32
    %c0_i32_3 = arith.constant 0 : i32
    return %c0_i32, %c0_i32_0, %c0_i32_1, %c0_i32_2 : i32, i32, i32, i32
  }
  func.func @transform_4(%arg0: i32) -> (i32, i32) {
    %c0_i32 = arith.constant 0 : i32
    %c0_i32_0 = arith.constant 0 : i32
    %c0_i32_1 = arith.constant 0 : i32
    return %c0_i32, %c0_i32_0 : i32, i32
  }
  func.func @transform_5(%arg0: i32) -> (i32, i32, i32, i32) {
    %c0_i32 = arith.constant 0 : i32
    %c0_i32_0 = arith.constant 0 : i32
    %c0_i32_1 = arith.constant 0 : i32
    %c0_i32_2 = arith.constant 0 : i32
    %c0_i32_3 = arith.constant 0 : i32
    return %c0_i32, %c0_i32_0, %c0_i32_1, %c0_i32_2 : i32, i32, i32, i32
  }
  func.func @transform_6(%arg0: i32) -> (i32, i32) {
    %c0_i32 = arith.constant 0 : i32
    %c0_i32_0 = arith.constant 0 : i32
    %c0_i32_1 = arith.constant 0 : i32
    return %c0_i32, %c0_i32_0 : i32, i32
  }
  func.func @transform_7(%arg0: i32) -> (i32, i32, i32, i32) {
    %c0_i32 = arith.constant 0 : i32
    %c0_i32_0 = arith.constant 0 : i32
    %c0_i32_1 = arith.constant 0 : i32
    %c0_i32_2 = arith.constant 0 : i32
    %c0_i32_3 = arith.constant 0 : i32
    return %c0_i32, %c0_i32_0, %c0_i32_1, %c0_i32_2 : i32, i32, i32, i32
  }
  func.func @transform_8(%arg0: i32) -> (i32, i32) {
    %c0_i32 = arith.constant 0 : i32
    %c0_i32_0 = arith.constant 0 : i32
    %c0_i32_1 = arith.constant 0 : i32
    return %c0_i32, %c0_i32_0 : i32, i32
  }
  func.func @transform_9(%arg0: i32) -> (i32, i32, i32, i32) {
    %c0_i32 = arith.constant 0 : i32
    %c0_i32_0 = arith.constant 0 : i32
    %c0_i32_1 = arith.constant 0 : i32
    %c0_i32_2 = arith.constant 0 : i32
    %c0_i32_3 = arith.constant 0 : i32
    return %c0_i32, %c0_i32_0, %c0_i32_1, %c0_i32_2 : i32, i32, i32, i32
  }
  func.func @transform_10(%arg0: i32) -> (i32, i32) {
    %c0_i32 = arith.constant 0 : i32
    %c0_i32_0 = arith.constant 0 : i32
    %c0_i32_1 = arith.constant 0 : i32
    return %c0_i32, %c0_i32_0 : i32, i32
  }
  func.func @transform_11(%arg0: i32) -> (i32, i32, i32, i32) {
    %c0_i32 = arith.constant 0 : i32
    %c0_i32_0 = arith.constant 0 : i32
    %c0_i32_1 = arith.constant 0 : i32
    %c0_i32_2 = arith.constant 0 : i32
    %c0_i32_3 = arith.constant 0 : i32
    return %c0_i32, %c0_i32_0, %c0_i32_1, %c0_i32_2 : i32, i32, i32, i32
  }
  func.func @transform_12(%arg0: i32) -> (i32, i32) {
    %c0_i32 = arith.constant 0 : i32
    %c0_i32_0 = arith.constant 0 : i32
    %c0_i32_1 = arith.constant 0 : i32
    return %c0_i32, %c0_i32_0 : i32, i32
  }
  func.func @transform_13(%arg0: i32) -> (i32, i32, i32, i32) {
    %c0_i32 = arith.constant 0 : i32
    %c0_i32_0 = arith.constant 0 : i32
    %c0_i32_1 = arith.constant 0 : i32
    %c0_i32_2 = arith.constant 0 : i32
    return %arg0, %c0_i32, %c0_i32_0, %c0_i32_1 : i32, i32, i32, i32
  }
}

</mosaic_0001>

<bundles_post_ra>
// kernel: colorization_cnn_forward.1
= control target key start
LH: loop header
LB: loop body
LE: loop exit
PB: predicated region body
PF: predicated region fallthrough
CT: control target
= control target key end

     0   :  { %s17780_s25 = smov 0   ;;  %s23883_s0 = inlined_call_operand.vmem [shape: f32[2,18,18,1], index: 0, kind: input, shape index: {}]   ;;  %s23884_s1 = inlined_call_operand.vmem [shape: f32[3,3,1,64], index: 1, kind: input, shape index: {}]   ;;  %s23885_s2 = inlined_call_operand.vmem [shape: f32[1,64], index: 2, kind: input, shape index: {}]   ;;  %s23886_s3 = inlined_call_operand.vmem [shape: f32[3,3,64,128], index: 3, kind: input, shape index: {}]   ;;  %s23887_s4 = inlined_call_operand.vmem [shape: f32[1,128], index: 4, kind: input, shape index: {}]   ;;  %s23888_s5 = inlined_call_operand.vmem [shape: f32[3,3,128,256], index: 5, kind: input, shape index: {}]   ;;  %s23889_s6 = inlined_call_operand.vmem [shape: f32[1,256], index: 6, kind: input, shape index: {}]   ;;  %s23890_s7 = inlined_call_operand.vmem [shape: f32[3,3,256,128], index: 7, kind: input, shape index: {}]   ;;  %s23891_s8 = inlined_call_operand.vmem [shape: f32[1,128], index: 8, kind: input, shape index: {}]   ;;  %s23892_s9 = inlined_call_operand.vmem [shape: f32[3,3,128,64], index: 9, kind: input, shape index: {}]   ;;  %s23893_s10 = inlined_call_operand.vmem [shape: f32[1,64], index: 10, kind: input, shape index: {}]   ;;  %s23894_s11 = inlined_call_operand.vmem [shape: f32[3,3,64,128], index: 11, kind: input, shape index: {}]   ;;  %s23895_s12 = inlined_call_operand.vmem [shape: f32[1,128], index: 12, kind: input, shape index: {}]   ;;  %s23896_s13 = inlined_call_operand.vmem [shape: f32[2,16,16,128], index: 13, kind: output, shape index: {}]  }
   0x1 LB: > { %s12367_s26 = sadd.s32 4294967295, %s17706_s25   ;;  %p12371_p0 = scmp.ge.s32.totalorder %s17706_s25, 1  ;;  %s17706_s25 = sphi %s17780_s25, %s23_s25  }
   0x2   : > { %p387_p1 = scmp.lt.s32.totalorder %s17706_s25, 3 }
   0x4   : > { %p388_p2 = pnand %p12371_p0, %p387_p1 }
   0x6   : > { %391 = sbr.rel (%p388_p2) target bundleno = 3101 (0xc1d), region = 72 }
   0xd   : > { %p431_p3 = scmp.lt.s32.totalorder %s12367_s26, 1  ;;  %v17708_v0 = vmov 0   ;;  %vm441_vm0 = vcmask 523264   ;;  %vm443_vm1 = vcmask 517120   ;;  %vm5921_vm2 = vcmask 1046528  }
   0xe   : > { %17680 = vset.pattern.permute.xlu1 %v17708_v0  ;;  %17679 = vset.pattern.permute.xlu0 %v17708_v0  ;;  %vm6189_vm3 = vcmask 1045504  }
   0xf   : > { %s24234_s26 = smov (!%p431_p3, %s12367_s26), 1 }
  0x10   : > { %s17668_s27 = smul.u32 432, %s24234_s26  ;;  %s13719_s14 = sshll.u32 %s24234_s26, 8 }
  0x11   : > { %s23783_s18 = scalar_lea.vmem %s23896_s13, %s13719_s14 }
  0x12   : > { %s17794_s30 = scalar_lea.vmem %s23883_s0, %s17668_s27 }
  0x13   : > { %v575_v1 = vld [vmem:[%s17794_s30 + $0x18] sm:$0xff]  ;;  %v573_v2 = vld [vmem:[%s17794_s30] sm:$0xff]  ;;  %v574_v4 = vld [vmem:[%s17794_s30 + $0x8] sm:$0xff] }
  0x14   : > { %618 = vperm.xlu1 %17680, %v575_v1   ;;  %608 = vperm.xlu0 %17679, %v573_v2   ;;  %v576_v3 = vld [vmem:[%s17794_s30 + $0x20] sm:$0xff]  ;;  %v837_v5 = vld [vmem:[%s17794_s30 + $0x9] sm:$0xff]  ;;  %v17821_v13 = vld [vmem:[%s17794_s30 + $0x38] sm:$0xff] }
  0x15   : > { %v836_v6 = vld [vmem:[%s17794_s30 + $0x1] sm:$0xff]  ;;  %v17806_v8 = vld [vmem:[%s17794_s30 + $0x19] sm:$0xff]  ;;  %v1101_v9 = vld [vmem:[%s17794_s30 + $0xa] sm:$0xff] }
  0x16   : > { %v17803_v7 = vld [vmem:[%s17794_s30 + $0x21] sm:$0xff]  ;;  %v17824_v14 = vld [vmem:[%s17794_s30 + $0x30] sm:$0xff]  ;;  %v17837_v17 = vld [vmem:[%s17794_s30 + $0x39] sm:$0xff] }
  0x17   : > { %v1100_v10 = vld [vmem:[%s17794_s30 + $0x2] sm:$0xff]  ;;  %v17816_v12 = vld [vmem:[%s17794_s30 + $0x1a] sm:$0xff]  ;;  %v17829_v15 = vld [vmem:[%s17794_s30 + $0x50] sm:$0xff] }
  0x18   : > { %623 = vperm.xlu1 %17680, %v576_v3   ;;  %613 = vperm.xlu0 %17679, %v574_v4   ;;  %v17813_v11 = vld [vmem:[%s17794_s30 + $0x22] sm:$0xff]  ;;  %v17840_v18 = vld [vmem:[%s17794_s30 + $0x31] sm:$0xff]  ;;  %v17880_v28 = vld [vmem:[%s17794_s30 + $0x79] sm:$0xff] }
  0x19   : > { %v17832_v16 = vld [vmem:[%s17794_s30 + $0x48] sm:$0xff]  ;;  %v17845_v19 = vld [vmem:[%s17794_s30 + $0x51] sm:$0xff]  ;;  %v17856_v22 = vld [vmem:[%s17794_s30 + $0x60] sm:$0xff] }
  0x1a   : > { %v17848_v20 = vld [vmem:[%s17794_s30 + $0x49] sm:$0xff]  ;;  %v17861_v23 = vld [vmem:[%s17794_s30 + $0x80] sm:$0xff]  ;;  %v17864_v24 = vld [vmem:[%s17794_s30 + $0x78] sm:$0xff] }
  0x1b   : > { %v17853_v21 = vld [vmem:[%s17794_s30 + $0x68] sm:$0xff]  ;;  %v17887_v29 = vld [vmem:[%s17794_s30 + $0x3a] sm:$0xff]  ;;  %v17890_v30 = vld [vmem:[%s17794_s30 + $0x32] sm:$0xff] }
  0x1c   : > { %877 = vperm.xlu1 %17680, %v837_v5   ;;  %872 = vperm.xlu0 %17679, %v836_v6   ;;  %v17869_v25 = vld [vmem:[%s17794_s30 + $0x69] sm:$0xff]  ;;  %v17872_v26 = vld [vmem:[%s17794_s30 + $0x61] sm:$0xff]  ;;  %v17895_v31 = vld [vmem:[%s17794_s30 + $0x52] sm:$0xff] }
  0x1d   : > { %v17877_v27 = vld [vmem:[%s17794_s30 + $0x81] sm:$0xff]  ;;  %v17898_v32 = vld [vmem:[%s17794_s30 + $0x4a] sm:$0xff]  ;;  %v17923_v37 = vld [vmem:[%s17794_s30 + $0x98] sm:$0xff] }
  0x1e   : > { %v17903_v33 = vld [vmem:[%s17794_s30 + $0x6a] sm:$0xff]  ;;  %v17906_v34 = vld [vmem:[%s17794_s30 + $0x62] sm:$0xff]  ;;  %v17914_v36 = vld [vmem:[%s17794_s30 + $0x7a] sm:$0xff] }
  0x1f   : > { %v17911_v35 = vld [vmem:[%s17794_s30 + $0x82] sm:$0xff]  ;;  %v17926_v38 = vld [vmem:[%s17794_s30 + $0x90] sm:$0xff]  ;;  %v17939_v41 = vld [vmem:[%s17794_s30 + $0x99] sm:$0xff] }
  0x20   : > { %887 = vperm.xlu1 %17680, %v17803_v7   ;;  %882 = vperm.xlu0 %17679, %v17806_v8   ;;  %v17931_v39 = vld [vmem:[%s17794_s30 + $0xb0] sm:$0xff]  ;;  %v17934_v40 = vld [vmem:[%s17794_s30 + $0xa8] sm:$0xff]  ;;  %v17962_v46 = vld [vmem:[%s17794_s30 + $0xc0] sm:$0xff] }
  0x21   : > { %v17942_v42 = vld [vmem:[%s17794_s30 + $0x91] sm:$0xff]  ;;  %v17950_v44 = vld [vmem:[%s17794_s30 + $0xa9] sm:$0xff]  ;;  %v17967_v47 = vld [vmem:[%s17794_s30 + $0xe0] sm:$0xff] }
  0x22   : > { %v17947_v43 = vld [vmem:[%s17794_s30 + $0xb1] sm:$0xff]  ;;  %v17959_v45 = vld [vmem:[%s17794_s30 + $0xc8] sm:$0xff]  ;;  %v17986_v52 = vld [vmem:[%s17794_s30 + $0xd9] sm:$0xff] }
  0x23   : > { %v17970_v48 = vld [vmem:[%s17794_s30 + $0xd8] sm:$0xff]  ;;  %v17975_v49 = vld [vmem:[%s17794_s30 + $0xc9] sm:$0xff]  ;;  %v17978_v50 = vld [vmem:[%s17794_s30 + $0xc1] sm:$0xff] }
  0x24   : > { %1141 = vperm.xlu1 %17680, %v1101_v9   ;;  %1136 = vperm.xlu0 %17679, %v1100_v10   ;;  %v17983_v51 = vld [vmem:[%s17794_s30 + $0xe1] sm:$0xff]  ;;  %v18018_v62 = vld [vmem:[%s17794_s30 + $0x92] sm:$0xff]  ;;  %v18030_v2 = vld [vmem:[%s17794_s30 + $0xaa] sm:$0xff] }
  0x25   : > { %v18015_v61 = vld [vmem:[%s17794_s30 + $0x9a] sm:$0xff]  ;;  %v18051_v9 = vld [vmem:[%s17794_s30 + $0xca] sm:$0xff]  ;;  %v18054_v10 = vld [vmem:[%s17794_s30 + $0xc2] sm:$0xff] }
  0x28   : > { %1151 = vperm.xlu1 %17680, %v17813_v11   ;;  %1146 = vperm.xlu0 %17679, %v17816_v12  }
  0x2c   : > { %633 = vperm.xlu1 %17680, %v17821_v13   ;;  %628 = vperm.xlu0 %17679, %v17824_v14  }
  0x30   : > { %643 = vperm.xlu1 %17680, %v17829_v15   ;;  %638 = vperm.xlu0 %17679, %v17832_v16  }
  0x34   : > { %897 = vperm.xlu1 %17680, %v17837_v17   ;;  %892 = vperm.xlu0 %17679, %v17840_v18  }
  0x38   : > { %907 = vperm.xlu1 %17680, %v17845_v19   ;;  %902 = vperm.xlu0 %17679, %v17848_v20  }
  0x3c   : > { %653 = vperm.xlu1 %17680, %v17853_v21   ;;  %648 = vperm.xlu0 %17679, %v17856_v22  }
  0x40   : > { %663 = vperm.xlu1 %17680, %v17861_v23   ;;  %658 = vperm.xlu0 %17679, %v17864_v24  }
  0x44   : > { %917 = vperm.xlu1 %17680, %v17869_v25   ;;  %912 = vperm.xlu0 %17679, %v17872_v26  }
  0x48   : > { %927 = vperm.xlu1 %17680, %v17877_v27   ;;  %922 = vperm.xlu0 %17679, %v17880_v28  }
  0x4c   : > { %1406 = vperm.xlu1 %17680, %v576_v3   ;;  %1401 = vperm.xlu0 %17679, %v575_v1   ;;  %v18027_v1 = vld [vmem:[%s17794_s30 + $0xb2] sm:$0xff] }
  0x50   : > { %1416 = vperm.xlu1 %17680, %v17821_v13   ;;  %1411 = vperm.xlu0 %17679, %v17824_v14  }
  0x54   : > { %1161 = vperm.xlu1 %17680, %v17887_v29   ;;  %1156 = vperm.xlu0 %17679, %v17890_v30  }
  0x58   : > { %1171 = vperm.xlu1 %17680, %v17895_v31   ;;  %1166 = vperm.xlu0 %17679, %v17898_v32  }
  0x5c   : > { %1181 = vperm.xlu1 %17680, %v17903_v33   ;;  %1176 = vperm.xlu0 %17679, %v17906_v34  }
  0x60   : > { %1191 = vperm.xlu1 %17680, %v17911_v35   ;;  %1186 = vperm.xlu0 %17679, %v17914_v36  }
  0x64   : > { %1670 = vperm.xlu1 %17680, %v17803_v7   ;;  %1665 = vperm.xlu0 %17679, %v17806_v8  }
  0x68   : > { %1680 = vperm.xlu1 %17680, %v17837_v17   ;;  %1675 = vperm.xlu0 %17679, %v17840_v18  }
  0x6c   : > { %673 = vperm.xlu1 %17680, %v17923_v37   ;;  %668 = vperm.xlu0 %17679, %v17926_v38  }
  0x70   : > { %683 = vperm.xlu1 %17680, %v17931_v39   ;;  %678 = vperm.xlu0 %17679, %v17934_v40  }
  0x74   : > { %937 = vperm.xlu1 %17680, %v17939_v41   ;;  %932 = vperm.xlu0 %17679, %v17942_v42  }
  0x78   : > { %947 = vperm.xlu1 %17680, %v17947_v43   ;;  %942 = vperm.xlu0 %17679, %v17950_v44  }
  0x7c   : > { %1426 = vperm.xlu1 %17680, %v17829_v15   ;;  %1421 = vperm.xlu0 %17679, %v17832_v16  }
  0x80   : > { %1436 = vperm.xlu1 %17680, %v17853_v21   ;;  %1431 = vperm.xlu0 %17679, %v17856_v22  }
  0x84   : > { %693 = vperm.xlu1 %17680, %v17959_v45   ;;  %688 = vperm.xlu0 %17679, %v17962_v46  }
  0x88   : > { %703 = vperm.xlu1 %17680, %v17967_v47   ;;  %698 = vperm.xlu0 %17679, %v17970_v48  }
  0x8c   : > { %957 = vperm.xlu1 %17680, %v17975_v49   ;;  %952 = vperm.xlu0 %17679, %v17978_v50  }
  0x90   : > { %967 = vperm.xlu1 %17680, %v17983_v51   ;;  %962 = vperm.xlu0 %17679, %v17986_v52  }
  0x93   : > { %v17990_v53 = vpop.permute.xlu1 %618  ;;  %v17992_v54 = vpop.permute.xlu0 %608 }
  0x94   : > { %23919 = vst [vmem:[#allocation9_spill] sm:$0xff] %v17990_v53  ;;  %1446 = vperm.xlu1 %17680, %v17861_v23   ;;  %1441 = vperm.xlu0 %17679, %v17864_v24   ;;  %v18207_v53 = vld [vmem:[%s17794_s30 + $0x141] sm:$0xff] }
  0x97   : > { %v17996_v55 = vpop.permute.xlu1 %623  ;;  %v17998_v56 = vpop.permute.xlu0 %613 }
  0x98   : > { %23920 = vst [vmem:[#allocation10_spill] sm:$0xff] %v17996_v55  ;;  %1456 = vperm.xlu1 %17680, %v17923_v37   ;;  %1451 = vperm.xlu0 %17679, %v17926_v38  }
  0x9b   : > { %v18002_v57 = vpop.permute.xlu1 %877  ;;  %v18004_v58 = vpop.permute.xlu0 %872 }
  0x9c   : > { %1934 = vperm.xlu1 %17680, %v17813_v11   ;;  %1929 = vperm.xlu0 %17679, %v17816_v12  }
  0x9f   : > { %v18008_v59 = vpop.permute.xlu1 %887  ;;  %v18010_v60 = vpop.permute.xlu0 %882 }
  0xa0   : > { %1944 = vperm.xlu1 %17680, %v17887_v29   ;;  %1939 = vperm.xlu0 %17679, %v17890_v30  }
  0xa3   : > { %v18020_v63 = vpop.permute.xlu1 %1141  ;;  %v18022_v0 = vpop.permute.xlu0 %1136 }
  0xa4   : > { %1201 = vperm.xlu1 %17680, %v18015_v61   ;;  %1196 = vperm.xlu0 %17679, %v18018_v62  }
  0xa7   : > { %v18032_v3 = vpop.permute.xlu1 %1151  ;;  %v18034_v4 = vpop.permute.xlu0 %1146 }
  0xa8   : > { %23921 = vst [vmem:[#allocation11_spill] sm:$0xff] %v18032_v3  ;;  %23922 = vst [vmem:[#allocation12_spill] sm:$0xff] %v18034_v4  ;;  %1211 = vperm.xlu1 %17680, %v18027_v1   ;;  %1206 = vperm.xlu0 %17679, %v18030_v2  }
  0xab   : > { %v18038_v5 = vpop.permute.xlu1 %633  ;;  %v18040_v6 = vpop.permute.xlu0 %628 }
  0xac   : > { %23923 = vst [vmem:[#allocation13_spill] sm:$0xff] %v18038_v5  ;;  %23924 = vst [vmem:[#allocation14_spill] sm:$0xff] %v18040_v6  ;;  %1690 = vperm.xlu1 %17680, %v17845_v19   ;;  %1685 = vperm.xlu0 %17679, %v17848_v20   ;;  %v18063_v6 = vld [vmem:[%s17794_s30 + $0xe2] sm:$0xff] }
  0xaf   : > { %v18044_v7 = vpop.permute.xlu1 %643  ;;  %v18046_v8 = vpop.permute.xlu0 %638 }
  0xb0   : > { %23925 = vst [vmem:[#allocation15_spill] sm:$0xff] %v18044_v7  ;;  %23926 = vst [vmem:[#allocation16_spill] sm:$0xff] %v18046_v8  ;;  %1700 = vperm.xlu1 %17680, %v17869_v25   ;;  %1695 = vperm.xlu0 %17679, %v17872_v26   ;;  %v18066_v7 = vld [vmem:[%s17794_s30 + $0xda] sm:$0xff] }
  0xb3   : > { %v18056_v11 = vpop.permute.xlu1 %897  ;;  %v18058_v12 = vpop.permute.xlu0 %892 }
  0xb4   : > { %23927 = vst [vmem:[#allocation17_spill] sm:$0xff] %v18056_v11  ;;  %23928 = vst [vmem:[#allocation18_spill] sm:$0xff] %v18058_v12  ;;  %1221 = vperm.xlu1 %17680, %v18051_v9   ;;  %1216 = vperm.xlu0 %17679, %v18054_v10  }
  0xb7   : > { %v18068_v8 = vpop.permute.xlu1 %907  ;;  %v18070_v25 = vpop.permute.xlu0 %902 }
  0xb8   : > { %23929 = vst [vmem:[#allocation19_spill] sm:$0xff] %v18068_v8  ;;  %23930 = vst [vmem:[#allocation20_spill] sm:$0xff] %v18070_v25  ;;  %1231 = vperm.xlu1 %17680, %v18063_v6   ;;  %1226 = vperm.xlu0 %17679, %v18066_v7   ;;  %v18138_v8 = vld [vmem:[%s17794_s30 + $0x109] sm:$0xff] }
  0xbb   : > { %v18074_v26 = vpop.permute.xlu1 %653  ;;  %v18076_v5 = vpop.permute.xlu0 %648 }
  0xbc   : > { %23931 = vst [vmem:[#allocation21_spill] sm:$0xff] %v18074_v26  ;;  %23932 = vst [vmem:[#allocation22_spill] sm:$0xff] %v18076_v5  ;;  %1710 = vperm.xlu1 %17680, %v17877_v27   ;;  %1705 = vperm.xlu0 %17679, %v17880_v28  }
  0xbf   : > { %v18080_v12 = vpop.permute.xlu1 %663  ;;  %v18082_v11 = vpop.permute.xlu0 %658 }
  0xc0   : > { %23933 = vst [vmem:[#allocation23_spill] sm:$0xff] %v18080_v12  ;;  %23934 = vst [vmem:[#allocation24_spill] sm:$0xff] %v18082_v11  ;;  %1720 = vperm.xlu1 %17680, %v17939_v41   ;;  %1715 = vperm.xlu0 %17679, %v17942_v42   ;;  %v18099_v41 = vld [vmem:[%s17794_s30 + $0xf8] sm:$0xff]  ;;  %v18102_v42 = vld [vmem:[%s17794_s30 + $0xf0] sm:$0xff] }
  0xc3   : > { %v18086_v25 = vpop.permute.xlu1 %917  ;;  %v18088_v26 = vpop.permute.xlu0 %912 }
  0xc4   : > { %23935 = vst [vmem:[#allocation25_spill] sm:$0xff] %v18086_v25  ;;  %23936 = vst [vmem:[#allocation26_spill] sm:$0xff] %v18088_v26  ;;  %2199 = vperm.xlu1 %17680, %v17821_v13   ;;  %2194 = vperm.xlu0 %17679, %v17824_v14   ;;  %v18111_v14 = vld [vmem:[%s17794_s30 + $0x110] sm:$0xff] }
  0xc5   : > { %v18126_v26 = vld [vmem:[%s17794_s30 + $0xf1] sm:$0xff] }
  0xc6   : > { %v18135_v25 = vld [vmem:[%s17794_s30 + $0x111] sm:$0xff] }
  0xc7   : > { %v18092_v27 = vpop.permute.xlu1 %927  ;;  %v18094_v28 = vpop.permute.xlu0 %922 }
  0xc8   : > { %23937 = vst [vmem:[#allocation27_spill] sm:$0xff] %v18092_v27  ;;  %23938 = vst [vmem:[#allocation28_spill] sm:$0xff] %v18094_v28  ;;  %2209 = vperm.xlu1 %17680, %v17829_v15   ;;  %2204 = vperm.xlu0 %17679, %v17832_v16   ;;  %v18114_v28 = vld [vmem:[%s17794_s30 + $0x108] sm:$0xff]  ;;  %v18123_v27 = vld [vmem:[%s17794_s30 + $0xf9] sm:$0xff] }
  0xcb   : > { %v18104_v11 = vpop.permute.xlu1 %1406  ;;  %v18106_v13 = vpop.permute.xlu0 %1401 }
  0xcc   : > { %23939 = vst [vmem:[#allocation29_spill] sm:$0xff] %v18104_v11  ;;  %23940 = vst [vmem:[#allocation30_spill] sm:$0xff] %v18106_v13  ;;  %713 = vperm.xlu1 %17680, %v18099_v41   ;;  %708 = vperm.xlu0 %17679, %v18102_v42  }
  0xcf   : > { %v18116_v15 = vpop.permute.xlu1 %1416  ;;  %v18118_v16 = vpop.permute.xlu0 %1411 }
  0xd0   : > { %23941 = vst [vmem:[#allocation31_spill] sm:$0xff] %v18116_v15  ;;  %23942 = vst [vmem:[#allocation32_spill] sm:$0xff] %v18118_v16  ;;  %723 = vperm.xlu1 %17680, %v18111_v14   ;;  %718 = vperm.xlu0 %17679, %v18114_v28  }
  0xd3   : > { %v18128_v12 = vpop.permute.xlu1 %1161  ;;  %v18130_v5 = vpop.permute.xlu0 %1156 }
  0xd4   : > { %23943 = vst [vmem:[#allocation33_spill] sm:$0xff] %v18128_v12  ;;  %23944 = vst [vmem:[#allocation34_spill] sm:$0xff] %v18130_v5  ;;  %977 = vperm.xlu1 %17680, %v18123_v27   ;;  %972 = vperm.xlu0 %17679, %v18126_v26  }
  0xd7   : > { %v18140_v16 = vpop.permute.xlu1 %1171  ;;  %v18142_v15 = vpop.permute.xlu0 %1166 }
  0xd8   : > { %23945 = vst [vmem:[#allocation35_spill] sm:$0xff] %v18140_v16  ;;  %23946 = vst [vmem:[#allocation36_spill] sm:$0xff] %v18142_v15  ;;  %987 = vperm.xlu1 %17680, %v18135_v25   ;;  %982 = vperm.xlu0 %17679, %v18138_v8  }
  0xdb   : > { %v18146_v4 = vpop.permute.xlu1 %1181  ;;  %v18148_v5 = vpop.permute.xlu0 %1176 }
  0xdc   : > { %23947 = vst [vmem:[#allocation37_spill] sm:$0xff] %v18146_v4  ;;  %23948 = vst [vmem:[#allocation38_spill] sm:$0xff] %v18148_v5  ;;  %1466 = vperm.xlu1 %17680, %v17931_v39   ;;  %1461 = vperm.xlu0 %17679, %v17934_v40  }
  0xdf   : > { %v18152_v12 = vpop.permute.xlu1 %1191  ;;  %v18154_v13 = vpop.permute.xlu0 %1186 }
  0xe0   : > { %23949 = vst [vmem:[#allocation39_spill] sm:$0xff] %v18152_v12  ;;  %23950 = vst [vmem:[#allocation40_spill] sm:$0xff] %v18154_v13  ;;  %1476 = vperm.xlu1 %17680, %v17959_v45   ;;  %1471 = vperm.xlu0 %17679, %v17962_v46   ;;  %v18171_v45 = vld [vmem:[%s17794_s30 + $0x128] sm:$0xff]  ;;  %v18174_v46 = vld [vmem:[%s17794_s30 + $0x120] sm:$0xff] }
  0xe3   : > { %v18158_v15 = vpop.permute.xlu1 %1670  ;;  %v18160_v4 = vpop.permute.xlu0 %1665 }
  0xe4   : > { %23951 = vst [vmem:[#allocation41_spill] sm:$0xff] %v18158_v15  ;;  %23952 = vst [vmem:[#allocation42_spill] sm:$0xff] %v18160_v4  ;;  %1954 = vperm.xlu1 %17680, %v17895_v31   ;;  %1949 = vperm.xlu0 %17679, %v17898_v32  }
  0xe7   : > { %v18164_v5 = vpop.permute.xlu1 %1680  ;;  %v18166_v12 = vpop.permute.xlu0 %1675 }
  0xe8   : > { %23953 = vst [vmem:[#allocation43_spill] sm:$0xff] %v18164_v5  ;;  %23954 = vst [vmem:[#allocation44_spill] sm:$0xff] %v18166_v12  ;;  %1964 = vperm.xlu1 %17680, %v17903_v33   ;;  %1959 = vperm.xlu0 %17679, %v17906_v34   ;;  %v18183_v12 = vld [vmem:[%s17794_s30 + $0x140] sm:$0xff]  ;;  %v18186_v5 = vld [vmem:[%s17794_s30 + $0x138] sm:$0xff] }
  0xeb   : > { %v18176_v13 = vpop.permute.xlu1 %673  ;;  %v18178_v16 = vpop.permute.xlu0 %668 }
  0xec   : > { %23955 = vst [vmem:[#allocation45_spill] sm:$0xff] %v18176_v13  ;;  %23956 = vst [vmem:[#allocation46_spill] sm:$0xff] %v18178_v16  ;;  %733 = vperm.xlu1 %17680, %v18171_v45   ;;  %728 = vperm.xlu0 %17679, %v18174_v46   ;;  %v18195_v13 = vld [vmem:[%s17794_s30 + $0x129] sm:$0xff]  ;;  %v18198_v16 = vld [vmem:[%s17794_s30 + $0x121] sm:$0xff] }
  0xef   : > { %v18188_v33 = vpop.permute.xlu1 %683  ;;  %v18190_v34 = vpop.permute.xlu0 %678 }
  0xf0   : > { %23957 = vst [vmem:[#allocation47_spill] sm:$0xff] %v18188_v33  ;;  %23958 = vst [vmem:[#allocation48_spill] sm:$0xff] %v18190_v34  ;;  %743 = vperm.xlu1 %17680, %v18183_v12   ;;  %738 = vperm.xlu0 %17679, %v18186_v5   ;;  %v18210_v33 = vld [vmem:[%s17794_s30 + $0x139] sm:$0xff] }
  0xf3   : > { %v18200_v4 = vpop.permute.xlu1 %937  ;;  %v18202_v15 = vpop.permute.xlu0 %932 }
  0xf4   : > { %23959 = vst [vmem:[#allocation49_spill] sm:$0xff] %v18200_v4  ;;  %23960 = vst [vmem:[#allocation50_spill] sm:$0xff] %v18202_v15  ;;  %997 = vperm.xlu1 %17680, %v18195_v13   ;;  %992 = vperm.xlu0 %17679, %v18198_v16  }
  0xf7   : > { %v18212_v34 = vpop.permute.xlu1 %947  ;;  %v18214_v11 = vpop.permute.xlu0 %942 }
  0xf8   : > { %23961 = vst [vmem:[#allocation51_spill] sm:$0xff] %v18212_v34  ;;  %23962 = vst [vmem:[#allocation52_spill] sm:$0xff] %v18214_v11  ;;  %1007 = vperm.xlu1 %17680, %v18207_v53   ;;  %1002 = vperm.xlu0 %17679, %v18210_v33  }
  0xfb   : > { %v18218_v3 = vpop.permute.xlu1 %1426  ;;  %v18220_v4 = vpop.permute.xlu0 %1421 }
  0xfc   : > { %1486 = vperm.xlu1 %17680, %v17967_v47   ;;  %1481 = vperm.xlu0 %17679, %v17970_v48  }
  0xff   : > { %v18224_v15 = vpop.permute.xlu1 %1436  ;;  %v18226_v55 = vpop.permute.xlu0 %1431 }
 0x100   : > { %23963 = vst [vmem:[#allocation53_spill] sm:$0xff] %v18226_v55  ;;  %1496 = vperm.xlu1 %17680, %v18099_v41   ;;  %1491 = vperm.xlu0 %17679, %v18102_v42  }
 0x103   : > { %v18230_v11 = vpop.permute.xlu1 %693  ;;  %v18232_v34 = vpop.permute.xlu0 %688 }
 0x104   : > { %23964 = vst [vmem:[#allocation54_spill] sm:$0xff] %v18230_v11  ;;  %23965 = vst [vmem:[#allocation55_spill] sm:$0xff] %v18232_v34  ;;  %1974 = vperm.xlu1 %17680, %v17911_v35   ;;  %1969 = vperm.xlu0 %17679, %v17914_v36  }
 0x107   : > { %v18236_v47 = vpop.permute.xlu1 %703  ;;  %v18238_v48 = vpop.permute.xlu0 %698 }
 0x108   : > { %23966 = vst [vmem:[#allocation56_spill] sm:$0xff] %v18236_v47  ;;  %23967 = vst [vmem:[#allocation57_spill] sm:$0xff] %v18238_v48  ;;  %1984 = vperm.xlu1 %17680, %v18015_v61   ;;  %1979 = vperm.xlu0 %17679, %v18018_v62   ;;  %v18255_v61 = vld [vmem:[%s17794_s30 + $0xfa] sm:$0xff]  ;;  %v18258_v62 = vld [vmem:[%s17794_s30 + $0xf2] sm:$0xff] }
 0x10b   : > { %v18242_v55 = vpop.permute.xlu1 %957  ;;  %v18244_v11 = vpop.permute.xlu0 %952 }
 0x10c   : > { %23968 = vst [vmem:[#allocation58_spill] sm:$0xff] %v18242_v55  ;;  %23969 = vst [vmem:[#allocation59_spill] sm:$0xff] %v18244_v11  ;;  %2463 = vperm.xlu1 %17680, %v17837_v17   ;;  %2458 = vperm.xlu0 %17679, %v17840_v18   ;;  %v18267_v17 = vld [vmem:[%s17794_s30 + $0x112] sm:$0xff]  ;;  %v18270_v18 = vld [vmem:[%s17794_s30 + $0x10a] sm:$0xff] }
 0x10f   : > { %v18248_v35 = vpop.permute.xlu1 %967  ;;  %v18250_v36 = vpop.permute.xlu0 %962 }
 0x110   : > { %23970 = vst [vmem:[#allocation60_spill] sm:$0xff] %v18248_v35  ;;  %23971 = vst [vmem:[#allocation61_spill] sm:$0xff] %v18250_v36  ;;  %2473 = vperm.xlu1 %17680, %v17845_v19   ;;  %2468 = vperm.xlu0 %17679, %v17848_v20  }
 0x113   : > { %v18260_v48 = vpop.permute.xlu1 %1446  ;;  %v18262_v47 = vpop.permute.xlu0 %1441 }
 0x114   : > { %23972 = vst [vmem:[#allocation62_spill] sm:$0xff] %v18260_v48  ;;  %23973 = vst [vmem:[#allocation63_spill] sm:$0xff] %v18262_v47  ;;  %1241 = vperm.xlu1 %17680, %v18255_v61   ;;  %1236 = vperm.xlu0 %17679, %v18258_v62  }
 0x117   : > { %v18272_v36 = vpop.permute.xlu1 %1456  ;;  %v18274_v19 = vpop.permute.xlu0 %1451 }
 0x118   : > { %23974 = vst [vmem:[#allocation64_spill] sm:$0xff] %v18272_v36  ;;  %23975 = vst [vmem:[#allocation65_spill] sm:$0xff] %v18274_v19  ;;  %1251 = vperm.xlu1 %17680, %v18267_v17   ;;  %1246 = vperm.xlu0 %17679, %v18270_v18  }
 0x11b   : > { %v18278_v20 = vpop.permute.xlu1 %1934  ;;  %v18280_v34 = vpop.permute.xlu0 %1929 }
 0x11c   : > { %1730 = vperm.xlu1 %17680, %v17947_v43   ;;  %1725 = vperm.xlu0 %17679, %v17950_v44  }
 0x11f   : > { %v18284_v35 = vpop.permute.xlu1 %1944  ;;  %v18286_v11 = vpop.permute.xlu0 %1939 }
 0x120   : > { %1740 = vperm.xlu1 %17680, %v17975_v49   ;;  %1735 = vperm.xlu0 %17679, %v17978_v50   ;;  %v18303_v49 = vld [vmem:[%s17794_s30 + $0x12a] sm:$0xff]  ;;  %v18306_v50 = vld [vmem:[%s17794_s30 + $0x122] sm:$0xff] }
 0x123   : > { %v18290_v55 = vpop.permute.xlu1 %1201  ;;  %v18292_v19 = vpop.permute.xlu0 %1196 }
 0x124   : > { %23976 = vst [vmem:[#allocation66_spill] sm:$0xff] %v18290_v55  ;;  %23977 = vst [vmem:[#allocation67_spill] sm:$0xff] %v18292_v19  ;;  %2219 = vperm.xlu1 %17680, %v17853_v21   ;;  %2214 = vperm.xlu0 %17679, %v17856_v22   ;;  %v18315_v21 = vld [vmem:[%s17794_s30 + $0x142] sm:$0xff]  ;;  %v18318_v22 = vld [vmem:[%s17794_s30 + $0x13a] sm:$0xff] }
 0x127   : > { %v18296_v43 = vpop.permute.xlu1 %1211  ;;  %v18298_v44 = vpop.permute.xlu0 %1206 }
 0x128   : > { %23978 = vst [vmem:[#allocation68_spill] sm:$0xff] %v18296_v43  ;;  %23979 = vst [vmem:[#allocation69_spill] sm:$0xff] %v18298_v44  ;;  %2229 = vperm.xlu1 %17680, %v17861_v23   ;;  %2224 = vperm.xlu0 %17679, %v17864_v24  }
 0x12b   : > { %v18308_v36 = vpop.permute.xlu1 %1690  ;;  %v18310_v55 = vpop.permute.xlu0 %1685 }
 0x12c   : > { %1261 = vperm.xlu1 %17680, %v18303_v49   ;;  %1256 = vperm.xlu0 %17679, %v18306_v50  }
 0x12f   : > { %v18320_v44 = vpop.permute.xlu1 %1700  ;;  %v18322_v23 = vpop.permute.xlu0 %1695 }
 0x130   : > { %23980 = vst [vmem:[#allocation70_spill] sm:$0xff] %v18322_v23  ;;  %1271 = vperm.xlu1 %17680, %v18315_v21   ;;  %1266 = vperm.xlu0 %17679, %v18318_v22  }
 0x133   : > { %v18326_v24 = vpop.permute.xlu1 %1221  ;;  %v18328_v43 = vpop.permute.xlu0 %1216 }
 0x134   : > { %23981 = vst [vmem:[#allocation71_spill] sm:$0xff] %v18326_v24  ;;  %23982 = vst [vmem:[#allocation72_spill] sm:$0xff] %v18328_v43  ;;  %1750 = vperm.xlu1 %17680, %v17983_v51   ;;  %1745 = vperm.xlu0 %17679, %v17986_v52  }
 0x137   : > { %v18332_v19 = vpop.permute.xlu1 %1231  ;;  %v18334_v47 = vpop.permute.xlu0 %1226 }
 0x138   : > { %23983 = vst [vmem:[#allocation73_spill] sm:$0xff] %v18332_v19  ;;  %23984 = vst [vmem:[#allocation74_spill] sm:$0xff] %v18334_v47  ;;  %1760 = vperm.xlu1 %17680, %v18123_v27   ;;  %1755 = vperm.xlu0 %17679, %v18126_v26   ;;  %v18641_v47 = vld [vmem:[%s17794_s30 + $0x150] sm:$0xff] }
 0x13b   : > { %v18338_v48 = vpop.permute.xlu1 %1710  ;;  %v18340_v23 = vpop.permute.xlu0 %1705 }
 0x13c   : > { %23985 = vst [vmem:[#allocation75_spill] sm:$0xff] %v18340_v23  ;;  %2239 = vperm.xlu1 %17680, %v17923_v37   ;;  %2234 = vperm.xlu0 %17679, %v17926_v38  }
 0x13f   : > { %v18344_v43 = vpop.permute.xlu1 %1720  ;;  %v18346_v51 = vpop.permute.xlu0 %1715 }
 0x140   : > { %23986 = vst [vmem:[#allocation76_spill] sm:$0xff] %v18344_v43  ;;  %23987 = vst [vmem:[#allocation77_spill] sm:$0xff] %v18346_v51  ;;  %2249 = vperm.xlu1 %17680, %v17931_v39   ;;  %2244 = vperm.xlu0 %17679, %v17934_v40   ;;  %v24040_v43 = vld [vmem:[#allocation42_spill] sm:$0xff] }
 0x143   : > { %v18350_v52 = vpop.permute.xlu1 %2199  ;;  %v18352_v27 = vpop.permute.xlu0 %2194 }
 0x144   : > { %2727 = vperm.xlu1 %17680, %v17887_v29   ;;  %2722 = vperm.xlu0 %17679, %v17890_v30   ;;  %v12585_v30 = vld [vmem:[%s23886_s3 + $0x40] sm:$0xff] }
 0x147   : > { %v18356_v26 = vpop.permute.xlu1 %2209  ;;  %v18358_v37 = vpop.permute.xlu0 %2204 }
 0x148   : > { %2737 = vperm.xlu1 %17680, %v17895_v31   ;;  %2732 = vperm.xlu0 %17679, %v17898_v32   ;;  %v12586_v31 = vld [vmem:[%s23886_s3 + $0x48] sm:$0xff] }
 0x14b   : > { %v18362_v38 = vpop.permute.xlu1 %713  ;;  %v18364_v39 = vpop.permute.xlu0 %708 }
 0x14c   : > { %23988 = vst [vmem:[#allocation78_spill] sm:$0xff] %v18362_v38  ;;  %23989 = vst [vmem:[#allocation79_spill] sm:$0xff] %v18364_v39  ;;  %1506 = vperm.xlu1 %17680, %v18111_v14   ;;  %1501 = vperm.xlu0 %17679, %v18114_v28  }
 0x14f   : > { %v18368_v40 = vpop.permute.xlu1 %723  ;;  %v18370_v29 = vpop.permute.xlu0 %718 }
 0x150   : > { %23990 = vst [vmem:[#allocation80_spill] sm:$0xff] %v18368_v40  ;;  %23991 = vst [vmem:[#allocation81_spill] sm:$0xff] %v18370_v29  ;;  %1516 = vperm.xlu1 %17680, %v18171_v45   ;;  %1511 = vperm.xlu0 %17679, %v18174_v46   ;;  %v16060_v40 = vpack.c.bf16 %v12586_v31, %v12585_v30  ;;  %v12587_v45 = vld [vmem:[%s23886_s3 + $0x50] sm:$0xff]  ;;  %v12588_v46 = vld [vmem:[%s23886_s3 + $0x58] sm:$0xff] }
 0x151   : > { %v12590_v30 = vld [vmem:[%s23886_s3 + $0x68] sm:$0xff] }
 0x152   : > { %16061 = vmatprep.subr.bf16.mxu0 %v16060_v40 }
 0x153   : > { %v18380_v32 = vpop.permute.xlu1 %977  ;;  %v18382_v39 = vpop.permute.xlu0 %972  ;;  %16063 = vmatpush3.bf16.msra.mxu0 %v16060_v40  ;;  %v12589_v40 = vld [vmem:[%s23886_s3 + $0x60] sm:$0xff] }
 0x154   : > { %23992 = vst [vmem:[#allocation82_spill] sm:$0xff] %v18380_v32  ;;  %23993 = vst [vmem:[#allocation83_spill] sm:$0xff] %v18382_v39  ;;  %1994 = vperm.xlu1 %17680, %v18027_v1   ;;  %1989 = vperm.xlu0 %17679, %v18030_v2   ;;  %v16064_v39 = vpack.c.bf16 %v12588_v46, %v12587_v45  ;;  %v12521_v1 = vld [vmem:[%s17794_s30 + $0x69] sm:$0xff]  ;;  %v12520_v2 = vld [vmem:[%s17794_s30 + $0x61] sm:$0xff] }
 0x155   : > { %v12522_v45 = vld [vmem:[%s17794_s30 + $0x79] sm:$0xff]  ;;  %v12591_v46 = vld [vmem:[%s23886_s3 + $0x70] sm:$0xff] }
 0x156   : > { %16065 = vmatprep.subr.bf16.mxu0 %v16064_v39  ;;  %v18638_v32 = vld [vmem:[%s17794_s30 + $0x158] sm:$0xff] }
 0x157   : > { %v18392_v29 = vpop.permute.xlu1 %987  ;;  %v18394_v38 = vpop.permute.xlu0 %982  ;;  %16067 = vmatpush3.bf16.msra.mxu0 %v16064_v39  ;;  %v12523_v39 = vld [vmem:[%s17794_s30 + $0x81] sm:$0xff] }
 0x158   : > { %23994 = vst [vmem:[#allocation84_spill] sm:$0xff] %v18392_v29  ;;  %23995 = vst [vmem:[#allocation85_spill] sm:$0xff] %v18394_v38  ;;  %2004 = vperm.xlu1 %17680, %v18051_v9   ;;  %1999 = vperm.xlu0 %17679, %v18054_v10   ;;  %v18410_v9 = vpack.c.bf16 %v12590_v30, %v12589_v40  ;;  %v17709_v10 = vmov 0.0  }
 0x159   : > { %442 = vst.msk [vmem:[#allocation3] sm:$0xff] %vm441_vm0, %v17709_v10  ;;  %445 = vst.msk [vmem:[#allocation3 + $0x10] sm:$0xff] %vm441_vm0, %v17709_v10  ;;  %4735 = vmatprep.mubr.f32.mxu1 %v17709_v10 }
 0x15a   : > { %444 = vst.msk [vmem:[#allocation3 + $0x8] sm:$0x3] %vm443_vm1, %v17709_v10  ;;  %446 = vst.msk [vmem:[#allocation3 + $0x18] sm:$0x3] %vm443_vm1, %v17709_v10  ;;  %16069 = vmatprep.subr.bf16.mxu0 %v18410_v9 }
 0x15b   : > { %v18406_v31 = vpop.permute.xlu1 %1466  ;;  %v18408_v38 = vpop.permute.xlu0 %1461  ;;  %447 = vst.msk [vmem:[#allocation3 + $0x20] sm:$0xff] %vm441_vm0, %v17709_v10  ;;  %449 = vst.msk [vmem:[#allocation3 + $0x30] sm:$0xff] %vm441_vm0, %v17709_v10  ;;  %16071 = vmatpush3.bf16.msra.mxu0 %v18410_v9 }
 0x15c   : > { %23996 = vst [vmem:[#allocation86_spill] sm:$0xff] %v18406_v31  ;;  %23997 = vst [vmem:[#allocation87_spill] sm:$0xff] %v18408_v38  ;;  %2483 = vperm.xlu1 %17680, %v12521_v1   ;;  %2478 = vperm.xlu0 %17679, %v12520_v2   ;;  %v12592_v1 = vld [vmem:[%s23886_s3 + $0x78] sm:$0xff] }
 0x15d   : > { %448 = vst.msk [vmem:[#allocation3 + $0x28] sm:$0x3] %vm443_vm1, %v17709_v10  ;;  %450 = vst.msk [vmem:[#allocation3 + $0x38] sm:$0x3] %vm443_vm1, %v17709_v10  ;;  %v16072_v30 = vpack.c.bf16 %v12592_v1, %v12591_v46  ;;  %v12525_v1 = vld [vmem:[%s17794_s30 + $0x99] sm:$0xff] }
 0x15e   : > { %451 = vst.msk [vmem:[#allocation3 + $0x40] sm:$0xff] %vm441_vm0, %v17709_v10  ;;  %453 = vst.msk [vmem:[#allocation3 + $0x50] sm:$0xff] %vm441_vm0, %v17709_v10 }
 0x15f   : > { %452 = vst.msk [vmem:[#allocation3 + $0x48] sm:$0x3] %vm443_vm1, %v17709_v10  ;;  %454 = vst.msk [vmem:[#allocation3 + $0x58] sm:$0x3] %vm443_vm1, %v17709_v10  ;;  %v18627_v2 = vpop.permute.xlu1 %1476  ;;  %v18629_v40 = vpop.permute.xlu0 %1471  ;;  %16073 = vmatprep.subr.bf16.mxu0 %v16072_v30 }
 0x160   : > { %455 = vst.msk [vmem:[#allocation3 + $0x60] sm:$0xff] %vm441_vm0, %v17709_v10  ;;  %457 = vst.msk [vmem:[#allocation3 + $0x70] sm:$0xff] %vm441_vm0, %v17709_v10  ;;  %2493 = vperm.xlu1 %17680, %v12523_v39   ;;  %2488 = vperm.xlu0 %17679, %v12522_v45  }
 0x161   : > { %456 = vst.msk [vmem:[#allocation3 + $0x68] sm:$0x3] %vm443_vm1, %v17709_v10  ;;  %458 = vst.msk [vmem:[#allocation3 + $0x78] sm:$0x3] %vm443_vm1, %v17709_v10  ;;  %16075 = vmatpush3.bf16.msra.mxu0 %v16072_v30  ;;  %v3165_v29 = vld [vmem:[#allocation3 + $0x1] sm:$0xff]  ;;  %v12524_v30 = vld [vmem:[%s17794_s30 + $0x91] sm:$0xff] }
 0x162   : > { %459 = vst.msk [vmem:[#allocation3 + $0x80] sm:$0xff] %vm441_vm0, %v17709_v10  ;;  %461 = vst.msk [vmem:[#allocation3 + $0x90] sm:$0xff] %vm441_vm0, %v17709_v10  ;;  %14852 = vmatprep.mubr.msk.f32.mxu0 %vm441_vm0, %v3165_v29 }
 0x163   : > { %460 = vst.msk [vmem:[#allocation3 + $0x88] sm:$0x3] %vm443_vm1, %v17709_v10  ;;  %462 = vst.msk [vmem:[#allocation3 + $0x98] sm:$0x3] %vm443_vm1, %v17709_v10  ;;  %v18633_v9 = vpop.permute.xlu0 %1949 }
 0x164   : > { %463 = vst [vmem:[#allocation5] sm:$0xff] %v17709_v10  ;;  %464 = vst [vmem:[#allocation5 + $0x8] sm:$0x3] %v17709_v10  ;;  %1526 = vperm.xlu1 %17680, %v18183_v12   ;;  %1521 = vperm.xlu0 %17679, %v18186_v5  }
 0x165   : > { %465 = vst [vmem:[#allocation5 + $0x10] sm:$0xff] %v17709_v10  ;;  %466 = vst [vmem:[#allocation5 + $0x18] sm:$0x3] %v17709_v10 }
 0x166   : > { %467 = vst [vmem:[#allocation5 + $0x20] sm:$0xff] %v17709_v10  ;;  %468 = vst [vmem:[#allocation5 + $0x28] sm:$0x3] %v17709_v10 }
 0x167   : > { %469 = vst [vmem:[#allocation5 + $0x30] sm:$0xff] %v17709_v10  ;;  %470 = vst [vmem:[#allocation5 + $0x38] sm:$0x3] %v17709_v10  ;;  %v18646_v45 = vpop.permute.xlu0 %1959 }
 0x168   : > { %471 = vst [vmem:[#allocation5 + $0x40] sm:$0xff] %v17709_v10  ;;  %472 = vst [vmem:[#allocation5 + $0x48] sm:$0x3] %v17709_v10  ;;  %1536 = vperm.xlu1 %17680, %v18638_v32   ;;  %1531 = vperm.xlu0 %17679, %v18641_v47  }
 0x169   : > { %473 = vst [vmem:[#allocation5 + $0x50] sm:$0xff] %v17709_v10  ;;  %474 = vst [vmem:[#allocation5 + $0x58] sm:$0x3] %v17709_v10 }
 0x16a   : > { %475 = vst [vmem:[#allocation6] sm:$0xff] %v17709_v10  ;;  %476 = vst [vmem:[#allocation6 + $0x8] sm:$0xff] %v17709_v10 }
 0x16b   : > { %477 = vst [vmem:[#allocation6 + $0x10] sm:$0x3] %v17709_v10  ;;  %478 = vst [vmem:[#allocation6 + $0x18] sm:$0x3] %v17709_v10  ;;  %v18652_v5 = vpop.permute.xlu0 %728 }
 0x16c   : > { %479 = vst [vmem:[#allocation6 + $0x20] sm:$0xff] %v17709_v10  ;;  %480 = vst [vmem:[#allocation6 + $0x28] sm:$0xff] %v17709_v10  ;;  %2014 = vperm.xlu1 %17680, %v18063_v6   ;;  %2009 = vperm.xlu0 %17679, %v18066_v7   ;;  %v12527_v6 = vld [vmem:[%s17794_s30 + $0xb1] sm:$0xff]  ;;  %v12526_v7 = vld [vmem:[%s17794_s30 + $0xa9] sm:$0xff] }
 0x16d   : > { %481 = vst [vmem:[#allocation6 + $0x30] sm:$0x3] %v17709_v10  ;;  %482 = vst [vmem:[#allocation6 + $0x38] sm:$0x3] %v17709_v10 }
 0x16e   : > { %483 = vst [vmem:[#allocation6 + $0x40] sm:$0xff] %v17709_v10  ;;  %484 = vst [vmem:[#allocation6 + $0x48] sm:$0xff] %v17709_v10 }
 0x16f   : > { %485 = vst [vmem:[#allocation6 + $0x50] sm:$0x3] %v17709_v10  ;;  %486 = vst [vmem:[#allocation6 + $0x58] sm:$0x3] %v17709_v10  ;;  %v18658_v29 = vpop.permute.xlu0 %738 }
 0x170   : > { %487 = vst [vmem:[#allocation6 + $0x60] sm:$0xff] %v17709_v10  ;;  %488 = vst [vmem:[#allocation6 + $0x68] sm:$0xff] %v17709_v10  ;;  %2024 = vperm.xlu1 %17680, %v18255_v61   ;;  %2019 = vperm.xlu0 %17679, %v18258_v62  }
 0x171   : > { %489 = vst [vmem:[#allocation6 + $0x70] sm:$0x3] %v17709_v10  ;;  %490 = vst [vmem:[#allocation6 + $0x78] sm:$0x3] %v17709_v10 }
 0x172   : > { %491 = vst [vmem:[#allocation6 + $0x80] sm:$0xff] %v17709_v10  ;;  %492 = vst [vmem:[#allocation6 + $0x88] sm:$0xff] %v17709_v10 }
 0x173   : > { %493 = vst [vmem:[#allocation6 + $0x90] sm:$0x3] %v17709_v10  ;;  %494 = vst [vmem:[#allocation6 + $0x98] sm:$0x3] %v17709_v10 }
 0x174   : > { %495 = vst [vmem:[#allocation6 + $0xa0] sm:$0xff] %v17709_v10  ;;  %496 = vst [vmem:[#allocation6 + $0xa8] sm:$0xff] %v17709_v10  ;;  %2503 = vperm.xlu1 %17680, %v12525_v1   ;;  %2498 = vperm.xlu0 %17679, %v12524_v30  }
 0x175   : > { %497 = vst [vmem:[#allocation6 + $0xb0] sm:$0x3] %v17709_v10  ;;  %498 = vst [vmem:[#allocation6 + $0xb8] sm:$0x3] %v17709_v10 }
 0x176   : > { %499 = vst [vmem:[#allocation7] sm:$0xff] %v17709_v10  ;;  %500 = vst [vmem:[#allocation7 + $0x8] sm:$0x3] %v17709_v10 }
 0x177   : > { %501 = vst [vmem:[#allocation7 + $0x10] sm:$0xff] %v17709_v10  ;;  %502 = vst [vmem:[#allocation7 + $0x18] sm:$0x3] %v17709_v10 }
 0x178   : > { %503 = vst [vmem:[#allocation7 + $0x20] sm:$0xff] %v17709_v10  ;;  %504 = vst [vmem:[#allocation7 + $0x28] sm:$0x3] %v17709_v10  ;;  %2513 = vperm.xlu1 %17680, %v12527_v6   ;;  %2508 = vperm.xlu0 %17679, %v12526_v7   ;;  %v12495_v6 = vld [vmem:[%s17794_s30 + $0xc8] sm:$0xff]  ;;  %v12494_v7 = vld [vmem:[%s17794_s30 + $0xc0] sm:$0xff] }
 0x179   : > { %505 = vst [vmem:[#allocation7 + $0x30] sm:$0xff] %v17709_v10  ;;  %506 = vst [vmem:[#allocation7 + $0x38] sm:$0x3] %v17709_v10 }
 0x17a   : > { %507 = vst [vmem:[#allocation7 + $0x40] sm:$0xff] %v17709_v10  ;;  %508 = vst [vmem:[#allocation7 + $0x48] sm:$0x3] %v17709_v10 }
 0x17b   : > { %509 = vst [vmem:[#allocation7 + $0x50] sm:$0xff] %v17709_v10  ;;  %510 = vst [vmem:[#allocation7 + $0x58] sm:$0x3] %v17709_v10 }
 0x17c   : > { %511 = vst [vmem:[#allocation7 + $0x60] sm:$0xff] %v17709_v10  ;;  %512 = vst [vmem:[#allocation7 + $0x68] sm:$0x3] %v17709_v10  ;;  %1770 = vperm.xlu1 %17680, %v18135_v25   ;;  %1765 = vperm.xlu0 %17679, %v18138_v8   ;;  %v12497_v8 = vld [vmem:[%s17794_s30 + $0xe0] sm:$0xff]  ;;  %v12496_v25 = vld [vmem:[%s17794_s30 + $0xd8] sm:$0xff] }
 0x17d   : > { %513 = vst [vmem:[#allocation7 + $0x70] sm:$0xff] %v17709_v10  ;;  %514 = vst [vmem:[#allocation7 + $0x78] sm:$0x3] %v17709_v10 }
 0x17e   : > { %515 = vst [vmem:[#allocation7 + $0x80] sm:$0xff] %v17709_v10  ;;  %516 = vst [vmem:[#allocation7 + $0x88] sm:$0x3] %v17709_v10 }
 0x17f   : > { %517 = vst [vmem:[#allocation7 + $0x90] sm:$0xff] %v17709_v10  ;;  %518 = vst [vmem:[#allocation7 + $0x98] sm:$0x3] %v17709_v10 }
 0x180   : > { %519 = vst.msk [vmem:[#allocation8] sm:$0xff] %vm441_vm0, %v17709_v10  ;;  %520 = vst.msk [vmem:[#allocation8 + $0x8] sm:$0xff] %vm441_vm0, %v17709_v10  ;;  %1780 = vperm.xlu1 %17680, %v18195_v13   ;;  %1775 = vperm.xlu0 %17679, %v18198_v16   ;;  %v12555_v13 = vld [vmem:[%s17794_s30 + $0x6a] sm:$0xff]  ;;  %v12554_v16 = vld [vmem:[%s17794_s30 + $0x62] sm:$0xff] }
 0x181   : > { %521 = vst.msk [vmem:[#allocation8 + $0x10] sm:$0x3] %vm443_vm1, %v17709_v10  ;;  %524 = vst.msk [vmem:[#allocation8 + $0x28] sm:$0x3] %vm443_vm1, %v17709_v10 }
 0x182   : > { %522 = vst.msk [vmem:[#allocation8 + $0x18] sm:$0xff] %vm441_vm0, %v17709_v10  ;;  %523 = vst.msk [vmem:[#allocation8 + $0x20] sm:$0xff] %vm441_vm0, %v17709_v10 }
 0x183   : > { %525 = vst.msk [vmem:[#allocation8 + $0x30] sm:$0xff] %vm441_vm0, %v17709_v10  ;;  %526 = vst.msk [vmem:[#allocation8 + $0x38] sm:$0xff] %vm441_vm0, %v17709_v10 }
 0x184   : > { %527 = vst.msk [vmem:[#allocation8 + $0x40] sm:$0x3] %vm443_vm1, %v17709_v10  ;;  %530 = vst.msk [vmem:[#allocation8 + $0x58] sm:$0x3] %vm443_vm1, %v17709_v10  ;;  %2259 = vperm.xlu1 %17680, %v12495_v6   ;;  %2254 = vperm.xlu0 %17679, %v12494_v7   ;;  %v12557_v6 = vld [vmem:[%s17794_s30 + $0x82] sm:$0xff]  ;;  %v12556_v7 = vld [vmem:[%s17794_s30 + $0x7a] sm:$0xff] }
 0x185   : > { %528 = vst.msk [vmem:[#allocation8 + $0x48] sm:$0xff] %vm441_vm0, %v17709_v10  ;;  %529 = vst.msk [vmem:[#allocation8 + $0x50] sm:$0xff] %vm441_vm0, %v17709_v10 }
 0x186   : > { %531 = vst.msk [vmem:[#allocation8 + $0x60] sm:$0xff] %vm441_vm0, %v17709_v10  ;;  %532 = vst.msk [vmem:[#allocation8 + $0x68] sm:$0xff] %vm441_vm0, %v17709_v10 }
 0x187   : > { %533 = vst.msk [vmem:[#allocation8 + $0x70] sm:$0x3] %vm443_vm1, %v17709_v10  ;;  %536 = vst.msk [vmem:[#allocation8 + $0x88] sm:$0x3] %vm443_vm1, %v17709_v10 }
 0x188   : > { %534 = vst.msk [vmem:[#allocation8 + $0x78] sm:$0xff] %vm441_vm0, %v17709_v10  ;;  %535 = vst.msk [vmem:[#allocation8 + $0x80] sm:$0xff] %vm441_vm0, %v17709_v10  ;;  %2269 = vperm.xlu1 %17680, %v12497_v8   ;;  %2264 = vperm.xlu0 %17679, %v12496_v25  }
 0x189   : > { %537 = vst.msk [vmem:[#allocation8 + $0x90] sm:$0xff] %vm441_vm0, %v17709_v10  ;;  %538 = vst.msk [vmem:[#allocation8 + $0x98] sm:$0xff] %vm441_vm0, %v17709_v10 }
 0x18a   : > { %539 = vst.msk [vmem:[#allocation8 + $0xa0] sm:$0x3] %vm443_vm1, %v17709_v10  ;;  %542 = vst.msk [vmem:[#allocation8 + $0xb8] sm:$0x3] %vm443_vm1, %v17709_v10 }
 0x18b   : > { %540 = vst.msk [vmem:[#allocation8 + $0xa8] sm:$0xff] %vm441_vm0, %v17709_v10  ;;  %541 = vst.msk [vmem:[#allocation8 + $0xb0] sm:$0xff] %vm441_vm0, %v17709_v10 }
 0x18c   : > { %543 = vst.msk [vmem:[#allocation8 + $0xc0] sm:$0xff] %vm441_vm0, %v17709_v10  ;;  %544 = vst.msk [vmem:[#allocation8 + $0xc8] sm:$0xff] %vm441_vm0, %v17709_v10  ;;  %2747 = vperm.xlu1 %17680, %v12555_v13   ;;  %2742 = vperm.xlu0 %17679, %v12554_v16   ;;  %v18717_v13 = vld [vmem:[%s17794_s30 + $0x159] sm:$0xff]  ;;  %v18720_v16 = vld [vmem:[%s17794_s30 + $0x151] sm:$0xff] }
 0x18d   : > { %545 = vst.msk [vmem:[#allocation8 + $0xd0] sm:$0x3] %vm443_vm1, %v17709_v10  ;;  %548 = vst.msk [vmem:[#allocation8 + $0xe8] sm:$0x3] %vm443_vm1, %v17709_v10 }
 0x18e   : > { %546 = vst.msk [vmem:[#allocation8 + $0xd8] sm:$0xff] %vm441_vm0, %v17709_v10  ;;  %547 = vst.msk [vmem:[#allocation8 + $0xe0] sm:$0xff] %vm441_vm0, %v17709_v10 }
 0x18f   : > { %549 = vst.msk [vmem:[#allocation8 + $0xf0] sm:$0xff] %vm441_vm0, %v17709_v10  ;;  %550 = vst.msk [vmem:[#allocation8 + $0xf8] sm:$0xff] %vm441_vm0, %v17709_v10 }
 0x190   : > { %551 = vst.msk [vmem:[#allocation8 + $0x100] sm:$0x3] %vm443_vm1, %v17709_v10  ;;  %554 = vst.msk [vmem:[#allocation8 + $0x118] sm:$0x3] %vm443_vm1, %v17709_v10  ;;  %2757 = vperm.xlu1 %17680, %v12557_v6   ;;  %2752 = vperm.xlu0 %17679, %v12556_v7  }
 0x191   : > { %552 = vst.msk [vmem:[#allocation8 + $0x108] sm:$0xff] %vm441_vm0, %v17709_v10  ;;  %553 = vst.msk [vmem:[#allocation8 + $0x110] sm:$0xff] %vm441_vm0, %v17709_v10 }
 0x192   : > { %555 = vst.msk [vmem:[#allocation8 + $0x120] sm:$0xff] %vm441_vm0, %v17709_v10  ;;  %556 = vst.msk [vmem:[#allocation8 + $0x128] sm:$0xff] %vm441_vm0, %v17709_v10 }
 0x193   : > { %557 = vst.msk [vmem:[#allocation8 + $0x130] sm:$0x3] %vm443_vm1, %v17709_v10  ;;  %560 = vst.msk [vmem:[#allocation8 + $0x148] sm:$0x3] %vm443_vm1, %v17709_v10 }
 0x194   : > { %558 = vst.msk [vmem:[#allocation8 + $0x138] sm:$0xff] %vm441_vm0, %v17709_v10  ;;  %559 = vst.msk [vmem:[#allocation8 + $0x140] sm:$0xff] %vm441_vm0, %v17709_v10  ;;  %1790 = vperm.xlu1 %17680, %v18207_v53   ;;  %1785 = vperm.xlu0 %17679, %v18210_v33  }
 0x195   : > { %561 = vst.msk [vmem:[#allocation8 + $0x150] sm:$0xff] %vm441_vm0, %v17709_v10  ;;  %562 = vst.msk [vmem:[#allocation8 + $0x158] sm:$0xff] %vm441_vm0, %v17709_v10 }
 0x196   : > { %563 = vst.msk [vmem:[#allocation8 + $0x160] sm:$0x3] %vm443_vm1, %v17709_v10  ;;  %566 = vst.msk [vmem:[#allocation8 + $0x178] sm:$0x3] %vm443_vm1, %v17709_v10 }
 0x197   : > { %564 = vst.msk [vmem:[#allocation8 + $0x168] sm:$0xff] %vm441_vm0, %v17709_v10  ;;  %565 = vst.msk [vmem:[#allocation8 + $0x170] sm:$0xff] %vm441_vm0, %v17709_v10 }
 0x198   : > { %567 = vst.msk [vmem:[#allocation8 + $0x180] sm:$0xff] %vm441_vm0, %v17709_v10  ;;  %568 = vst.msk [vmem:[#allocation8 + $0x188] sm:$0xff] %vm441_vm0, %v17709_v10  ;;  %1800 = vperm.xlu1 %17680, %v18717_v13   ;;  %1795 = vperm.xlu0 %17679, %v18720_v16  }
 0x199   : > { %569 = vst.msk [vmem:[#allocation8 + $0x190] sm:$0x3] %vm443_vm1, %v17709_v10  ;;  %572 = vst.msk [vmem:[#allocation8 + $0x1a8] sm:$0x3] %vm443_vm1, %v17709_v10 }
 0x19a   : > { %570 = vst.msk [vmem:[#allocation8 + $0x198] sm:$0xff] %vm441_vm0, %v17709_v10  ;;  %571 = vst.msk [vmem:[#allocation8 + $0x1a0] sm:$0xff] %vm441_vm0, %v17709_v10  ;;  %v18631_v10 = vpop.permute.xlu1 %1954 }
 0x19b   : > { %23998 = vst [vmem:[#allocation88_spill] sm:$0xff] %v18627_v2  ;;  %23999 = vst [vmem:[#allocation89_spill] sm:$0xff] %v18629_v40  ;;  %v18666_v40 = vpop.permute.xlu0 %992 }
 0x19c   : > { %24001 = vst [vmem:[#allocation91_spill] sm:$0xff] %v18652_v5  ;;  %24003 = vst [vmem:[#allocation93_spill] sm:$0xff] %v18658_v29  ;;  %2279 = vperm.xlu1 %17680, %v18099_v41   ;;  %2274 = vperm.xlu0 %17679, %v18102_v42   ;;  %v12561_v41 = vld [vmem:[%s17794_s30 + $0xb2] sm:$0xff]  ;;  %v12560_v42 = vld [vmem:[%s17794_s30 + $0xaa] sm:$0xff] }
 0x19d   : > { %24005 = vst [vmem:[#allocation95_spill] sm:$0xff] %v18666_v40 }
 0x19e   : > { %v18644_v39 = vpop.permute.xlu1 %1964 }
 0x19f   : > { %v18672_v24 = vpop.permute.xlu0 %1002 }
 0x1a0   : > { %24007 = vst [vmem:[#allocation97_spill] sm:$0xff] %v18672_v24  ;;  %2289 = vperm.xlu1 %17680, %v18111_v14   ;;  %2284 = vperm.xlu0 %17679, %v18114_v28  }
 0x1a2   : > { %v18650_v12 = vpop.permute.xlu1 %733 }
 0x1a3   : > { %24000 = vst [vmem:[#allocation90_spill] sm:$0xff] %v18650_v12  ;;  %v18676_v62 = vpop.permute.xlu0 %1481  ;;  %v24031_v12 = vld [vmem:[#allocation11_spill] sm:$0xff] }
 0x1a4   : > { %24009 = vst [vmem:[#allocation99_spill] sm:$0xff] %v18676_v62 }
 0x1a6   : > { %v18656_v46 = vpop.permute.xlu1 %743 }
 0x1a7   : > { %24002 = vst [vmem:[#allocation92_spill] sm:$0xff] %v18656_v46  ;;  %v18682_v30 = vpop.permute.xlu0 %1491 }
 0x1a8   : > { %24011 = vst [vmem:[#allocation101_spill] sm:$0xff] %v18682_v30 }
 0x1aa   : > { %v18664_v19 = vpop.permute.xlu1 %997 }
 0x1ab   : > { %24004 = vst [vmem:[#allocation94_spill] sm:$0xff] %v18664_v19  ;;  %v18690_v62 = vpop.permute.xlu0 %1969  ;;  %v24032_v19 = vld [vmem:[#allocation29_spill] sm:$0xff] }
 0x1ac   : > { %24013 = vst [vmem:[#allocation103_spill] sm:$0xff] %v18690_v62  ;;  %v24036_v62 = vld [vmem:[#allocation30_spill] sm:$0xff] }
 0x1ae   : > { %v18670_v2 = vpop.permute.xlu1 %1007 }
 0x1af   : > { %24006 = vst [vmem:[#allocation96_spill] sm:$0xff] %v18670_v2  ;;  %v18696_v30 = vpop.permute.xlu0 %1979 }
 0x1b0   : > { %24015 = vst [vmem:[#allocation105_spill] sm:$0xff] %v18696_v30 }
 0x1b2   : > { %v18674_v61 = vpop.permute.xlu1 %1486 }
 0x1b3   : > { %24008 = vst [vmem:[#allocation98_spill] sm:$0xff] %v18674_v61  ;;  %v18702_v31 = vpop.permute.xlu0 %2458 }
 0x1b6   : > { %v18680_v1 = vpop.permute.xlu1 %1496 }
 0x1b7   : > { %24010 = vst [vmem:[#allocation100_spill] sm:$0xff] %v18680_v1  ;;  %v18708_v46 = vpop.permute.xlu0 %2468 }
 0x1ba   : > { %v18688_v38 = vpop.permute.xlu1 %1974 }
 0x1bb   : > { %24012 = vst [vmem:[#allocation102_spill] sm:$0xff] %v18688_v38  ;;  %v18712_v25 = vpop.permute.xlu0 %1236 }
 0x1bc   : > { %24017 = vst [vmem:[#allocation107_spill] sm:$0xff] %v18712_v25 }
 0x1be   : > { %v18694_v1 = vpop.permute.xlu1 %1984 }
 0x1bf   : > { %24014 = vst [vmem:[#allocation104_spill] sm:$0xff] %v18694_v1  ;;  %v18724_v2 = vpop.permute.xlu0 %1246 }
 0x1c0   : > { %24019 = vst [vmem:[#allocation109_spill] sm:$0xff] %v18724_v2  ;;  %v12559_v2 = vld [vmem:[%s17794_s30 + $0x9a] sm:$0xff] }
 0x1c1   : > { %2767 = vperm.xlu1 %17680, %v12559_v2  }
 0x1c2   : > { %v18700_v61 = vpop.permute.xlu1 %2463 }
 0x1c3   : > { %v18730_v53 = vpop.permute.xlu0 %1725 }
 0x1c4   : > { %24021 = vst [vmem:[#allocation111_spill] sm:$0xff] %v18730_v53 }
 0x1c5   : > { %2777 = vperm.xlu1 %17680, %v12561_v41   ;;  %v12529_v41 = vld [vmem:[%s17794_s30 + $0xc9] sm:$0xff] }
 0x1c6   : > { %v18706_v29 = vpop.permute.xlu1 %2473 }
 0x1c7   : > { %v18736_v7 = vpop.permute.xlu0 %1735 }
 0x1c8   : > { %24023 = vst [vmem:[#allocation113_spill] sm:$0xff] %v18736_v7  ;;  %v18765_v7 = vld [vmem:[%s23884_s1 + $0x1] ss:$0 sm:$0xff] }
 0x1c9   : > { %2034 = vperm.xlu1 %17680, %v18267_v17   ;;  %v18774_v17 = vld [vmem:[%s23884_s1 + $0x2] ss:$0 sm:$0xff]  ;;  %v1038_v5 = vmul.f32 %v18765_v7, %v18010_v60 }
 0x1ca   : > { %v18710_v8 = vpop.permute.xlu1 %1241  ;;  %v1303_v40 = vmul.f32 %v18774_v17, %v24031_v12 }
 0x1cb   : > { %24016 = vst [vmem:[#allocation106_spill] sm:$0xff] %v18710_v8  ;;  %v18744_v8 = vpop.permute.xlu0 %2214 }
 0x1cd   : > { %2044 = vperm.xlu1 %17680, %v18303_v49  }
 0x1ce   : > { %v18722_v24 = vpop.permute.xlu1 %1251 }
 0x1cf   : > { %24018 = vst [vmem:[#allocation108_spill] sm:$0xff] %v18722_v24  ;;  %v12558_v24 = vld [vmem:[%s17794_s30 + $0x92] sm:$0xff] }
 0x1d0   : > { %2762 = vperm.xlu0 %17679, %v12558_v24  }
 0x1d1   : > { %2523 = vperm.xlu1 %17680, %v12529_v41   ;;  %v1300_v41 = vmul.f32 %v18774_v17, %v18022_v0  ;;  %v24035_v0 = vld [vmem:[#allocation9_spill] sm:$0xff] }
 0x1d2   : > { %v18728_v6 = vpop.permute.xlu1 %1730 }
 0x1d3   : > { %24020 = vst [vmem:[#allocation110_spill] sm:$0xff] %v18728_v6  ;;  %v1037_v6 = vmul.f32 %v18765_v7, %v18002_v57  ;;  %v1039_v57 = vmul.f32 %v18765_v7, %v18008_v59  ;;  %v24030_v59 = vld [vmem:[#allocation10_spill] sm:$0xff] }
 0x1d4   : > { %2772 = vperm.xlu0 %17679, %v12560_v42   ;;  %v12528_v42 = vld [vmem:[%s17794_s30 + $0xc1] sm:$0xff] }
 0x1d6   : > { %v18734_v33 = vpop.permute.xlu1 %1740 }
 0x1d7   : > { %24022 = vst [vmem:[#allocation112_spill] sm:$0xff] %v18734_v33  ;;  %v18750_v33 = vpop.permute.xlu0 %2224 }
 0x1d8   : > { %2029 = vperm.xlu0 %17679, %v18270_v18   ;;  %v18779_v18 = vld [vmem:[%s23884_s1] ss:$0 sm:$0xff] }
 0x1d9   : > { %v774_v1 = vmul.f32 %v18779_v18, %v24035_v0 }
 0x1da   : > { %v18742_v25 = vpop.permute.xlu1 %2219 }
 0x1db   : > { %v18754_v28 = vpop.permute.xlu0 %1256  ;;  %v1070_v0 = vadd.f32 %v1038_v5, %v774_v1 }
 0x1dc   : > { %24025 = vst [vmem:[#allocation115_spill] sm:$0xff] %v18754_v28  ;;  %2039 = vperm.xlu0 %17679, %v18306_v50   ;;  %v1036_v50 = vmul.f32 %v18765_v7, %v18004_v58  ;;  %v773_v28 = vmul.f32 %v18779_v18, %v17998_v56  ;;  %v772_v58 = vmul.f32 %v18779_v18, %v17992_v54  ;;  %v18811_v56 = vld [vmem:[%s23884_s1 + $0x4] ss:$0 sm:$0xff] }
 0x1dd   : > { %v1829_v23 = vmul.f32 %v18811_v56, %v24040_v43 }
 0x1de   : > { %v18748_v53 = vpop.permute.xlu1 %2229  ;;  %v1068_v51 = vadd.f32 %v1036_v50, %v772_v58  ;;  %v24039_v58 = vld [vmem:[#allocation31_spill] sm:$0xff] }
 0x1df   : > { %v18760_v24 = vpop.permute.xlu0 %1266 }
 0x1e0   : > { %24027 = vst [vmem:[#allocation117_spill] sm:$0xff] %v18760_v24  ;;  %2518 = vperm.xlu0 %17679, %v12528_v42   ;;  %v775_v42 = vmul.f32 %v18779_v18, %v24030_v59  ;;  %v1332_v50 = vadd.f32 %v1300_v41, %v1068_v51  ;;  %v24042_v41 = vld [vmem:[#allocation43_spill] sm:$0xff] }
 0x1e2   : > { %v18752_v14 = vpop.permute.xlu1 %1261  ;;  %v1071_v12 = vadd.f32 %v1039_v57, %v775_v42  ;;  %v24041_v57 = vld [vmem:[#allocation32_spill] sm:$0xff] }
 0x1e3   : > { %24024 = vst [vmem:[#allocation114_spill] sm:$0xff] %v18752_v14  ;;  %v18785_v24 = vpop.permute.xlu0 %1745  ;;  %v12530_v14 = vld [vmem:[%s17794_s30 + $0xd9] sm:$0xff] }
 0x1e4   : > { %24029 = vst [vmem:[#allocation119_spill] sm:$0xff] %v18785_v24  ;;  %v12531_v24 = vld [vmem:[%s17794_s30 + $0xe1] sm:$0xff]  ;;  %2528 = vperm.xlu0 %17679, %v12530_v14  }
 0x1e5   : > { %2533 = vperm.xlu1 %17680, %v12531_v24   ;;  %v18843_v14 = vld [vmem:[%s23884_s1 + $0x6] ss:$0 sm:$0xff]  ;;  %v1335_v24 = vadd.f32 %v1303_v40, %v1071_v12  ;;  %v24043_v12 = vld [vmem:[#allocation44_spill] sm:$0xff] }
 0x1e6   : > { %v18758_v2 = vpop.permute.xlu1 %1271 }
 0x1e7   : > { %24026 = vst [vmem:[#allocation116_spill] sm:$0xff] %v18758_v2  ;;  %v18792_v2 = vld [vmem:[%s23884_s1 + $0x3] ss:$0 sm:$0xff]  ;;  %v18821_v60 = vpop.permute.xlu0 %1755 }
 0x1e8   : > { %v1566_v54 = vmul.f32 %v18792_v2, %v24032_v19  ;;  %24034 = vst [vmem:[#allocation11_spill] sm:$0xff] %v18821_v60  ;;  %v1565_v38 = vmul.f32 %v18792_v2, %v24036_v62  ;;  %v24038_v60 = vld [vmem:[#allocation41_spill] sm:$0xff]  ;;  %v1568_v62 = vmul.f32 %v18792_v2, %v24039_v58  ;;  %v1567_v42 = vmul.f32 %v18792_v2, %v24041_v57 }
 0x1e9   : > { %2054 = vperm.xlu1 %17680, %v18315_v21   ;;  %2049 = vperm.xlu0 %17679, %v18318_v22   ;;  %v2358_v21 = vmul.f32 %v18843_v14, %v18352_v27 }
 0x1ea   : > { %v18783_v49 = vpop.permute.xlu1 %1750  ;;  %v1597_v43 = vadd.f32 %v1565_v38, %v1332_v50  ;;  %v1831_v38 = vmul.f32 %v18811_v56, %v24043_v12  ;;  %v1600_v50 = vadd.f32 %v1568_v62, %v1335_v24 }
 0x1eb   : > { %24028 = vst [vmem:[#allocation118_spill] sm:$0xff] %v18783_v49  ;;  %v1301_v49 = vmul.f32 %v18774_v17, %v18020_v63  ;;  %v1069_v63 = vadd.f32 %v1037_v6, %v773_v28  ;;  %v18830_v6 = vld [vmem:[%s23884_s1 + $0x5] ss:$0 sm:$0xff]  ;;  %v24037_v28 = vld [vmem:[#allocation12_spill] sm:$0xff]  ;;  %v18851_v1 = vpop.permute.xlu0 %2234 }
 0x1ec   : > { %v1302_v59 = vmul.f32 %v18774_v17, %v24037_v28  ;;  %v2094_v51 = vmul.f32 %v18830_v6, %v18278_v20  ;;  %v2093_v40 = vmul.f32 %v18830_v6, %v18280_v34  ;;  %v18869_v28 = vld [vmem:[%s17794_s30 + $0x15a] sm:$0xff]  ;;  %v18872_v34 = vld [vmem:[%s17794_s30 + $0x152] sm:$0xff]  ;;  %v1861_v58 = vadd.f32 %v1829_v23, %v1597_v43 }
 0x1ed   : > { %v1333_v19 = vadd.f32 %v1301_v49, %v1069_v63  ;;  %v1832_v63 = vmul.f32 %v18811_v56, %v24042_v41  ;;  %v2096_v57 = vmul.f32 %v18830_v6, %v18284_v35  ;;  %2064 = vperm.xlu1 %17680, %v18869_v28   ;;  %2059 = vperm.xlu0 %17679, %v18872_v34   ;;  %v12532_v43 = vld [vmem:[%s17794_s30 + $0xf1] sm:$0xff] }
 0x1ee   : > { %v18819_v30 = vpop.permute.xlu1 %1760  ;;  %v1334_v20 = vadd.f32 %v1302_v59, %v1070_v0  ;;  %v2095_v59 = vmul.f32 %v18830_v6, %v18286_v11  ;;  %v2125_v24 = vadd.f32 %v2093_v40, %v1861_v58  ;;  %v2361_v11 = vmul.f32 %v18843_v14, %v18356_v26 }
 0x1ef   : > { %24033 = vst [vmem:[#allocation10_spill] sm:$0xff] %v18819_v30  ;;  %v1830_v30 = vmul.f32 %v18811_v56, %v24038_v60  ;;  %v1598_v49 = vadd.f32 %v1566_v54, %v1333_v19  ;;  %v18860_v54 = vld [vmem:[%s23884_s1 + $0x7] ss:$0 sm:$0xff]  ;;  %v2359_v19 = vmul.f32 %v18843_v14, %v18350_v52  ;;  %v18884_v62 = vpop.permute.xlu0 %2244  ;;  %v1864_v23 = vadd.f32 %v1832_v63, %v1600_v50 }
 0x1f0   : > { %v1599_v22 = vadd.f32 %v1567_v42, %v1334_v20  ;;  %v2623_v52 = vmul.f32 %v18860_v54, %v18700_v61  ;;  %24044 = vst [vmem:[#allocation29_spill] sm:$0xff] %v18884_v62  ;;  %v2622_v35 = vmul.f32 %v18860_v54, %v18702_v31  ;;  %v2360_v61 = vmul.f32 %v18843_v14, %v18358_v37  ;;  %v18897_v42 = vld [vmem:[%s23884_s1 + $0x8] ss:$0 sm:$0xff] }
 0x1f1   : > { %v1862_v60 = vadd.f32 %v1830_v30, %v1598_v49  ;;  %v2128_v31 = vadd.f32 %v2096_v57, %v1864_v23  ;;  %v2390_v41 = vadd.f32 %v2358_v21, %v2125_v24  ;;  %v2625_v20 = vmul.f32 %v18860_v54, %v18706_v29  ;;  %2538 = vperm.xlu0 %17679, %v12532_v43   ;;  %v18910_v57 = vld [vmem:[%s23885_s2] ss:$0 sm:$0xff]  ;;  %v12535_v29 = vld [vmem:[%s17794_s30 + $0x111] sm:$0xff]  ;;  %v24078_v62 = vld [vmem:[#allocation36_spill] sm:$0xff] }
 0x1f2   : > { %v18849_v5 = vpop.permute.xlu1 %2239  ;;  %v1863_v27 = vadd.f32 %v1831_v38, %v1599_v22  ;;  %v2624_v26 = vmul.f32 %v18860_v54, %v18708_v46  ;;  %v12534_v22 = vld [vmem:[%s17794_s30 + $0x109] sm:$0xff] }
 0x1f3   : > { %v2126_v30 = vadd.f32 %v2094_v51, %v1862_v60  ;;  %v12533_v51 = vld [vmem:[%s17794_s30 + $0xf9] sm:$0xff]  ;;  %v2723_v60 = vpop.permute.xlu0 %2722  ;;  %v2654_v12 = vadd.f32 %v2622_v35, %v2390_v41  ;;  %v2393_v50 = vadd.f32 %v2361_v11, %v2128_v31  ;;  %v12503_v11 = vld [vmem:[%s17794_s30 + $0x128] sm:$0xff] }
 0x1f4   : > { %v2127_v63 = vadd.f32 %v2095_v59, %v1863_v27  ;;  %2543 = vperm.xlu1 %17680, %v12533_v51   ;;  %v12502_v41 = vld [vmem:[%s17794_s30 + $0x120] sm:$0xff] }
 0x1f5   : > { %v2391_v49 = vadd.f32 %v2359_v19, %v2126_v30  ;;  %v2886_v19 = vmul.f32 %v18897_v42, %v2723_v60  ;;  %v2657_v30 = vadd.f32 %v2625_v20, %v2393_v50  ;;  %2548 = vperm.xlu0 %17679, %v12534_v22  }
 0x1f6   : > { %v18882_v0 = vpop.permute.xlu1 %2249  ;;  %v2392_v58 = vadd.f32 %v2360_v61, %v2127_v63 }
 0x1f7   : > { %v2655_v40 = vadd.f32 %v2623_v52, %v2391_v49  ;;  %v2918_v46 = vadd.f32 %v2886_v19, %v2654_v12  ;;  %v2733_v23 = vpop.permute.xlu0 %2732 }
 0x1f8   : > { %v2656_v59 = vadd.f32 %v2624_v26, %v2392_v58  ;;  %v2888_v49 = vmul.f32 %v18897_v42, %v2733_v23  ;;  %2553 = vperm.xlu1 %17680, %v12535_v29   ;;  %v12563_v58 = vld [vmem:[%s17794_s30 + $0xca] sm:$0xff]  ;;  %v12562_v29 = vld [vmem:[%s17794_s30 + $0xc2] sm:$0xff] }
 0x1f9   : > { %v2957_v35 = vadd.f32 %v18910_v57, %v2918_v46  ;;  %2294 = vperm.xlu0 %17679, %v12502_v41   ;;  %v18959_v41 = vld [vmem:[%s17794_s30 + $0x168] sm:$0xff] }
 0x1fa   : > { %v2728_v37 = vpop.permute.xlu1 %2727  ;;  %v2920_v31 = vadd.f32 %v2888_v49, %v2656_v59  ;;  %v12565_v59 = vld [vmem:[%s17794_s30 + $0xe2] sm:$0xff] }
 0x1fb   : > { %v2887_v38 = vmul.f32 %v18897_v42, %v2728_v37  ;;  %v2989_v51 = vmax.f32 %v2957_v35, 0.0  ;;  %v12505_v37 = vld [vmem:[%s17794_s30 + $0x140] sm:$0xff] }
 0x1fc   : > { %v2959_v26 = vadd.f32 %v18910_v57, %v2920_v31  ;;  %2299 = vperm.xlu1 %17680, %v12503_v11   ;;  %v18956_v31 = vld [vmem:[%s17794_s30 + $0x170] sm:$0xff] }
 0x1fd   : > { %v2919_v21 = vadd.f32 %v2887_v38, %v2655_v40  ;;  %v18922_v40 = vpop.permute.xlu0 %1501  ;;  %3021 = vst.msk [vmem:[#allocation2] sm:$0xff] %vm441_vm0, %v2989_v51  ;;  %v12504_v38 = vld [vmem:[%s17794_s30 + $0x138] sm:$0xff] }
 0x1fe   : > { %v2738_v52 = vpop.permute.xlu1 %2737  ;;  %24046 = vst [vmem:[#allocation30_spill] sm:$0xff] %v18922_v40  ;;  %v2991_v12 = vmax.f32 %v2959_v26, 0.0  ;;  %2304 = vperm.xlu0 %17679, %v12504_v38   ;;  %v12569_v38 = vld [vmem:[%s17794_s30 + $0x112] sm:$0xff] }
 0x1ff   : > { %v2958_v24 = vadd.f32 %v18910_v57, %v2919_v21  ;;  %v2889_v27 = vmul.f32 %v18897_v42, %v2738_v52  ;;  %v12564_v52 = vld [vmem:[%s17794_s30 + $0xda] sm:$0xff] }
 0x200   : > { %3023 = vst.msk [vmem:[#allocation2 + $0x10] sm:$0xff] %vm441_vm0, %v2991_v12  ;;  %2309 = vperm.xlu1 %17680, %v12505_v37   ;;  %v12566_v37 = vld [vmem:[%s17794_s30 + $0xf2] sm:$0xff] }
 0x201   : > { %v2990_v61 = vmax.f32 %v2958_v24, 0.0  ;;  %v2921_v43 = vadd.f32 %v2889_v27, %v2657_v30  ;;  %v18932_v50 = vpop.permute.xlu0 %1511 }
 0x202   : > { %v18920_v63 = vpop.permute.xlu1 %1506  ;;  %24048 = vst [vmem:[#allocation41_spill] sm:$0xff] %v18932_v50  ;;  %2782 = vperm.xlu0 %17679, %v12562_v29  }
 0x203   : > { %24045 = vst [vmem:[#allocation9_spill] sm:$0xff] %v18920_v63  ;;  %3022 = vst.msk [vmem:[#allocation2 + $0x8] sm:$0xff] %vm441_vm0, %v2990_v61  ;;  %v2960_v20 = vadd.f32 %v18910_v57, %v2921_v43  ;;  %v24066_v63 = vld [vmem:[#allocation18_spill] sm:$0xff] }
 0x204   : > { %2787 = vperm.xlu1 %17680, %v12563_v58   ;;  %v12568_v58 = vld [vmem:[%s17794_s30 + $0x10a] sm:$0xff] }
 0x205   : > { %v2992_v60 = vmax.f32 %v2960_v20, 0.0  ;;  %v18940_v46 = vpop.permute.xlu0 %1989 }
 0x206   : > { %v18930_v19 = vpop.permute.xlu1 %1516  ;;  %24050 = vst [vmem:[#allocation42_spill] sm:$0xff] %v18940_v46  ;;  %2792 = vperm.xlu0 %17679, %v12564_v52   ;;  %v24069_v46 = vld [vmem:[#allocation33_spill] sm:$0xff] }
 0x207   : > { %24047 = vst [vmem:[#allocation12_spill] sm:$0xff] %v18930_v19  ;;  %3024 = vst.msk [vmem:[#allocation2 + $0x18] sm:$0xff] %vm441_vm0, %v2992_v60  ;;  %v24065_v19 = vld [vmem:[#allocation17_spill] sm:$0xff] }
 0x208   : > { %2797 = vperm.xlu1 %17680, %v12565_v59   ;;  %v12536_v59 = vld [vmem:[%s17794_s30 + $0x121] sm:$0xff]  ;;  %v1041_v40 = vmul.f32 %v18765_v7, %v24065_v19 }
 0x209   : > { %v18946_v27 = vpop.permute.xlu0 %1999  ;;  %v24071_v19 = vld [vmem:[#allocation19_spill] sm:$0xff] }
 0x20a   : > { %v18938_v21 = vpop.permute.xlu1 %1994  ;;  %v3053_v22 = vld [vmem:[#allocation2] ss:$2 sm:$0xff]  ;;  %v3085_v30 = vld [vmem:[#allocation2 + $0x1] ss:$2 sm:$0xff]  ;;  %24052 = vst [vmem:[#allocation43_spill] sm:$0xff] %v18946_v27  ;;  %2314 = vperm.xlu0 %17679, %v18641_v47   ;;  %v24068_v27 = vld [vmem:[#allocation14_spill] sm:$0xff] }
 0x20b   : > { %24049 = vst [vmem:[#allocation31_spill] sm:$0xff] %v18938_v21  ;;  %v3116_v49 = vmax.f32 %v3053_v22, %v3085_v30  ;;  %v12537_v30 = vld [vmem:[%s17794_s30 + $0x129] sm:$0xff]  ;;  %v24070_v21 = vld [vmem:[#allocation34_spill] sm:$0xff] }
 0x20c   : > { %2319 = vperm.xlu1 %17680, %v18638_v32   ;;  %v12567_v32 = vld [vmem:[%s17794_s30 + $0xfa] sm:$0xff] }
 0x20d   : > { %v18950_v43 = vpop.permute.xlu0 %2478 }
 0x20e   : > { %v3055_v23 = vld [vmem:[#allocation2 + $0x10] ss:$2 sm:$0xff]  ;;  %v3087_v24 = vld [vmem:[#allocation2 + $0x11] ss:$2 sm:$0xff]  ;;  %v18944_v35 = vpop.permute.xlu1 %2004  ;;  %2324 = vperm.xlu0 %17679, %v18959_v41  }
 0x20f   : > { %24051 = vst [vmem:[#allocation32_spill] sm:$0xff] %v18944_v35  ;;  %v3117_v11 = vmax.f32 %v3055_v23, %v3087_v24  ;;  %v12539_v24 = vld [vmem:[%s17794_s30 + $0x141] sm:$0xff]  ;;  %v776_v35 = vmul.f32 %v18779_v18, %v24068_v27  ;;  %v1570_v27 = vmul.f32 %v18792_v2, %v18218_v3  ;;  %v1834_v3 = vmul.f32 %v18811_v56, %v18308_v36 }
 0x210   : > { %2329 = vperm.xlu1 %17680, %v18956_v31   ;;  %v2098_v36 = vmul.f32 %v18830_v6, %v18631_v10  ;;  %v2363_v10 = vmul.f32 %v18843_v14, %v18742_v25 }
 0x211   : > { %v3132_v61 = vmax.f32 %v3116_v49, %v3117_v11  ;;  %v18963_v26 = vpop.permute.xlu0 %2488  ;;  %v12538_v49 = vld [vmem:[%s17794_s30 + $0x139] sm:$0xff] }
 0x212   : > { %v18948_v51 = vpop.permute.xlu1 %2483  ;;  %2802 = vperm.xlu0 %17679, %v12566_v37  }
 0x213   : > { %3141 = vst.msk [vmem:[#allocation3 + $0x11] sm:$0xff] %vm441_vm0, %v3132_v61 }
 0x214   : > { %2807 = vperm.xlu1 %17680, %v12567_v32  }
 0x215   : > { %v18971_v47 = vpop.permute.xlu0 %1521 }
 0x216   : > { %v18961_v20 = vpop.permute.xlu1 %2493  ;;  %24054 = vst [vmem:[#allocation120_spill] sm:$0xff] %v18971_v47  ;;  %2812 = vperm.xlu0 %17679, %v12568_v58  }
 0x218   : > { %2817 = vperm.xlu1 %17680, %v12569_v38   ;;  %v19002_v38 = vld [vmem:[%s17794_s30 + $0x169] sm:$0xff] }
 0x219   : > { %v18978_v22 = vpop.permute.xlu0 %1531 }
 0x21a   : > { %v18969_v60 = vpop.permute.xlu1 %1526  ;;  %v3166_v12 = vld [vmem:[#allocation3 + $0x11] sm:$0xff]  ;;  %24056 = vst [vmem:[#allocation122_spill] sm:$0xff] %v18978_v22  ;;  %2558 = vperm.xlu0 %17679, %v12536_v59   ;;  %v12572_v22 = vld [vmem:[%s17794_s30 + $0x13a] sm:$0xff] }
 0x21b   : > { %24053 = vst [vmem:[#allocation44_spill] sm:$0xff] %v18969_v60  ;;  %14853 = vmatmul.mubr.msk.f32.vlgmr.msra.gmra.mrb[0].mxu0 %vm441_vm0, %v3166_v12  ;;  %v18999_v12 = vld [vmem:[%s17794_s30 + $0x171] sm:$0xff] }
 0x21c   : > { %2563 = vperm.xlu1 %17680, %v12537_v30   ;;  %v12571_v59 = vld [vmem:[%s17794_s30 + $0x12a] sm:$0xff] }
 0x21d   : > { %v18984_v23 = vpop.permute.xlu0 %2009 }
 0x21e   : > { %v18976_v29 = vpop.permute.xlu1 %1536  ;;  %24058 = vst [vmem:[#allocation124_spill] sm:$0xff] %v18984_v23  ;;  %2568 = vperm.xlu0 %17679, %v12538_v49   ;;  %v24067_v23 = vld [vmem:[#allocation13_spill] sm:$0xff] }
 0x21f   : > { %24055 = vst [vmem:[#allocation121_spill] sm:$0xff] %v18976_v29  ;;  %v1043_v29 = vmul.f32 %v18765_v7, %v24071_v19  ;;  %v24076_v19 = vld [vmem:[#allocation16_spill] sm:$0xff] }
 0x220   : > { %2573 = vperm.xlu1 %17680, %v12539_v24   ;;  %v12570_v24 = vld [vmem:[%s17794_s30 + $0x122] sm:$0xff] }
 0x221   : > { %v18990_v61 = vpop.permute.xlu0 %2019 }
 0x222   : > { %v18982_v52 = vpop.permute.xlu1 %2014  ;;  %24060 = vst [vmem:[#allocation126_spill] sm:$0xff] %v18990_v61  ;;  %2578 = vperm.xlu0 %17679, %v18720_v16   ;;  %v1040_v61 = vmul.f32 %v18765_v7, %v24066_v63  ;;  %v24072_v63 = vld [vmem:[#allocation20_spill] sm:$0xff] }
 0x223   : > { %24057 = vst [vmem:[#allocation123_spill] sm:$0xff] %v18982_v52  ;;  %v777_v52 = vmul.f32 %v18779_v18, %v24067_v23 }
 0x224   : > { %2583 = vperm.xlu1 %17680, %v18717_v13   ;;  %v1072_v60 = vadd.f32 %v1040_v61, %v776_v35 }
 0x225   : > { %v18994_v37 = vpop.permute.xlu0 %2498  ;;  %v1073_v23 = vadd.f32 %v1041_v40, %v777_v52  ;;  %v1306_v40 = vmul.f32 %v18774_v17, %v24078_v62 }
 0x226   : > { %v18988_v11 = vpop.permute.xlu1 %2024  ;;  %2588 = vperm.xlu0 %17679, %v19002_v38  }
 0x227   : > { %24059 = vst [vmem:[#allocation125_spill] sm:$0xff] %v18988_v11  ;;  %v12573_v11 = vld [vmem:[%s17794_s30 + $0x142] sm:$0xff] }
 0x228   : > { %2593 = vperm.xlu1 %17680, %v18999_v12  }
 0x229   : > { %v19006_v30 = vpop.permute.xlu0 %2508 }
 0x22a   : > { %v18992_v32 = vpop.permute.xlu1 %2503  ;;  %24062 = vst [vmem:[#allocation128_spill] sm:$0xff] %v19006_v30  ;;  %2822 = vperm.xlu0 %17679, %v12570_v24  }
 0x22c   : > { %2827 = vperm.xlu1 %17680, %v12571_v59   ;;  %v1042_v59 = vmul.f32 %v18765_v7, %v24072_v63  ;;  %v24077_v63 = vld [vmem:[#allocation35_spill] sm:$0xff] }
 0x22d   : > { %v19014_v50 = vpop.permute.xlu0 %1765 }
 0x22e   : > { %v19004_v58 = vpop.permute.xlu1 %2513  ;;  %24064 = vst [vmem:[#allocation130_spill] sm:$0xff] %v19014_v50  ;;  %v1304_v50 = vmul.f32 %v18774_v17, %v24070_v21  ;;  %v24075_v21 = vld [vmem:[#allocation15_spill] sm:$0xff]  ;;  %2832 = vperm.xlu0 %17679, %v12572_v22   ;;  %v1836_v22 = vmul.f32 %v18811_v56, %v18320_v44 }
 0x22f   : > { %24061 = vst [vmem:[#allocation127_spill] sm:$0xff] %v19004_v58  ;;  %v779_v30 = vmul.f32 %v18779_v18, %v24075_v21  ;;  %v778_v58 = vmul.f32 %v18779_v18, %v24076_v19  ;;  %v1572_v21 = vmul.f32 %v18792_v2, %v18224_v15  ;;  %v24079_v19 = vld [vmem:[#allocation53_spill] sm:$0xff] }
 0x230   : > { %2837 = vperm.xlu1 %17680, %v12573_v11   ;;  %v1336_v52 = vadd.f32 %v1304_v50, %v1072_v60 }
 0x231   : > { %v19036_v47 = vpop.permute.xlu0 %1775  ;;  %v1075_v11 = vadd.f32 %v1043_v29, %v779_v30  ;;  %v1074_v61 = vadd.f32 %v1042_v59, %v778_v58  ;;  %v24080_v58 = vld [vmem:[#allocation70_spill] sm:$0xff] }
 0x232   : > { %v19012_v49 = vpop.permute.xlu1 %1770  ;;  %24074 = vst [vmem:[#allocation18_spill] sm:$0xff] %v19036_v47  ;;  %v1835_v30 = vmul.f32 %v18811_v56, %v24080_v58  ;;  %2842 = vperm.xlu0 %17679, %v18872_v34  }
 0x233   : > { %24063 = vst [vmem:[#allocation129_spill] sm:$0xff] %v19012_v49  ;;  %v1305_v49 = vmul.f32 %v18774_v17, %v24069_v46  ;;  %v1569_v46 = vmul.f32 %v18792_v2, %v18220_v4  ;;  %v1833_v4 = vmul.f32 %v18811_v56, %v18310_v55  ;;  %v2097_v55 = vmul.f32 %v18830_v6, %v18633_v9 }
 0x234   : > { %2847 = vperm.xlu1 %17680, %v18869_v28   ;;  %v1338_v15 = vadd.f32 %v1306_v40, %v1074_v61  ;;  %v2362_v9 = vmul.f32 %v18843_v14, %v18744_v8  ;;  %v2099_v40 = vmul.f32 %v18830_v6, %v18646_v45  ;;  %v2627_v8 = vmul.f32 %v18860_v54, %v18948_v51 }
 0x235   : > { %v1337_v35 = vadd.f32 %v1305_v49, %v1073_v23  ;;  %v19060_v62 = vpop.permute.xlu0 %2254  ;;  %v1601_v60 = vadd.f32 %v1569_v46, %v1336_v52  ;;  %v19073_v49 = vld [vmem:[%s17794_s30 + $0x172] sm:$0xff]  ;;  %v2100_v46 = vmul.f32 %v18830_v6, %v18644_v39  ;;  %v2365_v45 = vmul.f32 %v18843_v14, %v18748_v53 }
 0x236   : > { %v19034_v24 = vpop.permute.xlu1 %1780  ;;  %v2364_v61 = vmul.f32 %v18843_v14, %v18750_v33 }
 0x237   : > { %24073 = vst [vmem:[#allocation17_spill] sm:$0xff] %v19034_v24  ;;  %v1307_v24 = vmul.f32 %v18774_v17, %v24077_v63  ;;  %v1571_v63 = vmul.f32 %v18792_v2, %v24079_v19  ;;  %v1602_v50 = vadd.f32 %v1570_v27, %v1337_v35  ;;  %v1865_v23 = vadd.f32 %v1833_v4, %v1601_v60 }
 0x238   : > { %v2626_v4 = vmul.f32 %v18860_v54, %v18950_v43  ;;  %2857 = vperm.xlu1 %17680, %v19073_v49   ;;  %v2629_v43 = vmul.f32 %v18860_v54, %v18961_v20 }
 0x239   : > { %v1339_v29 = vadd.f32 %v1307_v24, %v1075_v11  ;;  %v1866_v59 = vadd.f32 %v1834_v3, %v1602_v50  ;;  %v19080_v24 = vld [vmem:[%s17794_s30 + $0x16a] sm:$0xff]  ;;  %v1603_v44 = vadd.f32 %v1571_v63, %v1338_v15  ;;  %v19088_v52 = vpop.permute.xlu0 %2264  ;;  %v2129_v3 = vadd.f32 %v2097_v55, %v1865_v23 }
 0x23a   : > { %v19058_v47 = vpop.permute.xlu1 %2259  ;;  %2852 = vperm.xlu0 %17679, %v19080_v24   ;;  %v601_v50 = vld [vmem:[%s17794_s30 + $0x150] sm:$0xff] }
 0x23b   : > { %v1604_v27 = vadd.f32 %v1572_v21, %v1339_v29  ;;  %v2130_v25 = vadd.f32 %v2098_v36, %v1866_v59  ;;  %v1867_v39 = vadd.f32 %v1835_v30, %v1603_v44  ;;  %v602_v21 = vld [vmem:[%s17794_s30 + $0x158] sm:$0xff]  ;;  %v2394_v63 = vadd.f32 %v2362_v9, %v2129_v3 }
 0x23c   : > { %v2628_v36 = vmul.f32 %v18860_v54, %v18963_v26  ;;  %753 = vperm.xlu1 %17680, %v602_v21   ;;  %v24083_v21 = vld [vmem:[#allocation22_spill] sm:$0xff] }
 0x23d   : > { %v1868_v11 = vadd.f32 %v1836_v22, %v1604_v27  ;;  %v2395_v19 = vadd.f32 %v2363_v10, %v2130_v25  ;;  %v2131_v60 = vadd.f32 %v2099_v40, %v1867_v39  ;;  %v2743_v29 = vpop.permute.xlu0 %2742  ;;  %v2658_v15 = vadd.f32 %v2626_v4, %v2394_v63  ;;  %v24081_v25 = vld [vmem:[#allocation21_spill] sm:$0xff]  ;;  %v24084_v63 = vld [vmem:[#allocation23_spill] sm:$0xff] }
 0x23e   : > { %v19086_v35 = vpop.permute.xlu1 %2269  ;;  %v2890_v22 = vmul.f32 %v18897_v42, %v2743_v29  ;;  %748 = vperm.xlu0 %17679, %v601_v50   ;;  %v781_v3 = vmul.f32 %v18779_v18, %v24081_v25  ;;  %v783_v50 = vmul.f32 %v18779_v18, %v24084_v63 }
 0x23f   : > { %v2132_v51 = vadd.f32 %v2100_v46, %v1868_v11  ;;  %v2659_v53 = vadd.f32 %v2627_v8, %v2395_v19  ;;  %v2396_v30 = vadd.f32 %v2364_v61, %v2131_v60  ;;  %v24082_v8 = vld [vmem:[#allocation25_spill] sm:$0xff]  ;;  %v780_v19 = vmul.f32 %v18779_v18, %v24083_v21 }
 0x240   : > { %v2922_v23 = vadd.f32 %v2890_v22, %v2658_v15  ;;  %763 = vperm.xlu1 %17680, %v18956_v31   ;;  %v1045_v4 = vmul.f32 %v18765_v7, %v24082_v8 }
 0x241   : > { %v2397_v58 = vadd.f32 %v2365_v45, %v2132_v51  ;;  %v2660_v9 = vadd.f32 %v2628_v36, %v2396_v30  ;;  %v2753_v27 = vpop.permute.xlu0 %2752  ;;  %v24085_v51 = vld [vmem:[#allocation26_spill] sm:$0xff] }
 0x242   : > { %v2748_v55 = vpop.permute.xlu1 %2747  ;;  %v2961_v44 = vadd.f32 %v18910_v57, %v2922_v23  ;;  %v2892_v40 = vmul.f32 %v18897_v42, %v2753_v27  ;;  %758 = vperm.xlu0 %17679, %v18959_v41   ;;  %v1044_v60 = vmul.f32 %v18765_v7, %v24085_v51  ;;  %v24091_v27 = vld [vmem:[#allocation39_spill] sm:$0xff] }
 0x243   : > { %v2891_v33 = vmul.f32 %v18897_v42, %v2748_v55  ;;  %v2661_v10 = vadd.f32 %v2629_v43, %v2397_v58  ;;  %v24086_v43 = vld [vmem:[#allocation27_spill] sm:$0xff] }
 0x244   : > { %v2993_v39 = vmax.f32 %v2961_v44, 0.0  ;;  %v2924_v61 = vadd.f32 %v2892_v40, %v2660_v9  ;;  %v1047_v36 = vmul.f32 %v18765_v7, %v24086_v43  ;;  %1017 = vperm.xlu1 %17680, %v18717_v13   ;;  %v24090_v9 = vld [vmem:[#allocation38_spill] sm:$0xff]  ;;  %v24092_v44 = vld [vmem:[#allocation40_spill] sm:$0xff] }
 0x245   : > { %v2923_v59 = vadd.f32 %v2891_v33, %v2659_v53  ;;  %v19128_v29 = vpop.permute.xlu0 %1785  ;;  %v24087_v53 = vld [vmem:[#allocation28_spill] sm:$0xff]  ;;  %v24088_v33 = vld [vmem:[#allocation37_spill] sm:$0xff]  ;;  %v24093_v40 = vld [vmem:[#allocation62_spill] sm:$0xff] }
 0x246   : > { %v2758_v20 = vpop.permute.xlu1 %2757  ;;  %v1046_v15 = vmul.f32 %v18765_v7, %v24087_v53  ;;  %v1309_v22 = vmul.f32 %v18774_v17, %v24088_v33  ;;  %3025 = vst.msk [vmem:[#allocation2 + $0x20] sm:$0xff] %vm441_vm0, %v2993_v39  ;;  %v2963_v30 = vadd.f32 %v18910_v57, %v2924_v61  ;;  %1012 = vperm.xlu0 %17679, %v18720_v16   ;;  %v24095_v53 = vld [vmem:[#allocation64_spill] sm:$0xff] }
 0x247   : > { %v2962_v26 = vadd.f32 %v18910_v57, %v2923_v59  ;;  %v2893_v46 = vmul.f32 %v18897_v42, %v2758_v20  ;;  %v24089_v59 = vld [vmem:[#allocation24_spill] sm:$0xff]  ;;  %v1308_v20 = vmul.f32 %v18774_v17, %v24090_v9  ;;  %v1574_v25 = vmul.f32 %v18792_v2, %v24093_v40  ;;  %v3159_v9 = vld [vmem:[%s23886_s3 + $0x10] sm:$0xff]  ;;  %v24100_v40 = vld [vmem:[#allocation103_spill] sm:$0xff] }
 0x248   : > { %v782_v23 = vmul.f32 %v18779_v18, %v24089_v59  ;;  %v2995_v13 = vmax.f32 %v2963_v30, 0.0  ;;  %v1079_v39 = vadd.f32 %v1047_v36, %v783_v50  ;;  %v1576_v33 = vmul.f32 %v18792_v2, %v24095_v53  ;;  %1027 = vperm.xlu1 %17680, %v18999_v12  }
 0x249   : > { %v2994_v11 = vmax.f32 %v2962_v26, 0.0  ;;  %v2925_v45 = vadd.f32 %v2893_v46, %v2661_v10  ;;  %v1077_v10 = vadd.f32 %v1045_v4, %v781_v3  ;;  %v1311_v26 = vmul.f32 %v18774_v17, %v24091_v27  ;;  %v3157_v3 = vld [vmem:[%s23886_s3] sm:$0xff]  ;;  %v3158_v4 = vld [vmem:[%s23886_s3 + $0x8] sm:$0xff]  ;;  %v19160_v21 = vpop.permute.xlu0 %1795  ;;  %v24099_v27 = vld [vmem:[#allocation102_spill] sm:$0xff] }
 0x24a   : > { %v19126_v55 = vpop.permute.xlu1 %1790  ;;  %v1310_v46 = vmul.f32 %v18774_v17, %v24092_v44  ;;  %v16076_v63 = vpack.c.bf16 %v3158_v4, %v3157_v3  ;;  %v1078_v51 = vadd.f32 %v1046_v15, %v782_v23  ;;  %3027 = vst.msk [vmem:[#allocation2 + $0x30] sm:$0xff] %vm441_vm0, %v2995_v13  ;;  %v1838_v50 = vmul.f32 %v18811_v56, %v18338_v48  ;;  %v24098_v23 = vld [vmem:[#allocation76_spill] sm:$0xff]  ;;  %v3160_v48 = vld [vmem:[%s23886_s3 + $0x18] sm:$0xff] }
 0x24b   : > { %3026 = vst.msk [vmem:[#allocation2 + $0x28] sm:$0xff] %vm441_vm0, %v2994_v11  ;;  %v2964_v58 = vadd.f32 %v18910_v57, %v2925_v45  ;;  %v1076_v11 = vadd.f32 %v1044_v60, %v780_v19  ;;  %v24094_v45 = vld [vmem:[#allocation63_spill] sm:$0xff]  ;;  %v1341_v43 = vadd.f32 %v1309_v22, %v1077_v10  ;;  %1022 = vperm.xlu0 %17679, %v19002_v38  }
 0x24c   : > { %v1573_v16 = vmul.f32 %v18792_v2, %v24094_v45  ;;  %v24097_v60 = vld [vmem:[#allocation75_spill] sm:$0xff]  ;;  %16077 = vmatprep.subr.bf16.mxu0 %v16076_v63  ;;  %v1343_v15 = vadd.f32 %v1311_v26, %v1079_v39  ;;  %v1342_v22 = vadd.f32 %v1310_v46, %v1078_v51  ;;  %v1840_v10 = vmul.f32 %v18811_v56, %v24098_v23  ;;  %v24101_v39 = vld [vmem:[#allocation77_spill] sm:$0xff] }
 0x24d   : > { %v2996_v8 = vmax.f32 %v2964_v58, 0.0  ;;  %v24096_v58 = vld [vmem:[#allocation65_spill] sm:$0xff]  ;;  %v1340_v19 = vadd.f32 %v1308_v20, %v1076_v11  ;;  %v1837_v36 = vmul.f32 %v18811_v56, %v24097_v60  ;;  %v1606_v59 = vadd.f32 %v1574_v25, %v1341_v43  ;;  %16079 = vmatpush3.bf16.msra.mxu0 %v16076_v63  ;;  %v19188_v25 = vpop.permute.xlu0 %2274  ;;  %1281 = vperm.xlu1 %17680, %v18869_v28   ;;  %v24102_v43 = vld [vmem:[#allocation104_spill] sm:$0xff] }
 0x24e   : > { %v19158_v61 = vpop.permute.xlu1 %1800  ;;  %v1575_v30 = vmul.f32 %v18792_v2, %v24096_v58  ;;  %v2102_v44 = vmul.f32 %v18830_v6, %v24099_v27  ;;  %v2101_v26 = vmul.f32 %v18830_v6, %v24100_v40  ;;  %v1608_v13 = vadd.f32 %v1576_v33, %v1343_v15  ;;  %v3161_v58 = vld [vmem:[%s23886_s3 + $0x20] sm:$0xff]  ;;  %v24104_v27 = vld [vmem:[#allocation29_spill] sm:$0xff] }
 0x24f   : > { %3028 = vst.msk [vmem:[#allocation2 + $0x38] sm:$0xff] %vm441_vm0, %v2996_v8  ;;  %v1605_v20 = vadd.f32 %v1573_v16, %v1340_v19  ;;  %v16080_v8 = vpack.c.bf16 %v3160_v48, %v3159_v9  ;;  %v1870_v4 = vadd.f32 %v1838_v50, %v1606_v59  ;;  %v1839_v45 = vmul.f32 %v18811_v56, %v24101_v39  ;;  %v24103_v50 = vld [vmem:[#allocation105_spill] sm:$0xff] }
 0x250   : > { %v1607_v3 = vadd.f32 %v1575_v30, %v1342_v22  ;;  %1276 = vperm.xlu0 %17679, %v18872_v34   ;;  %v1872_v51 = vadd.f32 %v1840_v10, %v1608_v13  ;;  %v2104_v53 = vmul.f32 %v18830_v6, %v24102_v43  ;;  %v2367_v33 = vmul.f32 %v18843_v14, %v18849_v5  ;;  %v3162_v34 = vld [vmem:[%s23886_s3 + $0x28] sm:$0xff]  ;;  %v3164_v13 = vld [vmem:[%s23886_s3 + $0x38] sm:$0xff] }
 0x251   : > { %v1869_v11 = vadd.f32 %v1837_v36, %v1605_v20  ;;  %16081 = vmatprep.subr.bf16.mxu0 %v16080_v8  ;;  %v2366_v28 = vmul.f32 %v18843_v14, %v18851_v1  ;;  %v2134_v30 = vadd.f32 %v2102_v44, %v1870_v4  ;;  %v2103_v60 = vmul.f32 %v18830_v6, %v24103_v50  ;;  %v19210_v22 = vpop.permute.xlu0 %2284  ;;  %v24106_v4 = vld [vmem:[#allocation128_spill] sm:$0xff] }
 0x252   : > { %v19186_v46 = vpop.permute.xlu1 %2279  ;;  %v3057_v16 = vld [vmem:[#allocation2 + $0x20] ss:$2 sm:$0xff]  ;;  %v3089_v63 = vld [vmem:[#allocation2 + $0x21] ss:$2 sm:$0xff]  ;;  %16083 = vmatpush3.bf16.msra.mxu0 %v16080_v8  ;;  %v16084_v1 = vpack.c.bf16 %v3162_v34, %v3161_v58  ;;  %v2631_v59 = vmul.f32 %v18860_v54, %v18992_v32  ;;  %v2630_v23 = vmul.f32 %v18860_v54, %v18994_v37  ;;  %1291 = vperm.xlu1 %17680, %v19073_v49   ;;  %v3163_v37 = vld [vmem:[%s23886_s3 + $0x30] sm:$0xff] }
 0x253   : > { %v2133_v19 = vadd.f32 %v2101_v26, %v1869_v11  ;;  %v3118_v10 = vmax.f32 %v3057_v16, %v3089_v63  ;;  %v1871_v48 = vadd.f32 %v1839_v45, %v1607_v3  ;;  %v2369_v20 = vmul.f32 %v18843_v14, %v18882_v0  ;;  %v24105_v3 = vld [vmem:[#allocation127_spill] sm:$0xff]  ;;  %v19238_v58 = vld [vmem:[%s17794_s30 + $0x188] sm:$0xff] }
 0x254   : > { %v2368_v44 = vmul.f32 %v18843_v14, %v24104_v27  ;;  %1286 = vperm.xlu0 %17679, %v19080_v24   ;;  %16085 = vmatprep.subr.bf16.mxu0 %v16084_v1  ;;  %v2136_v40 = vadd.f32 %v2104_v53, %v1872_v51  ;;  %v2399_v26 = vadd.f32 %v2367_v33, %v2134_v30  ;;  %v19241_v30 = vld [vmem:[%s17794_s30 + $0x180] sm:$0xff] }
 0x255   : > { %v2398_v32 = vadd.f32 %v2366_v28, %v2133_v19  ;;  %v2135_v0 = vadd.f32 %v2103_v60, %v1871_v48  ;;  %v2633_v14 = vmul.f32 %v18860_v54, %v24105_v3  ;;  %v2632_v11 = vmul.f32 %v18860_v54, %v24106_v4  ;;  %v2763_v45 = vpop.permute.xlu0 %2762  ;;  %v12609_v19 = vld [vmem:[%s23886_s3 + $0x80] sm:$0xff]  ;;  %v24107_v4 = vld [vmem:[#allocation94_spill] sm:$0xff] }
 0x256   : > { %v3059_v36 = vld [vmem:[#allocation2 + $0x30] ss:$2 sm:$0xff]  ;;  %v3091_v15 = vld [vmem:[#allocation2 + $0x31] ss:$2 sm:$0xff]  ;;  %v19208_v5 = vpop.permute.xlu1 %2289  ;;  %16087 = vmatpush3.bf16.msra.mxu0 %v16084_v1  ;;  %v16088_v16 = vpack.c.bf16 %v3164_v13, %v3163_v37  ;;  %v2663_v63 = vadd.f32 %v2631_v59, %v2399_v26  ;;  %v2894_v53 = vmul.f32 %v18897_v42, %v2763_v45  ;;  %1546 = vperm.xlu1 %17680, %v18956_v31   ;;  %v12610_v31 = vld [vmem:[%s23886_s3 + $0x88] sm:$0xff] }
 0x257   : > { %v3119_v9 = vmax.f32 %v3059_v36, %v3091_v15  ;;  %v2662_v51 = vadd.f32 %v2630_v23, %v2398_v32  ;;  %v2401_v33 = vadd.f32 %v2369_v20, %v2136_v40  ;;  %v2400_v28 = vadd.f32 %v2368_v44, %v2135_v0  ;;  %v19273_v0 = vld [vmem:[%s17794_s30 + $0x181] sm:$0xff] }
 0x258   : > { %1541 = vperm.xlu0 %17679, %v18959_v41   ;;  %16089 = vmatprep.subr.bf16.mxu0 %v16088_v16  ;;  %v19249_v15 = vpack.c.bf16 %v12610_v31, %v12609_v19  ;;  %v24110_v45 = vld [vmem:[#allocation91_spill] sm:$0xff]  ;;  %v24113_v19 = vld [vmem:[#allocation96_spill] sm:$0xff] }
 0x259   : > { %v3133_v8 = vmax.f32 %v3118_v10, %v3119_v9  ;;  %v2926_v34 = vadd.f32 %v2894_v53, %v2662_v51  ;;  %v2665_v50 = vadd.f32 %v2633_v14, %v2401_v33  ;;  %v2664_v60 = vadd.f32 %v2632_v11, %v2400_v28  ;;  %v2773_v41 = vpop.permute.xlu0 %2772 }
 0x25a   : > { %v2768_v39 = vpop.permute.xlu1 %2767  ;;  %16091 = vmatpush3.bf16.msra.mxu0 %v16088_v16  ;;  %v2896_v10 = vmul.f32 %v18897_v42, %v2773_v41  ;;  %1556 = vperm.xlu1 %17680, %v19238_v58   ;;  %v1061_v11 = vmul.f32 %v18765_v7, %v24107_v4  ;;  %v796_v16 = vmul.f32 %v18779_v18, %v24110_v45 }
 0x25b   : > { %3142 = vst.msk [vmem:[#allocation3 + $0x21] sm:$0xff] %vm441_vm0, %v3133_v8  ;;  %v2895_v43 = vmul.f32 %v18897_v42, %v2768_v39  ;;  %v2965_v59 = vadd.f32 %v18910_v57, %v2926_v34  ;;  %16093 = vmatprep.subr.bf16.mxu0 %v19249_v15  ;;  %v19270_v8 = vld [vmem:[%s17794_s30 + $0x189] sm:$0xff]  ;;  %v1063_v31 = vmul.f32 %v18765_v7, %v24113_v19 }
 0x25c   : > { %1551 = vperm.xlu0 %17679, %v19241_v30   ;;  %v2928_v27 = vadd.f32 %v2896_v10, %v2664_v60 }
 0x25d   : > { %v2927_v54 = vadd.f32 %v2895_v43, %v2663_v63  ;;  %v2997_v48 = vmax.f32 %v2965_v59, 0.0  ;;  %v19260_v40 = vpop.permute.xlu0 %2029  ;;  %v24111_v63 = vld [vmem:[#allocation114_spill] sm:$0xff]  ;;  %v24112_v43 = vld [vmem:[#allocation115_spill] sm:$0xff] }
 0x25e   : > { %v2778_v36 = vpop.permute.xlu1 %2777  ;;  %v2967_v32 = vadd.f32 %v18910_v57, %v2928_v27  ;;  %1810 = vperm.xlu1 %17680, %v18999_v12   ;;  %v1325_v51 = vmul.f32 %v18774_v17, %v24111_v63  ;;  %v1324_v53 = vmul.f32 %v18774_v17, %v24112_v43 }
 0x25f   : > { %v2966_v1 = vadd.f32 %v18910_v57, %v2927_v54  ;;  %v2897_v23 = vmul.f32 %v18897_v42, %v2778_v36  ;;  %3029 = vst.msk [vmem:[#allocation2 + $0x40] sm:$0xff] %vm441_vm0, %v2997_v48  ;;  %v24115_v36 = vld [vmem:[#allocation44_spill] sm:$0xff] }
 0x260   : > { %1805 = vperm.xlu0 %17679, %v19002_v38   ;;  %v2999_v13 = vmax.f32 %v2967_v32, 0.0  ;;  %v24109_v38 = vld [vmem:[#allocation90_spill] sm:$0xff]  ;;  %v1590_v41 = vmul.f32 %v18792_v2, %v24115_v36  ;;  %v24117_v48 = vld [vmem:[#allocation92_spill] sm:$0xff] }
 0x261   : > { %v2998_v9 = vmax.f32 %v2966_v1, 0.0  ;;  %v2929_v20 = vadd.f32 %v2897_v23, %v2665_v50  ;;  %v19277_v14 = vpop.permute.xlu0 %2039  ;;  %v797_v39 = vmul.f32 %v18779_v18, %v24109_v38  ;;  %v24114_v50 = vld [vmem:[#allocation97_spill] sm:$0xff]  ;;  %v24116_v1 = vld [vmem:[#allocation120_spill] sm:$0xff] }
 0x262   : > { %v19258_v44 = vpop.permute.xlu1 %2034  ;;  %v3167_v26 = vld [vmem:[#allocation3 + $0x21] sm:$0xff]  ;;  %3031 = vst.msk [vmem:[#allocation2 + $0x50] sm:$0xff] %vm441_vm0, %v2999_v13  ;;  %1820 = vperm.xlu1 %17680, %v19270_v8   ;;  %v1062_v60 = vmul.f32 %v18765_v7, %v24114_v50  ;;  %v1589_v59 = vmul.f32 %v18792_v2, %v24116_v1  ;;  %v24120_v13 = vld [vmem:[#allocation117_spill] sm:$0xff] }
 0x263   : > { %3030 = vst.msk [vmem:[#allocation2 + $0x48] sm:$0xff] %vm441_vm0, %v2998_v9  ;;  %v2968_v42 = vadd.f32 %v18910_v57, %v2929_v20  ;;  %14855 = vmatprep.mubr.msk.f32.mxu0 %vm441_vm0, %v3167_v26  ;;  %v24108_v57 = vld [vmem:[#allocation95_spill] sm:$0xff]  ;;  %v1093_v54 = vadd.f32 %v1061_v11, %v797_v39  ;;  %v19310_v9 = vld [vmem:[%s17794_s30 + $0x18a] sm:$0xff]  ;;  %v1326_v4 = vmul.f32 %v18774_v17, %v24120_v13  ;;  %v24124_v13 = vld [vmem:[#allocation50_spill] sm:$0xff] }
 0x264   : > { %v1060_v12 = vmul.f32 %v18765_v7, %v24108_v57  ;;  %1815 = vperm.xlu0 %17679, %v19273_v0   ;;  %v24118_v20 = vld [vmem:[#allocation93_spill] sm:$0xff]  ;;  %v24119_v32 = vld [vmem:[#allocation116_spill] sm:$0xff]  ;;  %v1853_v11 = vmul.f32 %v18811_v56, %v19128_v29  ;;  %v24122_v29 = vld [vmem:[#allocation122_spill] sm:$0xff] }
 0x265   : > { %v3000_v37 = vmax.f32 %v2968_v42, 0.0  ;;  %v19297_v28 = vpop.permute.xlu0 %2518  ;;  %v798_v27 = vmul.f32 %v18779_v18, %v24118_v20  ;;  %v1357_v26 = vadd.f32 %v1325_v51, %v1093_v54  ;;  %v19317_v42 = vld [vmem:[%s17794_s30 + $0x182] sm:$0xff] }
 0x266   : > { %v19275_v3 = vpop.permute.xlu1 %2044  ;;  %v1092_v34 = vadd.f32 %v1060_v12, %v796_v16  ;;  %2074 = vperm.xlu1 %17680, %v19073_v49   ;;  %v799_v49 = vmul.f32 %v18779_v18, %v24117_v48 }
 0x267   : > { %3032 = vst.msk [vmem:[#allocation2 + $0x58] sm:$0xff] %vm441_vm0, %v3000_v37  ;;  %v1327_v37 = vmul.f32 %v18774_v17, %v24119_v32  ;;  %v1094_v63 = vadd.f32 %v1062_v60, %v798_v27  ;;  %v1622_v51 = vadd.f32 %v1590_v41, %v1357_v26  ;;  %v1856_v60 = vmul.f32 %v18811_v56, %v19158_v61  ;;  %v12512_v61 = vld [vmem:[%s17794_s30 + $0x198] sm:$0xff] }
 0x268   : > { %2069 = vperm.xlu0 %17679, %v19080_v24   ;;  %v1356_v7 = vadd.f32 %v1324_v53, %v1092_v34  ;;  %v1854_v24 = vmul.f32 %v18811_v56, %v19126_v55  ;;  %v1095_v16 = vadd.f32 %v1063_v31, %v799_v49  ;;  %v24121_v55 = vld [vmem:[#allocation121_spill] sm:$0xff]  ;;  %v1591_v53 = vmul.f32 %v18792_v2, %v24122_v29 }
 0x269   : > { %v19329_v18 = vpop.permute.xlu0 %2528  ;;  %v1592_v43 = vmul.f32 %v18792_v2, %v24121_v55  ;;  %v1358_v19 = vadd.f32 %v1326_v4, %v1094_v63  ;;  %v1855_v41 = vmul.f32 %v18811_v56, %v19160_v21 }
 0x26a   : > { %v19295_v33 = vpop.permute.xlu1 %2523  ;;  %v3061_v23 = vld [vmem:[#allocation2 + $0x40] ss:$2 sm:$0xff]  ;;  %v3093_v10 = vld [vmem:[#allocation2 + $0x41] ss:$2 sm:$0xff]  ;;  %2084 = vperm.xlu1 %17680, %v19310_v9   ;;  %v1621_v17 = vadd.f32 %v1589_v59, %v1356_v7  ;;  %v1359_v34 = vadd.f32 %v1327_v37, %v1095_v16  ;;  %v1886_v50 = vadd.f32 %v1854_v24, %v1622_v51  ;;  %v24127_v16 = vld [vmem:[#allocation45_spill] sm:$0xff] }
 0x26b   : > { %v3120_v39 = vmax.f32 %v3061_v23, %v3093_v10  ;;  %v12513_v23 = vld [vmem:[%s17794_s30 + $0x1a0] sm:$0xff]  ;;  %v1623_v48 = vadd.f32 %v1591_v53, %v1358_v19  ;;  %v24128_v51 = vld [vmem:[#allocation46_spill] sm:$0xff] }
 0x26c   : > { %2079 = vperm.xlu0 %17679, %v19317_v42   ;;  %v1885_v36 = vadd.f32 %v1853_v11, %v1621_v17  ;;  %v1624_v10 = vadd.f32 %v1592_v43, %v1359_v34  ;;  %v24125_v24 = vld [vmem:[#allocation51_spill] sm:$0xff]  ;;  %v24130_v34 = vld [vmem:[#allocation48_spill] sm:$0xff] }
 0x26d   : > { %v2050_v31 = vpop.permute.xlu0 %2049  ;;  %v1887_v26 = vadd.f32 %v1855_v41, %v1623_v48  ;;  %v24129_v53 = vld [vmem:[#allocation47_spill] sm:$0xff] }
 0x26e   : > { %v3063_v57 = vld [vmem:[#allocation2 + $0x50] ss:$2 sm:$0xff]  ;;  %v3095_v12 = vld [vmem:[#allocation2 + $0x51] ss:$2 sm:$0xff]  ;;  %v19327_v38 = vpop.permute.xlu1 %2533  ;;  %v2117_v2 = vmul.f32 %v18830_v6, %v2050_v31  ;;  %2339 = vperm.xlu1 %17680, %v19238_v58   ;;  %v1888_v21 = vadd.f32 %v1856_v60, %v1624_v10  ;;  %v19357_v58 = vld [vmem:[%s23884_s1 + $0x1] ss:$0 sm:$0xff] }
 0x26f   : > { %v3121_v45 = vmax.f32 %v3063_v57, %v3095_v12  ;;  %v1048_v4 = vmul.f32 %v19357_v58, %v24124_v13  ;;  %v1051_v11 = vmul.f32 %v19357_v58, %v24125_v24  ;;  %v24126_v57 = vld [vmem:[#allocation52_spill] sm:$0xff]  ;;  %v24132_v60 = vld [vmem:[#allocation59_spill] sm:$0xff] }
 0x270   : > { %2334 = vperm.xlu0 %17679, %v19241_v30   ;;  %v19349_v20 = vadd.f32 %v2117_v2, %v1885_v36  ;;  %v24123_v30 = vld [vmem:[#allocation49_spill] sm:$0xff]  ;;  %v1050_v12 = vmul.f32 %v19357_v58, %v24126_v57  ;;  %v1052_v41 = vmul.f32 %v19357_v58, %v24132_v60  ;;  %v24133_v10 = vld [vmem:[#allocation60_spill] sm:$0xff]  ;;  %v24144_v60 = vld [vmem:[#allocation87_spill] sm:$0xff] }
 0x271   : > { %v3134_v54 = vmax.f32 %v3120_v39, %v3121_v45  ;;  %v2060_v56 = vpop.permute.xlu0 %2059  ;;  %v1049_v37 = vmul.f32 %v19357_v58, %v24123_v30  ;;  %v19374_v45 = vld [vmem:[%s23884_s1] ss:$0 sm:$0xff]  ;;  %v1055_v48 = vmul.f32 %v19357_v58, %v24133_v10  ;;  %v24139_v24 = vld [vmem:[#allocation56_spill] sm:$0xff]  ;;  %v24140_v57 = vld [vmem:[#allocation57_spill] sm:$0xff] }
 0x272   : > { %v2055_v1 = vpop.permute.xlu1 %2054  ;;  %v2119_v32 = vmul.f32 %v18830_v6, %v2060_v56  ;;  %2349 = vperm.xlu1 %17680, %v12513_v23   ;;  %v785_v63 = vmul.f32 %v19374_v45, %v24127_v16  ;;  %v784_v17 = vmul.f32 %v19374_v45, %v24128_v51  ;;  %v786_v19 = vmul.f32 %v19374_v45, %v24130_v34  ;;  %v12546_v56 = vld [vmem:[%s17794_s30 + $0x199] sm:$0xff]  ;;  %v24141_v16 = vld [vmem:[#allocation68_spill] sm:$0xff]  ;;  %v19425_v51 = vld [vmem:[%s23884_s1 + $0x3] ss:$0 sm:$0xff] }
 0x273   : > { %3143 = vst.msk [vmem:[#allocation3 + $0x31] sm:$0xff] %vm441_vm0, %v3134_v54  ;;  %v2118_v59 = vmul.f32 %v18830_v6, %v2055_v1  ;;  %v787_v54 = vmul.f32 %v19374_v45, %v24129_v53  ;;  %v24131_v1 = vld [vmem:[#allocation58_spill] sm:$0xff]  ;;  %v1577_v10 = vmul.f32 %v19425_v51, %v24144_v60 }
 0x274   : > { %2344 = vperm.xlu0 %17679, %v12512_v61   ;;  %v19369_v39 = vadd.f32 %v2119_v32, %v1887_v26  ;;  %v1080_v36 = vadd.f32 %v1048_v4, %v784_v17  ;;  %v1053_v31 = vmul.f32 %v19357_v58, %v24131_v1  ;;  %v1082_v23 = vadd.f32 %v1050_v12, %v786_v19  ;;  %v24134_v61 = vld [vmem:[#allocation66_spill] sm:$0xff]  ;;  %v24137_v32 = vld [vmem:[#allocation61_spill] sm:$0xff] }
 0x275   : > { %v19347_v49 = vadd.f32 %v2118_v59, %v1886_v50  ;;  %v19382_v43 = vpop.permute.xlu0 %2538  ;;  %v1081_v50 = vadd.f32 %v1049_v37, %v785_v63  ;;  %v12547_v59 = vld [vmem:[%s17794_s30 + $0x1a1] sm:$0xff]  ;;  %v1083_v2 = vadd.f32 %v1051_v11, %v787_v54  ;;  %v1054_v30 = vmul.f32 %v19357_v58, %v24137_v32  ;;  %v24142_v17 = vld [vmem:[#allocation86_spill] sm:$0xff]  ;;  %v24143_v19 = vld [vmem:[#allocation69_spill] sm:$0xff] }
 0x276   : > { %v2065_v27 = vpop.permute.xlu1 %2064  ;;  %2603 = vperm.xlu1 %17680, %v19270_v8   ;;  %v19401_v8 = vld [vmem:[%s23884_s1 + $0x2] ss:$0 sm:$0xff]  ;;  %v791_v11 = vmul.f32 %v19374_v45, %v24139_v24  ;;  %v790_v12 = vmul.f32 %v19374_v45, %v24140_v57  ;;  %v24149_v57 = vld [vmem:[#allocation88_spill] sm:$0xff] }
 0x277   : > { %v2120_v7 = vmul.f32 %v18830_v6, %v2065_v27  ;;  %v1313_v27 = vmul.f32 %v19401_v8, %v24134_v61  ;;  %v24138_v37 = vld [vmem:[#allocation67_spill] sm:$0xff]  ;;  %v1315_v63 = vmul.f32 %v19401_v8, %v24141_v16  ;;  %v1314_v1 = vmul.f32 %v19401_v8, %v24143_v19 }
 0x278   : > { %2598 = vperm.xlu0 %17679, %v19273_v0   ;;  %v1312_v13 = vmul.f32 %v19401_v8, %v24138_v37  ;;  %v19435_v61 = vadd.f32 %v1055_v48, %v791_v11  ;;  %v19442_v37 = vld [vmem:[%s23884_s1 + $0x4] ss:$0 sm:$0xff]  ;;  %v1580_v16 = vmul.f32 %v19425_v51, %v24149_v57  ;;  %v24154_v57 = vld [vmem:[#allocation113_spill] sm:$0xff] }
 0x279   : > { %v19367_v6 = vadd.f32 %v2120_v7, %v1888_v21  ;;  %v24135_v21 = vld [vmem:[#allocation54_spill] sm:$0xff]  ;;  %v24136_v7 = vld [vmem:[#allocation55_spill] sm:$0xff]  ;;  %v19429_v53 = vpop.permute.xlu0 %2548  ;;  %v1347_v24 = vadd.f32 %v1315_v63, %v1083_v2  ;;  %v24151_v2 = vld [vmem:[#allocation89_spill] sm:$0xff] }
 0x27a   : > { %v19380_v55 = vpop.permute.xlu1 %2543  ;;  %v3168_v29 = vld [vmem:[#allocation3 + $0x31] sm:$0xff]  ;;  %v789_v26 = vmul.f32 %v19374_v45, %v24135_v21  ;;  %v788_v0 = vmul.f32 %v19374_v45, %v24136_v7  ;;  %2613 = vperm.xlu1 %17680, %v12547_v59   ;;  %v1345_v21 = vadd.f32 %v1313_v27, %v1081_v50  ;;  %v24145_v7 = vld [vmem:[#allocation71_spill] sm:$0xff]  ;;  %v19446_v59 = vadd.f32 %v1054_v30, %v790_v12 }
 0x27b   : > { %14856 = vmatmul.mubr.msk.f32.gmra.mrb[2].mxu0 %vm441_vm0, %v3168_v29  ;;  %v1578_v29 = vmul.f32 %v19425_v51, %v24142_v17  ;;  %v1317_v32 = vmul.f32 %v19401_v8, %v24145_v7  ;;  %v19459_v30 = vld [vmem:[%s23884_s1 + $0x5] ss:$0 sm:$0xff]  ;;  %v1346_v17 = vadd.f32 %v1314_v1, %v1082_v23  ;;  %v1579_v63 = vmul.f32 %v19425_v51, %v24151_v2  ;;  %v12580_v1 = vld [vmem:[%s17794_s30 + $0x19a] sm:$0xff] }
 0x27c   : > { %v1085_v54 = vadd.f32 %v1053_v31, %v789_v26  ;;  %v1084_v34 = vadd.f32 %v1052_v41, %v788_v0  ;;  %2608 = vperm.xlu0 %17679, %v12546_v56   ;;  %v24146_v31 = vld [vmem:[#allocation110_spill] sm:$0xff]  ;;  %v1344_v26 = vadd.f32 %v1312_v13, %v1080_v36  ;;  %v24147_v0 = vld [vmem:[#allocation72_spill] sm:$0xff]  ;;  %v24148_v56 = vld [vmem:[#allocation111_spill] sm:$0xff] }
 0x27d   : > { %v1842_v41 = vmul.f32 %v19442_v37, %v24146_v31  ;;  %v1316_v48 = vmul.f32 %v19401_v8, %v24147_v0  ;;  %v1841_v50 = vmul.f32 %v19442_v37, %v24148_v56  ;;  %v1610_v11 = vadd.f32 %v1578_v29, %v1345_v21  ;;  %v24150_v36 = vld [vmem:[#allocation31_spill] sm:$0xff]  ;;  %v19463_v12 = vpop.permute.xlu0 %2294  ;;  %v24152_v29 = vld [vmem:[#allocation42_spill] sm:$0xff]  ;;  %v24153_v0 = vld [vmem:[#allocation112_spill] sm:$0xff] }
 0x27e   : > { %v19414_v4 = vpop.permute.xlu1 %2553  ;;  %v2106_v13 = vmul.f32 %v19459_v30, %v24150_v36  ;;  %2867 = vperm.xlu1 %17680, %v19310_v9   ;;  %v1609_v19 = vadd.f32 %v1577_v10, %v1344_v26  ;;  %v2105_v60 = vmul.f32 %v19459_v30, %v24152_v29  ;;  %v12581_v21 = vld [vmem:[%s17794_s30 + $0x1a2] sm:$0xff]  ;;  %v19472_v7 = vadd.f32 %v1317_v32, %v1085_v54 }
 0x27f   : > { %v1874_v31 = vadd.f32 %v1842_v41, %v1610_v11  ;;  %v1844_v56 = vmul.f32 %v19442_v37, %v24153_v0  ;;  %v19479_v9 = vld [vmem:[%s23884_s1 + $0x6] ss:$0 sm:$0xff]  ;;  %v1348_v10 = vadd.f32 %v1316_v48, %v1084_v34  ;;  %v1612_v41 = vadd.f32 %v1580_v16, %v1347_v24  ;;  %v24155_v36 = vld [vmem:[#allocation32_spill] sm:$0xff] }
 0x280   : > { %2862 = vperm.xlu0 %17679, %v19317_v42   ;;  %v2371_v23 = vmul.f32 %v19479_v9, %v19058_v47  ;;  %v1873_v26 = vadd.f32 %v1841_v50, %v1609_v19  ;;  %v1843_v42 = vmul.f32 %v19442_v37, %v24154_v57  ;;  %v2370_v54 = vmul.f32 %v19479_v9, %v19060_v62  ;;  %v19495_v47 = vld [vmem:[%s23884_s1 + $0x7] ss:$0 sm:$0xff]  ;;  %v24158_v57 = vld [vmem:[#allocation74_spill] sm:$0xff] }
 0x281   : > { %v2138_v11 = vadd.f32 %v2106_v13, %v1874_v31  ;;  %v2108_v2 = vmul.f32 %v19459_v30, %v24155_v36  ;;  %v2635_v34 = vmul.f32 %v19495_v47, %v19295_v33  ;;  %v19499_v48 = vpop.permute.xlu0 %2304  ;;  %v1611_v50 = vadd.f32 %v1579_v63, %v1346_v17  ;;  %v24156_v19 = vld [vmem:[#allocation43_spill] sm:$0xff]  ;;  %v24157_v13 = vld [vmem:[#allocation73_spill] sm:$0xff] }
 0x282   : > { %v19452_v27 = vpop.permute.xlu1 %2299  ;;  %2877 = vperm.xlu1 %17680, %v12581_v21   ;;  %v2137_v62 = vadd.f32 %v2105_v60, %v1873_v26  ;;  %v2107_v24 = vmul.f32 %v19459_v30, %v24156_v19  ;;  %v2634_v16 = vmul.f32 %v19495_v47, %v19297_v28  ;;  %v1319_v29 = vmul.f32 %v19401_v8, %v24157_v13  ;;  %v24161_v13 = vld [vmem:[#allocation100_spill] sm:$0xff] }
 0x283   : > { %v1876_v31 = vadd.f32 %v1844_v56, %v1612_v41  ;;  %v2403_v0 = vadd.f32 %v2371_v23, %v2138_v11  ;;  %v2373_v33 = vmul.f32 %v19479_v9, %v19086_v35  ;;  %v1318_v21 = vmul.f32 %v19401_v8, %v24158_v57  ;;  %v19518_v56 = vld [vmem:[%s23884_s1 + $0x8] ss:$0 sm:$0xff]  ;;  %v24162_v57 = vld [vmem:[#allocation101_spill] sm:$0xff] }
 0x284   : > { %2872 = vperm.xlu0 %17679, %v12580_v1   ;;  %v1875_v17 = vadd.f32 %v1843_v42, %v1611_v50  ;;  %v2402_v63 = vadd.f32 %v2370_v54, %v2137_v62  ;;  %v2372_v60 = vmul.f32 %v19479_v9, %v19088_v52  ;;  %v2637_v1 = vmul.f32 %v19495_v47, %v19327_v38  ;;  %v24160_v62 = vld [vmem:[#allocation99_spill] sm:$0xff] }
 0x285   : > { %v2140_v36 = vadd.f32 %v2108_v2, %v1876_v31  ;;  %v2667_v28 = vadd.f32 %v2635_v34, %v2403_v0  ;;  %v2783_v23 = vpop.permute.xlu0 %2782  ;;  %v2636_v54 = vmul.f32 %v19495_v47, %v19329_v18  ;;  %v1351_v11 = vadd.f32 %v1319_v29, %v19435_v61  ;;  %v24159_v2 = vld [vmem:[#allocation98_spill] sm:$0xff]  ;;  %v19536_v61 = vld [vmem:[%s23885_s2] ss:$0 sm:$0xff] }
 0x286   : > { %v19488_v32 = vpop.permute.xlu1 %2309  ;;  %v2139_v41 = vadd.f32 %v2107_v24, %v1875_v17  ;;  %v2666_v42 = vadd.f32 %v2634_v16, %v2402_v63  ;;  %v2898_v52 = vmul.f32 %v19518_v56, %v2783_v23  ;;  %v1582_v38 = vmul.f32 %v19425_v51, %v24159_v2  ;;  %v24164_v23 = vld [vmem:[#allocation119_spill] sm:$0xff] }
 0x287   : > { %v2405_v34 = vadd.f32 %v2373_v33, %v2140_v36  ;;  %v1581_v19 = vmul.f32 %v19425_v51, %v24160_v62  ;;  %v1584_v31 = vmul.f32 %v19425_v51, %v24161_v13  ;;  %v1583_v18 = vmul.f32 %v19425_v51, %v24162_v57  ;;  %v24166_v57 = vld [vmem:[#allocation10_spill] sm:$0xff] }
 0x288   : > { %v2404_v24 = vadd.f32 %v2372_v60, %v2139_v41  ;;  %v2930_v16 = vadd.f32 %v2898_v52, %v2666_v42  ;;  %v1845_v41 = vmul.f32 %v19442_v37, %v24164_v23  ;;  %v1614_v2 = vadd.f32 %v1582_v38, %v19472_v7  ;;  %v24167_v7 = vld [vmem:[#allocation11_spill] sm:$0xff]  ;;  %v24168_v38 = vld [vmem:[#allocation124_spill] sm:$0xff] }
 0x289   : > { %v2669_v17 = vadd.f32 %v2637_v1, %v2405_v34  ;;  %v2793_v63 = vpop.permute.xlu0 %2792  ;;  %v1613_v34 = vadd.f32 %v1581_v19, %v1348_v10  ;;  %v1847_v10 = vmul.f32 %v19442_v37, %v24167_v7  ;;  %v2109_v19 = vmul.f32 %v19459_v30, %v24168_v38 }
 0x28a   : > { %v2788_v26 = vpop.permute.xlu1 %2787  ;;  %v2668_v36 = vadd.f32 %v2636_v54, %v2404_v24  ;;  %v2969_v60 = vadd.f32 %v19536_v61, %v2930_v16  ;;  %v24165_v54 = vld [vmem:[#allocation123_spill] sm:$0xff] }
 0x28b   : > { %v2899_v35 = vmul.f32 %v19518_v56, %v2788_v26  ;;  %v1350_v26 = vadd.f32 %v1318_v21, %v19446_v59  ;;  %v1616_v59 = vadd.f32 %v1584_v31, %v1351_v11  ;;  %v2110_v24 = vmul.f32 %v19459_v30, %v24165_v54 }
 0x28d   : > { %v2931_v50 = vadd.f32 %v2899_v35, %v2667_v28  ;;  %v2900_v28 = vmul.f32 %v19518_v56, %v2793_v63  ;;  %v24163_v35 = vld [vmem:[#allocation118_spill] sm:$0xff]  ;;  %v1615_v21 = vadd.f32 %v1583_v18, %v1350_v26  ;;  %v1877_v18 = vadd.f32 %v1845_v41, %v1613_v34  ;;  %v24169_v63 = vld [vmem:[#allocation125_spill] sm:$0xff] }
 0x28e   : > { %v2798_v0 = vpop.permute.xlu1 %2797  ;;  %v1846_v1 = vmul.f32 %v19442_v37, %v24163_v35  ;;  %v2112_v26 = vmul.f32 %v19459_v30, %v24169_v63  ;;  %v2638_v34 = vmul.f32 %v19495_v47, %v19382_v43  ;;  %v2640_v43 = vmul.f32 %v19495_v47, %v19429_v53 }
 0x28f   : > { %v2970_v29 = vadd.f32 %v19536_v61, %v2931_v50  ;;  %v2901_v33 = vmul.f32 %v19518_v56, %v2798_v0  ;;  %v3001_v50 = vmax.f32 %v2969_v60, 0.0  ;;  %v2932_v62 = vadd.f32 %v2900_v28, %v2668_v36  ;;  %v19554_v0 = vpop.permute.xlu0 %2314  ;;  %v24170_v36 = vld [vmem:[#allocation126_spill] sm:$0xff] }
 0x290   : > { %v1878_v31 = vadd.f32 %v1846_v1, %v1614_v2  ;;  %v2111_v60 = vmul.f32 %v19459_v30, %v24170_v36  ;;  %v2374_v28 = vmul.f32 %v19479_v9, %v19188_v25  ;;  %v2639_v1 = vmul.f32 %v19495_v47, %v19380_v55 }
 0x291   : > { %v3002_v42 = vmax.f32 %v2970_v29, 0.0  ;;  %v2933_v52 = vadd.f32 %v2901_v33, %v2669_v17  ;;  %v1848_v17 = vmul.f32 %v19442_v37, %v24166_v57  ;;  %3033 = vst.msk [vmem:[#allocation2 + $0x60] sm:$0xff] %vm441_vm0, %v3001_v50  ;;  %v2971_v11 = vadd.f32 %v19536_v61, %v2932_v62 }
 0x292   : > { %v19548_v13 = vpop.permute.xlu1 %2319  ;;  %v2375_v29 = vmul.f32 %v19479_v9, %v19186_v46  ;;  %v2141_v2 = vadd.f32 %v2109_v19, %v1877_v18  ;;  %v2377_v50 = vmul.f32 %v19479_v9, %v19208_v5  ;;  %v2376_v62 = vmul.f32 %v19479_v9, %v19210_v22 }
 0x293   : > { %3034 = vst.msk [vmem:[#allocation2 + $0x68] sm:$0xff] %vm441_vm0, %v3002_v42  ;;  %v2972_v16 = vadd.f32 %v19536_v61, %v2933_v52  ;;  %v3003_v35 = vmax.f32 %v2971_v11, 0.0  ;;  %v2142_v42 = vadd.f32 %v2110_v24, %v1878_v31  ;;  %v19577_v46 = vpop.permute.xlu0 %2324  ;;  %v1880_v41 = vadd.f32 %v1848_v17, %v1616_v59 }
 0x294   : > { %v1879_v52 = vadd.f32 %v1847_v10, %v1615_v21  ;;  %v2406_v24 = vadd.f32 %v2374_v28, %v2141_v2  ;;  %v2641_v59 = vmul.f32 %v19495_v47, %v19414_v4 }
 0x295   : > { %v3004_v33 = vmax.f32 %v2972_v16, 0.0  ;;  %3035 = vst.msk [vmem:[#allocation2 + $0x70] sm:$0xff] %vm441_vm0, %v3003_v35  ;;  %v2407_v25 = vadd.f32 %v2375_v29, %v2142_v42  ;;  %v2144_v55 = vadd.f32 %v2112_v26, %v1880_v41 }
 0x296   : > { %v19572_v23 = vpop.permute.xlu1 %2329  ;;  %v2143_v54 = vadd.f32 %v2111_v60, %v1879_v52  ;;  %v2670_v7 = vadd.f32 %v2638_v34, %v2406_v24 }
 0x297   : > { %3036 = vst.msk [vmem:[#allocation2 + $0x78] sm:$0xff] %vm441_vm0, %v3004_v33  ;;  %v2671_v57 = vadd.f32 %v2639_v1, %v2407_v25  ;;  %v2803_v17 = vpop.permute.xlu0 %2802  ;;  %v2409_v10 = vadd.f32 %v2377_v50, %v2144_v55  ;;  %v24171_v50 = vld [vmem:[#allocation82_spill] sm:$0xff]  ;;  %v24172_v55 = vld [vmem:[#allocation83_spill] sm:$0xff] }
 0x298   : > { %v2902_v5 = vmul.f32 %v19518_v56, %v2803_v17  ;;  %v2408_v38 = vadd.f32 %v2376_v62, %v2143_v54  ;;  %v1057_v62 = vmul.f32 %v19357_v58, %v24171_v50  ;;  %v1056_v54 = vmul.f32 %v19357_v58, %v24172_v55 }
 0x299   : > { %v2673_v29 = vadd.f32 %v2641_v59, %v2409_v10  ;;  %v24176_v10 = vld [vmem:[#allocation107_spill] sm:$0xff] }
 0x29a   : > { %v2808_v16 = vpop.permute.xlu1 %2807  ;;  %v3065_v22 = vld [vmem:[#allocation2 + $0x60] ss:$2 sm:$0xff]  ;;  %v3097_v19 = vld [vmem:[#allocation2 + $0x61] ss:$2 sm:$0xff]  ;;  %v2934_v31 = vadd.f32 %v2902_v5, %v2670_v7  ;;  %v2672_v33 = vadd.f32 %v2640_v43, %v2408_v38  ;;  %v24175_v7 = vld [vmem:[#allocation106_spill] sm:$0xff]  ;;  %v1320_v38 = vmul.f32 %v19401_v8, %v24176_v10 }
 0x29b   : > { %v2903_v21 = vmul.f32 %v19518_v56, %v2808_v16  ;;  %v2813_v36 = vpop.permute.xlu0 %2812  ;;  %v3122_v60 = vmax.f32 %v3065_v22, %v3097_v19  ;;  %v1321_v5 = vmul.f32 %v19401_v8, %v24175_v7  ;;  %v24177_v19 = vld [vmem:[#allocation84_spill] sm:$0xff]  ;;  %v24188_v10 = vld [vmem:[#allocation41_spill] sm:$0xff] }
 0x29c   : > { %v2973_v35 = vadd.f32 %v19536_v61, %v2934_v31  ;;  %v2904_v42 = vmul.f32 %v19518_v56, %v2813_v36  ;;  %v24178_v31 = vld [vmem:[#allocation85_spill] sm:$0xff]  ;;  %v24180_v36 = vld [vmem:[#allocation30_spill] sm:$0xff] }
 0x29d   : > { %v2935_v11 = vadd.f32 %v2903_v21, %v2671_v57  ;;  %v24173_v57 = vld [vmem:[#allocation78_spill] sm:$0xff]  ;;  %v24174_v21 = vld [vmem:[#allocation79_spill] sm:$0xff] }
 0x29e   : > { %v2818_v18 = vpop.permute.xlu1 %2817  ;;  %v3067_v63 = vld [vmem:[#allocation2 + $0x70] ss:$2 sm:$0xff]  ;;  %v3099_v4 = vld [vmem:[#allocation2 + $0x71] ss:$2 sm:$0xff]  ;;  %v3005_v2 = vmax.f32 %v2973_v35, 0.0  ;;  %v2936_v34 = vadd.f32 %v2904_v42, %v2672_v33  ;;  %v793_v59 = vmul.f32 %v19374_v45, %v24173_v57  ;;  %v792_v17 = vmul.f32 %v19374_v45, %v24174_v21  ;;  %v24181_v35 = vld [vmem:[#allocation80_spill] sm:$0xff] }
 0x29f   : > { %v2974_v26 = vadd.f32 %v19536_v61, %v2935_v11  ;;  %v2905_v53 = vmul.f32 %v19518_v56, %v2818_v18  ;;  %v3123_v28 = vmax.f32 %v3067_v63, %v3099_v4  ;;  %v19604_v16 = vpop.permute.xlu0 %2558  ;;  %v1059_v11 = vmul.f32 %v19357_v58, %v24177_v19  ;;  %v24186_v57 = vld [vmem:[#allocation130_spill] sm:$0xff] }
 0x2a0   : > { %3037 = vst.msk [vmem:[#allocation2 + $0x80] sm:$0xff] %vm441_vm0, %v3005_v2  ;;  %v2975_v43 = vadd.f32 %v19536_v61, %v2936_v34  ;;  %v1058_v18 = vmul.f32 %v19357_v58, %v24178_v31  ;;  %v1089_v63 = vadd.f32 %v1057_v62, %v793_v59  ;;  %v1088_v4 = vadd.f32 %v1056_v54, %v792_v17  ;;  %v24184_v34 = vld [vmem:[#allocation109_spill] sm:$0xff]  ;;  %v24187_v17 = vld [vmem:[#allocation12_spill] sm:$0xff] }
 0x2a1   : > { %v3006_v1 = vmax.f32 %v2974_v26, 0.0  ;;  %v2937_v41 = vadd.f32 %v2905_v53, %v2673_v29  ;;  %v3135_v52 = vmax.f32 %v3122_v60, %v3123_v28  ;;  %v24179_v26 = vld [vmem:[#allocation9_spill] sm:$0xff]  ;;  %v1585_v60 = vmul.f32 %v19425_v51, %v24180_v36 }
 0x2a2   : > { %v19596_v25 = vpop.permute.xlu1 %2563  ;;  %v3007_v29 = vmax.f32 %v2975_v43, 0.0  ;;  %v1586_v53 = vmul.f32 %v19425_v51, %v24179_v26  ;;  %v795_v42 = vmul.f32 %v19374_v45, %v24181_v35  ;;  %v1322_v50 = vmul.f32 %v19401_v8, %v24184_v34  ;;  %v24185_v54 = vld [vmem:[#allocation129_spill] sm:$0xff] }
 0x2a3   : > { %3038 = vst.msk [vmem:[#allocation2 + $0x88] sm:$0xff] %vm441_vm0, %v3006_v1  ;;  %v2976_v24 = vadd.f32 %v19536_v61, %v2937_v41  ;;  %3144 = vst.msk [vmem:[#allocation3 + $0x41] sm:$0xff] %vm441_vm0, %v3135_v52  ;;  %v2569_v28 = vpop.permute.xlu0 %2568  ;;  %v24182_v1 = vld [vmem:[#allocation81_spill] sm:$0xff]  ;;  %v24183_v52 = vld [vmem:[#allocation108_spill] sm:$0xff]  ;;  %v1353_v62 = vadd.f32 %v1321_v5, %v1089_v63  ;;  %v1352_v55 = vadd.f32 %v1320_v38, %v1088_v4 }
 0x2a4   : > { %v794_v41 = vmul.f32 %v19374_v45, %v24182_v1  ;;  %v1323_v2 = vmul.f32 %v19401_v8, %v24183_v52  ;;  %3039 = vst.msk [vmem:[#allocation2 + $0x90] sm:$0xff] %vm441_vm0, %v3007_v29  ;;  %v1849_v59 = vmul.f32 %v19442_v37, %v24186_v57  ;;  %v1091_v43 = vadd.f32 %v1059_v11, %v795_v42  ;;  %v24189_v35 = vld [vmem:[#allocation17_spill] sm:$0xff] }
 0x2a5   : > { %v3008_v22 = vmax.f32 %v2976_v24, 0.0  ;;  %v1850_v24 = vmul.f32 %v19442_v37, %v24185_v54  ;;  %v1588_v7 = vmul.f32 %v19425_v51, %v24187_v17  ;;  %v1618_v31 = vadd.f32 %v1586_v53, %v1353_v62 }
 0x2a6   : > { %v2574_v33 = vpop.permute.xlu1 %2573  ;;  %v1090_v21 = vadd.f32 %v1058_v18, %v794_v41  ;;  %v1617_v26 = vadd.f32 %v1585_v60, %v1352_v55  ;;  %v2114_v5 = vmul.f32 %v19459_v30, %v19258_v44  ;;  %v2113_v38 = vmul.f32 %v19459_v30, %v19260_v40  ;;  %v24190_v41 = vld [vmem:[#allocation18_spill] sm:$0xff] }
 0x2a7   : > { %3040 = vst.msk [vmem:[#allocation2 + $0x98] sm:$0xff] %vm441_vm0, %v3008_v22  ;;  %v1587_v22 = vmul.f32 %v19425_v51, %v24188_v10  ;;  %v2579_v29 = vpop.permute.xlu0 %2578  ;;  %v1355_v11 = vadd.f32 %v1323_v2, %v1091_v43  ;;  %v1882_v4 = vadd.f32 %v1850_v24, %v1618_v31  ;;  %v1852_v53 = vmul.f32 %v19442_v37, %v24189_v35 }
 0x2a8   : > { %v1354_v18 = vadd.f32 %v1322_v50, %v1090_v21  ;;  %v1881_v36 = vadd.f32 %v1849_v59, %v1617_v26  ;;  %v2379_v60 = vmul.f32 %v19479_v9, %v19452_v27  ;;  %v1851_v52 = vmul.f32 %v19442_v37, %v24190_v41 }
 0x2a9   : > { %v1620_v1 = vadd.f32 %v1588_v7, %v1355_v11  ;;  %v2378_v2 = vmul.f32 %v19479_v9, %v19463_v12  ;;  %v2146_v50 = vadd.f32 %v2114_v5, %v1882_v4  ;;  %v2116_v55 = vmul.f32 %v19459_v30, %v19275_v3 }
 0x2aa   : > { %v2584_v19 = vpop.permute.xlu1 %2583  ;;  %v19647_v63 = vld [vmem:[#allocation3 + $0x41] sm:$0xff]  ;;  %v1619_v40 = vadd.f32 %v1587_v22, %v1354_v18  ;;  %v2145_v62 = vadd.f32 %v2113_v38, %v1881_v36  ;;  %v2643_v27 = vmul.f32 %v19495_v47, %v19596_v25  ;;  %v2115_v59 = vmul.f32 %v19459_v30, %v19277_v14 }
 0x2ab   : > { %14858 = vmatprep.mubr.msk.f32.mxu0 %vm441_vm0, %v19647_v63  ;;  %v3069_v44 = vld [vmem:[#allocation2 + $0x80] ss:$2 sm:$0xff]  ;;  %v3101_v42 = vld [vmem:[#allocation2 + $0x81] ss:$2 sm:$0xff]  ;;  %v2589_v57 = vpop.permute.xlu0 %2588  ;;  %v2642_v12 = vmul.f32 %v19495_v47, %v19604_v16  ;;  %v1884_v17 = vadd.f32 %v1852_v53, %v1620_v1  ;;  %v2411_v7 = vadd.f32 %v2379_v60, %v2146_v50  ;;  %v2381_v10 = vmul.f32 %v19479_v9, %v19488_v32 }
 0x2ac   : > { %v3124_v43 = vmax.f32 %v3069_v44, %v3101_v42  ;;  %v1883_v3 = vadd.f32 %v1851_v52, %v1619_v40  ;;  %v2410_v22 = vadd.f32 %v2378_v2, %v2145_v62  ;;  %v2380_v31 = vmul.f32 %v19479_v9, %v19499_v48 }
 0x2ad   : > { %v2148_v5 = vadd.f32 %v2116_v55, %v1884_v17  ;;  %v2675_v38 = vadd.f32 %v2643_v27, %v2411_v7  ;;  %v2645_v14 = vmul.f32 %v19495_v47, %v2574_v33  ;;  %v2644_v32 = vmul.f32 %v19495_v47, %v2569_v28 }
 0x2ae   : > { %v2594_v34 = vpop.permute.xlu1 %2593  ;;  %v3071_v54 = vld [vmem:[#allocation2 + $0x90] ss:$2 sm:$0xff]  ;;  %v3103_v24 = vld [vmem:[#allocation2 + $0x91] ss:$2 sm:$0xff]  ;;  %v2147_v16 = vadd.f32 %v2115_v59, %v1883_v3  ;;  %v2674_v4 = vadd.f32 %v2642_v12, %v2410_v22  ;;  %v2383_v48 = vmul.f32 %v19479_v9, %v19548_v13  ;;  %v2382_v33 = vmul.f32 %v19479_v9, %v19554_v0 }
 0x2af   : > { %v3125_v21 = vmax.f32 %v3071_v54, %v3103_v24  ;;  %v2823_v18 = vpop.permute.xlu0 %2822  ;;  %v2413_v35 = vadd.f32 %v2381_v10, %v2148_v5  ;;  %v2647_v40 = vmul.f32 %v19495_v47, %v2584_v19  ;;  %v2646_v50 = vmul.f32 %v19495_v47, %v2579_v29 }
 0x2b0   : > { %v2906_v36 = vmul.f32 %v19518_v56, %v2823_v18  ;;  %v2412_v60 = vadd.f32 %v2380_v31, %v2147_v16  ;;  %v2415_v55 = vadd.f32 %v2383_v48, %v19347_v49  ;;  %v2385_v0 = vmul.f32 %v19479_v9, %v19572_v23 }
 0x2b1   : > { %v3136_v25 = vmax.f32 %v3124_v43, %v3125_v21  ;;  %v2677_v1 = vadd.f32 %v2645_v14, %v2413_v35  ;;  %v2414_v19 = vadd.f32 %v2382_v33, %v19349_v20  ;;  %v2384_v27 = vmul.f32 %v19479_v9, %v19577_v46 }
 0x2b2   : > { %v2828_v26 = vpop.permute.xlu1 %2827  ;;  %v2938_v44 = vadd.f32 %v2906_v36, %v2674_v4  ;;  %v2676_v2 = vadd.f32 %v2644_v32, %v2412_v60  ;;  %v2679_v29 = vadd.f32 %v2647_v40, %v2415_v55  ;;  %v2649_v12 = vmul.f32 %v19495_v47, %v2594_v34 }
 0x2b3   : > { %v2907_v11 = vmul.f32 %v19518_v56, %v2828_v26  ;;  %3145 = vst.msk [vmem:[#allocation3 + $0x51] sm:$0xff] %vm441_vm0, %v3136_v25  ;;  %v2833_v52 = vpop.permute.xlu0 %2832  ;;  %v2678_v10 = vadd.f32 %v2646_v50, %v2414_v19  ;;  %v2648_v20 = vmul.f32 %v19495_v47, %v2589_v57  ;;  %v2417_v34 = vadd.f32 %v2385_v0, %v19367_v6 }
 0x2b4   : > { %v2977_v13 = vadd.f32 %v19536_v61, %v2938_v44  ;;  %v2908_v62 = vmul.f32 %v19518_v56, %v2833_v52  ;;  %v2416_v25 = vadd.f32 %v2384_v27, %v19369_v39 }
 0x2b5   : > { %v2939_v53 = vadd.f32 %v2907_v11, %v2675_v38  ;;  %v2681_v14 = vadd.f32 %v2649_v12, %v2417_v34 }
 0x2b6   : > { %v2838_v42 = vpop.permute.xlu1 %2837  ;;  %v3009_v59 = vmax.f32 %v2977_v13, 0.0  ;;  %v2940_v43 = vadd.f32 %v2908_v62, %v2676_v2  ;;  %v2680_v16 = vadd.f32 %v2648_v20, %v2416_v25  ;;  %v12612_v25 = vld [vmem:[%s23886_s3 + $0x98] sm:$0xff] }
 0x2b7   : > { %v2978_v41 = vadd.f32 %v19536_v61, %v2939_v53  ;;  %v2909_v28 = vmul.f32 %v19518_v56, %v2838_v42  ;;  %v2843_v23 = vpop.permute.xlu0 %2842 }
 0x2b8   : > { %3041 = vst.msk [vmem:[#allocation2 + $0xa0] sm:$0xff] %vm441_vm0, %v3009_v59  ;;  %v2979_v46 = vadd.f32 %v19536_v61, %v2940_v43  ;;  %v2910_v3 = vmul.f32 %v19518_v56, %v2843_v23 }
 0x2b9   : > { %v3010_v54 = vmax.f32 %v2978_v41, 0.0  ;;  %v2941_v24 = vadd.f32 %v2909_v28, %v2677_v1 }
 0x2ba   : > { %v2848_v21 = vpop.permute.xlu1 %2847  ;;  %v19696_v7 = vld [vmem:[#allocation3 + $0x51] sm:$0xff]  ;;  %v3011_v26 = vmax.f32 %v2979_v46, 0.0  ;;  %v2942_v5 = vadd.f32 %v2910_v3, %v2678_v10  ;;  %v3149_v3 = vld [vmem:[#allocation3] sm:$0xff] }
 0x2bb   : > { %3042 = vst.msk [vmem:[#allocation2 + $0xa8] sm:$0xff] %vm441_vm0, %v3010_v54  ;;  %v2980_v49 = vadd.f32 %v19536_v61, %v2941_v24  ;;  %v2911_v17 = vmul.f32 %v19518_v56, %v2848_v21  ;;  %14859 = vmatmul.mubr.msk.f32.gmra.mrb[4].mxu0 %vm441_vm0, %v19696_v7  ;;  %v2853_v18 = vpop.permute.xlu0 %2852 }
 0x2bc   : > { %3043 = vst.msk [vmem:[#allocation2 + $0xb0] sm:$0xff] %vm441_vm0, %v3011_v26  ;;  %v2981_v6 = vadd.f32 %v19536_v61, %v2942_v5  ;;  %v2912_v4 = vmul.f32 %v19518_v56, %v2853_v18  ;;  %v19777_v18 = vld [vmem:[#allocation3 + $0x20] sm:$0xff] }
 0x2bd   : > { %v3012_v22 = vmax.f32 %v2980_v49, 0.0  ;;  %v2943_v31 = vadd.f32 %v2911_v17, %v2679_v29 }
 0x2be   : > { %v2858_v38 = vpop.permute.xlu1 %2857  ;;  %v3013_v36 = vmax.f32 %v2981_v6, 0.0  ;;  %v2944_v35 = vadd.f32 %v2912_v4, %v2680_v16 }
 0x2bf   : > { %3044 = vst.msk [vmem:[#allocation2 + $0xb8] sm:$0xff] %vm441_vm0, %v3012_v22  ;;  %v2982_v57 = vadd.f32 %v19536_v61, %v2943_v31  ;;  %v2913_v11 = vmul.f32 %v19518_v56, %v2858_v38  ;;  %v19716_v60 = vpop.permute.xlu0 %748  ;;  %v12611_v31 = vld [vmem:[%s23886_s3 + $0x90] sm:$0xff] }
 0x2c0   : > { %3045 = vst.msk [vmem:[#allocation2 + $0xc0] sm:$0xff] %vm441_vm0, %v3013_v36  ;;  %v2983_v33 = vadd.f32 %v19536_v61, %v2944_v35  ;;  %v16096_v5 = vpack.c.bf16 %v12612_v25, %v12611_v31  ;;  %v12616_v36 = vld [vmem:[%s23886_s3 + $0xb8] sm:$0xff]  ;;  %v12643_v31 = vld [vmem:[%s23886_s3 + $0x110] sm:$0xff] }
 0x2c1   : > { %v3014_v32 = vmax.f32 %v2982_v57, 0.0  ;;  %v2945_v39 = vadd.f32 %v2913_v11, %v2681_v14  ;;  %v19767_v14 = vld [vmem:[#allocation3 + $0x10] sm:$0xff]  ;;  %v12613_v57 = vld [vmem:[%s23886_s3 + $0xa0] sm:$0xff]  ;;  %v12614_v11 = vld [vmem:[%s23886_s3 + $0xa8] sm:$0xff] }
 0x2c2   : > { %v19712_v48 = vpop.permute.xlu1 %753  ;;  %v3073_v44 = vld [vmem:[#allocation2 + $0xa0] ss:$2 sm:$0xff]  ;;  %v3105_v42 = vld [vmem:[#allocation2 + $0xa1] ss:$2 sm:$0xff]  ;;  %v3015_v40 = vmax.f32 %v2983_v33, 0.0  ;;  %v16100_v6 = vpack.c.bf16 %v12614_v11, %v12613_v57  ;;  %v12644_v57 = vld [vmem:[%s23886_s3 + $0x118] sm:$0xff] }
 0x2c3   : > { %3046 = vst.msk [vmem:[#allocation2 + $0xc8] sm:$0xff] %vm441_vm0, %v3014_v32  ;;  %v2984_v53 = vadd.f32 %v19536_v61, %v2945_v39  ;;  %v19723_v2 = vpop.permute.xlu0 %758  ;;  %v3126_v50 = vmax.f32 %v3073_v44, %v3105_v42  ;;  %v19786_v32 = vld [vmem:[#allocation3 + $0x30] sm:$0xff]  ;;  %v12625_v42 = vld [vmem:[%s23886_s3 + $0xc0] sm:$0xff] }
 0x2c4   : > { %3047 = vst.msk [vmem:[#allocation2 + $0xd0] sm:$0xff] %vm441_vm0, %v3015_v40  ;;  %v12615_v39 = vld [vmem:[%s23886_s3 + $0xb0] sm:$0xff]  ;;  %v12645_v11 = vld [vmem:[%s23886_s3 + $0x120] sm:$0xff] }
 0x2c5   : > { %v3016_v1 = vmax.f32 %v2984_v53, 0.0  ;;  %v16104_v53 = vpack.c.bf16 %v12616_v36, %v12615_v39  ;;  %v19804_v44 = vld [vmem:[#allocation3 + $0x50] sm:$0xff] }
 0x2c6   : > { %v19720_v41 = vpop.permute.xlu1 %763  ;;  %v3075_v28 = vld [vmem:[#allocation2 + $0xb0] ss:$2 sm:$0xff]  ;;  %v3107_v52 = vld [vmem:[#allocation2 + $0xb1] ss:$2 sm:$0xff] }
 0x2c7   : > { %3048 = vst.msk [vmem:[#allocation2 + $0xd8] sm:$0xff] %vm441_vm0, %v3016_v1  ;;  %v3127_v13 = vmax.f32 %v3075_v28, %v3107_v52  ;;  %v19728_v0 = vpop.permute.xlu0 %1012  ;;  %v12626_v1 = vld [vmem:[%s23886_s3 + $0xc8] sm:$0xff]  ;;  %v19867_v36 = vld [vmem:[#allocation3 + $0x12] sm:$0xff] }
 0x2c8   : > { %v3440_v52 = vld [vmem:[#allocation3 + $0x2] sm:$0xff] }
 0x2c9   : > { %v3137_v62 = vmax.f32 %v3126_v50, %v3127_v13  ;;  %v16108_v50 = vpack.c.bf16 %v12626_v1, %v12625_v42  ;;  %v12627_v13 = vld [vmem:[%s23886_s3 + $0xd0] sm:$0xff]  ;;  %v1064_v1 = vmul.f32 %v19357_v58, %v19728_v0  ;;  %v801_v0 = vmul.f32 %v19374_v45, %v19712_v48 }
 0x2ca   : > { %v19726_v55 = vpop.permute.xlu1 %1017  ;;  %v3077_v54 = vld [vmem:[#allocation2 + $0xc0] ss:$2 sm:$0xff]  ;;  %v3109_v24 = vld [vmem:[#allocation2 + $0xc1] ss:$2 sm:$0xff] }
 0x2cb   : > { %3146 = vst.msk [vmem:[#allocation3 + $0x61] sm:$0xff] %vm441_vm0, %v3137_v62  ;;  %v19733_v43 = vpop.permute.xlu0 %1022  ;;  %v3128_v21 = vmax.f32 %v3077_v54, %v3109_v24  ;;  %v12628_v24 = vld [vmem:[%s23886_s3 + $0xd8] sm:$0xff]  ;;  %v1065_v42 = vmul.f32 %v19357_v58, %v19726_v55  ;;  %v19887_v55 = vpack.c.bf16 %v12644_v57, %v12643_v31 }
 0x2ce   : > { %v19731_v19 = vpop.permute.xlu1 %1027  ;;  %v3079_v27 = vld [vmem:[#allocation2 + $0xd0] ss:$2 sm:$0xff]  ;;  %v3111_v59 = vld [vmem:[#allocation2 + $0xd1] ss:$2 sm:$0xff] }
 0x2cf   : > { %v3129_v29 = vmax.f32 %v3079_v27, %v3111_v59  ;;  %v19737_v17 = vpop.permute.xlu0 %1276  ;;  %v12629_v27 = vld [vmem:[%s23886_s3 + $0xe0] sm:$0xff]  ;;  %v12630_v59 = vld [vmem:[%s23886_s3 + $0xe8] sm:$0xff] }
 0x2d0   : > { %v1328_v48 = vmul.f32 %v19401_v8, %v19737_v17  ;;  %v12722_v17 = vld [vmem:[%s23888_s5 + $0x100] sm:$0xff] }
 0x2d1   : > { %v3138_v12 = vmax.f32 %v3128_v21, %v3129_v29  ;;  %v12631_v21 = vld [vmem:[%s23886_s3 + $0xf0] sm:$0xff]  ;;  %v12632_v29 = vld [vmem:[%s23886_s3 + $0xf8] sm:$0xff] }
 0x2d2   : > { %v19735_v49 = vpop.permute.xlu1 %1281  ;;  %v19739_v23 = vld [vmem:[#allocation3 + $0x61] sm:$0xff] }
 0x2d3   : > { %3147 = vst.msk [vmem:[#allocation3 + $0x71] sm:$0xff] %vm441_vm0, %v3138_v12  ;;  %14861 = vmatprep.mubr.msk.f32.mxu0 %vm441_vm0, %v19739_v23  ;;  %v19746_v20 = vpop.permute.xlu0 %1286  ;;  %v19814_v40 = vld [vmem:[#allocation3 + $0x60] sm:$0xff] }
 0x2d4   : > { %v12641_v12 = vld [vmem:[%s23886_s3 + $0x100] sm:$0xff] }
 0x2d6   : > { %v19744_v10 = vpop.permute.xlu1 %1291 }
 0x2d7   : > { %v19750_v34 = vpop.permute.xlu0 %1541 }
 0x2da   : > { %v19748_v46 = vpop.permute.xlu1 %1546  ;;  %v19752_v22 = vld [vmem:[#allocation3 + $0x71] sm:$0xff] }
 0x2db   : > { %14862 = vmatmul.mubr.msk.f32.gmra.mrb[6].mxu0 %vm441_vm0, %v19752_v22  ;;  %v19765_v38 = vpop.permute.xlu0 %1551  ;;  %v19825_v54 = vld [vmem:[#allocation3 + $0x70] sm:$0xff] }
 0x2dc   : > { %14880 = vmatprep.mubr.msk.f32.mxu0 %vm441_vm0, %v3149_v3  ;;  %v12642_v3 = vld [vmem:[%s23886_s3 + $0x108] sm:$0xff] }
 0x2de   : > { %v19763_v26 = vpop.permute.xlu1 %1556 }
 0x2df   : > { %14881 = vmatmul.mubr.msk.f32.vlgmr.msra.gmra.mrb[0].mxu0 %vm441_vm0, %v19767_v14  ;;  %v19784_v4 = vpop.permute.xlu0 %1805 }
 0x2e0   : > { %14883 = vmatprep.mubr.msk.f32.mxu0 %vm441_vm0, %v19777_v18  ;;  %16095 = vmatpush3.bf16.msra.mxu0 %v19249_v15  ;;  %v19796_v15 = vld [vmem:[#allocation3 + $0x40] sm:$0xff] }
 0x2e1   : > { %16097 = vmatprep.subr.bf16.mxu0 %v16096_v5 }
 0x2e2   : > { %v19782_v16 = vpop.permute.xlu1 %1810 }
 0x2e3   : > { %14884 = vmatmul.mubr.msk.f32.gmra.mrb[2].mxu0 %vm441_vm0, %v19786_v32  ;;  %v19802_v33 = vpop.permute.xlu0 %1815 }
 0x2e4   : > { %14886 = vmatprep.mubr.msk.f32.mxu0 %vm441_vm0, %v19796_v15  ;;  %16099 = vmatpush3.bf16.msra.mxu0 %v16096_v5  ;;  %v16112_v5 = vpack.c.bf16 %v12628_v24, %v12627_v13  ;;  %v19879_v13 = vld [vmem:[#allocation3 + $0x22] sm:$0xff]  ;;  %v19881_v24 = vpack.c.bf16 %v12632_v29, %v12631_v21  ;;  %v803_v21 = vmul.f32 %v19374_v45, %v19720_v41  ;;  %v19911_v41 = vld [vmem:[#allocation3 + $0x32] sm:$0xff] }
 0x2e5   : > { %16101 = vmatprep.subr.bf16.mxu0 %v16100_v6  ;;  %24191 = vst [vmem:[#allocation13_spill] sm:$0xff] %v19879_v13  ;;  %v1066_v29 = vmul.f32 %v19357_v58, %v19733_v43  ;;  %v1097_v43 = vadd.f32 %v1065_v42, %v801_v0  ;;  %v12726_v0 = vld [vmem:[%s23888_s5 + $0x120] sm:$0xff] }
 0x2e6   : > { %v19800_v35 = vpop.permute.xlu1 %1820 }
 0x2e7   : > { %14887 = vmatmul.mubr.msk.f32.gmra.mrb[4].mxu0 %vm441_vm0, %v19804_v44  ;;  %v19823_v62 = vpop.permute.xlu0 %2069 }
 0x2e8   : > { %14889 = vmatprep.mubr.msk.f32.mxu0 %vm441_vm0, %v19814_v40  ;;  %16103 = vmatpush3.bf16.msra.mxu0 %v16100_v6  ;;  %v12646_v6 = vld [vmem:[%s23886_s3 + $0x128] sm:$0xff] }
 0x2e9   : > { %16105 = vmatprep.subr.bf16.mxu0 %v16104_v53 }
 0x2ea   : > { %v19818_v28 = vpop.permute.xlu1 %2074 }
 0x2eb   : > { %14890 = vmatmul.mubr.msk.f32.gmra.mrb[6].mxu0 %vm441_vm0, %v19825_v54  ;;  %v19865_v39 = vpop.permute.xlu0 %2079 }
 0x2ec   : > { %16107 = vmatpush3.bf16.msra.mxu0 %v16104_v53  ;;  %14908 = vmatprep.mubr.msk.f32.mxu0 %vm441_vm0, %v3440_v52  ;;  %v19869_v53 = vpack.c.bf16 %v12630_v59, %v12629_v27  ;;  %v1067_v52 = vmul.f32 %v19357_v58, %v19731_v19  ;;  %v19885_v27 = vpack.c.bf16 %v12642_v3, %v12641_v12  ;;  %v19913_v58 = vld [vmem:[#allocation3 + $0x42] sm:$0xff] }
 0x2ed   : > { %16109 = vmatprep.subr.bf16.mxu0 %v16108_v50  ;;  %v19889_v59 = vpack.c.bf16 %v12646_v6, %v12645_v11  ;;  %v800_v19 = vmul.f32 %v19374_v45, %v19716_v60  ;;  %v1329_v12 = vmul.f32 %v19401_v8, %v19735_v49  ;;  %v1331_v60 = vmul.f32 %v19401_v8, %v19744_v10  ;;  %v12725_v49 = vld [vmem:[%s23888_s5 + $0x118] sm:$0xff]  ;;  %v12724_v11 = vld [vmem:[%s23888_s5 + $0x110] sm:$0xff]  ;;  %v12727_v6 = vld [vmem:[%s23888_s5 + $0x128] sm:$0xff] }
 0x2ee   : > { %v19854_v25 = vpop.permute.xlu1 %2084  ;;  %v1099_v57 = vadd.f32 %v1067_v52, %v803_v21  ;;  %v1594_v10 = vmul.f32 %v19425_v51, %v19748_v46  ;;  %v12729_v46 = vld [vmem:[%s23888_s5 + $0x138] sm:$0xff] }
 0x2ef   : > { %14909 = vmatmul.mubr.msk.f32.vlgmr.msra.gmra.mrb[0].mxu0 %vm441_vm0, %v19867_v36  ;;  %v19909_v3 = vpop.permute.xlu0 %2334  ;;  %v1096_v31 = vadd.f32 %v1064_v1, %v800_v19  ;;  %v16208_v52 = vpack.c.bf16 %v12729_v46, %v12727_v6  ;;  %v12728_v19 = vld [vmem:[%s23888_s5 + $0x130] sm:$0xff]  ;;  %v1361_v21 = vadd.f32 %v1329_v12, %v1097_v43  ;;  %v1858_v12 = vmul.f32 %v19442_v37, %v19782_v16  ;;  %v12730_v16 = vld [vmem:[%s23888_s5 + $0x140] sm:$0xff] }
 0x2f0   : > { %14911 = vmatprep.mubr.msk.f32.mxu0 %vm441_vm0, %v19879_v13  ;;  %16111 = vmatpush3.bf16.msra.mxu0 %v16108_v50  ;;  %v802_v50 = vmul.f32 %v19374_v45, %v19723_v2  ;;  %v1330_v45 = vmul.f32 %v19401_v8, %v19746_v20  ;;  %v12723_v2 = vld [vmem:[%s23888_s5 + $0x108] sm:$0xff]  ;;  %v1593_v8 = vmul.f32 %v19425_v51, %v19750_v34 }
 0x2f1   : > { %16113 = vmatprep.subr.bf16.mxu0 %v16112_v5  ;;  %v16204_v20 = vpack.c.bf16 %v12725_v49, %v12723_v2  ;;  %v1596_v34 = vmul.f32 %v19425_v51, %v19763_v26  ;;  %v1360_v2 = vadd.f32 %v1328_v48, %v1096_v31  ;;  %v1595_v26 = vmul.f32 %v19425_v51, %v19765_v38  ;;  %v19958_v49 = vld [vmem:[#allocation3 + $0x52] sm:$0xff]  ;;  %v19970_v51 = vld [vmem:[#allocation3 + $0x62] sm:$0xff] }
 0x2f2   : > { %v19899_v13 = vpop.permute.xlu1 %2339  ;;  %v1098_v42 = vadd.f32 %v1066_v29, %v802_v50  ;;  %v1363_v29 = vadd.f32 %v1331_v60, %v1099_v57  ;;  %v16210_v38 = vpack.c.bf16 %v12728_v19, %v12726_v0  ;;  %v1626_v48 = vadd.f32 %v1594_v10, %v1361_v21  ;;  %v12732_v31 = vld [vmem:[%s23888_s5 + $0x150] sm:$0xff] }
 0x2f3   : > { %14912 = vmatmul.mubr.msk.f32.gmra.mrb[2].mxu0 %vm441_vm0, %v19911_v41  ;;  %v19956_v50 = vpop.permute.xlu0 %2344  ;;  %16205 = vmatprep.subr.bf16.mxu1 %v16204_v20  ;;  %v1625_v60 = vadd.f32 %v1593_v8, %v1360_v2  ;;  %v1857_v43 = vmul.f32 %v19442_v37, %v19784_v4  ;;  %v2122_v20 = vmul.f32 %v19459_v30, %v19818_v28  ;;  %v12736_v19 = vld [vmem:[%s23888_s5 + $0x170] sm:$0xff] }
 0x2f4   : > { %14914 = vmatprep.mubr.msk.f32.mxu0 %vm441_vm0, %v19913_v58  ;;  %16115 = vmatpush3.bf16.msra.mxu0 %v16112_v5  ;;  %v16206_v5 = vpack.c.bf16 %v12724_v11, %v12722_v17  ;;  %v12731_v17 = vld [vmem:[%s23888_s5 + $0x148] sm:$0xff]  ;;  %v12733_v11 = vld [vmem:[%s23888_s5 + $0x158] sm:$0xff]  ;;  %v1362_v6 = vadd.f32 %v1330_v45, %v1098_v42  ;;  %v1628_v57 = vadd.f32 %v1596_v34, %v1363_v29 }
 0x2f5   : > { %16117 = vmatprep.subr.bf16.mxu0 %v19869_v53  ;;  %v1860_v45 = vmul.f32 %v19442_v37, %v19800_v35  ;;  %v16212_v4 = vpack.c.bf16 %v12733_v11, %v12731_v17  ;;  %v2121_v46 = vmul.f32 %v19459_v30, %v19823_v62  ;;  %v19992_v34 = vld [vmem:[#allocation3 + $0x72] sm:$0xff]  ;;  %v12735_v35 = vld [vmem:[%s23888_s5 + $0x168] sm:$0xff]  ;;  %v1889_v28 = vadd.f32 %v1857_v43, %v1625_v60 }
 0x2f6   : > { %v19945_v1 = vpop.permute.xlu1 %2349  ;;  %16207 = vmatpush1.bf16.msra.mxu1 %v16206_v5  ;;  %v1627_v8 = vadd.f32 %v1595_v26, %v1362_v6  ;;  %v12737_v5 = vld [vmem:[%s23888_s5 + $0x178] sm:$0xff]  ;;  %v2123_v62 = vmul.f32 %v19459_v30, %v19865_v39  ;;  %v2387_v0 = vmul.f32 %v19479_v9, %v19899_v13  ;;  %v12739_v17 = vld [vmem:[%s23888_s5 + $0x188] sm:$0xff] }
 0x2f7   : > { %14915 = vmatmul.mubr.msk.f32.gmra.mrb[4].mxu0 %vm441_vm0, %v19958_v49  ;;  %16209 = vmatprep.subr.bf16.mxu1 %v16208_v52  ;;  %v2599_v42 = vpop.permute.xlu0 %2598  ;;  %v1890_v52 = vadd.f32 %v1858_v12, %v1626_v48  ;;  %v1892_v21 = vadd.f32 %v1860_v45, %v1628_v57  ;;  %v16216_v13 = vpack.c.bf16 %v12737_v5, %v12735_v35  ;;  %v12741_v11 = vld [vmem:[%s23888_s5 + $0x198] sm:$0xff]  ;;  %v12740_v48 = vld [vmem:[%s23888_s5 + $0x190] sm:$0xff] }
 0x2f8   : > { %14917 = vmatprep.mubr.msk.f32.mxu0 %vm441_vm0, %v19970_v51  ;;  %16119 = vmatpush3.bf16.msra.mxu0 %v19869_v53  ;;  %v1859_v53 = vmul.f32 %v19442_v37, %v19802_v33  ;;  %v2124_v37 = vmul.f32 %v19459_v30, %v19854_v25  ;;  %v16214_v33 = vpack.c.bf16 %v12732_v31, %v12730_v16  ;;  %v12734_v25 = vld [vmem:[%s23888_s5 + $0x160] sm:$0xff] }
 0x2f9   : > { %16121 = vmatprep.subr.bf16.mxu0 %v19881_v24  ;;  %v2386_v30 = vmul.f32 %v19479_v9, %v19909_v3  ;;  %v2154_v2 = vadd.f32 %v2122_v20, %v1890_v52  ;;  %v2650_v6 = vmul.f32 %v19495_v47, %v2599_v42  ;;  %v16218_v12 = vpack.c.bf16 %v12736_v19, %v12734_v25  ;;  %v12742_v52 = vld [vmem:[%s23888_s5 + $0x1a0] sm:$0xff] }
 0x2fa   : > { %v2604_v10 = vpop.permute.xlu1 %2603  ;;  %16211 = vmatpush1.bf16.msra.mxu1 %v16210_v38  ;;  %v2156_v3 = vadd.f32 %v2124_v37, %v1892_v21  ;;  %v12738_v38 = vld [vmem:[%s23888_s5 + $0x180] sm:$0xff]  ;;  %v2389_v16 = vmul.f32 %v19479_v9, %v19945_v1  ;;  %v2388_v57 = vmul.f32 %v19479_v9, %v19956_v50  ;;  %v12648_v1 = vld [vmem:[%s23886_s3 + $0x138] sm:$0xff]  ;;  %v12743_v50 = vld [vmem:[%s23888_s5 + $0x1a8] sm:$0xff] }
 0x2fb   : > { %14918 = vmatmul.mubr.msk.f32.gmra.mrb[6].mxu0 %vm441_vm0, %v19992_v34  ;;  %16213 = vmatprep.subr.bf16.mxu1 %v16212_v4  ;;  %v2651_v29 = vmul.f32 %v19495_v47, %v2604_v10  ;;  %v2609_v26 = vpop.permute.xlu0 %2608  ;;  %v2419_v43 = vadd.f32 %v2387_v0, %v2154_v2  ;;  %v12647_v10 = vld [vmem:[%s23886_s3 + $0x130] sm:$0xff]  ;;  %v16220_v4 = vpack.c.bf16 %v12741_v11, %v12739_v17  ;;  %v12747_v21 = vld [vmem:[%s23888_s5 + $0x1c8] sm:$0xff]  ;;  %v12657_v2 = vld [vmem:[%s23886_s3 + $0x140] sm:$0xff] }
 0x2fc   : > { %16123 = vmatpush3.bf16.msra.mxu0 %v19881_v24  ;;  %14936 = vmatprep.mubr.msk.f32.mxu0 %vm441_vm0, %v19767_v14  ;;  %v1891_v24 = vadd.f32 %v1859_v53, %v1627_v8  ;;  %v2153_v14 = vadd.f32 %v2121_v46, %v1889_v28  ;;  %v16222_v9 = vpack.c.bf16 %v12740_v48, %v12738_v38  ;;  %v12745_v46 = vld [vmem:[%s23888_s5 + $0x1b8] sm:$0xff]  ;;  %v12744_v37 = vld [vmem:[%s23888_s5 + $0x1b0] sm:$0xff]  ;;  %v17691_v11 = vld [vmem:[%s23884_s1 + $0x8] ss:$0 sm:$0xff] }
 0x2fd   : > { %16125 = vmatprep.subr.bf16.mxu0 %v19885_v27  ;;  %v2683_v8 = vadd.f32 %v2651_v29, %v2419_v43  ;;  %v2652_v35 = vmul.f32 %v19495_v47, %v2609_v26  ;;  %v16224_v19 = vpack.c.bf16 %v12745_v46, %v12743_v50  ;;  %v16226_v29 = vpack.c.bf16 %v12744_v37, %v12742_v52  ;;  %v12748_v38 = vld [vmem:[%s23888_s5 + $0x1d0] sm:$0xff]  ;;  %v20120_v52 = vld [vmem:[#allocation3 + $0x21] sm:$0xff] }
 0x2fe   : > { %v2614_v39 = vpop.permute.xlu1 %2613  ;;  %16215 = vmatpush1.bf16.msra.mxu1 %v16214_v33  ;;  %v2155_v60 = vadd.f32 %v2123_v62, %v1891_v24  ;;  %v2418_v31 = vadd.f32 %v2386_v30, %v2153_v14  ;;  %v2421_v33 = vadd.f32 %v2389_v16, %v2156_v3  ;;  %v12749_v30 = vld [vmem:[%s23888_s5 + $0x1d8] sm:$0xff]  ;;  %v12658_v14 = vld [vmem:[%s23886_s3 + $0x148] sm:$0xff]  ;;  %v12659_v46 = vld [vmem:[%s23886_s3 + $0x150] sm:$0xff] }
 0x2ff   : > { %14937 = vmatmul.mubr.msk.f32.vlgmr.msra.gmra.mrb[0].mxu0 %vm441_vm0, %v19777_v18  ;;  %16217 = vmatprep.subr.bf16.mxu1 %v16216_v13  ;;  %v2863_v20 = vpop.permute.xlu0 %2862  ;;  %v16140_v43 = vpack.c.bf16 %v12658_v14, %v12657_v2  ;;  %v12661_v37 = vld [vmem:[%s23886_s3 + $0x160] sm:$0xff]  ;;  %v12678_v14 = vld [vmem:[%s23886_s3 + $0x1a8] sm:$0xff] }
 0x300   : > { %14939 = vmatprep.mubr.msk.f32.mxu0 %vm441_vm0, %v19786_v32  ;;  %16127 = vmatpush3.bf16.msra.mxu0 %v19885_v27  ;;  %v2653_v27 = vmul.f32 %v19495_v47, %v2614_v39  ;;  %v2682_v42 = vadd.f32 %v2650_v6, %v2418_v31  ;;  %v2914_v5 = vmul.f32 %v19518_v56, %v2863_v20  ;;  %v12677_v2 = vld [vmem:[%s23886_s3 + $0x1a0] sm:$0xff] }
 0x301   : > { %16129 = vmatprep.subr.bf16.mxu0 %v19887_v55  ;;  %v16136_v47 = vpack.c.bf16 %v12648_v1, %v12647_v10  ;;  %v2420_v62 = vadd.f32 %v2388_v57, %v2155_v60 }
 0x302   : > { %v2868_v45 = vpop.permute.xlu1 %2867  ;;  %16219 = vmatpush1.bf16.msra.mxu1 %v16218_v12  ;;  %v2946_v0 = vadd.f32 %v2914_v5, %v2682_v42  ;;  %v2685_v39 = vadd.f32 %v2653_v27, %v2421_v33  ;;  %v16228_v12 = vpack.c.bf16 %v12749_v30, %v12747_v21  ;;  %v12660_v42 = vld [vmem:[%s23886_s3 + $0x158] sm:$0xff]  ;;  %v12662_v33 = vld [vmem:[%s23886_s3 + $0x168] sm:$0xff] }
 0x303   : > { %v2915_v53 = vmul.f32 %v19518_v56, %v2868_v45  ;;  %14940 = vmatmul.mubr.msk.f32.gmra.mrb[2].mxu0 %vm441_vm0, %v19796_v15  ;;  %16221 = vmatprep.subr.bf16.mxu1 %v16220_v4  ;;  %v2873_v24 = vpop.permute.xlu0 %2872  ;;  %v2684_v26 = vadd.f32 %v2652_v35, %v2420_v62  ;;  %v3748_v35 = vld [vmem:[#allocation3 + $0x11] sm:$0xff]  ;;  %v16144_v5 = vpack.c.bf16 %v12660_v42, %v12659_v46  ;;  %v12674_v21 = vld [vmem:[%s23886_s3 + $0x188] sm:$0xff]  ;;  %v4602_v46 = vld [vmem:[%s23888_s5] sm:$0xff] }
 0x304   : > { %14942 = vmatprep.mubr.msk.f32.mxu0 %vm441_vm0, %v19804_v44  ;;  %16131 = vmatpush3.bf16.msra.mxu0 %v19887_v55  ;;  %v2985_v17 = vadd.f32 %v19536_v61, %v2946_v0  ;;  %v2916_v3 = vmul.f32 %v17691_v11, %v2873_v24  ;;  %v12663_v62 = vld [vmem:[%s23886_s3 + $0x170] sm:$0xff]  ;;  %v12664_v0 = vld [vmem:[%s23886_s3 + $0x178] sm:$0xff] }
 0x305   : > { %v2947_v28 = vadd.f32 %v2915_v53, %v2683_v8  ;;  %16133 = vmatprep.subr.bf16.mxu0 %v19889_v59  ;;  %v4604_v42 = vld [vmem:[%s23888_s5 + $0x10] sm:$0xff] }
 0x306   : > { %v2878_v25 = vpop.permute.xlu1 %2877  ;;  %16223 = vmatpush1.bf16.msra.mxu1 %v16222_v9  ;;  %v3017_v48 = vmax.f32 %v2985_v17, 0.0  ;;  %v2948_v60 = vadd.f32 %v2916_v3, %v2684_v26  ;;  %v16164_v26 = vpack.c.bf16 %v12678_v14, %v12677_v2  ;;  %v12680_v17 = vld [vmem:[%s23886_s3 + $0x1b8] sm:$0xff]  ;;  %v12689_v3 = vld [vmem:[%s23886_s3 + $0x1c0] sm:$0xff] }
 0x307   : > { %v2986_v13 = vadd.f32 %v19536_v61, %v2947_v28  ;;  %v2917_v55 = vmul.f32 %v19518_v56, %v2878_v25  ;;  %14943 = vmatmul.mubr.msk.f32.gmra.mrb[4].mxu0 %vm441_vm0, %v19814_v40  ;;  %v12746_v61 = vld [vmem:[%s23888_s5 + $0x1c0] sm:$0xff]  ;;  %16225 = vmatprep.subr.bf16.mxu1 %v16224_v19  ;;  %v17693_v28 = vld [vmem:[#allocation3 + $0x31] sm:$0xff]  ;;  %v16152_v25 = vpack.c.bf16 %v12664_v0, %v12663_v62 }
 0x308   : > { %14945 = vmatprep.mubr.msk.f32.mxu0 %vm441_vm0, %v19825_v54  ;;  %16135 = vmatpush3.bf16.msra.mxu0 %v19889_v59  ;;  %v17692_v59 = vld [vmem:[%s23885_s2] ss:$0 sm:$0xff]  ;;  %3049 = vst.msk [vmem:[#allocation2 + $0xe0] sm:$0xff] %vm441_vm0, %v3017_v48  ;;  %v16230_v57 = vpack.c.bf16 %v12748_v38, %v12746_v61  ;;  %v12691_v61 = vld [vmem:[%s23886_s3 + $0x1d0] sm:$0xff]  ;;  %v12692_v38 = vld [vmem:[%s23886_s3 + $0x1d8] sm:$0xff] }
 0x309   : > { %v3018_v56 = vmax.f32 %v2986_v13, 0.0  ;;  %v2949_v6 = vadd.f32 %v2917_v55, %v2685_v39  ;;  %16137 = vmatprep.subr.bf16.mxu0 %v16136_v47  ;;  %v2987_v31 = vadd.f32 %v17692_v59, %v2948_v60  ;;  %v12673_v19 = vld [vmem:[%s23886_s3 + $0x180] sm:$0xff]  ;;  %v12675_v13 = vld [vmem:[%s23886_s3 + $0x190] sm:$0xff]  ;;  %v12676_v55 = vld [vmem:[%s23886_s3 + $0x198] sm:$0xff]  ;;  %v16176_v48 = vpack.c.bf16 %v12692_v38, %v12691_v61 }
 0x30a   : > { %16227 = vmatpush1.bf16.msra.mxu1 %v16226_v29  ;;  %v16156_v30 = vpack.c.bf16 %v12674_v21, %v12673_v19  ;;  %v16160_v24 = vpack.c.bf16 %v12676_v55, %v12675_v13  ;;  %v24192_v29 = vld [vmem:[#allocation13_spill] sm:$0xff]  ;;  %v12693_v60 = vld [vmem:[%s23886_s3 + $0x1e0] sm:$0xff]  ;;  %v4613_v19 = vld [vmem:[%s23888_s5 + $0x58] sm:$0xff] }
 0x30b   : > { %3050 = vst.msk [vmem:[#allocation2 + $0xe8] sm:$0xff] %vm441_vm0, %v3018_v56  ;;  %v2988_v16 = vadd.f32 %v17692_v59, %v2949_v6  ;;  %16229 = vmatprep.subr.bf16.mxu1 %v16228_v12  ;;  %v3019_v10 = vmax.f32 %v2987_v31, 0.0  ;;  %v12690_v56 = vld [vmem:[%s23886_s3 + $0x1c8] sm:$0xff]  ;;  %v4608_v62 = vld [vmem:[%s23888_s5 + $0x30] sm:$0xff]  ;;  %v4614_v14 = vld [vmem:[%s23888_s5 + $0x60] sm:$0xff] }
 0x30c   : > { %16139 = vmatpush3.bf16.msra.mxu0 %v16136_v47  ;;  %v16148_v47 = vpack.c.bf16 %v12662_v33, %v12661_v37  ;;  %v16172_v6 = vpack.c.bf16 %v12690_v56, %v12689_v3  ;;  %v12706_v31 = vld [vmem:[%s23886_s3 + $0x208] sm:$0xff]  ;;  %v4609_v37 = vld [vmem:[%s23888_s5 + $0x38] sm:$0xff]  ;;  %v20313_v33 = vld [vmem:[#allocation5] sm:$0xff] }
 0x30d   : > { %v3020_v45 = vmax.f32 %v2988_v16, 0.0  ;;  %16141 = vmatprep.subr.bf16.mxu0 %v16140_v43  ;;  %3051 = vst.msk [vmem:[#allocation2 + $0xf0] sm:$0xff] %vm441_vm0, %v3019_v10  ;;  %v12696_v16 = vld [vmem:[%s23886_s3 + $0x1f8] sm:$0xff]  ;;  %v4615_v55 = vld [vmem:[%s23888_s5 + $0x68] sm:$0xff]  ;;  %v4618_v3 = vld [vmem:[%s23888_s5 + $0x80] sm:$0xff] }
 0x30e   : > { %16231 = vmatpush1.bf16.msra.mxu1 %v16230_v57  ;;  %v12707_v57 = vld [vmem:[%s23886_s3 + $0x210] sm:$0xff]  ;;  %v4625_v61 = vld [vmem:[%s23888_s5 + $0xb8] sm:$0xff] }
 0x30f   : > { %3052 = vst.msk [vmem:[#allocation2 + $0xf8] sm:$0xff] %vm441_vm0, %v3020_v45  ;;  %v12708_v45 = vld [vmem:[%s23886_s3 + $0x218] sm:$0xff]  ;;  %v4620_v56 = vld [vmem:[%s23888_s5 + $0x90] sm:$0xff] }
 0x310   : > { %v4212_v10 = vld [vmem:[#allocation3 + $0x31] sm:$0xff] }
 0x312   : > { %v3081_v1 = vld [vmem:[#allocation2 + $0xe0] ss:$2 sm:$0xff]  ;;  %v3113_v4 = vld [vmem:[#allocation2 + $0xe1] ss:$2 sm:$0xff] }
 0x313   : > { %v3130_v53 = vmax.f32 %v3081_v1, %v3113_v4  ;;  %v12709_v1 = vld [vmem:[%s23886_s3 + $0x220] sm:$0xff]  ;;  %v12710_v4 = vld [vmem:[%s23886_s3 + $0x228] sm:$0xff] }
 0x316   : > { %v3083_v8 = vld [vmem:[#allocation2 + $0xf0] ss:$2 sm:$0xff]  ;;  %v3115_v27 = vld [vmem:[#allocation2 + $0xf1] ss:$2 sm:$0xff] }
 0x317   : > { %v3131_v20 = vmax.f32 %v3083_v8, %v3115_v27  ;;  %v16196_v8 = vpack.c.bf16 %v12710_v4, %v12709_v1  ;;  %v12711_v27 = vld [vmem:[%s23886_s3 + $0x230] sm:$0xff]  ;;  %v12755_v1 = vld [vmem:[%s23888_s5 + $0x208] sm:$0xff]  ;;  %v12757_v4 = vld [vmem:[%s23888_s5 + $0x218] sm:$0xff] }
 0x319   : > { %v3139_v9 = vmax.f32 %v3130_v53, %v3131_v20  ;;  %v12712_v53 = vld [vmem:[%s23886_s3 + $0x238] sm:$0xff] }
 0x31a   : > { %v16200_v20 = vpack.c.bf16 %v12712_v53, %v12711_v27  ;;  %v12721_v27 = vld [vmem:[%s23887_s4] ss:$0 sm:$0xff] }
 0x31b   : > { %3148 = vst.msk [vmem:[#allocation3 + $0x81] sm:$0xff] %vm441_vm0, %v3139_v9  ;;  %v4605_v9 = vld [vmem:[%s23888_s5 + $0x18] sm:$0xff] }
 0x322   : > { %v20109_v50 = vld [vmem:[#allocation3 + $0x80] sm:$0xff] }
 0x323   : > { %14946 = vmatmul.mubr.msk.f32.gmra.mrb[6].mxu0 %vm441_vm0, %v20109_v50  ;;  %v20151_v39 = vld [vmem:[#allocation3 + $0x81] sm:$0xff] }
 0x324   : > { %14964 = vmatprep.mubr.msk.f32.mxu0 %vm441_vm0, %v3748_v35  ;;  %v20193_v12 = vld [vmem:[#allocation3 + $0x82] sm:$0xff]  ;;  %v16238_v35 = vpack.c.bf16 %v4604_v42, %v4602_v46 }
 0x327   : > { %14965 = vmatmul.mubr.msk.f32.vlgmr.msra.gmra.mrb[0].mxu0 %vm441_vm0, %v20120_v52 }
 0x328   : > { %16143 = vmatpush3.bf16.msra.mxu0 %v16140_v43  ;;  %14967 = vmatprep.mubr.msk.f32.mxu0 %vm441_vm0, %v17693_v28  ;;  %v12694_v43 = vld [vmem:[%s23886_s3 + $0x1e8] sm:$0xff] }
 0x329   : > { %16145 = vmatprep.subr.bf16.mxu0 %v16144_v5  ;;  %v16180_v59 = vpack.c.bf16 %v12694_v43, %v12693_v60  ;;  %v4624_v60 = vld [vmem:[%s23888_s5 + $0xb0] sm:$0xff] }
 0x32b   : > { %14968 = vmatmul.mubr.msk.f32.gmra.mrb[2].mxu0 %vm441_vm0, %v19647_v63 }
 0x32c   : > { %16147 = vmatpush3.bf16.msra.mxu0 %v16144_v5  ;;  %14970 = vmatprep.mubr.msk.f32.mxu0 %vm441_vm0, %v19696_v7  ;;  %v4634_v5 = vld [vmem:[#allocation5 + $0x1] sm:$0xff] }
 0x32d   : > { %16149 = vmatprep.subr.bf16.mxu0 %v16148_v47 }
 0x32f   : > { %14971 = vmatmul.mubr.msk.f32.gmra.mrb[4].mxu0 %vm441_vm0, %v19739_v23 }
 0x330   : > { %16151 = vmatpush3.bf16.msra.mxu0 %v16148_v47  ;;  %14973 = vmatprep.mubr.msk.f32.mxu0 %vm441_vm0, %v19752_v22  ;;  %v4606_v47 = vld [vmem:[%s23888_s5 + $0x20] sm:$0xff] }
 0x331   : > { %16153 = vmatprep.subr.bf16.mxu0 %v16152_v25  ;;  %v16242_v0 = vpack.c.bf16 %v4608_v62, %v4606_v47 }
 0x333   : > { %14974 = vmatmul.mubr.msk.f32.gmra.mrb[6].mxu0 %vm441_vm0, %v20151_v39 }
 0x334   : > { %16155 = vmatpush3.bf16.msra.mxu0 %v16152_v25  ;;  %14992 = vmatprep.mubr.msk.f32.mxu0 %vm441_vm0, %v19867_v36  ;;  %v12679_v36 = vld [vmem:[%s23886_s3 + $0x1b0] sm:$0xff]  ;;  %v4611_v25 = vld [vmem:[%s23888_s5 + $0x48] sm:$0xff] }
 0x335   : > { %16157 = vmatprep.subr.bf16.mxu0 %v16156_v30  ;;  %v16168_v11 = vpack.c.bf16 %v12680_v17, %v12679_v36  ;;  %v16244_v21 = vpack.c.bf16 %v4613_v19, %v4611_v25  ;;  %v4619_v36 = vld [vmem:[%s23888_s5 + $0x88] sm:$0xff]  ;;  %v4621_v17 = vld [vmem:[%s23888_s5 + $0x98] sm:$0xff] }
 0x337   : > { %14993 = vmatmul.mubr.msk.f32.vlgmr.msra.gmra.mrb[0].mxu0 %vm441_vm0, %v24192_v29 }
 0x338   : > { %16159 = vmatpush3.bf16.msra.mxu0 %v16156_v30  ;;  %14995 = vmatprep.mubr.msk.f32.mxu0 %vm441_vm0, %v19911_v41  ;;  %v4610_v30 = vld [vmem:[%s23888_s5 + $0x40] sm:$0xff] }
 0x339   : > { %16161 = vmatprep.subr.bf16.mxu0 %v16160_v24 }
 0x33b   : > { %14996 = vmatmul.mubr.msk.f32.gmra.mrb[2].mxu0 %vm441_vm0, %v19913_v58 }
 0x33c   : > { %16163 = vmatpush3.bf16.msra.mxu0 %v16160_v24  ;;  %14998 = vmatprep.mubr.msk.f32.mxu0 %vm441_vm0, %v19958_v49  ;;  %v4617_v24 = vld [vmem:[%s23888_s5 + $0x78] sm:$0xff] }
 0x33d   : > { %16165 = vmatprep.subr.bf16.mxu0 %v16164_v26  ;;  %v16248_v2 = vpack.c.bf16 %v4617_v24, %v4615_v55 }
 0x33f   : > { %14999 = vmatmul.mubr.msk.f32.gmra.mrb[4].mxu0 %vm441_vm0, %v19970_v51 }
 0x340   : > { %16167 = vmatpush3.bf16.msra.mxu0 %v16164_v26  ;;  %15001 = vmatprep.mubr.msk.f32.mxu0 %vm441_vm0, %v19992_v34 }
 0x341   : > { %16169 = vmatprep.subr.bf16.mxu0 %v16168_v11 }
 0x343   : > { %15002 = vmatmul.mubr.msk.f32.gmra.mrb[6].mxu0 %vm441_vm0, %v20193_v12 }
 0x344   : > { %16171 = vmatpush3.bf16.msra.mxu0 %v16168_v11  ;;  %15020 = vmatprep.mubr.msk.f32.mxu0 %vm441_vm0, %v19777_v18  ;;  %v12695_v18 = vld [vmem:[%s23886_s3 + $0x1f0] sm:$0xff]  ;;  %v16252_v11 = vpack.c.bf16 %v4621_v17, %v4619_v36 }
 0x345   : > { %16173 = vmatprep.subr.bf16.mxu0 %v16172_v6 }
 0x347   : > { %15021 = vmatmul.mubr.msk.f32.vlgmr.msra.gmra.mrb[0].mxu0 %vm441_vm0, %v19786_v32  ;;  %v16184_v32 = vpack.c.bf16 %v12696_v16, %v12695_v18  ;;  %v4629_v18 = vld [vmem:[%s23888_s5 + $0xd8] sm:$0xff] }
 0x348   : > { %16175 = vmatpush3.bf16.msra.mxu0 %v16172_v6  ;;  %15023 = vmatprep.mubr.msk.f32.mxu0 %vm441_vm0, %v19796_v15  ;;  %v12705_v15 = vld [vmem:[%s23886_s3 + $0x200] sm:$0xff]  ;;  %v16254_v6 = vpack.c.bf16 %v4620_v56, %v4618_v3 }
 0x349   : > { %16177 = vmatprep.subr.bf16.mxu0 %v16176_v48 }
 0x34b   : > { %15024 = vmatmul.mubr.msk.f32.gmra.mrb[2].mxu0 %vm441_vm0, %v19804_v44  ;;  %v4064_v44 = vld [vmem:[#allocation3 + $0x90] sm:$0xff] }
 0x34c   : > { %16179 = vmatpush3.bf16.msra.mxu0 %v16176_v48  ;;  %15026 = vmatprep.mubr.msk.f32.mxu0 %vm441_vm0, %v19814_v40  ;;  %v16188_v40 = vpack.c.bf16 %v12706_v31, %v12705_v15  ;;  %v4622_v48 = vld [vmem:[%s23888_s5 + $0xa0] sm:$0xff]  ;;  %v4628_v15 = vld [vmem:[%s23888_s5 + $0xd0] sm:$0xff] }
 0x34d   : > { %16181 = vmatprep.subr.bf16.mxu0 %v16180_v59  ;;  %v16258_v43 = vpack.c.bf16 %v4624_v60, %v4622_v48 }
 0x34f   : > { %15027 = vmatmul.mubr.msk.f32.gmra.mrb[4].mxu0 %vm441_vm0, %v19825_v54  ;;  %v16192_v54 = vpack.c.bf16 %v12708_v45, %v12707_v57  ;;  %v4630_v45 = vld [vmem:[%s23888_s5 + $0xe0] sm:$0xff] }
 0x350   : > { %16183 = vmatpush3.bf16.msra.mxu0 %v16180_v59  ;;  %15029 = vmatprep.mubr.msk.f32.mxu0 %vm441_vm0, %v20109_v50  ;;  %v4627_v59 = vld [vmem:[%s23888_s5 + $0xc8] sm:$0xff] }
 0x351   : > { %16185 = vmatprep.subr.bf16.mxu0 %v16184_v32  ;;  %v16260_v16 = vpack.c.bf16 %v4629_v18, %v4627_v59 }
 0x353   : > { %15030 = vmatmul.mubr.msk.f32.gmra.mrb[6].mxu0 %vm441_vm0, %v4064_v44  ;;  %v4631_v44 = vld [vmem:[%s23888_s5 + $0xe8] sm:$0xff] }
 0x354   : > { %16187 = vmatpush3.bf16.msra.mxu0 %v16184_v32  ;;  %15048 = vmatprep.mubr.msk.f32.mxu0 %vm441_vm0, %v20120_v52  ;;  %v4607_v52 = vld [vmem:[%s23888_s5 + $0x28] sm:$0xff]  ;;  %v4626_v32 = vld [vmem:[%s23888_s5 + $0xc0] sm:$0xff] }
 0x355   : > { %16189 = vmatprep.subr.bf16.mxu0 %v16188_v40  ;;  %v16240_v28 = vpack.c.bf16 %v4609_v37, %v4607_v52  ;;  %v16262_v31 = vpack.c.bf16 %v4628_v15, %v4626_v32 }
 0x357   : > { %15049 = vmatmul.mubr.msk.f32.vlgmr.msra.gmra.mrb[0].mxu0 %vm441_vm0, %v4212_v10 }
 0x358   : > { %16191 = vmatpush3.bf16.msra.mxu0 %v16188_v40  ;;  %15051 = vmatprep.mubr.msk.f32.mxu0 %vm441_vm0, %v19647_v63  ;;  %v4218_v63 = vld [vmem:[#allocation3 + $0x91] sm:$0xff] }
 0x359   : > { %16193 = vmatprep.subr.bf16.mxu0 %v16192_v54  ;;  %v4633_v40 = vld [vmem:[%s23888_s5 + $0xf8] sm:$0xff] }
 0x35a   : > { %v16264_v57 = vpack.c.bf16 %v4633_v40, %v4631_v44  ;;  %v12754_v40 = vld [vmem:[%s23888_s5 + $0x200] sm:$0xff] }
 0x35b   : > { %15052 = vmatmul.mubr.msk.f32.gmra.mrb[2].mxu0 %vm441_vm0, %v19696_v7  ;;  %v4372_v7 = vld [vmem:[#allocation3 + $0x92] sm:$0xff] }
 0x35c   : > { %16195 = vmatpush3.bf16.msra.mxu0 %v16192_v54  ;;  %15054 = vmatprep.mubr.msk.f32.mxu0 %vm441_vm0, %v19739_v23  ;;  %v12751_v23 = vld [vmem:[%s23888_s5 + $0x1e8] sm:$0xff]  ;;  %v4632_v54 = vld [vmem:[%s23888_s5 + $0xf0] sm:$0xff] }
 0x35d   : > { %16197 = vmatprep.subr.bf16.mxu0 %v16196_v8  ;;  %v16266_v10 = vpack.c.bf16 %v4632_v54, %v4630_v45  ;;  %v12759_v54 = vld [vmem:[%s23888_s5 + $0x228] sm:$0xff] }
 0x35f   : > { %15055 = vmatmul.mubr.msk.f32.gmra.mrb[4].mxu0 %vm441_vm0, %v19752_v22  ;;  %v12753_v22 = vld [vmem:[%s23888_s5 + $0x1f8] sm:$0xff] }
 0x360   : > { %16199 = vmatpush3.bf16.msra.mxu0 %v16196_v8  ;;  %15057 = vmatprep.mubr.msk.f32.mxu0 %vm441_vm0, %v20151_v39  ;;  %v4612_v39 = vld [vmem:[%s23888_s5 + $0x50] sm:$0xff]  ;;  %v16268_v8 = vpack.c.bf16 %v12757_v4, %v12755_v1 }
 0x361   : > { %16201 = vmatprep.subr.bf16.mxu0 %v16200_v20  ;;  %v16246_v13 = vpack.c.bf16 %v4612_v39, %v4610_v30 }
 0x363   : > { %15058 = vmatmul.mubr.msk.f32.gmra.mrb[6].mxu0 %vm441_vm0, %v4218_v63 }
 0x364   : > { %16203 = vmatpush3.bf16.msra.mxu0 %v16200_v20  ;;  %15076 = vmatprep.mubr.msk.f32.mxu0 %vm441_vm0, %v24192_v29  ;;  %v4616_v29 = vld [vmem:[%s23888_s5 + $0x70] sm:$0xff] }
 0x365   : > { %v16250_v26 = vpack.c.bf16 %v4616_v29, %v4614_v14 }
 0x367   : > { %15077 = vmatmul.mubr.msk.f32.vlgmr.msra.gmra.mrb[0].mxu0 %vm441_vm0, %v19911_v41  ;;  %v16232_v41 = vpack.c.bf16 %v12753_v22, %v12751_v23 }
 0x368   : > { %15079 = vmatprep.mubr.msk.f32.mxu0 %vm441_vm0, %v19913_v58  ;;  %v12750_v58 = vld [vmem:[%s23888_s5 + $0x1e0] sm:$0xff] }
 0x369   : > { %16233 = vmatprep.subr.bf16.mxu1 %v16232_v41 }
 0x36b   : > { %15080 = vmatmul.mubr.msk.f32.gmra.mrb[2].mxu0 %vm441_vm0, %v19958_v49  ;;  %v12752_v49 = vld [vmem:[%s23888_s5 + $0x1f0] sm:$0xff] }
 0x36c   : > { %15082 = vmatprep.mubr.msk.f32.mxu0 %vm441_vm0, %v19970_v51  ;;  %v16234_v51 = vpack.c.bf16 %v12752_v49, %v12750_v58 }
 0x36e   : > { %16235 = vmatpush1.bf16.msra.mxu1 %v16234_v51 }
 0x36f   : > { %15083 = vmatmul.mubr.msk.f32.gmra.mrb[4].mxu0 %vm441_vm0, %v19992_v34  ;;  %v4603_v34 = vld [vmem:[%s23888_s5 + $0x8] sm:$0xff] }
 0x370   : > { %15085 = vmatprep.mubr.msk.f32.mxu0 %vm441_vm0, %v20193_v12  ;;  %v16236_v50 = vpack.c.bf16 %v4605_v9, %v4603_v34  ;;  %v4623_v12 = vld [vmem:[%s23888_s5 + $0xa8] sm:$0xff] }
 0x371   : > { %4736 = vmatmul.mubr.f32.vlgmr.msra.gmra.mrb[0].mxu1 %v4634_v5  ;;  %v16256_v38 = vpack.c.bf16 %v4625_v61, %v4623_v12 }
 0x372   : > { %16237 = vmatprep.subr.bf16.mxu1 %v16236_v50  ;;  %4741 = vmatprep.mubr.f32.mxu1 %v20313_v33 }
 0x373   : > { %15086 = vmatmul.mubr.msk.f32.gmra.mrb[6].mxu0 %vm441_vm0, %v4372_v7  ;;  %16239 = vmatpush1.bf16.msra.mxu1 %v16238_v35 }
 0x374   : > { %16241 = vmatprep.subr.bf16.mxu1 %v16240_v28 }
 0x377   : > { %16243 = vmatpush1.bf16.msra.mxu1 %v16242_v0 }
 0x378   : > { %16245 = vmatprep.subr.bf16.mxu1 %v16244_v21 }
 0x37b   : > { %16247 = vmatpush1.bf16.msra.mxu1 %v16246_v13 }
 0x37c   : > { %16249 = vmatprep.subr.bf16.mxu1 %v16248_v2 }
 0x37f   : > { %16251 = vmatpush1.bf16.msra.mxu1 %v16250_v26 }
 0x380   : > { %16253 = vmatprep.subr.bf16.mxu1 %v16252_v11 }
 0x383   : > { %16255 = vmatpush1.bf16.msra.mxu1 %v16254_v6 }
 0x384   : > { %16257 = vmatprep.subr.bf16.mxu1 %v16256_v38 }
 0x387   : > { %16259 = vmatpush1.bf16.msra.mxu1 %v16258_v43 }
 0x388   : > { %16261 = vmatprep.subr.bf16.mxu1 %v16260_v16 }
 0x38b   : > { %16263 = vmatpush1.bf16.msra.mxu1 %v16262_v31 }
 0x38c   : > { %16265 = vmatprep.subr.bf16.mxu1 %v16264_v57  ;;  %v12756_v57 = vld [vmem:[%s23888_s5 + $0x210] sm:$0xff] }
 0x38d   : > { %v16270_v1 = vpack.c.bf16 %v12756_v57, %v12754_v40  ;;  %v12795_v40 = vld [vmem:[%s23888_s5 + $0x348] sm:$0xff]  ;;  %v12797_v57 = vld [vmem:[%s23888_s5 + $0x358] sm:$0xff] }
 0x38f   : > { %16267 = vmatpush1.bf16.msra.mxu1 %v16266_v10  ;;  %v12761_v10 = vld [vmem:[%s23888_s5 + $0x238] sm:$0xff] }
 0x390   : > { %16269 = vmatprep.subr.bf16.mxu1 %v16268_v8  ;;  %v16272_v4 = vpack.c.bf16 %v12761_v10, %v12759_v54  ;;  %v12758_v8 = vld [vmem:[%s23888_s5 + $0x220] sm:$0xff]  ;;  %v16308_v10 = vpack.c.bf16 %v12797_v57, %v12795_v40  ;;  %v12831_v40 = vld [vmem:[%s23888_s5 + $0x468] sm:$0xff] }
 0x43a   : > { %v15078_v53 = vpop.f32.mrb[0].mxu0 }
 0x43b   : > { %v4527_v20 = vadd.f32 %v15078_v53, %v12721_v27  ;;  %v4472_v63 = vpop.f32.mrb[1].mxu0  ;;  %v12763_v53 = vld [vmem:[%s23888_s5 + $0x248] sm:$0xff] }
 0x43c   : > { %v4526_v7 = vadd.f32 %v12721_v27, %v4472_v63 }
 0x43d   : > { %v4535_v23 = vmax.f32 %v4527_v20, 0.0  ;;  %v12765_v20 = vld [vmem:[%s23888_s5 + $0x258] sm:$0xff] }
 0x43e   : > { %v4534_v22 = vmax.f32 %v4526_v7, 0.0  ;;  %v15081_v41 = vpop.f32.mrb[2].mxu0  ;;  %v16276_v7 = vpack.c.bf16 %v12765_v20, %v12763_v53  ;;  %v12801_v53 = vld [vmem:[%s23888_s5 + $0x378] sm:$0xff] }
 0x43f   : > { %4543 = vst [vmem:[#allocation4 + $0x8] sm:$0xff] %v4535_v23  ;;  %v4529_v58 = vadd.f32 %v15081_v41, %v12721_v27  ;;  %v4482_v49 = vpop.f32.mrb[3].mxu0  ;;  %v12762_v23 = vld [vmem:[%s23888_s5 + $0x240] sm:$0xff] }
 0x440   : > { %4542 = vst [vmem:[#allocation4] sm:$0xff] %v4534_v22  ;;  %v4528_v51 = vadd.f32 %v12721_v27, %v4482_v49  ;;  %v12764_v22 = vld [vmem:[%s23888_s5 + $0x250] sm:$0xff]  ;;  %v12769_v49 = vld [vmem:[%s23888_s5 + $0x278] sm:$0xff] }
 0x441   : > { %v4537_v34 = vmax.f32 %v4529_v58, 0.0  ;;  %v12767_v58 = vld [vmem:[%s23888_s5 + $0x268] sm:$0xff] }
 0x442   : > { %v4536_v9 = vmax.f32 %v4528_v51, 0.0  ;;  %v15084_v50 = vpop.f32.mrb[4].mxu0  ;;  %v16278_v51 = vpack.c.bf16 %v12764_v22, %v12762_v23  ;;  %v12800_v23 = vld [vmem:[%s23888_s5 + $0x370] sm:$0xff] }
 0x443   : > { %4545 = vst [vmem:[#allocation4 + $0x18] sm:$0xff] %v4537_v34  ;;  %v4531_v46 = vadd.f32 %v15084_v50, %v12721_v27  ;;  %v4492_v42 = vpop.f32.mrb[5].mxu0  ;;  %v16280_v34 = vpack.c.bf16 %v12769_v49, %v12767_v58  ;;  %v12768_v50 = vld [vmem:[%s23888_s5 + $0x270] sm:$0xff]  ;;  %v12803_v58 = vld [vmem:[%s23888_s5 + $0x388] sm:$0xff]  ;;  %v12805_v49 = vld [vmem:[%s23888_s5 + $0x398] sm:$0xff] }
 0x444   : > { %4544 = vst [vmem:[#allocation4 + $0x10] sm:$0xff] %v4536_v9  ;;  %v4530_v35 = vadd.f32 %v12721_v27, %v4492_v42  ;;  %v12766_v9 = vld [vmem:[%s23888_s5 + $0x260] sm:$0xff]  ;;  %v12771_v42 = vld [vmem:[%s23888_s5 + $0x288] sm:$0xff] }
 0x445   : > { %v4539_v5 = vmax.f32 %v4531_v46, 0.0 }
 0x446   : > { %v4552_v52 = vld [vmem:[#allocation4 + $0x8] ss:$2 sm:$0xf]  ;;  %v4568_v37 = vld [vmem:[#allocation4 + $0x9] ss:$2 sm:$0xf] }
 0x447   : > { %v4582_v28 = vmax.f32 %v4552_v52, %v4568_v37  ;;  %v4550_v47 = vld [vmem:[#allocation4] ss:$2 sm:$0xf]  ;;  %v4566_v62 = vld [vmem:[#allocation4 + $0x1] ss:$2 sm:$0xf] }
 0x448   : > { %4547 = vst [vmem:[#allocation4 + $0x28] sm:$0xff] %v4539_v5  ;;  %v4581_v0 = vmax.f32 %v4550_v47, %v4566_v62  ;;  %v4538_v25 = vmax.f32 %v4530_v35, 0.0  ;;  %v15087_v19 = vpop.f32.mrb[6].mxu0  ;;  %v12773_v35 = vld [vmem:[%s23888_s5 + $0x298] sm:$0xff]  ;;  %v16282_v5 = vpack.c.bf16 %v12768_v50, %v12766_v9  ;;  %v12770_v37 = vld [vmem:[%s23888_s5 + $0x280] sm:$0xff]  ;;  %v12775_v62 = vld [vmem:[%s23888_s5 + $0x2a8] sm:$0xff] }
 0x449   : > { %v4533_v21 = vadd.f32 %v15087_v19, %v12721_v27  ;;  %v4502_v30 = vpop.f32.mrb[7].mxu0  ;;  %v16284_v52 = vpack.c.bf16 %v12773_v35, %v12771_v42  ;;  %v12802_v9 = vld [vmem:[%s23888_s5 + $0x380] sm:$0xff]  ;;  %v12804_v50 = vld [vmem:[%s23888_s5 + $0x390] sm:$0xff]  ;;  %v12807_v35 = vld [vmem:[%s23888_s5 + $0x3a8] sm:$0xff] }
 0x44a   : > { %v4556_v39 = vld [vmem:[#allocation4 + $0x18] ss:$2 sm:$0xf]  ;;  %v4572_v13 = vld [vmem:[#allocation4 + $0x19] ss:$2 sm:$0xf]  ;;  %v4532_v55 = vadd.f32 %v12721_v27, %v4502_v30  ;;  %v4589_v24 = vmax.f32 %v4581_v0, %v4582_v28 }
 0x44b   : > { %4546 = vst [vmem:[#allocation4 + $0x20] sm:$0xff] %v4538_v25  ;;  %v4584_v2 = vmax.f32 %v4556_v39, %v4572_v13  ;;  %v4554_v14 = vld [vmem:[#allocation4 + $0x10] ss:$2 sm:$0xf]  ;;  %v4541_v36 = vmax.f32 %v4533_v21, 0.0  ;;  %v12777_v0 = vld [vmem:[%s23888_s5 + $0x2b8] sm:$0xff] }
 0x44c   : > { %v4570_v29 = vld [vmem:[#allocation4 + $0x11] ss:$2 sm:$0xf]  ;;  %v4540_v17 = vmax.f32 %v4532_v55, 0.0  ;;  %4594 = vst [vmem:[#allocation5 + $0x11] sm:$0xf] %v4589_v24  ;;  %v16288_v19 = vpack.c.bf16 %v12777_v0, %v12775_v62 }
 0x44d   : > { %v4583_v26 = vmax.f32 %v4554_v14, %v4570_v29  ;;  %4549 = vst [vmem:[#allocation4 + $0x38] sm:$0xff] %v4541_v36  ;;  %v12760_v27 = vld [vmem:[%s23888_s5 + $0x230] sm:$0xff]  ;;  %v12774_v21 = vld [vmem:[%s23888_s5 + $0x2a0] sm:$0xff]  ;;  %v12779_v39 = vld [vmem:[%s23888_s5 + $0x2c8] sm:$0xff] }
 0x44e   : > { %4548 = vst [vmem:[#allocation4 + $0x30] sm:$0xff] %v4540_v17  ;;  %v16274_v63 = vpack.c.bf16 %v12760_v27, %v12758_v8  ;;  %v12772_v28 = vld [vmem:[%s23888_s5 + $0x290] sm:$0xff]  ;;  %v12781_v13 = vld [vmem:[%s23888_s5 + $0x2d8] sm:$0xff]  ;;  %v12783_v29 = vld [vmem:[%s23888_s5 + $0x2e8] sm:$0xff] }
 0x44f   : > { %v4560_v11 = vld [vmem:[#allocation4 + $0x28] ss:$2 sm:$0xf]  ;;  %v4576_v3 = vld [vmem:[#allocation4 + $0x29] ss:$2 sm:$0xf]  ;;  %v4590_v56 = vmax.f32 %v4583_v26, %v4584_v2  ;;  %v16286_v25 = vpack.c.bf16 %v12772_v28, %v12770_v37  ;;  %v16292_v24 = vpack.c.bf16 %v12781_v13, %v12779_v39 }
 0x450   : > { %v4586_v6 = vmax.f32 %v4560_v11, %v4576_v3  ;;  %v12776_v30 = vld [vmem:[%s23888_s5 + $0x2b0] sm:$0xff]  ;;  %v12778_v2 = vld [vmem:[%s23888_s5 + $0x2c0] sm:$0xff]  ;;  %v12785_v26 = vld [vmem:[%s23888_s5 + $0x2f8] sm:$0xff] }
 0x451   : > { %4595 = vst [vmem:[#allocation5 + $0x21] sm:$0xf] %v4590_v56  ;;  %v16290_v55 = vpack.c.bf16 %v12776_v30, %v12774_v21  ;;  %v12780_v14 = vld [vmem:[%s23888_s5 + $0x2d0] sm:$0xff]  ;;  %v16296_v17 = vpack.c.bf16 %v12785_v26, %v12783_v29  ;;  %v12782_v11 = vld [vmem:[%s23888_s5 + $0x2e0] sm:$0xff]  ;;  %v12787_v56 = vld [vmem:[%s23888_s5 + $0x308] sm:$0xff] }
 0x452   : > { %v4558_v12 = vld [vmem:[#allocation4 + $0x20] ss:$2 sm:$0xf]  ;;  %v4574_v61 = vld [vmem:[#allocation4 + $0x21] ss:$2 sm:$0xf]  ;;  %v16294_v36 = vpack.c.bf16 %v12780_v14, %v12778_v2 }
 0x453   : > { %v4585_v38 = vmax.f32 %v4558_v12, %v4574_v61  ;;  %v20403_v48 = vld [vmem:[#allocation5 + $0x11] sm:$0xff]  ;;  %v12799_v27 = vld [vmem:[%s23888_s5 + $0x368] sm:$0xff]  ;;  %v12806_v28 = vld [vmem:[%s23888_s5 + $0x3a0] sm:$0xff] }
 0x454   : > { %4742 = vmatmul.mubr.f32.gmra.mrb[2].mxu1 %v20403_v48  ;;  %v4564_v43 = vld [vmem:[#allocation4 + $0x38] ss:$2 sm:$0xf]  ;;  %v4580_v59 = vld [vmem:[#allocation4 + $0x39] ss:$2 sm:$0xf] }
 0x455   : > { %v4591_v60 = vmax.f32 %v4585_v38, %v4586_v6  ;;  %4747 = vmatprep.mubr.f32.mxu1 %v20313_v33  ;;  %v4588_v18 = vmax.f32 %v4564_v43, %v4580_v59  ;;  %v4562_v16 = vld [vmem:[#allocation4 + $0x30] ss:$2 sm:$0xf]  ;;  %v4578_v32 = vld [vmem:[#allocation4 + $0x31] ss:$2 sm:$0xf] }
 0x456   : > { %v4587_v15 = vmax.f32 %v4562_v16, %v4578_v32  ;;  %v20447_v41 = vld [vmem:[#allocation5 + $0x10] sm:$0xff]  ;;  %v12789_v6 = vld [vmem:[%s23888_s5 + $0x318] sm:$0xff]  ;;  %v12786_v38 = vld [vmem:[%s23888_s5 + $0x300] sm:$0xff] }
 0x457   : > { %4596 = vst [vmem:[#allocation5 + $0x31] sm:$0xf] %v4591_v60  ;;  %v12784_v3 = vld [vmem:[%s23888_s5 + $0x2f0] sm:$0xff]  ;;  %v16300_v61 = vpack.c.bf16 %v12789_v6, %v12787_v56  ;;  %v12791_v43 = vld [vmem:[%s23888_s5 + $0x328] sm:$0xff]  ;;  %v12793_v59 = vld [vmem:[%s23888_s5 + $0x338] sm:$0xff] }
 0x458   : > { %v20407_v31 = vld [vmem:[#allocation5 + $0x21] sm:$0xff]  ;;  %v4592_v44 = vmax.f32 %v4587_v15, %v4588_v18  ;;  %v16298_v12 = vpack.c.bf16 %v12784_v3, %v12782_v11  ;;  %v12788_v60 = vld [vmem:[%s23888_s5 + $0x310] sm:$0xff]  ;;  %v16304_v32 = vpack.c.bf16 %v12793_v59, %v12791_v43 }
 0x459   : > { %4748 = vmatmul.mubr.f32.gmra.mrb[4].mxu1 %v20407_v31  ;;  %v20463_v46 = vld [vmem:[#allocation5 + $0x20] sm:$0xff]  ;;  %v16302_v16 = vpack.c.bf16 %v12788_v60, %v12786_v38  ;;  %v20556_v8 = vld [vmem:[#allocation5 + $0x12] sm:$0xff]  ;;  %v12811_v0 = vld [vmem:[%s23888_s5 + $0x3c8] sm:$0xff] }
 0x45a   : > { %4753 = vmatprep.mubr.f32.mxu1 %v20313_v33  ;;  %4597 = vst [vmem:[#allocation5 + $0x41] sm:$0xf] %v4592_v44  ;;  %v4849_v18 = vld [vmem:[#allocation5 + $0x2] sm:$0xff]  ;;  %v12792_v44 = vld [vmem:[%s23888_s5 + $0x330] sm:$0xff] }
 0x45b   : > { %v12790_v15 = vld [vmem:[%s23888_s5 + $0x320] sm:$0xff]  ;;  %v12808_v62 = vld [vmem:[%s23888_s5 + $0x3b0] sm:$0xff]  ;;  %v12815_v13 = vld [vmem:[%s23888_s5 + $0x3e8] sm:$0xff] }
 0x45c   : > { %v16306_v54 = vpack.c.bf16 %v12792_v44, %v12790_v15  ;;  %v20572_v22 = vld [vmem:[#allocation5 + $0x22] sm:$0xff]  ;;  %v12812_v39 = vld [vmem:[%s23888_s5 + $0x3d0] sm:$0xff] }
 0x45d   : > { %v12810_v30 = vld [vmem:[%s23888_s5 + $0x3c0] sm:$0xff]  ;;  %v12816_v29 = vld [vmem:[%s23888_s5 + $0x3f0] sm:$0xff]  ;;  %v12819_v26 = vld [vmem:[%s23888_s5 + $0x408] sm:$0xff] }
 0x45e   : > { %v20417_v45 = vld [vmem:[#allocation5 + $0x31] sm:$0xff]  ;;  %v12814_v14 = vld [vmem:[%s23888_s5 + $0x3e0] sm:$0xff]  ;;  %v12823_v6 = vld [vmem:[%s23888_s5 + $0x428] sm:$0xff] }
 0x45f   : > { %4754 = vmatmul.mubr.f32.gmra.mrb[6].mxu1 %v20417_v45  ;;  %v20479_v47 = vld [vmem:[#allocation5 + $0x30] sm:$0xff]  ;;  %v12818_v3 = vld [vmem:[%s23888_s5 + $0x400] sm:$0xff]  ;;  %v12827_v59 = vld [vmem:[%s23888_s5 + $0x448] sm:$0xff] }
 0x460   : > { %4824 = vmatprep.mubr.f32.mxu1 %v20313_v33  ;;  %v20588_v42 = vld [vmem:[#allocation5 + $0x32] sm:$0xff]  ;;  %v12822_v60 = vld [vmem:[%s23888_s5 + $0x420] sm:$0xff] }
 0x461   : > { %v12820_v56 = vld [vmem:[%s23888_s5 + $0x410] sm:$0xff]  ;;  %v12826_v15 = vld [vmem:[%s23888_s5 + $0x440] sm:$0xff] }
 0x462   : > { %v12824_v43 = vld [vmem:[%s23888_s5 + $0x430] sm:$0xff] }
 0x463   : > { %4825 = vmatmul.mubr.f32.vlgmr.msra.gmra.mrb[0].mxu1 %v20313_v33  ;;  %v12828_v44 = vld [vmem:[%s23888_s5 + $0x450] sm:$0xff] }
 0x464   : > { %16271 = vmatpush1.bf16.msra.mxu1 %v16270_v1  ;;  %4830 = vmatprep.mubr.f32.mxu1 %v20313_v33  ;;  %v12794_v1 = vld [vmem:[%s23888_s5 + $0x340] sm:$0xff]  ;;  %v16342_v57 = vpack.c.bf16 %v12828_v44, %v12826_v15  ;;  %v12864_v15 = vld [vmem:[%s23888_s5 + $0x570] sm:$0xff]  ;;  %v12867_v44 = vld [vmem:[%s23888_s5 + $0x588] sm:$0xff] }
 0x465   : > { %16273 = vmatprep.subr.bf16.mxu1 %v16272_v4  ;;  %v12796_v4 = vld [vmem:[%s23888_s5 + $0x350] sm:$0xff] }
 0x466   : > { %v16310_v20 = vpack.c.bf16 %v12796_v4, %v12794_v1  ;;  %v12832_v1 = vld [vmem:[%s23888_s5 + $0x470] sm:$0xff]  ;;  %v12835_v4 = vld [vmem:[%s23888_s5 + $0x488] sm:$0xff] }
 0x467   : > { %4831 = vmatmul.mubr.f32.gmra.mrb[2].mxu1 %v20447_v41 }
 0x468   : > { %16275 = vmatpush1.bf16.msra.mxu1 %v16274_v63  ;;  %4836 = vmatprep.mubr.f32.mxu1 %v20313_v33  ;;  %v16312_v63 = vpack.c.bf16 %v12801_v53, %v12799_v27  ;;  %v12837_v27 = vld [vmem:[%s23888_s5 + $0x498] sm:$0xff] }
 0x469   : > { %16277 = vmatprep.subr.bf16.mxu1 %v16276_v7  ;;  %v12798_v7 = vld [vmem:[%s23888_s5 + $0x360] sm:$0xff] }
 0x46b   : > { %4837 = vmatmul.mubr.f32.gmra.mrb[4].mxu1 %v20463_v46 }
 0x46c   : > { %16279 = vmatpush1.bf16.msra.mxu1 %v16278_v51  ;;  %4842 = vmatprep.mubr.f32.mxu1 %v20313_v33  ;;  %v16314_v51 = vpack.c.bf16 %v12800_v23, %v12798_v7  ;;  %v12836_v7 = vld [vmem:[%s23888_s5 + $0x490] sm:$0xff]  ;;  %v20694_v23 = vld [vmem:[#allocation5 + $0x40] sm:$0xff] }
 0x46d   : > { %16281 = vmatprep.subr.bf16.mxu1 %v16280_v34  ;;  %v16316_v34 = vpack.c.bf16 %v12805_v49, %v12803_v58  ;;  %v12839_v58 = vld [vmem:[%s23888_s5 + $0x4a8] sm:$0xff]  ;;  %v12841_v49 = vld [vmem:[%s23888_s5 + $0x4b8] sm:$0xff] }
 0x46f   : > { %4843 = vmatmul.mubr.f32.gmra.mrb[6].mxu1 %v20479_v47 }
 0x470   : > { %16283 = vmatpush1.bf16.msra.mxu1 %v16282_v5  ;;  %4950 = vmatprep.mubr.f32.mxu1 %v20313_v33  ;;  %v12809_v5 = vld [vmem:[%s23888_s5 + $0x3b8] sm:$0xff] }
 0x471   : > { %16285 = vmatprep.subr.bf16.mxu1 %v16284_v52  ;;  %v16318_v52 = vpack.c.bf16 %v12804_v50, %v12802_v9  ;;  %v16320_v37 = vpack.c.bf16 %v12809_v5, %v12807_v35  ;;  %v12838_v9 = vld [vmem:[%s23888_s5 + $0x4a0] sm:$0xff]  ;;  %v12840_v50 = vld [vmem:[%s23888_s5 + $0x4b0] sm:$0xff]  ;;  %v12843_v35 = vld [vmem:[%s23888_s5 + $0x4c8] sm:$0xff] }
 0x472   : > { %v12845_v5 = vld [vmem:[%s23888_s5 + $0x4d8] sm:$0xff] }
 0x474   : > { %16287 = vmatpush1.bf16.msra.mxu1 %v16286_v25  ;;  %v12813_v25 = vld [vmem:[%s23888_s5 + $0x3d8] sm:$0xff] }
 0x475   : > { %16289 = vmatprep.subr.bf16.mxu1 %v16288_v19  ;;  %v16322_v19 = vpack.c.bf16 %v12808_v62, %v12806_v28  ;;  %v16324_v21 = vpack.c.bf16 %v12813_v25, %v12811_v0  ;;  %v12842_v28 = vld [vmem:[%s23888_s5 + $0x4c0] sm:$0xff]  ;;  %v12844_v62 = vld [vmem:[%s23888_s5 + $0x4d0] sm:$0xff]  ;;  %v12847_v0 = vld [vmem:[%s23888_s5 + $0x4e8] sm:$0xff] }
 0x476   : > { %v12849_v25 = vld [vmem:[%s23888_s5 + $0x4f8] sm:$0xff] }
 0x478   : > { %16291 = vmatpush1.bf16.msra.mxu1 %v16290_v55  ;;  %v12817_v55 = vld [vmem:[%s23888_s5 + $0x3f8] sm:$0xff] }
 0x479   : > { %16293 = vmatprep.subr.bf16.mxu1 %v16292_v24  ;;  %v16326_v24 = vpack.c.bf16 %v12812_v39, %v12810_v30  ;;  %v16328_v2 = vpack.c.bf16 %v12817_v55, %v12815_v13  ;;  %v12846_v30 = vld [vmem:[%s23888_s5 + $0x4e0] sm:$0xff]  ;;  %v12848_v39 = vld [vmem:[%s23888_s5 + $0x4f0] sm:$0xff]  ;;  %v12851_v13 = vld [vmem:[%s23888_s5 + $0x508] sm:$0xff] }
 0x47a   : > { %v12853_v55 = vld [vmem:[%s23888_s5 + $0x518] sm:$0xff] }
 0x47c   : > { %16295 = vmatpush1.bf16.msra.mxu1 %v16294_v36  ;;  %v12821_v36 = vld [vmem:[%s23888_s5 + $0x418] sm:$0xff] }
 0x47d   : > { %16297 = vmatprep.subr.bf16.mxu1 %v16296_v17  ;;  %v16330_v17 = vpack.c.bf16 %v12816_v29, %v12814_v14  ;;  %v16332_v11 = vpack.c.bf16 %v12821_v36, %v12819_v26  ;;  %v12850_v14 = vld [vmem:[%s23888_s5 + $0x500] sm:$0xff]  ;;  %v12852_v29 = vld [vmem:[%s23888_s5 + $0x510] sm:$0xff]  ;;  %v12855_v26 = vld [vmem:[%s23888_s5 + $0x528] sm:$0xff] }
 0x47e   : > { %v12857_v36 = vld [vmem:[%s23888_s5 + $0x538] sm:$0xff] }
 0x480   : > { %16299 = vmatpush1.bf16.msra.mxu1 %v16298_v12  ;;  %v12825_v12 = vld [vmem:[%s23888_s5 + $0x438] sm:$0xff] }
 0x481   : > { %16301 = vmatprep.subr.bf16.mxu1 %v16300_v61  ;;  %v16334_v61 = vpack.c.bf16 %v12820_v56, %v12818_v3  ;;  %v16336_v38 = vpack.c.bf16 %v12825_v12, %v12823_v6  ;;  %v12854_v3 = vld [vmem:[%s23888_s5 + $0x520] sm:$0xff]  ;;  %v12856_v56 = vld [vmem:[%s23888_s5 + $0x530] sm:$0xff]  ;;  %v12859_v6 = vld [vmem:[%s23888_s5 + $0x548] sm:$0xff] }
 0x482   : > { %v12861_v12 = vld [vmem:[%s23888_s5 + $0x558] sm:$0xff] }
 0x483   : > { %4951 = vmatmul.mubr.f32.vlgmr.msra.gmra.mrb[0].mxu1 %v4849_v18  ;;  %v12829_v18 = vld [vmem:[%s23888_s5 + $0x458] sm:$0xff] }
 0x484   : > { %16303 = vmatpush1.bf16.msra.mxu1 %v16302_v16  ;;  %4956 = vmatprep.mubr.f32.mxu1 %v20313_v33  ;;  %v16338_v16 = vpack.c.bf16 %v12824_v43, %v12822_v60  ;;  %v12858_v60 = vld [vmem:[%s23888_s5 + $0x540] sm:$0xff]  ;;  %v12860_v43 = vld [vmem:[%s23888_s5 + $0x550] sm:$0xff] }
 0x485   : > { %16305 = vmatprep.subr.bf16.mxu1 %v16304_v32  ;;  %v16340_v32 = vpack.c.bf16 %v12829_v18, %v12827_v59  ;;  %v12863_v59 = vld [vmem:[%s23888_s5 + $0x568] sm:$0xff]  ;;  %v16374_v18 = vpack.c.bf16 %v12860_v43, %v12858_v60 }
 0x486   : > { %v13003_v60 = vld [vmem:[%s23890_s7 + $0x1c8] sm:$0xff] }
 0x487   : > { %4957 = vmatmul.mubr.f32.gmra.mrb[2].mxu1 %v20556_v8  ;;  %v12883_v43 = vld [vmem:[%s23888_s5 + $0x608] sm:$0xff] }
 0x488   : > { %16307 = vmatpush1.bf16.msra.mxu1 %v16306_v54  ;;  %4962 = vmatprep.mubr.f32.mxu1 %v20313_v33 }
 0x489   : > { %16309 = vmatprep.subr.bf16.mxu1 %v16308_v10  ;;  %v12830_v10 = vld [vmem:[%s23888_s5 + $0x460] sm:$0xff] }
 0x48a   : > { %v16346_v53 = vpack.c.bf16 %v12832_v1, %v12830_v10  ;;  %v20800_v10 = vld [vmem:[#allocation5 + $0x41] sm:$0xff]  ;;  %v12873_v1 = vld [vmem:[%s23888_s5 + $0x5b8] sm:$0xff] }
 0x48b   : > { %4963 = vmatmul.mubr.f32.gmra.mrb[4].mxu1 %v20572_v22 }
 0x48c   : > { %16311 = vmatpush1.bf16.msra.mxu1 %v16310_v20  ;;  %4968 = vmatprep.mubr.f32.mxu1 %v20313_v33  ;;  %v16348_v20 = vpack.c.bf16 %v12837_v27, %v12835_v4  ;;  %v12870_v4 = vld [vmem:[%s23888_s5 + $0x5a0] sm:$0xff]  ;;  %v12872_v27 = vld [vmem:[%s23888_s5 + $0x5b0] sm:$0xff] }
 0x48d   : > { %16313 = vmatprep.subr.bf16.mxu1 %v16312_v63  ;;  %v12834_v63 = vld [vmem:[%s23888_s5 + $0x480] sm:$0xff] }
 0x48f   : > { %4969 = vmatmul.mubr.f32.gmra.mrb[6].mxu1 %v20588_v42 }
 0x490   : > { %16315 = vmatpush1.bf16.msra.mxu1 %v16314_v51  ;;  %5084 = vmatprep.mubr.f32.mxu1 %v20313_v33  ;;  %v16350_v51 = vpack.c.bf16 %v12836_v7, %v12834_v63  ;;  %v12978_v63 = vld [vmem:[%s23890_s7 + $0x100] sm:$0xff] }
 0x491   : > { %16317 = vmatprep.subr.bf16.mxu1 %v16316_v34  ;;  %v16352_v34 = vpack.c.bf16 %v12841_v49, %v12839_v58  ;;  %v12979_v49 = vld [vmem:[%s23890_s7 + $0x108] sm:$0xff] }
 0x494   : > { %16319 = vmatpush1.bf16.msra.mxu1 %v16318_v52  ;;  %v16354_v52 = vpack.c.bf16 %v12840_v50, %v12838_v9  ;;  %v16494_v50 = vpack.c.bf16 %v12979_v49, %v12978_v63 }
 0x495   : > { %16321 = vmatprep.subr.bf16.mxu1 %v16320_v37  ;;  %v16356_v37 = vpack.c.bf16 %v12845_v5, %v12843_v35  ;;  %v12980_v5 = vld [vmem:[%s23890_s7 + $0x110] sm:$0xff] }
 0x498   : > { %16323 = vmatpush1.bf16.msra.mxu1 %v16322_v19  ;;  %v16358_v19 = vpack.c.bf16 %v12844_v62, %v12842_v28  ;;  %v12875_v28 = vld [vmem:[%s23888_s5 + $0x5c8] sm:$0xff]  ;;  %v12877_v62 = vld [vmem:[%s23888_s5 + $0x5d8] sm:$0xff] }
 0x499   : > { %16325 = vmatprep.subr.bf16.mxu1 %v16324_v21  ;;  %v16360_v21 = vpack.c.bf16 %v12849_v25, %v12847_v0  ;;  %v12999_v0 = vld [vmem:[%s23890_s7 + $0x1a8] sm:$0xff] }
 0x49c   : > { %16327 = vmatpush1.bf16.msra.mxu1 %v16326_v24  ;;  %v16362_v24 = vpack.c.bf16 %v12848_v39, %v12846_v30  ;;  %v12982_v39 = vld [vmem:[%s23890_s7 + $0x120] sm:$0xff] }
 0x49d   : > { %16329 = vmatprep.subr.bf16.mxu1 %v16328_v2  ;;  %v16364_v2 = vpack.c.bf16 %v12853_v55, %v12851_v13  ;;  %v12983_v13 = vld [vmem:[%s23890_s7 + $0x128] sm:$0xff]  ;;  %v16388_v55 = vpack.c.bf16 %v12877_v62, %v12875_v28 }
 0x4a0   : > { %16331 = vmatpush1.bf16.msra.mxu1 %v16330_v17  ;;  %v16366_v17 = vpack.c.bf16 %v12852_v29, %v12850_v14  ;;  %v13001_v14 = vld [vmem:[%s23890_s7 + $0x1b8] sm:$0xff]  ;;  %v12879_v29 = vld [vmem:[%s23888_s5 + $0x5e8] sm:$0xff] }
 0x4a1   : > { %16333 = vmatprep.subr.bf16.mxu1 %v16332_v11  ;;  %v16368_v11 = vpack.c.bf16 %v12857_v36, %v12855_v26  ;;  %v12881_v26 = vld [vmem:[%s23888_s5 + $0x5f8] sm:$0xff]  ;;  %v16502_v36 = vpack.c.bf16 %v12983_v13, %v12982_v39  ;;  %v13008_v13 = vld [vmem:[%s23890_s7 + $0x1f0] sm:$0xff] }
 0x4a2   : > { %v12897_v39 = vld [vmem:[%s23888_s5 + $0x678] sm:$0xff] }
 0x4a3   : > { %5085 = vmatmul.mubr.f32.vlgmr.msra.gmra.mrb[0].mxu1 %v20447_v41  ;;  %v12833_v41 = vld [vmem:[%s23888_s5 + $0x478] sm:$0xff] }
 0x4a4   : > { %16335 = vmatpush1.bf16.msra.mxu1 %v16334_v61  ;;  %5090 = vmatprep.mubr.f32.mxu1 %v20313_v33  ;;  %v16344_v54 = vpack.c.bf16 %v12833_v41, %v12831_v40  ;;  %v16370_v61 = vpack.c.bf16 %v12856_v56, %v12854_v3  ;;  %v12984_v56 = vld [vmem:[%s23890_s7 + $0x130] sm:$0xff] }
 0x4a5   : > { %16337 = vmatprep.subr.bf16.mxu1 %v16336_v38  ;;  %v16372_v38 = vpack.c.bf16 %v12861_v12, %v12859_v6  ;;  %v12985_v6 = vld [vmem:[%s23890_s7 + $0x138] sm:$0xff]  ;;  %v16392_v12 = vpack.c.bf16 %v12881_v26, %v12879_v29 }
 0x4a6   : > { %v12993_v26 = vld [vmem:[%s23890_s7 + $0x178] sm:$0xff] }
 0x4a7   : > { %5091 = vmatmul.mubr.f32.gmra.mrb[2].mxu1 %v20463_v46 }
 0x4a8   : > { %16339 = vmatpush1.bf16.msra.mxu1 %v16338_v16  ;;  %5096 = vmatprep.mubr.f32.mxu1 %v20313_v33 }
 0x4a9   : > { %16341 = vmatprep.subr.bf16.mxu1 %v16340_v32  ;;  %v12862_v32 = vld [vmem:[%s23888_s5 + $0x560] sm:$0xff] }
 0x4aa   : > { %v16378_v40 = vpack.c.bf16 %v12864_v15, %v12862_v32  ;;  %v12884_v32 = vld [vmem:[%s23888_s5 + $0x610] sm:$0xff] }
 0x4ab   : > { %5097 = vmatmul.mubr.f32.gmra.mrb[4].mxu1 %v20479_v47 }
 0x4ac   : > { %16343 = vmatpush1.bf16.msra.mxu1 %v16342_v57  ;;  %5102 = vmatprep.mubr.f32.mxu1 %v20313_v33  ;;  %v12866_v57 = vld [vmem:[%s23888_s5 + $0x580] sm:$0xff] }
 0x4ad   : > { %16345 = vmatprep.subr.bf16.mxu1 %v16344_v54  ;;  %v12868_v54 = vld [vmem:[%s23888_s5 + $0x590] sm:$0xff] }
 0x4ae   : > { %v16382_v7 = vpack.c.bf16 %v12868_v54, %v12866_v57  ;;  %v12889_v57 = vld [vmem:[%s23888_s5 + $0x638] sm:$0xff]  ;;  %v5890_v54 = vld [vmem:[#allocation6 + $0x8] sm:$0xfe] }
 0x4af   : > { %5103 = vmatmul.mubr.f32.gmra.mrb[6].mxu1 %v20694_v23 }
 0x4b0   : > { %16347 = vmatpush1.bf16.msra.mxu1 %v16346_v53  ;;  %5218 = vmatprep.mubr.f32.mxu1 %v20313_v33  ;;  %v12994_v53 = vld [vmem:[%s23890_s7 + $0x180] sm:$0xff] }
 0x4b1   : > { %16349 = vmatprep.subr.bf16.mxu1 %v16348_v20  ;;  %v12995_v20 = vld [vmem:[%s23890_s7 + $0x188] sm:$0xff] }
 0x4b2   : > { %v16492_v58 = vpack.c.bf16 %v12995_v20, %v12994_v53 }
 0x4b4   : > { %16351 = vmatpush1.bf16.msra.mxu1 %v16350_v51  ;;  %v12996_v51 = vld [vmem:[%s23890_s7 + $0x190] sm:$0xff]  ;;  %16493 = vmatprep.subr.bf16.mxu0 %v16492_v58  ;;  %v12989_v58 = vld [vmem:[%s23890_s7 + $0x158] sm:$0xff] }
 0x4b5   : > { %16353 = vmatprep.subr.bf16.mxu1 %v16352_v34  ;;  %v12997_v34 = vld [vmem:[%s23890_s7 + $0x198] sm:$0xff]  ;;  %16495 = vmatpush3.bf16.msra.mxu0 %v16494_v50 }
 0x4b6   : > { %v16496_v35 = vpack.c.bf16 %v12997_v34, %v12996_v51  ;;  %v12886_v51 = vld [vmem:[%s23888_s5 + $0x620] sm:$0xff]  ;;  %v12888_v34 = vld [vmem:[%s23888_s5 + $0x630] sm:$0xff] }
 0x4b7   : > { %v16402_v62 = vpack.c.bf16 %v12888_v34, %v12886_v51  ;;  %v12913_v51 = vld [vmem:[%s23888_s5 + $0x6f8] sm:$0xff] }
 0x4b8   : > { %16355 = vmatpush1.bf16.msra.mxu1 %v16354_v52  ;;  %v12981_v52 = vld [vmem:[%s23890_s7 + $0x118] sm:$0xff]  ;;  %16497 = vmatprep.subr.bf16.mxu0 %v16496_v35 }
 0x4b9   : > { %16357 = vmatprep.subr.bf16.mxu1 %v16356_v37  ;;  %v12998_v37 = vld [vmem:[%s23890_s7 + $0x1a0] sm:$0xff]  ;;  %v16498_v25 = vpack.c.bf16 %v12981_v52, %v12980_v5  ;;  %v12893_v5 = vld [vmem:[%s23888_s5 + $0x658] sm:$0xff] }
 0x4ba   : > { %v16500_v30 = vpack.c.bf16 %v12999_v0, %v12998_v37  ;;  %v13006_v52 = vld [vmem:[%s23890_s7 + $0x1e0] sm:$0xff]  ;;  %v13007_v37 = vld [vmem:[%s23890_s7 + $0x1e8] sm:$0xff] }
 0x4bb   : > { %16499 = vmatpush3.bf16.msra.mxu0 %v16498_v25  ;;  %v12990_v0 = vld [vmem:[%s23890_s7 + $0x160] sm:$0xff]  ;;  %v12991_v25 = vld [vmem:[%s23890_s7 + $0x168] sm:$0xff] }
 0x4bc   : > { %16359 = vmatpush1.bf16.msra.mxu1 %v16358_v19  ;;  %v16386_v19 = vpack.c.bf16 %v12872_v27, %v12870_v4  ;;  %16501 = vmatprep.subr.bf16.mxu0 %v16500_v30  ;;  %v5892_v4 = vld [vmem:[#allocation6 + $0x18] sm:$0x1]  ;;  %v5925_v27 = vrot.slane %v5890_v54, 1  ;;  %v16516_v30 = vpack.c.bf16 %v13007_v37, %v13006_v52 }
 0x4bd   : > { %16361 = vmatprep.subr.bf16.mxu1 %v16360_v21  ;;  %v12874_v21 = vld [vmem:[%s23888_s5 + $0x5c0] sm:$0xff]  ;;  %v5926_v20 = vrot.slane %v5892_v4, 1  ;;  %v12904_v4 = vld [vmem:[%s23888_s5 + $0x6b0] sm:$0xff]  ;;  %v12917_v52 = vld [vmem:[%s23888_s5 + $0x718] sm:$0xff] }
 0x4bf   : > { %16503 = vmatpush3.bf16.msra.mxu0 %v16502_v36  ;;  %v5927_v35 = vsel %vm5921_vm2, %v5925_v27, %v5926_v20  ;;  %v5889_v36 = vld [vmem:[#allocation6] sm:$0xfe]  ;;  %v12907_v27 = vld [vmem:[%s23888_s5 + $0x6c8] sm:$0xff] }
 0x4c0   : > { %16363 = vmatpush1.bf16.msra.mxu1 %v16362_v24  ;;  %v12876_v24 = vld [vmem:[%s23888_s5 + $0x5d0] sm:$0xff]  ;;  %6051 = vmatprep.mubr.f32.mxu0 %v5927_v35 }
 0x4c1   : > { %16365 = vmatprep.subr.bf16.mxu1 %v16364_v2  ;;  %v13000_v2 = vld [vmem:[%s23890_s7 + $0x1b0] sm:$0xff] }
 0x4c2   : > { %v16504_v3 = vpack.c.bf16 %v13001_v14, %v13000_v2  ;;  %v12992_v2 = vld [vmem:[%s23890_s7 + $0x170] sm:$0xff]  ;;  %v20979_v14 = vld [vmem:[#allocation5] sm:$0xff] }
 0x4c3   : > { %5219 = vmatmul.mubr.f32.vlgmr.msra.gmra.mrb[0].mxu1 %v20403_v48  ;;  %v12865_v48 = vld [vmem:[%s23888_s5 + $0x578] sm:$0xff]  ;;  %v12912_v35 = vld [vmem:[%s23888_s5 + $0x6f0] sm:$0xff] }
 0x4c4   : > { %16367 = vmatpush1.bf16.msra.mxu1 %v16366_v17  ;;  %5224 = vmatprep.mubr.f32.mxu1 %v20313_v33  ;;  %v16376_v16 = vpack.c.bf16 %v12865_v48, %v12863_v59  ;;  %v16390_v17 = vpack.c.bf16 %v12876_v24, %v12874_v21  ;;  %v12885_v59 = vld [vmem:[%s23888_s5 + $0x618] sm:$0xff]  ;;  %v12882_v48 = vld [vmem:[%s23888_s5 + $0x600] sm:$0xff]  ;;  %v12892_v21 = vld [vmem:[%s23888_s5 + $0x650] sm:$0xff]  ;;  %v16518_v24 = vpack.c.bf16 %v12991_v25, %v12990_v0 }
 0x4c5   : > { %16369 = vmatprep.subr.bf16.mxu1 %v16368_v11  ;;  %v12878_v11 = vld [vmem:[%s23888_s5 + $0x5e0] sm:$0xff]  ;;  %16505 = vmatprep.subr.bf16.mxu0 %v16504_v3  ;;  %v16398_v63 = vpack.c.bf16 %v12884_v32, %v12882_v48  ;;  %v12916_v0 = vld [vmem:[%s23888_s5 + $0x710] sm:$0xff]  ;;  %v12919_v25 = vld [vmem:[%s23888_s5 + $0x728] sm:$0xff] }
 0x4c6   : > { %v12894_v3 = vld [vmem:[%s23888_s5 + $0x660] sm:$0xff] }
 0x4c7   : > { %5225 = vmatmul.mubr.f32.gmra.mrb[2].mxu1 %v20407_v31  ;;  %v12869_v31 = vld [vmem:[%s23888_s5 + $0x598] sm:$0xff]  ;;  %v12898_v32 = vld [vmem:[%s23888_s5 + $0x680] sm:$0xff] }
 0x4c8   : > { %16371 = vmatpush1.bf16.msra.mxu1 %v16370_v61  ;;  %5230 = vmatprep.mubr.f32.mxu1 %v20313_v33  ;;  %v16380_v41 = vpack.c.bf16 %v12869_v31, %v12867_v44  ;;  %v12880_v61 = vld [vmem:[%s23888_s5 + $0x5f0] sm:$0xff]  ;;  %v12986_v44 = vld [vmem:[%s23890_s7 + $0x140] sm:$0xff]  ;;  %v12987_v31 = vld [vmem:[%s23890_s7 + $0x148] sm:$0xff] }
 0x4c9   : > { %16373 = vmatprep.subr.bf16.mxu1 %v16372_v38  ;;  %v13002_v38 = vld [vmem:[%s23890_s7 + $0x1c0] sm:$0xff]  ;;  %v16510_v53 = vpack.c.bf16 %v12987_v31, %v12986_v44 }
 0x4ca   : > { %v16508_v15 = vpack.c.bf16 %v13003_v60, %v13002_v38  ;;  %v5873_v38 = vld [vmem:[%s23890_s7 + $0x80] sm:$0xff]  ;;  %v5874_v60 = vld [vmem:[%s23890_s7 + $0x88] sm:$0xff] }
 0x4cb   : > { %5231 = vmatmul.mubr.f32.gmra.mrb[4].mxu1 %v20417_v45  ;;  %v12871_v45 = vld [vmem:[%s23888_s5 + $0x5a8] sm:$0xff]  ;;  %v16524_v44 = vpack.c.bf16 %v5874_v60, %v5873_v38  ;;  %v12932_v38 = vld [vmem:[%s23888_s5 + $0x790] sm:$0xff] }
 0x4cc   : > { %16375 = vmatpush1.bf16.msra.mxu1 %v16374_v18  ;;  %5236 = vmatprep.mubr.f32.mxu1 %v20313_v33  ;;  %v16384_v9 = vpack.c.bf16 %v12873_v1, %v12871_v45  ;;  %v16506_v18 = vpack.c.bf16 %v12985_v6, %v12984_v56  ;;  %v13004_v45 = vld [vmem:[%s23890_s7 + $0x1d0] sm:$0xff]  ;;  %v13005_v1 = vld [vmem:[%s23890_s7 + $0x1d8] sm:$0xff]  ;;  %v12899_v6 = vld [vmem:[%s23888_s5 + $0x688] sm:$0xff] }
 0x4cd   : > { %16377 = vmatprep.subr.bf16.mxu1 %v16376_v16  ;;  %v16394_v16 = vpack.c.bf16 %v12880_v61, %v12878_v11  ;;  %v16512_v50 = vpack.c.bf16 %v13005_v1, %v13004_v45  ;;  %v12896_v56 = vld [vmem:[%s23888_s5 + $0x670] sm:$0xff]  ;;  %v12901_v61 = vld [vmem:[%s23888_s5 + $0x698] sm:$0xff]  ;;  %v21011_v31 = vld [vmem:[#allocation5 + $0x42] sm:$0xff] }
 0x4ce   : > { %16507 = vmatpush3.bf16.msra.mxu0 %v16506_v18  ;;  %v16410_v18 = vpack.c.bf16 %v12896_v56, %v12894_v3  ;;  %v12902_v1 = vld [vmem:[%s23888_s5 + $0x6a0] sm:$0xff]  ;;  %v12928_v3 = vld [vmem:[%s23888_s5 + $0x770] sm:$0xff]  ;;  %v12931_v56 = vld [vmem:[%s23888_s5 + $0x788] sm:$0xff] }
 0x4cf   : > { %5237 = vmatmul.mubr.f32.gmra.mrb[6].mxu1 %v20800_v10  ;;  %16509 = vmatprep.subr.bf16.mxu0 %v16508_v15  ;;  %v12900_v15 = vld [vmem:[%s23888_s5 + $0x690] sm:$0xff]  ;;  %v16418_v20 = vpack.c.bf16 %v12904_v4, %v12902_v1  ;;  %v12935_v60 = vld [vmem:[%s23888_s5 + $0x7a8] sm:$0xff]  ;;  %v12942_v4 = vld [vmem:[%s23888_s5 + $0x7e0] sm:$0xff] }
 0x4d0   : > { %16379 = vmatpush1.bf16.msra.mxu1 %v16378_v40  ;;  %5352 = vmatprep.mubr.f32.mxu1 %v20313_v33  ;;  %v16396_v40 = vpack.c.bf16 %v12885_v59, %v12883_v43  ;;  %v16522_v43 = vpack.c.bf16 %v12993_v26, %v12992_v2  ;;  %v5922_v59 = vrot.slane %v5889_v36, 1  ;;  %v16414_v54 = vpack.c.bf16 %v12900_v15, %v12898_v32  ;;  %v12922_v2 = vld [vmem:[%s23888_s5 + $0x740] sm:$0xff]  ;;  %v12927_v26 = vld [vmem:[%s23888_s5 + $0x768] sm:$0xff]  ;;  %v12941_v32 = vld [vmem:[%s23888_s5 + $0x7d8] sm:$0xff] }
 0x4d1   : > { %16381 = vmatprep.subr.bf16.mxu1 %v16380_v41  ;;  %v12887_v41 = vld [vmem:[%s23888_s5 + $0x628] sm:$0xff] }
 0x4d2   : > { %v16400_v49 = vpack.c.bf16 %v12889_v57, %v12887_v41  ;;  %16511 = vmatpush3.bf16.msra.mxu0 %v16510_v53  ;;  %v12905_v41 = vld [vmem:[%s23888_s5 + $0x6b8] sm:$0xff] }
 0x4d3   : > { %16513 = vmatprep.subr.bf16.mxu0 %v16512_v50  ;;  %v12909_v53 = vld [vmem:[%s23888_s5 + $0x6d8] sm:$0xff]  ;;  %v12910_v50 = vld [vmem:[%s23888_s5 + $0x6e0] sm:$0xff] }
 0x4d4   : > { %16383 = vmatpush1.bf16.msra.mxu1 %v16382_v7  ;;  %v12988_v7 = vld [vmem:[%s23890_s7 + $0x150] sm:$0xff]  ;;  %v16426_v37 = vpack.c.bf16 %v12912_v35, %v12910_v50  ;;  %v12950_v35 = vld [vmem:[%s23888_s5 + $0x820] sm:$0xff] }
 0x4d5   : > { %16385 = vmatprep.subr.bf16.mxu1 %v16384_v9  ;;  %v12891_v9 = vld [vmem:[%s23888_s5 + $0x648] sm:$0xff]  ;;  %v16514_v28 = vpack.c.bf16 %v12989_v58, %v12988_v7  ;;  %v12906_v7 = vld [vmem:[%s23888_s5 + $0x6c0] sm:$0xff]  ;;  %v12908_v58 = vld [vmem:[%s23888_s5 + $0x6d0] sm:$0xff] }
 0x4d6   : > { %v16422_v34 = vpack.c.bf16 %v12908_v58, %v12906_v7  ;;  %v12946_v58 = vld [vmem:[%s23888_s5 + $0x800] sm:$0xff] }
 0x4d7   : > { %16515 = vmatpush3.bf16.msra.mxu0 %v16514_v28 }
 0x4d8   : > { %16387 = vmatpush1.bf16.msra.mxu1 %v16386_v19  ;;  %v16404_v19 = vpack.c.bf16 %v12893_v5, %v12891_v9  ;;  %16517 = vmatprep.subr.bf16.mxu0 %v16516_v30  ;;  %v12915_v5 = vld [vmem:[%s23888_s5 + $0x708] sm:$0xff]  ;;  %v12920_v30 = vld [vmem:[%s23888_s5 + $0x730] sm:$0xff] }
 0x4d9   : > { %16389 = vmatprep.subr.bf16.mxu1 %v16388_v55  ;;  %v13009_v55 = vld [vmem:[%s23890_s7 + $0x1f8] sm:$0xff]  ;;  %v16428_v28 = vpack.c.bf16 %v12917_v52, %v12915_v5  ;;  %v12952_v5 = vld [vmem:[%s23888_s5 + $0x830] sm:$0xff]  ;;  %v12955_v52 = vld [vmem:[%s23888_s5 + $0x848] sm:$0xff] }
 0x4db   : > { %16519 = vmatpush3.bf16.msra.mxu0 %v16518_v24 }
 0x4dc   : > { %16391 = vmatpush1.bf16.msra.mxu1 %v16390_v17  ;;  %v5891_v17 = vld [vmem:[#allocation6 + $0x10] sm:$0x1] }
 0x4dd   : > { %16393 = vmatprep.subr.bf16.mxu1 %v16392_v12  ;;  %v16520_v12 = vpack.c.bf16 %v13009_v55, %v13008_v13  ;;  %v5923_v48 = vrot.slane %v5891_v17, 1  ;;  %v12925_v13 = vld [vmem:[%s23888_s5 + $0x758] sm:$0xff] }
 0x4df   : > { %16521 = vmatprep.subr.bf16.mxu0 %v16520_v12  ;;  %v5924_v57 = vsel %vm5921_vm2, %v5922_v59, %v5923_v48  ;;  %v12934_v48 = vld [vmem:[%s23888_s5 + $0x7a0] sm:$0xff] }
 0x4e0   : > { %16395 = vmatpush1.bf16.msra.mxu1 %v16394_v16  ;;  %v16412_v16 = vpack.c.bf16 %v12901_v61, %v12899_v6  ;;  %16523 = vmatpush3.bf16.msra.mxu0 %v16522_v43  ;;  %v12930_v61 = vld [vmem:[%s23888_s5 + $0x780] sm:$0xff] }
 0x4e1   : > { %16397 = vmatprep.subr.bf16.mxu1 %v16396_v40  ;;  %v12903_v40 = vld [vmem:[%s23888_s5 + $0x6a8] sm:$0xff]  ;;  %16525 = vmatprep.subr.bf16.mxu0 %v16524_v44  ;;  %v16446_v43 = vpack.c.bf16 %v12932_v38, %v12930_v61  ;;  %v12973_v61 = vld [vmem:[%s23888_s5 + $0x8d8] sm:$0xff] }
 0x4e2   : > { %v16416_v45 = vpack.c.bf16 %v12905_v41, %v12903_v40  ;;  %v12938_v40 = vld [vmem:[%s23888_s5 + $0x7c0] sm:$0xff]  ;;  %v12940_v41 = vld [vmem:[%s23888_s5 + $0x7d0] sm:$0xff] }
 0x4e3   : > { %5353 = vmatmul.mubr.f32.vlgmr.msra.gmra.mrb[0].mxu1 %v20556_v8  ;;  %v12890_v8 = vld [vmem:[%s23888_s5 + $0x640] sm:$0xff]  ;;  %6052 = vmatmul.mubr.f32.vlgmr.msra.gmra.mrb[8].mxu0 %v5924_v57  ;;  %v12943_v57 = vld [vmem:[%s23888_s5 + $0x7e8] sm:$0xff] }
 0x4e4   : > { %16399 = vmatpush1.bf16.msra.mxu1 %v16398_v63  ;;  %5358 = vmatprep.mubr.f32.mxu1 %v20313_v33  ;;  %v12895_v33 = vld [vmem:[%s23888_s5 + $0x668] sm:$0xff]  ;;  %v16406_v29 = vpack.c.bf16 %v12892_v21, %v12890_v8  ;;  %v16420_v63 = vpack.c.bf16 %v12909_v53, %v12907_v27  ;;  %v12944_v27 = vld [vmem:[%s23888_s5 + $0x7f0] sm:$0xff] }
 0x4e5   : > { %16401 = vmatprep.subr.bf16.mxu1 %v16400_v49  ;;  %v16408_v11 = vpack.c.bf16 %v12897_v39, %v12895_v33  ;;  %v12911_v49 = vld [vmem:[%s23888_s5 + $0x6e8] sm:$0xff]  ;;  %v12918_v33 = vld [vmem:[%s23888_s5 + $0x720] sm:$0xff] }
 0x4e6   : > { %v16424_v9 = vpack.c.bf16 %v12913_v51, %v12911_v49  ;;  %v12923_v39 = vld [vmem:[%s23888_s5 + $0x748] sm:$0xff]  ;;  %v16434_v55 = vpack.c.bf16 %v12920_v30, %v12918_v33  ;;  %v12948_v49 = vld [vmem:[%s23888_s5 + $0x810] sm:$0xff] }
 0x4e7   : > { %5359 = vmatmul.mubr.f32.gmra.mrb[2].mxu1 %v20572_v22  ;;  %v16436_v24 = vpack.c.bf16 %v12925_v13, %v12923_v39  ;;  %v12947_v53 = vld [vmem:[%s23888_s5 + $0x808] sm:$0xff]  ;;  %v17697_v33 = vld [vmem:[#allocation5 + $0x31] sm:$0xff]  ;;  %v12958_v13 = vld [vmem:[%s23888_s5 + $0x860] sm:$0xff] }
 0x4e8   : > { %16403 = vmatpush1.bf16.msra.mxu1 %v16402_v62  ;;  %5364 = vmatprep.mubr.f32.mxu1 %v20979_v14  ;;  %v12914_v62 = vld [vmem:[%s23888_s5 + $0x700] sm:$0xff]  ;;  %v12951_v51 = vld [vmem:[%s23888_s5 + $0x828] sm:$0xff] }
 0x4e9   : > { %16405 = vmatprep.subr.bf16.mxu1 %v16404_v19  ;;  %v12921_v19 = vld [vmem:[%s23888_s5 + $0x738] sm:$0xff]  ;;  %v16430_v8 = vpack.c.bf16 %v12916_v0, %v12914_v62  ;;  %v16466_v62 = vpack.c.bf16 %v12952_v5, %v12950_v35 }
 0x4ea   : > { %v16432_v21 = vpack.c.bf16 %v12921_v19, %v12919_v25  ;;  %v12954_v25 = vld [vmem:[%s23888_s5 + $0x840] sm:$0xff]  ;;  %v12956_v19 = vld [vmem:[%s23888_s5 + $0x850] sm:$0xff] }
 0x4eb   : > { %5365 = vmatmul.mubr.f32.gmra.mrb[4].mxu1 %v20588_v42  ;;  %v16470_v30 = vpack.c.bf16 %v12956_v19, %v12954_v25  ;;  %v5875_v25 = vld [vmem:[%s23890_s7 + $0x90] sm:$0xff]  ;;  %v5876_v19 = vld [vmem:[%s23890_s7 + $0x98] sm:$0xff] }
 0x4ec   : > { %16407 = vmatpush1.bf16.msra.mxu1 %v16406_v29  ;;  %5370 = vmatprep.mubr.f32.mxu1 %v20979_v14  ;;  %v12924_v29 = vld [vmem:[%s23888_s5 + $0x750] sm:$0xff] }
 0x4ed   : > { %16409 = vmatprep.subr.bf16.mxu1 %v16408_v11  ;;  %v16438_v36 = vpack.c.bf16 %v12924_v29, %v12922_v2  ;;  %v12926_v11 = vld [vmem:[%s23888_s5 + $0x760] sm:$0xff]  ;;  %v12965_v2 = vld [vmem:[%s23888_s5 + $0x898] sm:$0xff] }
 0x4ee   : > { %v16442_v6 = vpack.c.bf16 %v12928_v3, %v12926_v11  ;;  %v12967_v11 = vld [vmem:[%s23888_s5 + $0x8a8] sm:$0xff] }
 0x4ef   : > { %5371 = vmatmul.mubr.f32.gmra.mrb[6].mxu1 %v21011_v31 }
 0x4f0   : > { %16411 = vmatpush1.bf16.msra.mxu1 %v16410_v18  ;;  %5487 = vmatprep.mubr.f32.mxu1 %v20979_v14  ;;  %v12936_v18 = vld [vmem:[%s23888_s5 + $0x7b0] sm:$0xff] }
 0x4f1   : > { %16413 = vmatprep.subr.bf16.mxu1 %v16412_v16  ;;  %v12939_v16 = vld [vmem:[%s23888_s5 + $0x7c8] sm:$0xff]  ;;  %v16450_v15 = vpack.c.bf16 %v12936_v18, %v12934_v48  ;;  %v12977_v48 = vld [vmem:[%s23888_s5 + $0x8f8] sm:$0xff] }
 0x4f2   : > { %v16452_v44 = vpack.c.bf16 %v12941_v32, %v12939_v16  ;;  %v12974_v32 = vld [vmem:[%s23888_s5 + $0x8e0] sm:$0xff] }
 0x4f4   : > { %16415 = vmatpush1.bf16.msra.mxu1 %v16414_v54  ;;  %v12945_v54 = vld [vmem:[%s23888_s5 + $0x7f8] sm:$0xff] }
 0x4f5   : > { %16417 = vmatprep.subr.bf16.mxu1 %v16416_v45  ;;  %v16454_v45 = vpack.c.bf16 %v12940_v41, %v12938_v40  ;;  %v16456_v1 = vpack.c.bf16 %v12945_v54, %v12943_v57  ;;  %v13123_v40 = vld [vmem:[%s23890_s7 + $0x588] sm:$0xff]  ;;  %v13106_v54 = vld [vmem:[%s23890_s7 + $0x500] sm:$0xff] }
 0x4f8   : > { %16419 = vmatpush1.bf16.msra.mxu1 %v16418_v20  ;;  %v12949_v20 = vld [vmem:[%s23888_s5 + $0x818] sm:$0xff] }
 0x4f9   : > { %16421 = vmatprep.subr.bf16.mxu1 %v16420_v63  ;;  %v16458_v63 = vpack.c.bf16 %v12944_v27, %v12942_v4  ;;  %v16460_v7 = vpack.c.bf16 %v12949_v20, %v12947_v53  ;;  %v13125_v4 = vld [vmem:[%s23890_s7 + $0x598] sm:$0xff]  ;;  %v13108_v20 = vld [vmem:[%s23890_s7 + $0x510] sm:$0xff] }
 0x4fc   : > { %16423 = vmatpush1.bf16.msra.mxu1 %v16422_v34  ;;  %v12953_v34 = vld [vmem:[%s23888_s5 + $0x838] sm:$0xff] }
 0x4fd   : > { %16425 = vmatprep.subr.bf16.mxu1 %v16424_v9  ;;  %v16462_v9 = vpack.c.bf16 %v12948_v49, %v12946_v58  ;;  %v16464_v50 = vpack.c.bf16 %v12953_v34, %v12951_v51  ;;  %v13127_v58 = vld [vmem:[%s23890_s7 + $0x5a8] sm:$0xff]  ;;  %v13110_v34 = vld [vmem:[%s23890_s7 + $0x520] sm:$0xff] }
 0x500   : > { %16427 = vmatpush1.bf16.msra.mxu1 %v16426_v37  ;;  %v12957_v37 = vld [vmem:[%s23888_s5 + $0x858] sm:$0xff] }
 0x501   : > { %16429 = vmatprep.subr.bf16.mxu1 %v16428_v28  ;;  %v17696_v28 = vld [vmem:[#allocation5 + $0x21] sm:$0xff]  ;;  %v16468_v0 = vpack.c.bf16 %v12957_v37, %v12955_v52  ;;  %v5657_v52 = vld [vmem:[#allocation5 + $0x52] sm:$0xff] }
 0x502   : > { %v5857_v37 = vld [vmem:[%s23890_s7] sm:$0xff] }
 0x503   : > { %5488 = vmatmul.mubr.f32.vlgmr.msra.gmra.mrb[0].mxu1 %v20463_v46  ;;  %v12929_v46 = vld [vmem:[%s23888_s5 + $0x778] sm:$0xff] }
 0x504   : > { %16431 = vmatpush1.bf16.msra.mxu1 %v16430_v8  ;;  %5493 = vmatprep.mubr.f32.mxu1 %v20979_v14  ;;  %v16440_v17 = vpack.c.bf16 %v12929_v46, %v12927_v26  ;;  %v12959_v8 = vld [vmem:[%s23888_s5 + $0x868] sm:$0xff]  ;;  %v5523_v26 = vld [vmem:[#allocation5 + $0x51] sm:$0xff] }
 0x505   : > { %16433 = vmatprep.subr.bf16.mxu1 %v16432_v21  ;;  %v12961_v21 = vld [vmem:[%s23888_s5 + $0x878] sm:$0xff] }
 0x506   : > { %v16472_v39 = vpack.c.bf16 %v12961_v21, %v12959_v8  ;;  %v13130_v8 = vld [vmem:[%s23890_s7 + $0x5c0] sm:$0xff]  ;;  %v16528_v21 = vpack.c.bf16 %v5876_v19, %v5875_v25  ;;  %v5887_v25 = vld [vmem:[%s23890_s7 + $0xf0] sm:$0xff]  ;;  %v5888_v19 = vld [vmem:[%s23890_s7 + $0xf8] sm:$0xff] }
 0x507   : > { %5494 = vmatmul.mubr.f32.gmra.mrb[2].mxu1 %v20479_v47  ;;  %v12933_v47 = vld [vmem:[%s23888_s5 + $0x798] sm:$0xff] }
 0x508   : > { %16435 = vmatpush1.bf16.msra.mxu1 %v16434_v55  ;;  %5499 = vmatprep.mubr.f32.mxu1 %v20979_v14  ;;  %v16444_v12 = vpack.c.bf16 %v12933_v47, %v12931_v56  ;;  %v12960_v55 = vld [vmem:[%s23888_s5 + $0x870] sm:$0xff]  ;;  %v12966_v47 = vld [vmem:[%s23888_s5 + $0x8a0] sm:$0xff] }
 0x509   : > { %16437 = vmatprep.subr.bf16.mxu1 %v16436_v24  ;;  %v12963_v24 = vld [vmem:[%s23888_s5 + $0x888] sm:$0xff]  ;;  %v16474_v29 = vpack.c.bf16 %v12960_v55, %v12958_v13 }
 0x50a   : > { %v16476_v46 = vpack.c.bf16 %v12965_v2, %v12963_v24  ;;  %v13114_v24 = vld [vmem:[%s23890_s7 + $0x540] sm:$0xff]  ;;  %v13115_v2 = vld [vmem:[%s23890_s7 + $0x548] sm:$0xff] }
 0x50b   : > { %5500 = vmatmul.mubr.f32.gmra.mrb[4].mxu1 %v20694_v23  ;;  %v12937_v23 = vld [vmem:[%s23888_s5 + $0x7b8] sm:$0xff] }
 0x50c   : > { %16439 = vmatpush1.bf16.msra.mxu1 %v16438_v36  ;;  %5505 = vmatprep.mubr.f32.mxu1 %v20979_v14  ;;  %v16448_v59 = vpack.c.bf16 %v12937_v23, %v12935_v60  ;;  %v12962_v36 = vld [vmem:[%s23888_s5 + $0x880] sm:$0xff] }
 0x50d   : > { %16441 = vmatprep.subr.bf16.mxu1 %v16440_v17  ;;  %v12964_v17 = vld [vmem:[%s23888_s5 + $0x890] sm:$0xff]  ;;  %v12970_v23 = vld [vmem:[%s23888_s5 + $0x8c0] sm:$0xff] }
 0x50e   : > { %v16478_v3 = vpack.c.bf16 %v12964_v17, %v12962_v36  ;;  %v13132_v36 = vld [vmem:[%s23890_s7 + $0x5d0] sm:$0xff] }
 0x50f   : > { %5506 = vmatmul.mubr.f32.gmra.mrb[6].mxu1 %v20979_v14 }
 0x510   : > { %16443 = vmatpush1.bf16.msra.mxu1 %v16442_v6  ;;  %5621 = vmatprep.mubr.f32.mxu1 %v20979_v14  ;;  %v12968_v6 = vld [vmem:[%s23888_s5 + $0x8b0] sm:$0xff] }
 0x511   : > { %16445 = vmatprep.subr.bf16.mxu1 %v16444_v12  ;;  %v12971_v12 = vld [vmem:[%s23888_s5 + $0x8c8] sm:$0xff]  ;;  %v16482_v38 = vpack.c.bf16 %v12968_v6, %v12966_v47  ;;  %v13116_v6 = vld [vmem:[%s23890_s7 + $0x550] sm:$0xff] }
 0x512   : > { %v16484_v60 = vpack.c.bf16 %v12973_v61, %v12971_v12  ;;  %v13117_v12 = vld [vmem:[%s23890_s7 + $0x558] sm:$0xff] }
 0x513   : > { %v16674_v61 = vpack.c.bf16 %v13117_v12, %v13116_v6 }
 0x514   : > { %16447 = vmatpush1.bf16.msra.mxu1 %v16446_v43  ;;  %v12972_v43 = vld [vmem:[%s23888_s5 + $0x8d0] sm:$0xff] }
 0x515   : > { %16449 = vmatprep.subr.bf16.mxu1 %v16448_v59  ;;  %v12975_v59 = vld [vmem:[%s23888_s5 + $0x8e8] sm:$0xff]  ;;  %v16486_v18 = vpack.c.bf16 %v12972_v43, %v12970_v23  ;;  %v13134_v23 = vld [vmem:[%s23890_s7 + $0x5e0] sm:$0xff] }
 0x516   : > { %v16488_v16 = vpack.c.bf16 %v12977_v48, %v12975_v59  ;;  %v13135_v59 = vld [vmem:[%s23890_s7 + $0x5e8] sm:$0xff]  ;;  %v5863_v48 = vld [vmem:[%s23890_s7 + $0x30] sm:$0xff] }
 0x518   : > { %16451 = vmatpush1.bf16.msra.mxu1 %v16450_v15  ;;  %v12976_v15 = vld [vmem:[%s23888_s5 + $0x8f0] sm:$0xff] }
 0x519   : > { %16453 = vmatprep.subr.bf16.mxu1 %v16452_v44  ;;  %v13122_v44 = vld [vmem:[%s23890_s7 + $0x580] sm:$0xff]  ;;  %v16490_v41 = vpack.c.bf16 %v12976_v15, %v12974_v32 }
 0x51a   : > { %v16652_v57 = vpack.c.bf16 %v13123_v40, %v13122_v44  ;;  %v13118_v15 = vld [vmem:[%s23890_s7 + $0x560] sm:$0xff]  ;;  %v13119_v44 = vld [vmem:[%s23890_s7 + $0x568] sm:$0xff] }
 0x51b   : > { %v16678_v40 = vpack.c.bf16 %v13119_v44, %v13118_v15  ;;  %v6663_v15 = vld [vmem:[#allocation6 + $0x38] sm:$0x3]  ;;  %v21468_v44 = vld [vmem:[#allocation6 + $0x30] sm:$0x3] }
 0x51c   : > { %16455 = vmatpush1.bf16.msra.mxu1 %v16454_v45  ;;  %v13107_v45 = vld [vmem:[%s23890_s7 + $0x508] sm:$0xff] }
 0x51d   : > { %16457 = vmatprep.subr.bf16.mxu1 %v16456_v1  ;;  %v13124_v1 = vld [vmem:[%s23890_s7 + $0x590] sm:$0xff]  ;;  %v16654_v27 = vpack.c.bf16 %v13107_v45, %v13106_v54 }
 0x51e   : > { %v16656_v53 = vpack.c.bf16 %v13125_v4, %v13124_v1  ;;  %v13136_v54 = vld [vmem:[%s23890_s7 + $0x5f0] sm:$0xff]  ;;  %v13137_v1 = vld [vmem:[%s23890_s7 + $0x5f8] sm:$0xff]  ;;  %v5865_v4 = vld [vmem:[%s23890_s7 + $0x40] sm:$0xff] }
 0x520   : > { %16459 = vmatpush1.bf16.msra.mxu1 %v16458_v63  ;;  %v13109_v63 = vld [vmem:[%s23890_s7 + $0x518] sm:$0xff] }
 0x521   : > { %16461 = vmatprep.subr.bf16.mxu1 %v16460_v7  ;;  %v13126_v7 = vld [vmem:[%s23890_s7 + $0x5a0] sm:$0xff]  ;;  %v16658_v49 = vpack.c.bf16 %v13109_v63, %v13108_v20  ;;  %v13120_v63 = vld [vmem:[%s23890_s7 + $0x570] sm:$0xff] }
 0x522   : > { %v16660_v51 = vpack.c.bf16 %v13127_v58, %v13126_v7  ;;  %v13121_v7 = vld [vmem:[%s23890_s7 + $0x578] sm:$0xff] }
 0x523   : > { %5622 = vmatmul.mubr.f32.vlgmr.msra.gmra.mrb[0].mxu1 %v17696_v28  ;;  %v13112_v28 = vld [vmem:[%s23890_s7 + $0x530] sm:$0xff]  ;;  %v16682_v58 = vpack.c.bf16 %v13121_v7, %v13120_v63 }
 0x524   : > { %16463 = vmatpush1.bf16.msra.mxu1 %v16462_v9  ;;  %5627 = vmatprep.mubr.f32.mxu1 %v20979_v14  ;;  %v13111_v9 = vld [vmem:[%s23890_s7 + $0x528] sm:$0xff] }
 0x525   : > { %16465 = vmatprep.subr.bf16.mxu1 %v16464_v50  ;;  %v13128_v50 = vld [vmem:[%s23890_s7 + $0x5b0] sm:$0xff]  ;;  %v16662_v35 = vpack.c.bf16 %v13111_v9, %v13110_v34  ;;  %v13186_v34 = vld [vmem:[%s23890_s7 + $0x780] sm:$0xff] }
 0x527   : > { %5628 = vmatmul.mubr.f32.gmra.mrb[2].mxu1 %v17697_v33  ;;  %v13131_v33 = vld [vmem:[%s23890_s7 + $0x5c8] sm:$0xff] }
 0x528   : > { %16467 = vmatpush1.bf16.msra.mxu1 %v16466_v62  ;;  %5633 = vmatprep.mubr.f32.mxu1 %v20979_v14  ;;  %v16668_v13 = vpack.c.bf16 %v13131_v33, %v13130_v8  ;;  %v16552_v8 = vpack.c.bf16 %v5888_v19, %v5887_v25  ;;  %v5872_v33 = vld [vmem:[%s23890_s7 + $0x78] sm:$0xff] }
 0x529   : > { %16469 = vmatprep.subr.bf16.mxu1 %v16468_v0 }
 0x52b   : > { %5634 = vmatmul.mubr.f32.gmra.mrb[4].mxu1 %v20800_v10  ;;  %v12969_v10 = vld [vmem:[%s23888_s5 + $0x8b8] sm:$0xff] }
 0x52c   : > { %16471 = vmatpush1.bf16.msra.mxu1 %v16470_v30  ;;  %5639 = vmatprep.mubr.f32.mxu1 %v20979_v14  ;;  %v16480_v56 = vpack.c.bf16 %v12969_v10, %v12967_v11  ;;  %v5859_v30 = vld [vmem:[%s23890_s7 + $0x10] sm:$0xff]  ;;  %v13133_v11 = vld [vmem:[%s23890_s7 + $0x5d8] sm:$0xff]  ;;  %v5861_v10 = vld [vmem:[%s23890_s7 + $0x20] sm:$0xff] }
 0x52d   : > { %16473 = vmatprep.subr.bf16.mxu1 %v16472_v39  ;;  %v5860_v39 = vld [vmem:[%s23890_s7 + $0x18] sm:$0xff] }
 0x52e   : > { %v16530_v55 = vpack.c.bf16 %v5860_v39, %v5859_v30  ;;  %v13026_v39 = vld [vmem:[%s23890_s7 + $0x280] sm:$0xff] }
 0x52f   : > { %5640 = vmatmul.mubr.f32.gmra.mrb[6].mxu1 %v5523_v26  ;;  %v5877_v26 = vld [vmem:[%s23890_s7 + $0xa0] sm:$0xff] }
 0x530   : > { %16475 = vmatpush1.bf16.msra.mxu1 %v16474_v29  ;;  %5755 = vmatprep.mubr.f32.mxu1 %v20979_v14  ;;  %v16670_v29 = vpack.c.bf16 %v13115_v2, %v13114_v24  ;;  %v5790_v24 = vlaneseq }
 0x531   : > { %16477 = vmatprep.subr.bf16.mxu1 %v16476_v46  ;;  %v5878_v46 = vld [vmem:[%s23890_s7 + $0xa8] sm:$0xff] }
 0x532   : > { %v16532_v17 = vpack.c.bf16 %v5878_v46, %v5877_v26  ;;  %v5791_v2 = vshrl.u32 %v5790_v24, 7  ;;  %v5788_v26 = vld [vmem:[%s23889_s6] sm:$0x3] }
 0x534   : > { %16479 = vmatpush1.bf16.msra.mxu1 %v16478_v3  ;;  %v5862_v3 = vld [vmem:[%s23890_s7 + $0x28] sm:$0xff]  ;;  %v5796_v46 = vsub.s32 1, %v5791_v2 }
 0x535   : > { %16481 = vmatprep.subr.bf16.mxu1 %v16480_v56  ;;  %v16672_v56 = vpack.c.bf16 %v13133_v11, %v13132_v36  ;;  %v16534_v47 = vpack.c.bf16 %v5862_v3, %v5861_v10 }
 0x538   : > { %16483 = vmatpush1.bf16.msra.mxu1 %v16482_v38  ;;  %v5879_v38 = vld [vmem:[%s23890_s7 + $0xb0] sm:$0xff] }
 0x539   : > { %16485 = vmatprep.subr.bf16.mxu1 %v16484_v60  ;;  %v5880_v60 = vld [vmem:[%s23890_s7 + $0xb8] sm:$0xff] }
 0x53a   : > { %v16536_v43 = vpack.c.bf16 %v5880_v60, %v5879_v38 }
 0x53c   : > { %16487 = vmatpush1.bf16.msra.mxu1 %v16486_v18  ;;  %v5864_v18 = vld [vmem:[%s23890_s7 + $0x38] sm:$0xff] }
 0x53d   : > { %16489 = vmatprep.subr.bf16.mxu1 %v16488_v16  ;;  %v16676_v16 = vpack.c.bf16 %v13135_v59, %v13134_v23  ;;  %v16538_v32 = vpack.c.bf16 %v5864_v18, %v5863_v48  ;;  %v21464_v48 = vld [vmem:[#allocation6 + $0x38] sm:$0x1]  ;;  %v21466_v18 = vld [vmem:[#allocation6 + $0x30] sm:$0x1] }
 0x53e   : > { %v5932_v7 = vrot.slane %v21464_v48, 1 }
 0x540   : > { %16491 = vmatpush1.bf16.msra.mxu1 %v16490_v41  ;;  %v5881_v41 = vld [vmem:[%s23890_s7 + $0xc0] sm:$0xff] }
 0x541   : > { %16653 = vmatprep.subr.bf16.mxu1 %v16652_v57  ;;  %v5882_v57 = vld [vmem:[%s23890_s7 + $0xc8] sm:$0xff] }
 0x542   : > { %v16540_v45 = vpack.c.bf16 %v5882_v57, %v5881_v41 }
 0x543   : > { %5756 = vmatmul.mubr.f32.vlgmr.msra.gmra.mrb[0].mxu1 %v20572_v22  ;;  %v13129_v22 = vld [vmem:[%s23890_s7 + $0x5b8] sm:$0xff] }
 0x544   : > { %5761 = vmatprep.mubr.f32.mxu1 %v20979_v14  ;;  %16655 = vmatpush3.bf16.msra.mxu1 %v16654_v27  ;;  %v16664_v5 = vpack.c.bf16 %v13129_v22, %v13128_v50  ;;  %v5866_v27 = vld [vmem:[%s23890_s7 + $0x48] sm:$0xff]  ;;  %v5867_v22 = vld [vmem:[%s23890_s7 + $0x50] sm:$0xff] }
 0x545   : > { %16657 = vmatprep.subr.bf16.mxu1 %v16656_v53  ;;  %v16680_v53 = vpack.c.bf16 %v13137_v1, %v13136_v54  ;;  %v16542_v20 = vpack.c.bf16 %v5866_v27, %v5865_v4  ;;  %v13187_v50 = vld [vmem:[%s23890_s7 + $0x788] sm:$0xff]  ;;  %v21470_v54 = vld [vmem:[#allocation6 + $0x50] sm:$0x1]  ;;  %v5929_v27 = vrot.slane %v21466_v18, 1 }
 0x547   : > { %5762 = vmatmul.mubr.f32.gmra.mrb[2].mxu1 %v20588_v42  ;;  %v5858_v42 = vld [vmem:[%s23890_s7 + $0x8] sm:$0xff] }
 0x548   : > { %5767 = vmatprep.mubr.f32.mxu1 %v20979_v14  ;;  %16659 = vmatpush3.bf16.msra.mxu1 %v16658_v49  ;;  %v16526_v62 = vpack.c.bf16 %v5858_v42, %v5857_v37  ;;  %v5883_v49 = vld [vmem:[%s23890_s7 + $0xd0] sm:$0xff]  ;;  %v5885_v37 = vld [vmem:[%s23890_s7 + $0xe0] sm:$0xff]  ;;  %v5886_v42 = vld [vmem:[%s23890_s7 + $0xe8] sm:$0xff] }
 0x549   : > { %16661 = vmatprep.subr.bf16.mxu1 %v16660_v51  ;;  %v5884_v51 = vld [vmem:[%s23890_s7 + $0xd8] sm:$0xff] }
 0x54a   : > { %16527 = vmatpush3.bf16.msra.mxu0 %v16526_v62  ;;  %v16544_v9 = vpack.c.bf16 %v5884_v51, %v5883_v49  ;;  %v5869_v62 = vld [vmem:[%s23890_s7 + $0x60] sm:$0xff] }
 0x54b   : > { %5768 = vmatmul.mubr.f32.gmra.mrb[4].mxu1 %v21011_v31  ;;  %v13113_v31 = vld [vmem:[%s23890_s7 + $0x538] sm:$0xff]  ;;  %16529 = vmatprep.subr.bf16.mxu0 %v16528_v21  ;;  %v5871_v21 = vld [vmem:[%s23890_s7 + $0x70] sm:$0xff] }
 0x54c   : > { %5773 = vmatprep.mubr.f32.mxu1 %v20979_v14  ;;  %16663 = vmatpush3.bf16.msra.mxu1 %v16662_v35  ;;  %v16666_v0 = vpack.c.bf16 %v13113_v31, %v13112_v28  ;;  %v5868_v35 = vld [vmem:[%s23890_s7 + $0x58] sm:$0xff]  ;;  %v16548_v28 = vpack.c.bf16 %v5886_v42, %v5885_v37  ;;  %v5870_v31 = vld [vmem:[%s23890_s7 + $0x68] sm:$0xff]  ;;  %v16554_v30 = vpack.c.bf16 %v5872_v33, %v5871_v21 }
 0x54d   : > { %16665 = vmatprep.subr.bf16.mxu1 %v16664_v5  ;;  %v16716_v5 = vpack.c.bf16 %v13187_v50, %v13186_v34  ;;  %v6693_v34 = vrot.slane %v21468_v44, 2  ;;  %v5935_v50 = vrot.slane %v21470_v54, 1  ;;  %v13171_v37 = vld [vmem:[%s23890_s7 + $0x708] sm:$0xff] }
 0x54e   : > { %16531 = vmatpush3.bf16.msra.mxu0 %v16530_v55 }
 0x54f   : > { %5774 = vmatmul.mubr.f32.gmra.mrb[6].mxu1 %v5657_v52  ;;  %16533 = vmatprep.subr.bf16.mxu0 %v16532_v17  ;;  %v16546_v52 = vpack.c.bf16 %v5868_v35, %v5867_v22  ;;  %v5797_v17 = vrot.slane %v5788_v26, %v5796_v46  ;;  %v13173_v46 = vld [vmem:[%s23890_s7 + $0x718] sm:$0xff] }
 0x550   : > { %16667 = vmatpush3.bf16.msra.mxu1 %v16666_v0  ;;  %v16550_v0 = vpack.c.bf16 %v5870_v31, %v5869_v62  ;;  %v13188_v62 = vld [vmem:[%s23890_s7 + $0x790] sm:$0xff] }
 0x551   : > { %16669 = vmatprep.subr.bf16.mxu1 %v16668_v13  ;;  %v13027_v13 = vld [vmem:[%s23890_s7 + $0x288] sm:$0xff] }
 0x552   : > { %16535 = vmatpush3.bf16.msra.mxu0 %v16534_v47  ;;  %v16556_v55 = vpack.c.bf16 %v13027_v13, %v13026_v39  ;;  %v21497_v13 = vld [vmem:[#allocation6 + $0x70] sm:$0x1] }
 0x553   : > { %16537 = vmatprep.subr.bf16.mxu0 %v16536_v43 }
 0x554   : > { %16671 = vmatpush3.bf16.msra.mxu1 %v16670_v29  ;;  %v5792_v29 = vsub.s32 0, %v5791_v2 }
 0x555   : > { %16673 = vmatprep.subr.bf16.mxu1 %v16672_v56 }
 0x556   : > { %16539 = vmatpush3.bf16.msra.mxu0 %v16538_v32  ;;  %v5793_v36 = vrot.slane %v5788_v26, %v5792_v29  ;;  %v13172_v26 = vld [vmem:[%s23890_s7 + $0x710] sm:$0xff] }
 0x557   : > { %16541 = vmatprep.subr.bf16.mxu0 %v16540_v45  ;;  %v21472_v45 = vld [vmem:[#allocation6 + $0x50] sm:$0x3] }
 0x558   : > { %16675 = vmatpush3.bf16.msra.mxu1 %v16674_v61  ;;  %v6699_v22 = vrot.slane %v21472_v45, 2  ;;  %v13011_v45 = vld [vmem:[%s23890_s7 + $0x208] sm:$0xff] }
 0x559   : > { %16677 = vmatprep.subr.bf16.mxu1 %v16676_v16 }
 0x55a   : > { %16543 = vmatpush3.bf16.msra.mxu0 %v16542_v20  ;;  %v21477_v20 = vld [vmem:[#allocation6 + $0x58] sm:$0x3] }
 0x55b   : > { %16545 = vmatprep.subr.bf16.mxu0 %v16544_v9  ;;  %v13170_v9 = vld [vmem:[%s23890_s7 + $0x700] sm:$0xff] }
 0x55c   : > { %16679 = vmatpush3.bf16.msra.mxu1 %v16678_v40 }
 0x55d   : > { %16681 = vmatprep.subr.bf16.mxu1 %v16680_v53  ;;  %v21475_v53 = vld [vmem:[#allocation6 + $0x58] sm:$0x1] }
 0x55e   : > { %16547 = vmatpush3.bf16.msra.mxu0 %v16546_v52  ;;  %v5938_v42 = vrot.slane %v21475_v53, 1  ;;  %v6675_v53 = vld [vmem:[#allocation6 + $0x98] sm:$0x3] }
 0x55f   : > { %16549 = vmatprep.subr.bf16.mxu0 %v16548_v28  ;;  %v6702_v28 = vrot.slane %v21477_v20, 2  ;;  %v13192_v20 = vld [vmem:[%s23890_s7 + $0x7b0] sm:$0xff] }
 0x560   : > { %16683 = vmatpush3.bf16.msra.mxu1 %v16682_v58  ;;  %v6696_v58 = vrot.slane %v6663_v15, 2 }
 0x561   : > { %16717 = vmatprep.subr.bf16.mxu1 %v16716_v5 }
 0x562   : > { %16551 = vmatpush3.bf16.msra.mxu0 %v16550_v0 }
 0x563   : > { %16553 = vmatprep.subr.bf16.mxu0 %v16552_v8  ;;  %v13189_v8 = vld [vmem:[%s23890_s7 + $0x798] sm:$0xff] }
 0x566   : > { %16555 = vmatpush3.bf16.msra.mxu0 %v16554_v30 }
 0x567   : > { %16557 = vmatprep.subr.bf16.mxu0 %v16556_v55 }
 0x616   : > { %v5757_v11 = vpop.f32.mrb[0].mxu1 }
 0x617   : > { %v5800_v10 = vadd.f32 %v5793_v36, %v5757_v11  ;;  %v5759_v3 = vpop.f32.mrb[1].mxu1  ;;  %v16718_v11 = vpack.c.bf16 %v13171_v37, %v13170_v9  ;;  %v13193_v9 = vld [vmem:[%s23890_s7 + $0x7b8] sm:$0xff] }
 0x618   : > { %v5801_v56 = vadd.f32 %v5797_v17, %v5759_v3  ;;  %v21512_v3 = vld [vmem:[%s23890_s7 + $0x7a0] sm:$0xff] }
 0x619   : > { %v5808_v47 = vmax.f32 %v5800_v10, 0.0  ;;  %v21507_v10 = vld [vmem:[#allocation6 + $0x78] sm:$0x3] }
 0x61a   : > { %v5809_v6 = vmax.f32 %v5801_v56, 0.0  ;;  %v5763_v12 = vpop.f32.mrb[2].mxu1  ;;  %v21514_v56 = vld [vmem:[#allocation6 + $0x70] sm:$0x3] }
 0x61b   : > { %v5824_v61 = vrot.slane %v5808_v47, 7  ;;  %v5802_v38 = vadd.f32 %v5793_v36, %v5763_v12  ;;  %v5765_v60 = vpop.f32.mrb[3].mxu1 }
 0x61c   : > { %v5825_v23 = vrot.slane %v5809_v6, 7  ;;  %v5803_v43 = vadd.f32 %v5797_v17, %v5765_v60 }
 0x61d   : > { %5841 = vst [vmem:[#allocation6 + $0x20] sm:$0x1e] %v5824_v61  ;;  %v5810_v59 = vmax.f32 %v5802_v38, 0.0  ;;  %v16720_v61 = vpack.c.bf16 %v13189_v8, %v13188_v62 }
 0x61e   : > { %5842 = vst [vmem:[#allocation6 + $0x28] sm:$0x1e] %v5825_v23  ;;  %v5811_v16 = vmax.f32 %v5803_v43, 0.0  ;;  %v5769_v32 = vpop.f32.mrb[4].mxu1  ;;  %v13191_v23 = vld [vmem:[%s23890_s7 + $0x7a8] sm:$0xff] }
 0x61f   : > { %v5826_v40 = vrot.slane %v5810_v59, 7  ;;  %v5804_v41 = vadd.f32 %v5793_v36, %v5769_v32  ;;  %v5771_v57 = vpop.f32.mrb[5].mxu1 }
 0x620   : > { %v5827_v1 = vrot.slane %v5811_v16, 7  ;;  %v5805_v4 = vadd.f32 %v5797_v17, %v5771_v57  ;;  %v16722_v57 = vpack.c.bf16 %v13173_v46, %v13172_v26  ;;  %v13028_v46 = vld [vmem:[%s23890_s7 + $0x290] sm:$0xff] }
 0x621   : > { %5843 = vst [vmem:[#allocation6 + $0x40] sm:$0x1e] %v5826_v40  ;;  %v5812_v63 = vmax.f32 %v5804_v41, 0.0  ;;  %v5941_v40 = vrot.slane %v21497_v13, 1  ;;  %v13174_v41 = vld [vmem:[%s23890_s7 + $0x720] sm:$0xff] }
 0x622   : > { %5844 = vst [vmem:[#allocation6 + $0x48] sm:$0x1e] %v5827_v1  ;;  %v5813_v49 = vmax.f32 %v5805_v4, 0.0  ;;  %v5775_v51 = vpop.f32.mrb[6].mxu1  ;;  %v6708_v4 = vrot.slane %v21507_v10, 2  ;;  %v13195_v10 = vld [vmem:[%s23890_s7 + $0x7c8] sm:$0xff] }
 0x623   : > { %v5828_v35 = vrot.slane %v5812_v63, 7  ;;  %v5806_v5 = vadd.f32 %v5793_v36, %v5775_v51  ;;  %v5777_v52 = vpop.f32.mrb[7].mxu1  ;;  %v21505_v36 = vld [vmem:[#allocation6 + $0x78] sm:$0x1] }
 0x624   : > { %v5829_v31 = vrot.slane %v5813_v49, 7  ;;  %v5807_v0 = vadd.f32 %v5797_v17, %v5777_v52  ;;  %v5893_v25 = vld [vmem:[#allocation6 + $0x20] sm:$0xfe]  ;;  %v5944_v1 = vrot.slane %v21505_v36, 1  ;;  %v6980_v13 = vld [vmem:[#allocation6 + $0x58] sm:$0x1] }
 0x625   : > { %v6660_v19 = vld [vmem:[#allocation6 + $0x20] sm:$0xfc]  ;;  %5845 = vst [vmem:[#allocation6 + $0x60] sm:$0x1e] %v5828_v35  ;;  %v5814_v21 = vmax.f32 %v5806_v5, 0.0  ;;  %v5928_v39 = vrot.slane %v5893_v25, 1 }
 0x626   : > { %v5894_v33 = vld [vmem:[#allocation6 + $0x28] sm:$0xfe]  ;;  %5846 = vst [vmem:[#allocation6 + $0x68] sm:$0x1e] %v5829_v31  ;;  %v5815_v55 = vmax.f32 %v5807_v0, 0.0  ;;  %v6692_v29 = vrot.slane %v6660_v19, 2 }
 0x627   : > { %v6661_v30 = vld [vmem:[#allocation6 + $0x28] sm:$0xfc]  ;;  %v5931_v24 = vrot.slane %v5894_v33, 1  ;;  %v5830_v17 = vrot.slane %v5814_v21, 7  ;;  %v5930_v43 = vsel %vm5921_vm2, %v5928_v39, %v5929_v27  ;;  %v13010_v0 = vld [vmem:[%s23890_s7 + $0x200] sm:$0xff]  ;;  %v13177_v19 = vld [vmem:[%s23890_s7 + $0x738] sm:$0xff]  ;;  %v16728_v33 = vpack.c.bf16 %v13193_v9, %v13192_v20 }
 0x628   : > { %v6695_v2 = vrot.slane %v6661_v30, 2  ;;  %v5831_v47 = vrot.slane %v5815_v55, 7  ;;  %v5897_v38 = vld [vmem:[#allocation6 + $0x40] sm:$0xfe]  ;;  %v6694_v59 = vsel %vm6189_vm3, %v6692_v29, %v6693_v34  ;;  %v13175_v27 = vld [vmem:[%s23890_s7 + $0x728] sm:$0xff]  ;;  %v6705_v34 = vrot.slane %v21514_v56, 2 }
 0x629   : > { %v5933_v6 = vsel %vm5921_vm2, %v5931_v24, %v5932_v7  ;;  %v6664_v60 = vld [vmem:[#allocation6 + $0x40] sm:$0xfc]  ;;  %5847 = vst [vmem:[#allocation6 + $0x80] sm:$0x1e] %v5830_v17  ;;  %v5898_v48 = vld [vmem:[#allocation6 + $0x48] sm:$0xfe]  ;;  %v16726_v54 = vpack.c.bf16 %v13175_v27, %v13174_v41 }
 0x62a   : > { %v6697_v12 = vsel %vm6189_vm3, %v6695_v2, %v6696_v58  ;;  %6056 = vmatprep.mubr.f32.mxu0 %v5933_v6  ;;  %v6665_v18 = vld [vmem:[#allocation6 + $0x48] sm:$0xfc]  ;;  %v5934_v16 = vrot.slane %v5897_v38, 1  ;;  %v6698_v32 = vrot.slane %v6664_v60, 2  ;;  %5848 = vst [vmem:[#allocation6 + $0x88] sm:$0x1e] %v5831_v47  ;;  %v16724_v58 = vpack.c.bf16 %v13191_v23, %v21512_v3 }
 0x62b   : > { %6821 = vmatprep.mubr.f32.mxu1 %v6697_v12  ;;  %6057 = vmatmul.mubr.f32.gmra.mrb[10].mxu0 %v5930_v43  ;;  %v5937_v15 = vrot.slane %v5898_v48, 1  ;;  %v6701_v44 = vrot.slane %v6665_v18, 2  ;;  %v6674_v25 = vld [vmem:[#allocation6 + $0x90] sm:$0x3]  ;;  %v6978_v39 = vld [vmem:[#allocation6 + $0x48] sm:$0xfe]  ;;  %v16558_v3 = vpack.c.bf16 %v13011_v45, %v13010_v0 }
 0x62c   : > { %6822 = vmatmul.mubr.f32.vlgmr.msra.gmra.mrb[8].mxu1 %v6694_v59  ;;  %v5901_v49 = vld [vmem:[#allocation6 + $0x60] sm:$0xfe]  ;;  %v5936_v35 = vsel %vm5921_vm2, %v5934_v16, %v5935_v50  ;;  %v6700_v5 = vsel %vm6189_vm3, %v6698_v32, %v6699_v22  ;;  %v6714_v50 = vrot.slane %v6675_v53, 2  ;;  %v13176_v22 = vld [vmem:[%s23890_s7 + $0x730] sm:$0xff]  ;;  %v6711_v26 = vrot.slane %v6674_v25, 2  ;;  %v13029_v17 = vld [vmem:[%s23890_s7 + $0x298] sm:$0xff] }
 0x62d   : > { %16719 = vmatpush3.bf16.msra.mxu1 %v16718_v11  ;;  %v5939_v63 = vsel %vm5921_vm2, %v5937_v15, %v5938_v42  ;;  %v6703_v7 = vsel %vm6189_vm3, %v6701_v44, %v6702_v28  ;;  %v6668_v51 = vld [vmem:[#allocation6 + $0x60] sm:$0xfc]  ;;  %v5902_v52 = vld [vmem:[#allocation6 + $0x68] sm:$0xfe]  ;;  %v5940_v42 = vrot.slane %v5901_v49, 1  ;;  %v16730_v56 = vpack.c.bf16 %v13177_v19, %v13176_v22  ;;  %v13012_v12 = vld [vmem:[%s23890_s7 + $0x210] sm:$0xff] }
 0x62e   : > { %16721 = vmatprep.subr.bf16.mxu1 %v16720_v61  ;;  %6061 = vmatprep.mubr.f32.mxu0 %v5939_v63  ;;  %v6669_v37 = vld [vmem:[#allocation6 + $0x68] sm:$0xfc]  ;;  %v6704_v28 = vrot.slane %v6668_v51, 2  ;;  %v5943_v62 = vrot.slane %v5902_v52, 1  ;;  %v13194_v11 = vld [vmem:[%s23890_s7 + $0x7c0] sm:$0xff]  ;;  %v7012_v47 = vrot.slane %v6978_v39, 1  ;;  %v16560_v43 = vpack.c.bf16 %v13029_v17, %v13028_v46 }
 0x62f   : > { %6826 = vmatprep.mubr.f32.mxu1 %v6703_v7  ;;  %6062 = vmatmul.mubr.f32.gmra.mrb[12].mxu0 %v5936_v35  ;;  %v6707_v31 = vrot.slane %v6669_v37, 2  ;;  %v5942_v55 = vsel %vm5921_vm2, %v5940_v42, %v5941_v40  ;;  %v7013_v6 = vrot.slane %v6980_v13, 1  ;;  %v13013_v38 = vld [vmem:[%s23890_s7 + $0x218] sm:$0xff]  ;;  %v13178_v60 = vld [vmem:[%s23890_s7 + $0x740] sm:$0xff]  ;;  %v16732_v59 = vpack.c.bf16 %v13195_v10, %v13194_v11  ;;  %v13031_v18 = vld [vmem:[%s23890_s7 + $0x2a8] sm:$0xff] }
 0x630   : > { %6827 = vmatmul.mubr.f32.gmra.mrb[10].mxu1 %v6700_v5  ;;  %v5945_v8 = vsel %vm5921_vm2, %v5943_v62, %v5944_v1  ;;  %v6672_v30 = vld [vmem:[#allocation6 + $0x80] sm:$0xfc]  ;;  %v6706_v24 = vsel %vm6189_vm3, %v6704_v28, %v6705_v34  ;;  %v13196_v32 = vld [vmem:[%s23890_s7 + $0x7d0] sm:$0xff]  ;;  %v13197_v15 = vld [vmem:[%s23890_s7 + $0x7d8] sm:$0xff] }
 0x631   : > { %16723 = vmatpush3.bf16.msra.mxu1 %v16722_v57  ;;  %v6709_v21 = vsel %vm6189_vm3, %v6707_v31, %v6708_v4  ;;  %6066 = vmatprep.mubr.f32.mxu0 %v5945_v8  ;;  %v6673_v2 = vld [vmem:[#allocation6 + $0x88] sm:$0xfc]  ;;  %v6710_v29 = vrot.slane %v6672_v30, 2  ;;  %v13030_v48 = vld [vmem:[%s23890_s7 + $0x2a0] sm:$0xff]  ;;  %v7014_v41 = vsel %vm5921_vm2, %v7012_v47, %v7013_v6  ;;  %v16562_v57 = vpack.c.bf16 %v13013_v38, %v13012_v12  ;;  %v13180_v27 = vld [vmem:[%s23890_s7 + $0x750] sm:$0xff] }
 0x632   : > { %16725 = vmatprep.subr.bf16.mxu1 %v16724_v58  ;;  %6831 = vmatprep.mubr.f32.mxu1 %v6709_v21  ;;  %v6713_v36 = vrot.slane %v6673_v2, 2  ;;  %v21597_v16 = vld [vmem:[#allocation5] sm:$0xff]  ;;  %v21609_v40 = vld [vmem:[#allocation6 + $0x28] sm:$0xff]  ;;  %v16564_v53 = vpack.c.bf16 %v13031_v18, %v13030_v48  ;;  %v13181_v20 = vld [vmem:[%s23890_s7 + $0x758] sm:$0xff]  ;;  %v16736_v49 = vpack.c.bf16 %v13197_v15, %v13196_v32 }
 0x633   : > { %6067 = vmatmul.mubr.f32.gmra.mrb[14].mxu0 %v5942_v55  ;;  %v6712_v23 = vsel %vm6189_vm3, %v6710_v29, %v6711_v26  ;;  %v13014_v44 = vld [vmem:[%s23890_s7 + $0x220] sm:$0xff]  ;;  %v13015_v4 = vld [vmem:[%s23890_s7 + $0x228] sm:$0xff]  ;;  %v13032_v63 = vld [vmem:[%s23890_s7 + $0x2b0] sm:$0xff]  ;;  %v16738_v42 = vpack.c.bf16 %v13181_v20, %v13180_v27 }
 0x634   : > { %6832 = vmatmul.mubr.f32.gmra.mrb[12].mxu1 %v6706_v24  ;;  %6136 = vmatprep.mubr.f32.mxu0 %v20979_v14  ;;  %v6715_v61 = vsel %vm6189_vm3, %v6713_v36, %v6714_v50  ;;  %v13179_v14 = vld [vmem:[%s23890_s7 + $0x748] sm:$0xff]  ;;  %v13033_v7 = vld [vmem:[%s23890_s7 + $0x2b8] sm:$0xff]  ;;  %v21628_v58 = vld [vmem:[#allocation6 + $0x20] sm:$0xff]  ;;  %v16566_v37 = vpack.c.bf16 %v13015_v4, %v13014_v44 }
 0x635   : > { %16727 = vmatpush3.bf16.msra.mxu1 %v16726_v54  ;;  %6836 = vmatprep.mubr.f32.mxu1 %v6715_v61  ;;  %v16734_v1 = vpack.c.bf16 %v13179_v14, %v13178_v60  ;;  %v13198_v51 = vld [vmem:[%s23890_s7 + $0x7e0] sm:$0xff]  ;;  %v13199_v34 = vld [vmem:[%s23890_s7 + $0x7e8] sm:$0xff]  ;;  %v13016_v9 = vld [vmem:[%s23890_s7 + $0x230] sm:$0xff]  ;;  %v16568_v31 = vpack.c.bf16 %v13033_v7, %v13032_v63 }
 0x636   : > { %16729 = vmatprep.subr.bf16.mxu1 %v16728_v33  ;;  %v13017_v35 = vld [vmem:[%s23890_s7 + $0x238] sm:$0xff]  ;;  %v13182_v5 = vld [vmem:[%s23890_s7 + $0x760] sm:$0xff]  ;;  %v21646_v52 = vld [vmem:[#allocation6 + $0x48] sm:$0xff]  ;;  %v16740_v45 = vpack.c.bf16 %v13199_v34, %v13198_v51 }
 0x637   : > { %6137 = vmatmul.mubr.f32.vlgmr.msra.gmra.mrb[16].mxu0 %v21597_v16  ;;  %v6158_v28 = vld [vmem:[#allocation6 + $0x8] sm:$0xfc]  ;;  %v6160_v62 = vld [vmem:[#allocation6 + $0x18] sm:$0x3]  ;;  %v13034_v25 = vld [vmem:[%s23890_s7 + $0x2c0] sm:$0xff]  ;;  %v16570_v30 = vpack.c.bf16 %v13017_v35, %v13016_v9 }
 0x638   : > { %6837 = vmatmul.mubr.f32.gmra.mrb[14].mxu1 %v6712_v23  ;;  %16559 = vmatpush3.bf16.msra.mxu0 %v16558_v3  ;;  %v13183_v0 = vld [vmem:[%s23890_s7 + $0x768] sm:$0xff]  ;;  %v21658_v50 = vld [vmem:[#allocation6 + $0x40] sm:$0xff]  ;;  %v13200_v22 = vld [vmem:[%s23890_s7 + $0x7f0] sm:$0xff]  ;;  %v6193_v8 = vrot.slane %v6158_v28, 2  ;;  %v6194_v21 = vrot.slane %v6160_v62, 2 }
 0x639   : > { %16731 = vmatpush3.bf16.msra.mxu1 %v16730_v56  ;;  %6141 = vmatprep.mubr.f32.mxu0 %v21609_v40  ;;  %v13035_v54 = vld [vmem:[%s23890_s7 + $0x2c8] sm:$0xff]  ;;  %v13201_v19 = vld [vmem:[%s23890_s7 + $0x7f8] sm:$0xff]  ;;  %v16742_v39 = vpack.c.bf16 %v13183_v0, %v13182_v5  ;;  %v13018_v13 = vld [vmem:[%s23890_s7 + $0x240] sm:$0xff] }
 0x63a   : > { %7138 = vmatprep.mubr.f32.mxu1 %v7014_v41  ;;  %16561 = vmatprep.subr.bf16.mxu0 %v16560_v43  ;;  %v21667_v33 = vld [vmem:[#allocation6 + $0x68] sm:$0xff]  ;;  %v16572_v55 = vpack.c.bf16 %v13035_v54, %v13034_v25  ;;  %v16744_v24 = vpack.c.bf16 %v13201_v19, %v13200_v22  ;;  %v13184_v29 = vld [vmem:[%s23890_s7 + $0x770] sm:$0xff]  ;;  %v13185_v26 = vld [vmem:[%s23890_s7 + $0x778] sm:$0xff]  ;;  %v6195_v3 = vsel %vm6189_vm3, %v6193_v8, %v6194_v21 }
 0x63b   : > { %16733 = vmatprep.subr.bf16.mxu1 %v16732_v59  ;;  %6142 = vmatmul.mubr.f32.gmra.mrb[18].mxu0 %v21628_v58  ;;  %v13019_v2 = vld [vmem:[%s23890_s7 + $0x248] sm:$0xff]  ;;  %v21682_v46 = vld [vmem:[#allocation6 + $0x60] sm:$0xff]  ;;  %v13036_v36 = vld [vmem:[%s23890_s7 + $0x2d0] sm:$0xff]  ;;  %v16746_v47 = vpack.c.bf16 %v13185_v26, %v13184_v29 }
 0x63c   : > { %16563 = vmatpush3.bf16.msra.mxu0 %v16562_v57  ;;  %6146 = vmatprep.mubr.f32.mxu0 %v21646_v52  ;;  %v13037_v17 = vld [vmem:[%s23890_s7 + $0x2d8] sm:$0xff]  ;;  %v6977_v11 = vld [vmem:[#allocation6 + $0x40] sm:$0xfe]  ;;  %v6979_v10 = vld [vmem:[#allocation6 + $0x50] sm:$0x1]  ;;  %v16574_v56 = vpack.c.bf16 %v13019_v2, %v13018_v13 }
 0x63d   : > { %16735 = vmatpush3.bf16.msra.mxu1 %v16734_v1  ;;  %16565 = vmatprep.subr.bf16.mxu0 %v16564_v53  ;;  %v6982_v6 = vld [vmem:[#allocation6 + $0x68] sm:$0xfe]  ;;  %v6984_v12 = vld [vmem:[#allocation6 + $0x78] sm:$0x1]  ;;  %v16576_v61 = vpack.c.bf16 %v13037_v17, %v13036_v36  ;;  %v13020_v38 = vld [vmem:[%s23890_s7 + $0x250] sm:$0xff]  ;;  %v7009_v14 = vrot.slane %v6977_v11, 1 }
 0x63e   : > { %16737 = vmatprep.subr.bf16.mxu1 %v16736_v49  ;;  %v13021_v60 = vld [vmem:[%s23890_s7 + $0x258] sm:$0xff]  ;;  %v7010_v23 = vrot.slane %v6979_v10, 1  ;;  %v13038_v43 = vld [vmem:[%s23890_s7 + $0x2e0] sm:$0xff]  ;;  %v13039_v59 = vld [vmem:[%s23890_s7 + $0x2e8] sm:$0xff]  ;;  %v7018_v18 = vrot.slane %v6982_v6, 1  ;;  %v7019_v32 = vrot.slane %v6984_v12, 1 }
 0x63f   : > { %6147 = vmatmul.mubr.f32.gmra.mrb[20].mxu0 %v21658_v50  ;;  %v6983_v48 = vld [vmem:[#allocation6 + $0x70] sm:$0x1]  ;;  %v6981_v15 = vld [vmem:[#allocation6 + $0x60] sm:$0xfe]  ;;  %v16578_v44 = vpack.c.bf16 %v13021_v60, %v13020_v38  ;;  %v6986_v41 = vld [vmem:[#allocation6 + $0x88] sm:$0xfe]  ;;  %v16580_v1 = vpack.c.bf16 %v13039_v59, %v13038_v43 }
 0x640   : > { %16567 = vmatpush3.bf16.msra.mxu0 %v16566_v37  ;;  %6151 = vmatprep.mubr.f32.mxu0 %v21667_v33  ;;  %v6988_v57 = vld [vmem:[#allocation6 + $0x98] sm:$0x1]  ;;  %v7016_v4 = vrot.slane %v6983_v48, 1  ;;  %v13022_v27 = vld [vmem:[%s23890_s7 + $0x260] sm:$0xff]  ;;  %v13023_v53 = vld [vmem:[%s23890_s7 + $0x268] sm:$0xff]  ;;  %v7011_v7 = vsel %vm5921_vm2, %v7009_v14, %v7010_v23  ;;  %v7015_v49 = vrot.slane %v6981_v15, 1  ;;  %v7020_v35 = vsel %vm5921_vm2, %v7018_v18, %v7019_v32 }
 0x641   : > { %16739 = vmatpush3.bf16.msra.mxu1 %v16738_v42  ;;  %16569 = vmatprep.subr.bf16.mxu0 %v16568_v31  ;;  %v13040_v20 = vld [vmem:[%s23890_s7 + $0x2f0] sm:$0xff]  ;;  %v13041_v51 = vld [vmem:[%s23890_s7 + $0x2f8] sm:$0xff]  ;;  %v6990_v34 = vld [vmem:[#allocation6 + $0xa8] sm:$0xfe]  ;;  %v7024_v5 = vrot.slane %v6986_v41, 1  ;;  %v7025_v37 = vrot.slane %v6988_v57, 1  ;;  %v16582_v62 = vpack.c.bf16 %v13023_v53, %v13022_v27 }
 0x642   : > { %16741 = vmatprep.subr.bf16.mxu1 %v16740_v45  ;;  %v6987_v63 = vld [vmem:[#allocation6 + $0x90] sm:$0x1]  ;;  %v6992_v9 = vld [vmem:[#allocation6 + $0xb8] sm:$0x1]  ;;  %v6985_v42 = vld [vmem:[#allocation6 + $0x80] sm:$0xfe]  ;;  %v16584_v54 = vpack.c.bf16 %v13041_v51, %v13040_v20  ;;  %v7017_v21 = vsel %vm5921_vm2, %v7015_v49, %v7016_v4 }
 0x643   : > { %6152 = vmatmul.mubr.f32.gmra.mrb[22].mxu0 %v21682_v46  ;;  %v13024_v28 = vld [vmem:[%s23890_s7 + $0x270] sm:$0xff]  ;;  %v13025_v31 = vld [vmem:[%s23890_s7 + $0x278] sm:$0xff]  ;;  %v6157_v0 = vld [vmem:[#allocation6] sm:$0xfc]  ;;  %v7030_v45 = vrot.slane %v6990_v34, 1  ;;  %v7031_v22 = vrot.slane %v6992_v9, 1 }
 0x644   : > { %16571 = vmatpush3.bf16.msra.mxu0 %v16570_v30  ;;  %6319 = vmatprep.mubr.f32.mxu0 %v6195_v3  ;;  %v6159_v25 = vld [vmem:[#allocation6 + $0x10] sm:$0x3]  ;;  %v6989_v19 = vld [vmem:[#allocation6 + $0xa0] sm:$0xfe]  ;;  %v7021_v30 = vrot.slane %v6985_v42, 1  ;;  %v16586_v2 = vpack.c.bf16 %v13025_v31, %v13024_v28  ;;  %v6190_v26 = vrot.slane %v6157_v0, 2 }
 0x645   : > { %16743 = vmatpush3.bf16.msra.mxu1 %v16742_v39  ;;  %16573 = vmatprep.subr.bf16.mxu0 %v16572_v55  ;;  %v6991_v8 = vld [vmem:[#allocation6 + $0xb0] sm:$0x1]  ;;  %v7022_v39 = vrot.slane %v6987_v63, 1  ;;  %v13058_v13 = vld [vmem:[%s23890_s7 + $0x380] sm:$0xff]  ;;  %v13059_v55 = vld [vmem:[%s23890_s7 + $0x388] sm:$0xff]  ;;  %v6191_v36 = vrot.slane %v6159_v25, 2  ;;  %v7032_v6 = vsel %vm5921_vm2, %v7030_v45, %v7031_v22 }
 0x646   : > { %16745 = vmatprep.subr.bf16.mxu1 %v16744_v24  ;;  %v7026_v24 = vsel %vm5921_vm2, %v7024_v5, %v7025_v37  ;;  %v6164_v29 = vld [vmem:[#allocation6 + $0x38] sm:$0x3]  ;;  %v6162_v17 = vld [vmem:[#allocation6 + $0x28] sm:$0xfc]  ;;  %v7027_v11 = vrot.slane %v6989_v19, 1  ;;  %v7028_v10 = vrot.slane %v6991_v8, 1  ;;  %v16588_v3 = vpack.c.bf16 %v13059_v55, %v13058_v13 }
 0x647   : > { %v7023_v12 = vsel %vm5921_vm2, %v7021_v30, %v7022_v39  ;;  %v13061_v38 = vld [vmem:[%s23890_s7 + $0x398] sm:$0xff]  ;;  %v6199_v60 = vrot.slane %v6162_v17, 2  ;;  %v6200_v14 = vrot.slane %v6164_v29, 2  ;;  %v6161_v23 = vld [vmem:[#allocation6 + $0x20] sm:$0xfc]  ;;  %v6192_v59 = vsel %vm6189_vm3, %v6190_v26, %v6191_v36  ;;  %v13044_v41 = vld [vmem:[%s23890_s7 + $0x310] sm:$0xff] }
 0x648   : > { %16575 = vmatpush3.bf16.msra.mxu0 %v16574_v56  ;;  %v13042_v56 = vld [vmem:[%s23890_s7 + $0x300] sm:$0xff]  ;;  %v6163_v43 = vld [vmem:[#allocation6 + $0x30] sm:$0x3]  ;;  %v6166_v18 = vld [vmem:[#allocation6 + $0x48] sm:$0xfc]  ;;  %v7029_v15 = vsel %vm5921_vm2, %v7027_v11, %v7028_v10 }
 0x649   : > { %16747 = vmatpush3.bf16.msra.mxu1 %v16746_v47  ;;  %16577 = vmatprep.subr.bf16.mxu0 %v16576_v61  ;;  %v13043_v47 = vld [vmem:[%s23890_s7 + $0x308] sm:$0xff]  ;;  %v13060_v61 = vld [vmem:[%s23890_s7 + $0x390] sm:$0xff]  ;;  %v6168_v32 = vld [vmem:[#allocation6 + $0x58] sm:$0x3]  ;;  %v6197_v4 = vrot.slane %v6163_v43, 2  ;;  %v6201_v20 = vsel %vm6189_vm3, %v6199_v60, %v6200_v14  ;;  %v6205_v63 = vrot.slane %v6166_v18, 2 }
 0x64a   : > { %v16590_v48 = vpack.c.bf16 %v13043_v47, %v13042_v56  ;;  %v13045_v57 = vld [vmem:[%s23890_s7 + $0x318] sm:$0xff]  ;;  %v13062_v27 = vld [vmem:[%s23890_s7 + $0x3a0] sm:$0xff]  ;;  %v13063_v53 = vld [vmem:[%s23890_s7 + $0x3a8] sm:$0xff] }
 0x64b   : > { %v6165_v49 = vld [vmem:[#allocation6 + $0x40] sm:$0xfc]  ;;  %v6167_v51 = vld [vmem:[#allocation6 + $0x50] sm:$0x3]  ;;  %v16594_v34 = vpack.c.bf16 %v13045_v57, %v13044_v41  ;;  %v6170_v9 = vld [vmem:[#allocation6 + $0x68] sm:$0xfc]  ;;  %v16596_v5 = vpack.c.bf16 %v13063_v53, %v13062_v27 }
 0x64c   : > { %7139 = vmatmul.mubr.f32.vlgmr.msra.gmra.mrb[16].mxu1 %v7011_v7  ;;  %16579 = vmatpush3.bf16.msra.mxu0 %v16578_v44  ;;  %v16592_v44 = vpack.c.bf16 %v13061_v38, %v13060_v61  ;;  %v6206_v7 = vrot.slane %v6168_v32, 2  ;;  %v13046_v37 = vld [vmem:[%s23890_s7 + $0x320] sm:$0xff]  ;;  %v13047_v42 = vld [vmem:[%s23890_s7 + $0x328] sm:$0xff]  ;;  %v6203_v31 = vrot.slane %v6167_v51, 2  ;;  %v13064_v0 = vld [vmem:[%s23890_s7 + $0x3b0] sm:$0xff]  ;;  %v6211_v45 = vrot.slane %v6170_v9, 2 }
 0x64d   : > { %7143 = vmatprep.mubr.f32.mxu1 %v7020_v35  ;;  %16581 = vmatprep.subr.bf16.mxu0 %v16580_v1  ;;  %v6196_v1 = vrot.slane %v6161_v23, 2  ;;  %v6172_v35 = vld [vmem:[#allocation6 + $0x78] sm:$0x3]  ;;  %v6169_v19 = vld [vmem:[#allocation6 + $0x60] sm:$0xfc]  ;;  %v13048_v39 = vld [vmem:[%s23890_s7 + $0x330] sm:$0xff] }
 0x64e   : > { %v13065_v25 = vld [vmem:[%s23890_s7 + $0x3b8] sm:$0xff]  ;;  %v6212_v22 = vrot.slane %v6172_v35, 2  ;;  %v6171_v8 = vld [vmem:[#allocation6 + $0x70] sm:$0x3]  ;;  %v13066_v29 = vld [vmem:[%s23890_s7 + $0x3c0] sm:$0xff] }
 0x64f   : > { %v6198_v28 = vsel %vm6189_vm3, %v6196_v1, %v6197_v4  ;;  %v16600_v30 = vpack.c.bf16 %v13065_v25, %v13064_v0  ;;  %v13049_v13 = vld [vmem:[%s23890_s7 + $0x338] sm:$0xff]  ;;  %v13067_v26 = vld [vmem:[%s23890_s7 + $0x3c8] sm:$0xff]  ;;  %v13050_v10 = vld [vmem:[%s23890_s7 + $0x340] sm:$0xff] }
 0x650   : > { %7144 = vmatmul.mubr.f32.gmra.mrb[18].mxu1 %v7017_v21  ;;  %16583 = vmatpush3.bf16.msra.mxu0 %v16582_v62  ;;  %v6202_v62 = vrot.slane %v6165_v49, 2  ;;  %v16598_v21 = vpack.c.bf16 %v13047_v42, %v13046_v37  ;;  %v6213_v36 = vsel %vm6189_vm3, %v6211_v45, %v6212_v22  ;;  %v16602_v17 = vpack.c.bf16 %v13049_v13, %v13048_v39  ;;  %v13068_v47 = vld [vmem:[%s23890_s7 + $0x3d0] sm:$0xff]  ;;  %v13053_v23 = vld [vmem:[%s23890_s7 + $0x358] sm:$0xff]  ;;  %v13054_v32 = vld [vmem:[%s23890_s7 + $0x360] sm:$0xff] }
 0x651   : > { %7148 = vmatprep.mubr.f32.mxu1 %v7026_v24  ;;  %16585 = vmatprep.subr.bf16.mxu0 %v16584_v54  ;;  %v6207_v54 = vsel %vm6189_vm3, %v6205_v63, %v6206_v7  ;;  %v6208_v24 = vrot.slane %v6169_v19, 2  ;;  %v16604_v11 = vpack.c.bf16 %v13067_v26, %v13066_v29  ;;  %v13052_v14 = vld [vmem:[%s23890_s7 + $0x350] sm:$0xff]  ;;  %v13073_v41 = vld [vmem:[%s23890_s7 + $0x3f8] sm:$0xff]  ;;  %v13090_v53 = vld [vmem:[%s23890_s7 + $0x480] sm:$0xff] }
 0x652   : > { %v6204_v55 = vsel %vm6189_vm3, %v6202_v62, %v6203_v31  ;;  %v13056_v4 = vld [vmem:[%s23890_s7 + $0x370] sm:$0xff]  ;;  %v13057_v27 = vld [vmem:[%s23890_s7 + $0x378] sm:$0xff]  ;;  %v13074_v49 = vld [vmem:[%s23890_s7 + $0x400] sm:$0xff] }
 0x653   : > { %v16618_v63 = vpack.c.bf16 %v13057_v27, %v13056_v4  ;;  %v13075_v51 = vld [vmem:[%s23890_s7 + $0x408] sm:$0xff]  ;;  %v13093_v9 = vld [vmem:[%s23890_s7 + $0x498] sm:$0xff]  ;;  %v13076_v37 = vld [vmem:[%s23890_s7 + $0x410] sm:$0xff] }
 0x654   : > { %7149 = vmatmul.mubr.f32.gmra.mrb[20].mxu1 %v7023_v12  ;;  %16587 = vmatpush3.bf16.msra.mxu0 %v16586_v2  ;;  %v6209_v2 = vrot.slane %v6171_v8, 2  ;;  %v13896_v12 = vpop.f32.mrb[8].mxu0  ;;  %v16622_v35 = vpack.c.bf16 %v13075_v51, %v13074_v49  ;;  %v13077_v42 = vld [vmem:[%s23890_s7 + $0x418] sm:$0xff]  ;;  %v13095_v62 = vld [vmem:[%s23890_s7 + $0x4a8] sm:$0xff]  ;;  %v13078_v25 = vld [vmem:[%s23890_s7 + $0x420] sm:$0xff] }
 0x655   : > { %7153 = vmatprep.mubr.f32.mxu1 %v7032_v6  ;;  %16589 = vmatprep.subr.bf16.mxu0 %v16588_v3  ;;  %v13051_v3 = vld [vmem:[%s23890_s7 + $0x348] sm:$0xff]  ;;  %v13069_v6 = vld [vmem:[%s23890_s7 + $0x3d8] sm:$0xff]  ;;  %v13897_v38 = vpop.f32.mrb[9].mxu0  ;;  %v16626_v31 = vpack.c.bf16 %v13077_v42, %v13076_v37  ;;  %v13096_v45 = vld [vmem:[%s23890_s7 + $0x4b0] sm:$0xff] }
 0x656   : > { %v6210_v56 = vsel %vm6189_vm3, %v6208_v24, %v6209_v2  ;;  %v16606_v61 = vpack.c.bf16 %v13051_v3, %v13050_v10  ;;  %v16608_v60 = vpack.c.bf16 %v13069_v6, %v13068_v47  ;;  %v21809_v43 = vadd.f32 %v13897_v38, %v13896_v12  ;;  %v6475_v19 = vld [vmem:[#allocation6 + $0x28] sm:$0xfe]  ;;  %v6477_v8 = vld [vmem:[#allocation6 + $0x38] sm:$0x1]  ;;  %v13098_v13 = vld [vmem:[%s23890_s7 + $0x4c0] sm:$0xff] }
 0x657   : > { %6320 = vmatmul.mubr.f32.vlgmr.msra.gmra.mrb[24].mxu0 %v6192_v59  ;;  %v13070_v59 = vld [vmem:[%s23890_s7 + $0x3e0] sm:$0xff]  ;;  %v13081_v39 = vld [vmem:[%s23890_s7 + $0x438] sm:$0xff]  ;;  %v21894_v24 = vld [vmem:[#allocation6 + $0x88] sm:$0xff]  ;;  %v6509_v2 = vrot.slane %v6475_v19, 1  ;;  %v6510_v29 = vrot.slane %v6477_v8, 1 }
 0x658   : > { %7154 = vmatmul.mubr.f32.gmra.mrb[22].mxu1 %v7029_v15  ;;  %6324 = vmatprep.mubr.f32.mxu0 %v6201_v20  ;;  %v13055_v15 = vld [vmem:[%s23890_s7 + $0x368] sm:$0xff]  ;;  %v21903_v10 = vld [vmem:[#allocation6 + $0x80] sm:$0xff]  ;;  %v13100_v3 = vld [vmem:[%s23890_s7 + $0x4d0] sm:$0xff] }
 0x659   : > { %16591 = vmatpush3.bf16.msra.mxu0 %v16590_v48  ;;  %v16610_v48 = vpack.c.bf16 %v13053_v23, %v13052_v14  ;;  %v16614_v57 = vpack.c.bf16 %v13055_v15, %v13054_v32  ;;  %v13091_v20 = vld [vmem:[%s23890_s7 + $0x488] sm:$0xff]  ;;  %v6511_v47 = vsel %vm5921_vm2, %v6509_v2, %v6510_v29  ;;  %v13085_v38 = vld [vmem:[%s23890_s7 + $0x458] sm:$0xff]  ;;  %v6474_v27 = vld [vmem:[#allocation6 + $0x20] sm:$0xfe] }
 0x65a   : > { %16593 = vmatprep.subr.bf16.mxu0 %v16592_v44  ;;  %v13072_v44 = vld [vmem:[%s23890_s7 + $0x3f0] sm:$0xff]  ;;  %v16620_v7 = vpack.c.bf16 %v13091_v20, %v13090_v53  ;;  %v13103_v14 = vld [vmem:[%s23890_s7 + $0x4e8] sm:$0xff]  ;;  %v13105_v32 = vld [vmem:[%s23890_s7 + $0x4f8] sm:$0xff] }
 0x65b   : > { %6325 = vmatmul.mubr.f32.gmra.mrb[26].mxu0 %v6198_v28  ;;  %v16616_v1 = vpack.c.bf16 %v13073_v41, %v13072_v44  ;;  %v13094_v28 = vld [vmem:[%s23890_s7 + $0x4a0] sm:$0xff]  ;;  %v13088_v41 = vld [vmem:[%s23890_s7 + $0x470] sm:$0xff]  ;;  %v13155_v4 = vld [vmem:[%s23890_s7 + $0x688] sm:$0xff] }
 0x65c   : > { %6329 = vmatprep.mubr.f32.mxu0 %v6207_v54  ;;  %v16628_v0 = vpack.c.bf16 %v13095_v62, %v13094_v28  ;;  %v13079_v54 = vld [vmem:[%s23890_s7 + $0x428] sm:$0xff]  ;;  %v6476_v53 = vld [vmem:[#allocation6 + $0x30] sm:$0x1]  ;;  %v13138_v51 = vld [vmem:[%s23890_s7 + $0x600] sm:$0xff] }
 0x65d   : > { %16595 = vmatpush3.bf16.msra.mxu0 %v16594_v34  ;;  %v13092_v34 = vld [vmem:[%s23890_s7 + $0x490] sm:$0xff]  ;;  %v16630_v22 = vpack.c.bf16 %v13079_v54, %v13078_v25  ;;  %v13157_v37 = vld [vmem:[%s23890_s7 + $0x698] sm:$0xff]  ;;  %v6478_v62 = vld [vmem:[#allocation6 + $0x40] sm:$0xfe] }
 0x65e   : > { %16597 = vmatprep.subr.bf16.mxu0 %v16596_v5  ;;  %v16624_v5 = vpack.c.bf16 %v13093_v9, %v13092_v34  ;;  %v13139_v34 = vld [vmem:[%s23890_s7 + $0x608] sm:$0xff]  ;;  %v6506_v9 = vrot.slane %v6474_v27, 1  ;;  %v6485_v54 = vld [vmem:[#allocation6 + $0x78] sm:$0x1]  ;;  %v6512_v8 = vrot.slane %v6478_v62, 1 }
 0x65f   : > { %6330 = vmatmul.mubr.f32.gmra.mrb[28].mxu0 %v6204_v55  ;;  %v13099_v55 = vld [vmem:[%s23890_s7 + $0x4c8] sm:$0xff]  ;;  %v6522_v2 = vrot.slane %v6485_v54, 1  ;;  %v6482_v29 = vld [vmem:[#allocation6 + $0x60] sm:$0xfe]  ;;  %v13168_v54 = vld [vmem:[%s23890_s7 + $0x6f0] sm:$0xff] }
 0x660   : > { %6334 = vmatprep.mubr.f32.mxu0 %v6213_v36  ;;  %v16636_v36 = vpack.c.bf16 %v13099_v55, %v13098_v13  ;;  %v6483_v25 = vld [vmem:[#allocation6 + $0x68] sm:$0xfe] }
 0x661   : > { %16599 = vmatpush3.bf16.msra.mxu0 %v16598_v21  ;;  %v6521_v55 = vrot.slane %v6483_v25, 1  ;;  %v13163_v27 = vld [vmem:[%s23890_s7 + $0x6c8] sm:$0xff] }
 0x662   : > { %16601 = vmatprep.subr.bf16.mxu0 %v16600_v30  ;;  %v13080_v30 = vld [vmem:[%s23890_s7 + $0x430] sm:$0xff]  ;;  %v13167_v62 = vld [vmem:[%s23890_s7 + $0x6e8] sm:$0xff] }
 0x663   : > { %6335 = vmatmul.mubr.f32.gmra.mrb[30].mxu0 %v6210_v56  ;;  %v16634_v26 = vpack.c.bf16 %v13081_v39, %v13080_v30  ;;  %v13101_v56 = vld [vmem:[%s23890_s7 + $0x4d8] sm:$0xff]  ;;  %v13158_v30 = vld [vmem:[%s23890_s7 + $0x6a0] sm:$0xff]  ;;  %v13159_v39 = vld [vmem:[%s23890_s7 + $0x6a8] sm:$0xff] }
 0x664   : > { %6449 = vmatprep.mubr.f32.mxu0 %v21609_v40  ;;  %v13071_v40 = vld [vmem:[%s23890_s7 + $0x3e8] sm:$0xff]  ;;  %v16640_v12 = vpack.c.bf16 %v13101_v56, %v13100_v3  ;;  %v16692_v3 = vpack.c.bf16 %v13159_v39, %v13158_v30  ;;  %v13142_v56 = vld [vmem:[%s23890_s7 + $0x620] sm:$0xff] }
 0x665   : > { %16603 = vmatpush3.bf16.msra.mxu0 %v16602_v17  ;;  %v16612_v18 = vpack.c.bf16 %v13071_v40, %v13070_v59  ;;  %v13082_v17 = vld [vmem:[%s23890_s7 + $0x440] sm:$0xff]  ;;  %v13151_v25 = vld [vmem:[%s23890_s7 + $0x668] sm:$0xff] }
 0x666   : > { %16605 = vmatprep.subr.bf16.mxu0 %v16604_v11  ;;  %v13083_v11 = vld [vmem:[%s23890_s7 + $0x448] sm:$0xff]  ;;  %v13086_v40 = vld [vmem:[%s23890_s7 + $0x460] sm:$0xff] }
 0x667   : > { %v16638_v6 = vpack.c.bf16 %v13083_v11, %v13082_v17  ;;  %v6487_v17 = vld [vmem:[#allocation6 + $0x88] sm:$0xfe]  ;;  %v6489_v11 = vld [vmem:[#allocation6 + $0x98] sm:$0x1] }
 0x668   : > { %v13219_v30 = vld [vmem:[%s23890_s7 + $0x888] sm:$0xff] }
 0x669   : > { %16607 = vmatpush3.bf16.msra.mxu0 %v16606_v61  ;;  %v13084_v61 = vld [vmem:[%s23890_s7 + $0x450] sm:$0xff] }
 0x66a   : > { %16609 = vmatprep.subr.bf16.mxu0 %v16608_v60  ;;  %v13102_v60 = vld [vmem:[%s23890_s7 + $0x4e0] sm:$0xff]  ;;  %v16642_v23 = vpack.c.bf16 %v13085_v38, %v13084_v61  ;;  %v13160_v38 = vld [vmem:[%s23890_s7 + $0x6b0] sm:$0xff] }
 0x66b   : > { %v16644_v59 = vpack.c.bf16 %v13103_v14, %v13102_v60  ;;  %v13161_v60 = vld [vmem:[%s23890_s7 + $0x6b8] sm:$0xff]  ;;  %v6523_v14 = vsel %vm5921_vm2, %v6521_v55, %v6522_v2  ;;  %v13202_v55 = vld [vmem:[%s23890_s7 + $0x800] sm:$0xff]  ;;  %v13203_v2 = vld [vmem:[%s23890_s7 + $0x808] sm:$0xff] }
 0x66d   : > { %16611 = vmatpush3.bf16.msra.mxu0 %v16610_v48  ;;  %v13087_v48 = vld [vmem:[%s23890_s7 + $0x468] sm:$0xff] }
 0x66e   : > { %16613 = vmatprep.subr.bf16.mxu0 %v16612_v18  ;;  %v13104_v18 = vld [vmem:[%s23890_s7 + $0x4f0] sm:$0xff]  ;;  %v16646_v15 = vpack.c.bf16 %v13087_v48, %v13086_v40  ;;  %v6486_v40 = vld [vmem:[#allocation6 + $0x80] sm:$0xfe] }
 0x66f   : > { %v16648_v44 = vpack.c.bf16 %v13105_v32, %v13104_v18  ;;  %v6488_v48 = vld [vmem:[#allocation6 + $0x90] sm:$0x1]  ;;  %v16696_v32 = vpack.c.bf16 %v13161_v60, %v13160_v38  ;;  %v13207_v38 = vld [vmem:[%s23890_s7 + $0x828] sm:$0xff] }
 0x670   : > { %v13224_v60 = vld [vmem:[%s23890_s7 + $0x8b0] sm:$0xff] }
 0x671   : > { %16615 = vmatpush3.bf16.msra.mxu0 %v16614_v57  ;;  %v13089_v57 = vld [vmem:[%s23890_s7 + $0x478] sm:$0xff] }
 0x672   : > { %16617 = vmatprep.subr.bf16.mxu0 %v16616_v1  ;;  %v13154_v1 = vld [vmem:[%s23890_s7 + $0x680] sm:$0xff]  ;;  %v16650_v20 = vpack.c.bf16 %v13089_v57, %v13088_v41  ;;  %v6524_v57 = vrot.slane %v6486_v40, 1  ;;  %v13208_v40 = vld [vmem:[%s23890_s7 + $0x830] sm:$0xff] }
 0x673   : > { %v16684_v49 = vpack.c.bf16 %v13155_v4, %v13154_v1  ;;  %v6525_v1 = vrot.slane %v6488_v48, 1  ;;  %v13162_v4 = vld [vmem:[%s23890_s7 + $0x6c0] sm:$0xff]  ;;  %v13209_v48 = vld [vmem:[%s23890_s7 + $0x838] sm:$0xff] }
 0x675   : > { %16619 = vmatpush3.bf16.msra.mxu0 %v16618_v63  ;;  %v6479_v63 = vld [vmem:[#allocation6 + $0x48] sm:$0xfe] }
 0x676   : > { %16621 = vmatprep.subr.bf16.mxu0 %v16620_v7  ;;  %v6481_v7 = vld [vmem:[#allocation6 + $0x58] sm:$0x1]  ;;  %v6515_v42 = vrot.slane %v6479_v63, 1  ;;  %v16700_v63 = vpack.c.bf16 %v13163_v27, %v13162_v4 }
 0x677   : > { %v6516_v28 = vrot.slane %v6481_v7, 1  ;;  %v13146_v7 = vld [vmem:[%s23890_s7 + $0x640] sm:$0xff] }
 0x678   : > { %6450 = vmatmul.mubr.f32.vlgmr.msra.gmra.mrb[32].mxu0 %v21628_v58  ;;  %v13097_v58 = vld [vmem:[%s23890_s7 + $0x4b8] sm:$0xff] }
 0x679   : > { %6454 = vmatprep.mubr.f32.mxu0 %v21646_v52  ;;  %16623 = vmatpush3.bf16.msra.mxu0 %v16622_v35  ;;  %v16632_v21 = vpack.c.bf16 %v13097_v58, %v13096_v45  ;;  %v6507_v35 = vrot.slane %v6476_v53, 1  ;;  %v13140_v58 = vld [vmem:[%s23890_s7 + $0x610] sm:$0xff]  ;;  %v6517_v13 = vsel %vm5921_vm2, %v6515_v42, %v6516_v28  ;;  %v13149_v42 = vld [vmem:[%s23890_s7 + $0x658] sm:$0xff]  ;;  %v13166_v28 = vld [vmem:[%s23890_s7 + $0x6e0] sm:$0xff] }
 0x67a   : > { %16625 = vmatprep.subr.bf16.mxu0 %v16624_v5  ;;  %v13156_v5 = vld [vmem:[%s23890_s7 + $0x690] sm:$0xff] }
 0x67b   : > { %v16688_v45 = vpack.c.bf16 %v13157_v37, %v13156_v5  ;;  %v6508_v19 = vsel %vm5921_vm2, %v6506_v9, %v6507_v35  ;;  %v13165_v9 = vld [vmem:[%s23890_s7 + $0x6d8] sm:$0xff]  ;;  %v13148_v37 = vld [vmem:[%s23890_s7 + $0x650] sm:$0xff] }
 0x67c   : > { %6455 = vmatmul.mubr.f32.gmra.mrb[34].mxu0 %v21658_v50 }
 0x67d   : > { %6459 = vmatprep.mubr.f32.mxu0 %v21667_v33  ;;  %16627 = vmatpush3.bf16.msra.mxu0 %v16626_v31  ;;  %v6480_v31 = vld [vmem:[#allocation6 + $0x50] sm:$0x1] }
 0x67e   : > { %16629 = vmatprep.subr.bf16.mxu0 %v16628_v0  ;;  %v16686_v0 = vpack.c.bf16 %v13139_v34, %v13138_v51  ;;  %v6526_v51 = vsel %vm5921_vm2, %v6524_v57, %v6525_v1  ;;  %v13164_v34 = vld [vmem:[%s23890_s7 + $0x6d0] sm:$0xff]  ;;  %v13211_v57 = vld [vmem:[%s23890_s7 + $0x848] sm:$0xff]  ;;  %v13229_v1 = vld [vmem:[%s23890_s7 + $0x8d8] sm:$0xff] }
 0x67f   : > { %v16704_v5 = vpack.c.bf16 %v13165_v9, %v13164_v34  ;;  %v13214_v34 = vld [vmem:[%s23890_s7 + $0x860] sm:$0xff]  ;;  %v13215_v9 = vld [vmem:[%s23890_s7 + $0x868] sm:$0xff] }
 0x680   : > { %6460 = vmatmul.mubr.f32.gmra.mrb[36].mxu0 %v21682_v46 }
 0x681   : > { %6464 = vmatprep.mubr.f32.mxu0 %v21894_v24  ;;  %16631 = vmatpush3.bf16.msra.mxu0 %v16630_v22  ;;  %v13141_v22 = vld [vmem:[%s23890_s7 + $0x618] sm:$0xff] }
 0x682   : > { %16633 = vmatprep.subr.bf16.mxu0 %v16632_v21  ;;  %v6513_v21 = vrot.slane %v6480_v31, 1  ;;  %v16708_v31 = vpack.c.bf16 %v13167_v62, %v13166_v28  ;;  %v13216_v28 = vld [vmem:[%s23890_s7 + $0x870] sm:$0xff]  ;;  %v13217_v62 = vld [vmem:[%s23890_s7 + $0x878] sm:$0xff] }
 0x684   : > { %6465 = vmatmul.mubr.f32.gmra.mrb[38].mxu0 %v21903_v10 }
 0x685   : > { %16635 = vmatpush3.bf16.msra.mxu0 %v16634_v26  ;;  %6635 = vmatprep.mubr.f32.mxu0 %v6511_v47  ;;  %v6484_v26 = vld [vmem:[#allocation6 + $0x70] sm:$0x1]  ;;  %v13143_v47 = vld [vmem:[%s23890_s7 + $0x628] sm:$0xff] }
 0x686   : > { %16637 = vmatprep.subr.bf16.mxu0 %v16636_v36  ;;  %v16690_v36 = vpack.c.bf16 %v13141_v22, %v13140_v58  ;;  %v6519_v61 = vrot.slane %v6484_v26, 1  ;;  %v16694_v18 = vpack.c.bf16 %v13143_v47, %v13142_v56  ;;  %v13221_v26 = vld [vmem:[%s23890_s7 + $0x898] sm:$0xff]  ;;  %v13222_v56 = vld [vmem:[%s23890_s7 + $0x8a0] sm:$0xff]  ;;  %v13223_v47 = vld [vmem:[%s23890_s7 + $0x8a8] sm:$0xff] }
 0x689   : > { %16639 = vmatpush3.bf16.msra.mxu0 %v16638_v6  ;;  %v6514_v6 = vsel %vm5921_vm2, %v6512_v8, %v6513_v21  ;;  %v13153_v8 = vld [vmem:[%s23890_s7 + $0x678] sm:$0xff]  ;;  %v13218_v21 = vld [vmem:[%s23890_s7 + $0x880] sm:$0xff] }
 0x68a   : > { %16641 = vmatprep.subr.bf16.mxu0 %v16640_v12  ;;  %v6518_v12 = vrot.slane %v6482_v29, 1  ;;  %v13220_v29 = vld [vmem:[%s23890_s7 + $0x890] sm:$0xff] }
 0x68c   : > { %v6520_v41 = vsel %vm5921_vm2, %v6518_v12, %v6519_v61  ;;  %v16756_v12 = vpack.c.bf16 %v13223_v47, %v13222_v56  ;;  %v13206_v61 = vld [vmem:[%s23890_s7 + $0x820] sm:$0xff]  ;;  %v7173_v56 = vld [vmem:[#allocation6 + $0x90] sm:$0x3] }
 0x68d   : > { %16643 = vmatpush3.bf16.msra.mxu0 %v16642_v23  ;;  %v6527_v23 = vrot.slane %v6487_v17, 1  ;;  %v16752_v17 = vpack.c.bf16 %v13221_v26, %v13220_v29  ;;  %v7176_v29 = vld [vmem:[#allocation6 + $0xa8] sm:$0xfc]  ;;  %v7178_v26 = vld [vmem:[#allocation6 + $0xb8] sm:$0x3] }
 0x68e   : > { %16645 = vmatprep.subr.bf16.mxu0 %v16644_v59  ;;  %v6528_v59 = vrot.slane %v6489_v11, 1  ;;  %v13204_v11 = vld [vmem:[%s23890_s7 + $0x810] sm:$0xff]  ;;  %v7216_v47 = vrot.slane %v7176_v29, 2  ;;  %v13239_v29 = vld [vmem:[%s23892_s9 + $0xa0] sm:$0xff] }
 0x690   : > { %v6529_v53 = vsel %vm5921_vm2, %v6527_v23, %v6528_v59  ;;  %v7166_v23 = vld [vmem:[#allocation6 + $0x58] sm:$0x3] }
 0x691   : > { %16647 = vmatpush3.bf16.msra.mxu0 %v16646_v15  ;;  %v13144_v15 = vld [vmem:[%s23890_s7 + $0x630] sm:$0xff] }
 0x692   : > { %16649 = vmatprep.subr.bf16.mxu0 %v16648_v44  ;;  %v13145_v44 = vld [vmem:[%s23890_s7 + $0x638] sm:$0xff] }
 0x695   : > { %16651 = vmatpush3.bf16.msra.mxu0 %v16650_v20  ;;  %v16698_v20 = vpack.c.bf16 %v13145_v44, %v13144_v15  ;;  %v16762_v15 = vpack.c.bf16 %v13209_v48, %v13208_v40 }
 0x696   : > { %16685 = vmatprep.subr.bf16.mxu0 %v16684_v49  ;;  %v13147_v49 = vld [vmem:[%s23890_s7 + $0x648] sm:$0xff] }
 0x697   : > { %v16702_v35 = vpack.c.bf16 %v13147_v49, %v13146_v7  ;;  %v13230_v7 = vld [vmem:[%s23890_s7 + $0x8e0] sm:$0xff] }
 0x698   : > { %6636 = vmatmul.mubr.f32.vlgmr.msra.gmra.mrb[40].mxu0 %v6508_v19  ;;  %v13152_v19 = vld [vmem:[%s23890_s7 + $0x670] sm:$0xff] }
 0x699   : > { %6640 = vmatprep.mubr.f32.mxu0 %v6517_v13  ;;  %16687 = vmatpush3.bf16.msra.mxu0 %v16686_v0  ;;  %v13150_v0 = vld [vmem:[%s23890_s7 + $0x660] sm:$0xff]  ;;  %v16714_v39 = vpack.c.bf16 %v13153_v8, %v13152_v19  ;;  %v16748_v13 = vpack.c.bf16 %v13219_v30, %v13218_v21  ;;  %v7169_v21 = vld [vmem:[#allocation6 + $0x70] sm:$0x3]  ;;  %v7172_v30 = vld [vmem:[#allocation6 + $0x88] sm:$0xfc] }
 0x69a   : > { %16689 = vmatprep.subr.bf16.mxu0 %v16688_v45  ;;  %v13169_v45 = vld [vmem:[%s23890_s7 + $0x6f8] sm:$0xff]  ;;  %v16710_v58 = vpack.c.bf16 %v13151_v25, %v13150_v0  ;;  %v16778_v0 = vpack.c.bf16 %v13217_v62, %v13216_v28  ;;  %v7168_v25 = vld [vmem:[#allocation6 + $0x68] sm:$0xfc]  ;;  %v7167_v8 = vld [vmem:[#allocation6 + $0x60] sm:$0xfc] }
 0x69b   : > { %v16712_v22 = vpack.c.bf16 %v13169_v45, %v13168_v54  ;;  %v7170_v54 = vld [vmem:[#allocation6 + $0x78] sm:$0x3] }
 0x69c   : > { %6641 = vmatmul.mubr.f32.gmra.mrb[42].mxu0 %v6514_v6  ;;  %v7205_v19 = vrot.slane %v7170_v54, 2 }
 0x69d   : > { %6645 = vmatprep.mubr.f32.mxu0 %v6523_v14  ;;  %16691 = vmatpush3.bf16.msra.mxu0 %v16690_v36  ;;  %v16750_v36 = vpack.c.bf16 %v13203_v2, %v13202_v55  ;;  %v7164_v14 = vld [vmem:[#allocation6 + $0x48] sm:$0xfc]  ;;  %v7201_v55 = vrot.slane %v7167_v8, 2  ;;  %v7202_v2 = vrot.slane %v7169_v21, 2  ;;  %v13235_v21 = vld [vmem:[%s23892_s9 + $0x80] sm:$0xff] }
 0x69e   : > { %16693 = vmatprep.subr.bf16.mxu0 %v16692_v3  ;;  %v13205_v3 = vld [vmem:[%s23890_s7 + $0x818] sm:$0xff] }
 0x69f   : > { %v16754_v6 = vpack.c.bf16 %v13205_v3, %v13204_v11  ;;  %v7171_v3 = vld [vmem:[#allocation6 + $0x80] sm:$0xfc] }
 0x6a0   : > { %6646 = vmatmul.mubr.f32.gmra.mrb[44].mxu0 %v6520_v41  ;;  %v13210_v41 = vld [vmem:[%s23890_s7 + $0x840] sm:$0xff] }
 0x6a1   : > { %6650 = vmatprep.mubr.f32.mxu0 %v6529_v53  ;;  %16695 = vmatpush3.bf16.msra.mxu0 %v16694_v18  ;;  %v7198_v18 = vrot.slane %v7164_v14, 2  ;;  %v16766_v27 = vpack.c.bf16 %v13211_v57, %v13210_v41 }
 0x6a2   : > { %16697 = vmatprep.subr.bf16.mxu0 %v16696_v32  ;;  %v7199_v32 = vrot.slane %v7166_v23, 2 }
 0x6a4   : > { %6651 = vmatmul.mubr.f32.gmra.mrb[46].mxu0 %v6526_v51  ;;  %v7200_v4 = vsel %vm6189_vm3, %v7198_v18, %v7199_v32 }
 0x6a5   : > { %16699 = vmatpush3.bf16.msra.mxu0 %v16698_v20  ;;  %6952 = vmatprep.mubr.f32.mxu0 %v21646_v52  ;;  %v16706_v52 = vpack.c.bf16 %v13149_v42, %v13148_v37  ;;  %v13212_v20 = vld [vmem:[%s23890_s7 + $0x850] sm:$0xff]  ;;  %v16774_v37 = vpack.c.bf16 %v13215_v9, %v13214_v34 }
 0x6a6   : > { %16701 = vmatprep.subr.bf16.mxu0 %v16700_v63  ;;  %v13213_v63 = vld [vmem:[%s23890_s7 + $0x858] sm:$0xff] }
 0x6a7   : > { %v16770_v49 = vpack.c.bf16 %v13213_v63, %v13212_v20 }
 0x6a9   : > { %16703 = vmatpush3.bf16.msra.mxu0 %v16702_v35  ;;  %v13232_v35 = vld [vmem:[%s23890_s7 + $0x8f0] sm:$0xff] }
 0x6aa   : > { %16705 = vmatprep.subr.bf16.mxu0 %v16704_v5  ;;  %v13233_v5 = vld [vmem:[%s23890_s7 + $0x8f8] sm:$0xff] }
 0x6ab   : > { %v16776_v42 = vpack.c.bf16 %v13233_v5, %v13232_v35 }
 0x6ad   : > { %16707 = vmatpush3.bf16.msra.mxu0 %v16706_v52  ;;  %v7163_v52 = vld [vmem:[#allocation6 + $0x40] sm:$0xfc] }
 0x6ae   : > { %16709 = vmatprep.subr.bf16.mxu0 %v16708_v31  ;;  %v7165_v31 = vld [vmem:[#allocation6 + $0x50] sm:$0x3]  ;;  %v7195_v45 = vrot.slane %v7163_v52, 2 }
 0x6b1   : > { %16711 = vmatpush3.bf16.msra.mxu0 %v16710_v58  ;;  %v7196_v58 = vrot.slane %v7165_v31, 2 }
 0x6b2   : > { %16713 = vmatprep.subr.bf16.mxu0 %v16712_v22  ;;  %v7204_v22 = vrot.slane %v7168_v25, 2 }
 0x6b5   : > { %16715 = vmatpush3.bf16.msra.mxu0 %v16714_v39  ;;  %v7174_v39 = vld [vmem:[#allocation6 + $0x98] sm:$0x3] }
 0x6b6   : > { %16749 = vmatprep.subr.bf16.mxu0 %v16748_v13  ;;  %v7197_v13 = vsel %vm6189_vm3, %v7195_v45, %v7196_v58  ;;  %v7211_v11 = vrot.slane %v7174_v39, 2 }
 0x6b8   : > { %6953 = vmatmul.mubr.f32.vlgmr.msra.gmra.mrb[48].mxu0 %v21658_v50  ;;  %v13225_v50 = vld [vmem:[%s23890_s7 + $0x8b8] sm:$0xff] }
 0x6b9   : > { %6957 = vmatprep.mubr.f32.mxu0 %v21667_v33  ;;  %16751 = vmatpush3.bf16.msra.mxu0 %v16750_v36  ;;  %v16758_v33 = vpack.c.bf16 %v13207_v38, %v13206_v61  ;;  %v16760_v59 = vpack.c.bf16 %v13225_v50, %v13224_v60  ;;  %v7206_v36 = vsel %vm6189_vm3, %v7204_v22, %v7205_v19  ;;  %v7177_v61 = vld [vmem:[#allocation6 + $0xb0] sm:$0x3]  ;;  %v7207_v60 = vrot.slane %v7171_v3, 2 }
 0x6ba   : > { %16753 = vmatprep.subr.bf16.mxu0 %v16752_v17  ;;  %v7210_v17 = vrot.slane %v7172_v30, 2  ;;  %v7203_v38 = vsel %vm6189_vm3, %v7201_v55, %v7202_v2  ;;  %v7208_v50 = vrot.slane %v7173_v56, 2  ;;  %v7214_v23 = vrot.slane %v7177_v61, 2  ;;  %v13237_v30 = vld [vmem:[%s23892_s9 + $0x90] sm:$0xff] }
 0x6bb   : > { %v13241_v56 = vld [vmem:[%s23892_s9 + $0xb0] sm:$0xff] }
 0x6bc   : > { %6958 = vmatmul.mubr.f32.gmra.mrb[50].mxu0 %v21682_v46  ;;  %v13226_v46 = vld [vmem:[%s23890_s7 + $0x8c0] sm:$0xff]  ;;  %v7209_v40 = vsel %vm6189_vm3, %v7207_v60, %v7208_v50 }
 0x6bd   : > { %6962 = vmatprep.mubr.f32.mxu0 %v21894_v24  ;;  %16755 = vmatpush3.bf16.msra.mxu0 %v16754_v6  ;;  %v13227_v24 = vld [vmem:[%s23890_s7 + $0x8c8] sm:$0xff]  ;;  %v7217_v6 = vrot.slane %v7178_v26, 2 }
 0x6be   : > { %16757 = vmatprep.subr.bf16.mxu0 %v16756_v12  ;;  %v16764_v44 = vpack.c.bf16 %v13227_v24, %v13226_v46  ;;  %v7175_v12 = vld [vmem:[#allocation6 + $0xa0] sm:$0xfc]  ;;  %v13240_v26 = vld [vmem:[%s23892_s9 + $0xa8] sm:$0xff] }
 0x6bf   : > { %v7213_v14 = vrot.slane %v7175_v12, 2 }
 0x6c0   : > { %6963 = vmatmul.mubr.f32.gmra.mrb[52].mxu0 %v21903_v10  ;;  %v13228_v10 = vld [vmem:[%s23890_s7 + $0x8d0] sm:$0xff] }
 0x6c1   : > { %16759 = vmatpush3.bf16.msra.mxu0 %v16758_v33  ;;  %6967 = vmatprep.mubr.f32.mxu0 %v21597_v16  ;;  %v16768_v53 = vpack.c.bf16 %v13229_v1, %v13228_v10  ;;  %v7212_v33 = vsel %vm6189_vm3, %v7210_v17, %v7211_v11  ;;  %v7215_v48 = vsel %vm6189_vm3, %v7213_v14, %v7214_v23 }
 0x6c2   : > { %16761 = vmatprep.subr.bf16.mxu0 %v16760_v59  ;;  %v7218_v59 = vsel %vm6189_vm3, %v7216_v47, %v7217_v6  ;;  %v16788_v11 = vpack.c.bf16 %v13240_v26, %v13239_v29  ;;  %v13242_v47 = vld [vmem:[%s23892_s9 + $0xb8] sm:$0xff] }
 0x6c3   : > { %v16792_v61 = vpack.c.bf16 %v13242_v47, %v13241_v56 }
 0x6c4   : > { %6968 = vmatmul.mubr.f32.gmra.mrb[54].mxu0 %v21597_v16  ;;  %v13231_v16 = vld [vmem:[%s23890_s7 + $0x8e8] sm:$0xff] }
 0x6c5   : > { %16763 = vmatpush3.bf16.msra.mxu0 %v16762_v15  ;;  %7324 = vmatprep.mubr.f32.mxu0 %v7200_v4  ;;  %v16772_v51 = vpack.c.bf16 %v13231_v16, %v13230_v7 }
 0x6c6   : > { %16765 = vmatprep.subr.bf16.mxu0 %v16764_v44 }
 0x6c9   : > { %16767 = vmatpush3.bf16.msra.mxu0 %v16766_v27 }
 0x6ca   : > { %16769 = vmatprep.subr.bf16.mxu0 %v16768_v53 }
 0x6cd   : > { %16771 = vmatpush3.bf16.msra.mxu0 %v16770_v49 }
 0x6ce   : > { %16773 = vmatprep.subr.bf16.mxu0 %v16772_v51 }
 0x6d1   : > { %16775 = vmatpush3.bf16.msra.mxu0 %v16774_v37 }
 0x6d2   : > { %16777 = vmatprep.subr.bf16.mxu0 %v16776_v42 }
 0x6d5   : > { %16779 = vmatpush3.bf16.msra.mxu0 %v16778_v0 }
 0x6d8   : > { %7325 = vmatmul.mubr.f32.vlgmr.msra.gmra.mrb[56].mxu0 %v7197_v13  ;;  %v13238_v13 = vld [vmem:[%s23892_s9 + $0x98] sm:$0xff] }
 0x6d9   : > { %7329 = vmatprep.mubr.f32.mxu0 %v7206_v36  ;;  %v16784_v2 = vpack.c.bf16 %v13238_v13, %v13237_v30 }
 0x6dc   : > { %7330 = vmatmul.mubr.f32.gmra.mrb[58].mxu0 %v7203_v38 }
 0x6dd   : > { %7334 = vmatprep.mubr.f32.mxu0 %v7212_v33 }
 0x6e0   : > { %7335 = vmatmul.mubr.f32.gmra.mrb[60].mxu0 %v7209_v40 }
 0x6e1   : > { %7339 = vmatprep.mubr.f32.mxu0 %v7218_v59 }
 0x6e4   : > { %7340 = vmatmul.mubr.f32.gmra.mrb[62].mxu0 %v7215_v48 }
 0x6fe   : > { %v13899_v46 = vpop.f32.mrb[10].mxu0 }
 0x6ff   : > { %v14116_v24 = vpop.f32.mrb[8].mxu1  ;;  %v13900_v18 = vpop.f32.mrb[11].mxu0 }
 0x700   : > { %v14117_v32 = vpop.f32.mrb[9].mxu1  ;;  %v13901_v15 = vadd.f32 %v13900_v18, %v13899_v46 }
 0x701   : > { %v22158_v44 = vadd.f32 %v14117_v32, %v14116_v24 }
 0x702   : > { %v13902_v41 = vpop.f32.mrb[12].mxu0 }
 0x703   : > { %v14119_v57 = vpop.f32.mrb[10].mxu1  ;;  %v13903_v10 = vpop.f32.mrb[13].mxu0 }
 0x704   : > { %v14120_v1 = vpop.f32.mrb[11].mxu1  ;;  %v13904_v4 = vadd.f32 %v13903_v10, %v13902_v41 }
 0x705   : > { %v22160_v27 = vadd.f32 %v14120_v1, %v14119_v57  ;;  %v13243_v1 = vld [vmem:[%s23892_s9 + $0xc0] sm:$0xff] }
 0x706   : > { %v13905_v53 = vpop.f32.mrb[14].mxu0 }
 0x707   : > { %v14122_v20 = vpop.f32.mrb[12].mxu1  ;;  %v13906_v63 = vpop.f32.mrb[15].mxu0 }
 0x708   : > { %v14123_v7 = vpop.f32.mrb[13].mxu1  ;;  %v13907_v16 = vadd.f32 %v13906_v63, %v13905_v53 }
 0x709   : > { %v22162_v49 = vadd.f32 %v14123_v7, %v14122_v20 }
 0x70a   : > { %v13940_v51 = vpop.f32.mrb[16].mxu0 }
 0x70b   : > { %v14125_v34 = vpop.f32.mrb[14].mxu1  ;;  %v13941_v9 = vpop.f32.mrb[17].mxu0 }
 0x70c   : > { %v14126_v35 = vpop.f32.mrb[15].mxu1  ;;  %v13942_v5 = vadd.f32 %v13941_v9, %v13940_v51  ;;  %v13245_v51 = vld [vmem:[%s23892_s9 + $0xd0] sm:$0xff] }
 0x70d   : > { %v22164_v37 = vadd.f32 %v14126_v35, %v14125_v34  ;;  %v13246_v34 = vld [vmem:[%s23892_s9 + $0xd8] sm:$0xff] }
 0x70e   : > { %v6139_v42 = vadd.f32 %v13942_v5, %v21809_v43  ;;  %v13943_v28 = vpop.f32.mrb[18].mxu0  ;;  %v13236_v43 = vld [vmem:[%s23892_s9 + $0x88] sm:$0xff]  ;;  %v16800_v9 = vpack.c.bf16 %v13246_v34, %v13245_v51  ;;  %v13247_v5 = vld [vmem:[%s23892_s9 + $0xe0] sm:$0xff] }
 0x70f   : > { %v13944_v62 = vpop.f32.mrb[19].mxu0  ;;  %v16780_v39 = vpack.c.bf16 %v13236_v43, %v13235_v21 }
 0x710   : > { %v13945_v52 = vadd.f32 %v13944_v62, %v13943_v28  ;;  %v13249_v62 = vld [vmem:[%s23892_s9 + $0xf0] sm:$0xff] }
 0x711   : > { %16781 = vmatprep.subr.bf16.mxu1 %v16780_v39 }
 0x712   : > { %v6144_v31 = vadd.f32 %v13945_v52, %v13901_v15  ;;  %v13946_v0 = vpop.f32.mrb[20].mxu0  ;;  %16783 = vmatpush3.bf16.msra.mxu1 %v16780_v39  ;;  %v13250_v52 = vld [vmem:[%s23892_s9 + $0xf8] sm:$0xff] }
 0x713   : > { %v13947_v25 = vpop.f32.mrb[21].mxu0  ;;  %16785 = vmatprep.subr.bf16.mxu1 %v16784_v2 }
 0x714   : > { %v13948_v54 = vadd.f32 %v13947_v25, %v13946_v0  ;;  %v16808_v0 = vpack.c.bf16 %v13250_v52, %v13249_v62  ;;  %v7405_v25 = vld [vmem:[%s23892_s9] sm:$0xff] }
 0x716   : > { %v6149_v45 = vadd.f32 %v13948_v54, %v13904_v4  ;;  %v13949_v58 = vpop.f32.mrb[22].mxu0  ;;  %16787 = vmatpush3.bf16.msra.mxu1 %v16784_v2  ;;  %v13244_v4 = vld [vmem:[%s23892_s9 + $0xc8] sm:$0xff] }
 0x717   : > { %v13950_v22 = vpop.f32.mrb[23].mxu0  ;;  %16789 = vmatprep.subr.bf16.mxu1 %v16788_v11  ;;  %v16796_v53 = vpack.c.bf16 %v13244_v4, %v13243_v1  ;;  %v7406_v54 = vld [vmem:[%s23892_s9 + $0x8] sm:$0xff] }
 0x718   : > { %v13951_v19 = vadd.f32 %v13950_v22, %v13949_v58 }
 0x71a   : > { %v6154_v8 = vadd.f32 %v13951_v19, %v13907_v16  ;;  %16791 = vmatpush3.bf16.msra.mxu1 %v16788_v11 }
 0x71b   : > { %16793 = vmatprep.subr.bf16.mxu1 %v16792_v61 }
 0x71e   : > { %16795 = vmatpush3.bf16.msra.mxu1 %v16792_v61 }
 0x71f   : > { %v14204_v55 = vpop.f32.mrb[16].mxu1  ;;  %16797 = vmatprep.subr.bf16.mxu1 %v16796_v53 }
 0x720   : > { %v14205_v36 = vpop.f32.mrb[17].mxu1 }
 0x721   : > { %v22185_v17 = vadd.f32 %v14205_v36, %v14204_v55 }
 0x722   : > { %16799 = vmatpush3.bf16.msra.mxu1 %v16796_v53 }
 0x723   : > { %v14207_v3 = vpop.f32.mrb[18].mxu1  ;;  %16801 = vmatprep.subr.bf16.mxu1 %v16800_v9 }
 0x724   : > { %v14208_v6 = vpop.f32.mrb[19].mxu1 }
 0x725   : > { %v22193_v12 = vadd.f32 %v14208_v6, %v14207_v3 }
 0x726   : > { %16803 = vmatpush3.bf16.msra.mxu1 %v16800_v9 }
 0x727   : > { %v14210_v38 = vpop.f32.mrb[20].mxu1 }
 0x728   : > { %v14211_v60 = vpop.f32.mrb[21].mxu1 }
 0x729   : > { %v22195_v50 = vadd.f32 %v14211_v60, %v14210_v38 }
 0x72a   : > { %v13984_v33 = vpop.f32.mrb[24].mxu0 }
 0x72b   : > { %v14213_v14 = vpop.f32.mrb[22].mxu1  ;;  %v13985_v23 = vpop.f32.mrb[25].mxu0 }
 0x72c   : > { %v14214_v59 = vpop.f32.mrb[23].mxu1  ;;  %v13986_v40 = vadd.f32 %v13985_v23, %v13984_v33 }
 0x72d   : > { %v22197_v48 = vadd.f32 %v14214_v59, %v14213_v14 }
 0x72e   : > { %v6340_v46 = vadd.f32 %v13986_v40, %v6139_v42  ;;  %v13987_v24 = vpop.f32.mrb[26].mxu0  ;;  %v13248_v42 = vld [vmem:[%s23892_s9 + $0xe8] sm:$0xff] }
 0x72f   : > { %v13988_v18 = vpop.f32.mrb[27].mxu0  ;;  %v16804_v28 = vpack.c.bf16 %v13248_v42, %v13247_v5 }
 0x730   : > { %v13989_v32 = vadd.f32 %v13988_v18, %v13987_v24 }
 0x731   : > { %16805 = vmatprep.subr.bf16.mxu1 %v16804_v28 }
 0x732   : > { %v6341_v15 = vadd.f32 %v13989_v32, %v6144_v31  ;;  %v13990_v41 = vpop.f32.mrb[28].mxu0  ;;  %16807 = vmatpush3.bf16.msra.mxu1 %v16804_v28  ;;  %v7421_v31 = vld [vmem:[#allocation7 + $0x1] sm:$0xff] }
 0x733   : > { %v13991_v57 = vpop.f32.mrb[29].mxu0  ;;  %15120 = vmatprep.mubr.f32.mxu1 %v7421_v31  ;;  %16809 = vmatprep.subr.bf16.mxu1 %v16808_v0 }
 0x734   : > { %v13992_v10 = vadd.f32 %v13991_v57, %v13990_v41 }
 0x736   : > { %v6342_v20 = vadd.f32 %v13992_v10, %v6149_v45  ;;  %v13993_v63 = vpop.f32.mrb[30].mxu0  ;;  %v22229_v45 = vpack.c.bf16 %v7406_v54, %v7405_v25  ;;  %16811 = vmatpush3.bf16.msra.mxu1 %v16808_v0 }
 0x737   : > { %v13994_v7 = vpop.f32.mrb[31].mxu0 }
 0x738   : > { %v13995_v16 = vadd.f32 %v13994_v7, %v13993_v63  ;;  %16813 = vmatprep.subr.bf16.mxu1 %v22229_v45 }
 0x73a   : > { %v6343_v35 = vadd.f32 %v13995_v16, %v6154_v8 }
 0x74b   : > { %v14028_v58 = vpop.f32.mrb[32].mxu0 }
 0x74c   : > { %v14029_v22 = vpop.f32.mrb[33].mxu0 }
 0x74d   : > { %v14030_v19 = vadd.f32 %v14029_v22, %v14028_v58 }
 0x74f   : > { %v6470_v8 = vadd.f32 %v14030_v19, %v6340_v46  ;;  %v14031_v21 = vpop.f32.mrb[34].mxu0 }
 0x750   : > { %v14032_v43 = vpop.f32.mrb[35].mxu0 }
 0x751   : > { %v14033_v30 = vadd.f32 %v14032_v43, %v14031_v21 }
 0x753   : > { %v6471_v39 = vadd.f32 %v14033_v30, %v6341_v15  ;;  %v14034_v13 = vpop.f32.mrb[36].mxu0 }
 0x754   : > { %v14035_v55 = vpop.f32.mrb[37].mxu0 }
 0x755   : > { %v14036_v2 = vadd.f32 %v14035_v55, %v14034_v13 }
 0x757   : > { %v6472_v29 = vadd.f32 %v14036_v2, %v6342_v20  ;;  %v14037_v26 = vpop.f32.mrb[38].mxu0 }
 0x758   : > { %v14038_v36 = vpop.f32.mrb[39].mxu0 }
 0x759   : > { %v14039_v11 = vadd.f32 %v14038_v36, %v14037_v26  ;;  %v7407_v26 = vld [vmem:[%s23892_s9 + $0x10] sm:$0xff]  ;;  %v7408_v36 = vld [vmem:[%s23892_s9 + $0x18] sm:$0xff] }
 0x75b   : > { %v6473_v3 = vadd.f32 %v14039_v11, %v6343_v35 }
 0x76b   : > { %v14072_v56 = vpop.f32.mrb[40].mxu0 }
 0x76c   : > { %v14073_v47 = vpop.f32.mrb[41].mxu0 }
 0x76d   : > { %v14074_v6 = vadd.f32 %v14073_v47, %v14072_v56 }
 0x76f   : > { %v6656_v61 = vadd.f32 %v14074_v6, %v6470_v8  ;;  %v14075_v38 = vpop.f32.mrb[42].mxu0  ;;  %v16816_v6 = vpack.c.bf16 %v7408_v36, %v7407_v26  ;;  %v13265_v26 = vld [vmem:[%s23892_s9 + $0x170] sm:$0xff]  ;;  %v13266_v36 = vld [vmem:[%s23892_s9 + $0x178] sm:$0xff] }
 0x770   : > { %v14076_v60 = vpop.f32.mrb[43].mxu0 }
 0x771   : > { %v14077_v33 = vadd.f32 %v14076_v60, %v14075_v38  ;;  %v6842_v14 = vadd.f32 %v22158_v44, %v6656_v61  ;;  %v7409_v61 = vld [vmem:[%s23892_s9 + $0x20] sm:$0xff] }
 0x773   : > { %v6657_v23 = vadd.f32 %v14077_v33, %v6471_v39  ;;  %v14078_v59 = vpop.f32.mrb[44].mxu0  ;;  %v7410_v33 = vld [vmem:[%s23892_s9 + $0x28] sm:$0xff] }
 0x774   : > { %v14079_v40 = vpop.f32.mrb[45].mxu0 }
 0x775   : > { %v14080_v46 = vadd.f32 %v14079_v40, %v14078_v59  ;;  %v6843_v24 = vadd.f32 %v22160_v27, %v6657_v23  ;;  %v16820_v59 = vpack.c.bf16 %v7410_v33, %v7409_v61  ;;  %v7411_v40 = vld [vmem:[%s23892_s9 + $0x30] sm:$0xff]  ;;  %v13270_v61 = vld [vmem:[%s23892_s9 + $0x198] sm:$0xff] }
 0x777   : > { %v6658_v18 = vadd.f32 %v14080_v46, %v6472_v29  ;;  %v14081_v32 = vpop.f32.mrb[46].mxu0 }
 0x778   : > { %v14082_v15 = vpop.f32.mrb[47].mxu0 }
 0x779   : > { %v14083_v41 = vadd.f32 %v14082_v15, %v14081_v32  ;;  %v6844_v57 = vadd.f32 %v22162_v49, %v6658_v18  ;;  %v7412_v18 = vld [vmem:[%s23892_s9 + $0x38] sm:$0xff]  ;;  %v7413_v32 = vld [vmem:[%s23892_s9 + $0x40] sm:$0xff] }
 0x77b   : > { %v6659_v10 = vadd.f32 %v14083_v41, %v6473_v3 }
 0x77d   : > { %v6845_v1 = vadd.f32 %v22164_v37, %v6659_v10 }
 0x78b   : > { %v14160_v4 = vpop.f32.mrb[48].mxu0 }
 0x78c   : > { %v14161_v53 = vpop.f32.mrb[49].mxu0 }
 0x78d   : > { %v14162_v20 = vadd.f32 %v14161_v53, %v14160_v4  ;;  %v7415_v4 = vld [vmem:[%s23892_s9 + $0x50] sm:$0xff]  ;;  %v7416_v53 = vld [vmem:[%s23892_s9 + $0x58] sm:$0xff] }
 0x78f   : > { %v6973_v63 = vadd.f32 %v14162_v20, %v6842_v14  ;;  %v14163_v44 = vpop.f32.mrb[50].mxu0  ;;  %v22295_v20 = vld [vmem:[#allocation5] sm:$0xff] }
 0x790   : > { %v14164_v7 = vpop.f32.mrb[51].mxu0 }
 0x791   : > { %v14165_v16 = vadd.f32 %v14164_v7, %v14163_v44  ;;  %v7159_v51 = vadd.f32 %v22185_v17, %v6973_v63  ;;  %v13234_v17 = vld [vmem:[%s23891_s8] ss:$0 sm:$0xff]  ;;  %v16832_v63 = vpack.c.bf16 %v7416_v53, %v7415_v4  ;;  %v7418_v7 = vld [vmem:[%s23892_s9 + $0x68] sm:$0xff] }
 0x792   : > { %v7417_v44 = vld [vmem:[%s23892_s9 + $0x60] sm:$0xff] }
 0x793   : > { %v6974_v34 = vadd.f32 %v14165_v16, %v6843_v24  ;;  %v14166_v27 = vpop.f32.mrb[52].mxu0  ;;  %v16836_v16 = vpack.c.bf16 %v7418_v7, %v7417_v44  ;;  %v13276_v44 = vld [vmem:[%s23892_s9 + $0x1c8] sm:$0xff] }
 0x794   : > { %v14167_v9 = vpop.f32.mrb[53].mxu0 }
 0x795   : > { %v14168_v35 = vadd.f32 %v14167_v9, %v14166_v27  ;;  %v7160_v5 = vadd.f32 %v22193_v12, %v6974_v34  ;;  %v7420_v34 = vld [vmem:[%s23892_s9 + $0x78] sm:$0xff]  ;;  %v13251_v9 = vld [vmem:[%s23892_s9 + $0x100] sm:$0xff] }
 0x797   : > { %v6975_v42 = vadd.f32 %v14168_v35, %v6844_v57  ;;  %v14169_v49 = vpop.f32.mrb[54].mxu0  ;;  %v7414_v57 = vld [vmem:[%s23892_s9 + $0x48] sm:$0xff] }
 0x798   : > { %v14170_v28 = vpop.f32.mrb[55].mxu0  ;;  %v16828_v10 = vpack.c.bf16 %v7414_v57, %v7413_v32  ;;  %v13252_v35 = vld [vmem:[%s23892_s9 + $0x108] sm:$0xff]  ;;  %v13273_v32 = vld [vmem:[%s23892_s9 + $0x1b0] sm:$0xff]  ;;  %v13274_v57 = vld [vmem:[%s23892_s9 + $0x1b8] sm:$0xff] }
 0x799   : > { %v14171_v62 = vadd.f32 %v14170_v28, %v14169_v49  ;;  %v7161_v37 = vadd.f32 %v22195_v50, %v6975_v42  ;;  %v13253_v42 = vld [vmem:[%s23892_s9 + $0x110] sm:$0xff]  ;;  %v13254_v49 = vld [vmem:[%s23892_s9 + $0x118] sm:$0xff]  ;;  %v16888_v4 = vpack.c.bf16 %v13274_v57, %v13273_v32 }
 0x79a   : > { %v16848_v28 = vpack.c.bf16 %v13254_v49, %v13253_v42  ;;  %v13281_v49 = vld [vmem:[%s23892_s9 + $0x1f0] sm:$0xff]  ;;  %v13302_v32 = vld [vmem:[%s23892_s9 + $0x298] sm:$0xff] }
 0x79b   : > { %v6976_v52 = vadd.f32 %v14171_v62, %v6845_v1 }
 0x79d   : > { %v7162_v31 = vadd.f32 %v22197_v48, %v6976_v52  ;;  %v13256_v52 = vld [vmem:[%s23892_s9 + $0x128] sm:$0xff] }
 0x7ab   : > { %v14248_v0 = vpop.f32.mrb[56].mxu0 }
 0x7ac   : > { %v14249_v25 = vpop.f32.mrb[57].mxu0 }
 0x7ad   : > { %v14250_v54 = vadd.f32 %v14249_v25, %v14248_v0 }
 0x7af   : > { %v7345_v58 = vadd.f32 %v14250_v54, %v7159_v51  ;;  %v14251_v22 = vpop.f32.mrb[58].mxu0  ;;  %v7419_v51 = vld [vmem:[%s23892_s9 + $0x70] sm:$0xff] }
 0x7b0   : > { %v14252_v19 = vpop.f32.mrb[59].mxu0  ;;  %v16840_v27 = vpack.c.bf16 %v7420_v34, %v7419_v51  ;;  %v13257_v54 = vld [vmem:[%s23892_s9 + $0x130] sm:$0xff] }
 0x7b1   : > { %v7356_v12 = vadd.f32 %v13234_v17, %v7345_v58  ;;  %v14253_v8 = vadd.f32 %v14252_v19, %v14251_v22  ;;  %v13277_v34 = vld [vmem:[%s23892_s9 + $0x1d0] sm:$0xff] }
 0x7b3   : > { %v7360_v21 = vmax.f32 %v7356_v12, 0.0  ;;  %v7346_v43 = vadd.f32 %v14253_v8, %v7160_v5  ;;  %v14254_v30 = vpop.f32.mrb[60].mxu0  ;;  %v16844_v5 = vpack.c.bf16 %v13252_v35, %v13251_v9  ;;  %v13259_v12 = vld [vmem:[%s23892_s9 + $0x140] sm:$0xff]  ;;  %v13260_v8 = vld [vmem:[%s23892_s9 + $0x148] sm:$0xff] }
 0x7b4   : > { %v14255_v39 = vpop.f32.mrb[61].mxu0  ;;  %v13279_v35 = vld [vmem:[%s23892_s9 + $0x1e0] sm:$0xff] }
 0x7b5   : > { %7366 = vst [vmem:[#allocation7 + $0x11] ss:$2 sm:$0xf] %v7360_v21  ;;  %7368 = vst [vmem:[#allocation7 + $0x21] ss:$2 sm:$0xf] %v7360_v21  ;;  %v7357_v50 = vadd.f32 %v13234_v17, %v7346_v43  ;;  %v14256_v48 = vadd.f32 %v14255_v39, %v14254_v30  ;;  %v16860_v43 = vpack.c.bf16 %v13260_v8, %v13259_v12 }
 0x7b6   : > { %7382 = vst [vmem:[#allocation7 + $0x12] ss:$2 sm:$0xf] %v7360_v21  ;;  %7384 = vst [vmem:[#allocation7 + $0x22] ss:$2 sm:$0xf] %v7360_v21 }
 0x7b7   : > { %v7361_v13 = vmax.f32 %v7357_v50, 0.0  ;;  %v7347_v55 = vadd.f32 %v14256_v48, %v7161_v37  ;;  %v14257_v2 = vpop.f32.mrb[62].mxu0  ;;  %v13255_v37 = vld [vmem:[%s23892_s9 + $0x120] sm:$0xff]  ;;  %v13261_v50 = vld [vmem:[%s23892_s9 + $0x150] sm:$0xff]  ;;  %v13262_v48 = vld [vmem:[%s23892_s9 + $0x158] sm:$0xff] }
 0x7b8   : > { %v14258_v29 = vpop.f32.mrb[63].mxu0  ;;  %v16852_v0 = vpack.c.bf16 %v13256_v52, %v13255_v37  ;;  %v7656_v30 = vld [vmem:[#allocation7 + $0x2] sm:$0xff] }
 0x7b9   : > { %7370 = vst [vmem:[#allocation7 + $0x31] ss:$2 sm:$0xf] %v7361_v13  ;;  %7372 = vst [vmem:[#allocation7 + $0x41] ss:$2 sm:$0xf] %v7361_v13  ;;  %v7358_v11 = vadd.f32 %v13234_v17, %v7347_v55  ;;  %v14259_v3 = vadd.f32 %v14258_v29, %v14257_v2 }
 0x7ba   : > { %7386 = vst [vmem:[#allocation7 + $0x32] ss:$2 sm:$0xf] %v7361_v13  ;;  %7388 = vst [vmem:[#allocation7 + $0x42] ss:$2 sm:$0xf] %v7361_v13  ;;  %v16864_v13 = vpack.c.bf16 %v13262_v48, %v13261_v50 }
 0x7bb   : > { %v7362_v56 = vmax.f32 %v7358_v11, 0.0  ;;  %v7348_v47 = vadd.f32 %v14259_v3, %v7162_v31  ;;  %v13263_v55 = vld [vmem:[%s23892_s9 + $0x160] sm:$0xff]  ;;  %v13264_v2 = vld [vmem:[%s23892_s9 + $0x168] sm:$0xff]  ;;  %v16872_v11 = vpack.c.bf16 %v13266_v36, %v13265_v26  ;;  %v13290_v50 = vld [vmem:[%s23892_s9 + $0x238] sm:$0xff] }
 0x7bc   : > { %v16868_v29 = vpack.c.bf16 %v13264_v2, %v13263_v55  ;;  %v13267_v3 = vld [vmem:[%s23892_s9 + $0x180] sm:$0xff]  ;;  %v13284_v52 = vld [vmem:[%s23892_s9 + $0x208] sm:$0xff]  ;;  %v13293_v26 = vld [vmem:[%s23892_s9 + $0x250] sm:$0xff] }
 0x7bd   : > { %v22252_v38 = vld [vmem:[#allocation7 + $0x11] sm:$0xff]  ;;  %v22254_v60 = vld [vmem:[#allocation7 + $0x21] sm:$0xff]  ;;  %7374 = vst [vmem:[#allocation7 + $0x51] ss:$2 sm:$0xf] %v7362_v56  ;;  %v7359_v14 = vadd.f32 %v13234_v17, %v7348_v47 }
 0x7be   : > { %7376 = vst [vmem:[#allocation7 + $0x61] ss:$2 sm:$0xf] %v7362_v56  ;;  %7390 = vst [vmem:[#allocation7 + $0x52] ss:$2 sm:$0xf] %v7362_v56  ;;  %15121 = vmatmul.mubr.f32.vlgmr.msra.gmra.mrb[24].mxu1 %v22252_v38 }
 0x7bf   : > { %7392 = vst [vmem:[#allocation7 + $0x62] ss:$2 sm:$0xf] %v7362_v56  ;;  %16815 = vmatpush3.bf16.msra.mxu1 %v22229_v45  ;;  %15123 = vmatprep.mubr.f32.mxu1 %v22254_v60  ;;  %v7363_v23 = vmax.f32 %v7359_v14, 0.0  ;;  %v16824_v45 = vpack.c.bf16 %v7412_v18, %v7411_v40  ;;  %v22322_v62 = vld [vmem:[#allocation7 + $0x10] sm:$0xff]  ;;  %v22331_v31 = vld [vmem:[#allocation7 + $0x20] sm:$0xff] }
 0x7c0   : > { %16817 = vmatprep.subr.bf16.mxu1 %v16816_v6  ;;  %v13258_v17 = vld [vmem:[%s23892_s9 + $0x138] sm:$0xff]  ;;  %v13268_v56 = vld [vmem:[%s23892_s9 + $0x188] sm:$0xff]  ;;  %v13283_v37 = vld [vmem:[%s23892_s9 + $0x200] sm:$0xff] }
 0x7c1   : > { %v22265_v46 = vld [vmem:[#allocation7 + $0x31] sm:$0xff]  ;;  %v22267_v24 = vld [vmem:[#allocation7 + $0x41] sm:$0xff]  ;;  %7378 = vst [vmem:[#allocation7 + $0x71] ss:$2 sm:$0xf] %v7363_v23  ;;  %v16856_v22 = vpack.c.bf16 %v13258_v17, %v13257_v54  ;;  %v16876_v47 = vpack.c.bf16 %v13268_v56, %v13267_v3 }
 0x7c2   : > { %7380 = vst [vmem:[#allocation7 + $0x81] ss:$2 sm:$0xf] %v7363_v23  ;;  %7394 = vst [vmem:[#allocation7 + $0x72] ss:$2 sm:$0xf] %v7363_v23  ;;  %15124 = vmatmul.mubr.f32.gmra.mrb[26].mxu1 %v22265_v46 }
 0x7c3   : > { %7396 = vst [vmem:[#allocation7 + $0x82] ss:$2 sm:$0xf] %v7363_v23  ;;  %16819 = vmatpush3.bf16.msra.mxu1 %v16816_v6  ;;  %15126 = vmatprep.mubr.f32.mxu1 %v22267_v24  ;;  %v22334_v25 = vld [vmem:[#allocation7 + $0x30] sm:$0xff]  ;;  %v22343_v58 = vld [vmem:[#allocation7 + $0x40] sm:$0xff]  ;;  %v13286_v17 = vld [vmem:[%s23892_s9 + $0x218] sm:$0xff] }
 0x7c4   : > { %16821 = vmatprep.subr.bf16.mxu1 %v16820_v59  ;;  %v13269_v6 = vld [vmem:[%s23892_s9 + $0x190] sm:$0xff]  ;;  %v13271_v23 = vld [vmem:[%s23892_s9 + $0x1a0] sm:$0xff]  ;;  %v13288_v8 = vld [vmem:[%s23892_s9 + $0x228] sm:$0xff] }
 0x7c5   : > { %v22277_v15 = vld [vmem:[#allocation7 + $0x51] sm:$0xff]  ;;  %v16880_v33 = vpack.c.bf16 %v13270_v61, %v13269_v6  ;;  %v22400_v40 = vld [vmem:[#allocation7 + $0x22] sm:$0xff] }
 0x7c6   : > { %v22279_v41 = vld [vmem:[#allocation7 + $0x61] sm:$0xff]  ;;  %15127 = vmatmul.mubr.f32.gmra.mrb[28].mxu1 %v22277_v15  ;;  %v22346_v19 = vld [vmem:[#allocation7 + $0x50] sm:$0xff]  ;;  %v13294_v36 = vld [vmem:[%s23892_s9 + $0x258] sm:$0xff] }
 0x7c7   : > { %16823 = vmatpush3.bf16.msra.mxu1 %v16820_v59  ;;  %15129 = vmatprep.mubr.f32.mxu1 %v22279_v41  ;;  %v22355_v21 = vld [vmem:[#allocation7 + $0x60] sm:$0xff]  ;;  %v22391_v14 = vld [vmem:[#allocation7 + $0x12] sm:$0xff]  ;;  %v13272_v59 = vld [vmem:[%s23892_s9 + $0x1a8] sm:$0xff] }
 0x7c8   : > { %16825 = vmatprep.subr.bf16.mxu1 %v16824_v45  ;;  %v16884_v18 = vpack.c.bf16 %v13272_v59, %v13271_v23  ;;  %v22415_v53 = vld [vmem:[#allocation7 + $0x52] sm:$0xff]  ;;  %v22424_v7 = vld [vmem:[#allocation7 + $0x62] sm:$0xff] }
 0x7c9   : > { %v22286_v1 = vld [vmem:[#allocation7 + $0x71] sm:$0xff]  ;;  %v13287_v12 = vld [vmem:[%s23892_s9 + $0x220] sm:$0xff]  ;;  %v13292_v55 = vld [vmem:[%s23892_s9 + $0x248] sm:$0xff] }
 0x7ca   : > { %15130 = vmatmul.mubr.f32.gmra.mrb[30].mxu1 %v22286_v1  ;;  %v22358_v39 = vld [vmem:[#allocation7 + $0x70] sm:$0xff]  ;;  %v13295_v3 = vld [vmem:[%s23892_s9 + $0x260] sm:$0xff]  ;;  %v13296_v56 = vld [vmem:[%s23892_s9 + $0x268] sm:$0xff] }
 0x7cb   : > { %16827 = vmatpush3.bf16.msra.mxu1 %v16824_v45  ;;  %15164 = vmatprep.mubr.f32.mxu1 %v22295_v20  ;;  %v22403_v45 = vld [vmem:[#allocation7 + $0x32] sm:$0xff]  ;;  %v13300_v23 = vld [vmem:[%s23892_s9 + $0x288] sm:$0xff] }
 0x7cc   : > { %16829 = vmatprep.subr.bf16.mxu1 %v16828_v10  ;;  %v22427_v51 = vld [vmem:[#allocation7 + $0x72] sm:$0xff] }
 0x7cd   : > { %v13285_v54 = vld [vmem:[%s23892_s9 + $0x210] sm:$0xff] }
 0x7ce   : > { %v13297_v6 = vld [vmem:[%s23892_s9 + $0x270] sm:$0xff] }
 0x7cf   : > { %16831 = vmatpush3.bf16.msra.mxu1 %v16828_v10  ;;  %v22412_v10 = vld [vmem:[#allocation7 + $0x42] sm:$0xff] }
 0x7d0   : > { %16833 = vmatprep.subr.bf16.mxu1 %v16832_v63 }
 0x7d3   : > { %16835 = vmatpush3.bf16.msra.mxu1 %v16832_v63  ;;  %v13275_v63 = vld [vmem:[%s23892_s9 + $0x1c0] sm:$0xff] }
 0x7d4   : > { %16837 = vmatprep.subr.bf16.mxu1 %v16836_v16 }
 0x7d7   : > { %16839 = vmatpush3.bf16.msra.mxu1 %v16836_v16  ;;  %v16892_v16 = vpack.c.bf16 %v13276_v44, %v13275_v63  ;;  %v13304_v63 = vld [vmem:[%s23892_s9 + $0x2a8] sm:$0xff] }
 0x7d8   : > { %16841 = vmatprep.subr.bf16.mxu1 %v16840_v27 }
 0x7db   : > { %16843 = vmatpush3.bf16.msra.mxu1 %v16840_v27  ;;  %v13278_v27 = vld [vmem:[%s23892_s9 + $0x1d8] sm:$0xff] }
 0x7dc   : > { %16845 = vmatprep.subr.bf16.mxu1 %v16844_v5  ;;  %v16896_v9 = vpack.c.bf16 %v13278_v27, %v13277_v34  ;;  %v13306_v34 = vld [vmem:[%s23892_s9 + $0x2b8] sm:$0xff] }
 0x7de   : > { %15165 = vmatmul.mubr.f32.vlgmr.msra.gmra.mrb[24].mxu1 %v22322_v62 }
 0x7df   : > { %15167 = vmatprep.mubr.f32.mxu1 %v22331_v31  ;;  %16847 = vmatpush3.bf16.msra.mxu1 %v16844_v5  ;;  %v13280_v5 = vld [vmem:[%s23892_s9 + $0x1e8] sm:$0xff] }
 0x7e0   : > { %16849 = vmatprep.subr.bf16.mxu1 %v16848_v28  ;;  %v16900_v42 = vpack.c.bf16 %v13280_v5, %v13279_v35  ;;  %v13308_v35 = vld [vmem:[%s23892_s9 + $0x2c8] sm:$0xff] }
 0x7e2   : > { %15168 = vmatmul.mubr.f32.gmra.mrb[26].mxu1 %v22334_v25 }
 0x7e3   : > { %15170 = vmatprep.mubr.f32.mxu1 %v22343_v58  ;;  %16851 = vmatpush3.bf16.msra.mxu1 %v16848_v28  ;;  %v13282_v28 = vld [vmem:[%s23892_s9 + $0x1f8] sm:$0xff] }
 0x7e4   : > { %16853 = vmatprep.subr.bf16.mxu1 %v16852_v0 }
 0x7e6   : > { %15171 = vmatmul.mubr.f32.gmra.mrb[28].mxu1 %v22346_v19 }
 0x7e7   : > { %15173 = vmatprep.mubr.f32.mxu1 %v22355_v21  ;;  %16855 = vmatpush3.bf16.msra.mxu1 %v16852_v0  ;;  %v16908_v0 = vpack.c.bf16 %v13284_v52, %v13283_v37  ;;  %v13437_v37 = vld [vmem:[%s23894_s11 + $0x88] sm:$0xff] }
 0x7e8   : > { %16857 = vmatprep.subr.bf16.mxu1 %v16856_v22 }
 0x7ea   : > { %15174 = vmatmul.mubr.f32.gmra.mrb[30].mxu1 %v22358_v39 }
 0x7eb   : > { %16859 = vmatpush3.bf16.msra.mxu1 %v16856_v22  ;;  %15208 = vmatprep.mubr.f32.mxu1 %v7656_v30  ;;  %v16912_v22 = vpack.c.bf16 %v13286_v17, %v13285_v54  ;;  %v13289_v30 = vld [vmem:[%s23892_s9 + $0x230] sm:$0xff]  ;;  %v13439_v54 = vld [vmem:[%s23894_s11 + $0x98] sm:$0xff] }
 0x7ec   : > { %16861 = vmatprep.subr.bf16.mxu1 %v16860_v43  ;;  %v16920_v48 = vpack.c.bf16 %v13290_v50, %v13289_v30  ;;  %v13314_v30 = vld [vmem:[%s23892_s9 + $0x2f8] sm:$0xff] }
 0x7ef   : > { %16863 = vmatpush3.bf16.msra.mxu1 %v16860_v43  ;;  %v16916_v43 = vpack.c.bf16 %v13288_v8, %v13287_v12  ;;  %v13311_v12 = vld [vmem:[%s23892_s9 + $0x2e0] sm:$0xff] }
 0x7f0   : > { %16865 = vmatprep.subr.bf16.mxu1 %v16864_v13 }
 0x7f3   : > { %16867 = vmatpush3.bf16.msra.mxu1 %v16864_v13  ;;  %v13291_v13 = vld [vmem:[%s23892_s9 + $0x240] sm:$0xff] }
 0x7f4   : > { %16869 = vmatprep.subr.bf16.mxu1 %v16868_v29  ;;  %v16924_v2 = vpack.c.bf16 %v13292_v55, %v13291_v13  ;;  %v13316_v13 = vld [vmem:[%s23892_s9 + $0x308] sm:$0xff] }
 0x7f7   : > { %16871 = vmatpush3.bf16.msra.mxu1 %v16868_v29  ;;  %v22485_v29 = vld [vmem:[#allocation7 + $0x80] sm:$0xff] }
 0x7f8   : > { %16873 = vmatprep.subr.bf16.mxu1 %v16872_v11 }
 0x7fb   : > { %16875 = vmatpush3.bf16.msra.mxu1 %v16872_v11  ;;  %v16928_v11 = vpack.c.bf16 %v13294_v36, %v13293_v26  ;;  %v13318_v26 = vld [vmem:[%s23892_s9 + $0x318] sm:$0xff] }
 0x7fc   : > { %16877 = vmatprep.subr.bf16.mxu1 %v16876_v47 }
 0x7fe   : > { %15209 = vmatmul.mubr.f32.vlgmr.msra.gmra.mrb[24].mxu1 %v22391_v14 }
 0x7ff   : > { %15211 = vmatprep.mubr.f32.mxu1 %v22400_v40  ;;  %16879 = vmatpush3.bf16.msra.mxu1 %v16876_v47  ;;  %v16932_v47 = vpack.c.bf16 %v13296_v56, %v13295_v3  ;;  %v13320_v3 = vld [vmem:[%s23892_s9 + $0x328] sm:$0xff] }
 0x800   : > { %16881 = vmatprep.subr.bf16.mxu1 %v16880_v33 }
 0x802   : > { %15212 = vmatmul.mubr.f32.gmra.mrb[26].mxu1 %v22403_v45 }
 0x803   : > { %15214 = vmatprep.mubr.f32.mxu1 %v22412_v10  ;;  %16883 = vmatpush3.bf16.msra.mxu1 %v16880_v33  ;;  %v13299_v33 = vld [vmem:[%s23892_s9 + $0x280] sm:$0xff] }
 0x804   : > { %16885 = vmatprep.subr.bf16.mxu1 %v16884_v18  ;;  %v16940_v59 = vpack.c.bf16 %v13300_v23, %v13299_v33  ;;  %v13324_v33 = vld [vmem:[%s23892_s9 + $0x348] sm:$0xff] }
 0x806   : > { %15215 = vmatmul.mubr.f32.gmra.mrb[28].mxu1 %v22415_v53 }
 0x807   : > { %15217 = vmatprep.mubr.f32.mxu1 %v22424_v7  ;;  %16887 = vmatpush3.bf16.msra.mxu1 %v16884_v18  ;;  %v13301_v18 = vld [vmem:[%s23892_s9 + $0x290] sm:$0xff] }
 0x808   : > { %16889 = vmatprep.subr.bf16.mxu1 %v16888_v4  ;;  %v16944_v57 = vpack.c.bf16 %v13302_v32, %v13301_v18  ;;  %v13325_v18 = vld [vmem:[%s23892_s9 + $0x350] sm:$0xff]  ;;  %v13326_v32 = vld [vmem:[%s23892_s9 + $0x358] sm:$0xff] }
 0x80a   : > { %15218 = vmatmul.mubr.f32.gmra.mrb[30].mxu1 %v22427_v51 }
 0x80b   : > { %16891 = vmatpush3.bf16.msra.mxu1 %v16888_v4  ;;  %15252 = vmatprep.mubr.f32.mxu1 %v22322_v62  ;;  %v16904_v62 = vpack.c.bf16 %v13282_v28, %v13281_v49  ;;  %v13303_v4 = vld [vmem:[%s23892_s9 + $0x2a0] sm:$0xff]  ;;  %v13309_v49 = vld [vmem:[%s23892_s9 + $0x2d0] sm:$0xff]  ;;  %v13310_v28 = vld [vmem:[%s23892_s9 + $0x2d8] sm:$0xff] }
 0x80c   : > { %16893 = vmatprep.subr.bf16.mxu1 %v16892_v16  ;;  %v16948_v44 = vpack.c.bf16 %v13304_v63, %v13303_v4  ;;  %v16960_v17 = vpack.c.bf16 %v13310_v28, %v13309_v49  ;;  %v13327_v4 = vld [vmem:[%s23892_s9 + $0x360] sm:$0xff]  ;;  %v13328_v63 = vld [vmem:[%s23892_s9 + $0x368] sm:$0xff]  ;;  %v13334_v49 = vld [vmem:[%s23892_s9 + $0x398] sm:$0xff] }
 0x80f   : > { %16895 = vmatpush3.bf16.msra.mxu1 %v16892_v16  ;;  %v13305_v16 = vld [vmem:[%s23892_s9 + $0x2b0] sm:$0xff] }
 0x810   : > { %16897 = vmatprep.subr.bf16.mxu1 %v16896_v9  ;;  %v16952_v27 = vpack.c.bf16 %v13306_v34, %v13305_v16  ;;  %v13329_v16 = vld [vmem:[%s23892_s9 + $0x370] sm:$0xff] }
 0x813   : > { %16899 = vmatpush3.bf16.msra.mxu1 %v16896_v9  ;;  %v13307_v9 = vld [vmem:[%s23892_s9 + $0x2c0] sm:$0xff] }
 0x814   : > { %16901 = vmatprep.subr.bf16.mxu1 %v16900_v42  ;;  %v16956_v5 = vpack.c.bf16 %v13308_v35, %v13307_v9  ;;  %v13332_v9 = vld [vmem:[%s23892_s9 + $0x388] sm:$0xff] }
 0x817   : > { %16903 = vmatpush3.bf16.msra.mxu1 %v16900_v42  ;;  %v22543_v42 = vld [vmem:[#allocation7 + $0x81] sm:$0xff] }
 0x818   : > { %16905 = vmatprep.subr.bf16.mxu1 %v16904_v62 }
 0x81b   : > { %16907 = vmatpush3.bf16.msra.mxu1 %v16904_v62  ;;  %v13436_v62 = vld [vmem:[%s23894_s11 + $0x80] sm:$0xff] }
 0x81c   : > { %16909 = vmatprep.subr.bf16.mxu1 %v16908_v0  ;;  %v22559_v52 = vpack.c.bf16 %v13437_v37, %v13436_v62  ;;  %v13335_v62 = vld [vmem:[%s23892_s9 + $0x3a0] sm:$0xff]  ;;  %v13336_v37 = vld [vmem:[%s23892_s9 + $0x3a8] sm:$0xff] }
 0x81e   : > { %15253 = vmatmul.mubr.f32.vlgmr.msra.gmra.mrb[24].mxu1 %v22331_v31  ;;  %17101 = vmatprep.subr.bf16.mxu0 %v22559_v52 }
 0x81f   : > { %15255 = vmatprep.mubr.f32.mxu1 %v22334_v25  ;;  %16911 = vmatpush3.bf16.msra.mxu1 %v16908_v0  ;;  %v13438_v0 = vld [vmem:[%s23894_s11 + $0x90] sm:$0xff] }
 0x820   : > { %16913 = vmatprep.subr.bf16.mxu1 %v16912_v22  ;;  %17103 = vmatpush3.bf16.msra.mxu0 %v22559_v52 }
 0x822   : > { %15256 = vmatmul.mubr.f32.gmra.mrb[26].mxu1 %v22343_v58 }
 0x823   : > { %15258 = vmatprep.mubr.f32.mxu1 %v22346_v19  ;;  %16915 = vmatpush3.bf16.msra.mxu1 %v16912_v22  ;;  %v22567_v22 = vpack.c.bf16 %v13439_v54, %v13438_v0  ;;  %v17012_v0 = vpack.c.bf16 %v13336_v37, %v13335_v62  ;;  %v13337_v54 = vld [vmem:[%s23892_s9 + $0x3b0] sm:$0xff]  ;;  %v8751_v62 = vld [vmem:[#allocation8 + $0x1] sm:$0xff] }
 0x824   : > { %16917 = vmatprep.subr.bf16.mxu1 %v16916_v43  ;;  %v9434_v37 = vld [vmem:[#allocation8 + $0x2] sm:$0xff] }
 0x825   : > { %17105 = vmatprep.subr.bf16.mxu0 %v22567_v22  ;;  %15628 = vmatprep.mubr.msk.f32.mxu0 %vm441_vm0, %v9434_v37 }
 0x826   : > { %15259 = vmatmul.mubr.f32.gmra.mrb[28].mxu1 %v22355_v21  ;;  %17107 = vmatpush3.bf16.msra.mxu0 %v22567_v22 }
 0x827   : > { %15261 = vmatprep.mubr.f32.mxu1 %v22358_v39  ;;  %16919 = vmatpush3.bf16.msra.mxu1 %v16916_v43  ;;  %v13313_v43 = vld [vmem:[%s23892_s9 + $0x2f0] sm:$0xff] }
 0x828   : > { %16921 = vmatprep.subr.bf16.mxu1 %v16920_v48  ;;  %v16968_v50 = vpack.c.bf16 %v13314_v30, %v13313_v43 }
 0x82a   : > { %15262 = vmatmul.mubr.f32.gmra.mrb[30].mxu1 %v22485_v29 }
 0x82b   : > { %16923 = vmatpush3.bf16.msra.mxu1 %v16920_v48  ;;  %15296 = vmatprep.mubr.f32.mxu1 %v22252_v38  ;;  %v13298_v38 = vld [vmem:[%s23892_s9 + $0x278] sm:$0xff]  ;;  %v13315_v48 = vld [vmem:[%s23892_s9 + $0x300] sm:$0xff] }
 0x82c   : > { %16925 = vmatprep.subr.bf16.mxu1 %v16924_v2  ;;  %v16936_v61 = vpack.c.bf16 %v13298_v38, %v13297_v6  ;;  %v16972_v55 = vpack.c.bf16 %v13316_v13, %v13315_v48  ;;  %v13322_v6 = vld [vmem:[%s23892_s9 + $0x338] sm:$0xff]  ;;  %v13348_v48 = vld [vmem:[%s23892_s9 + $0x408] sm:$0xff] }
 0x82f   : > { %16927 = vmatpush3.bf16.msra.mxu1 %v16924_v2  ;;  %v13317_v2 = vld [vmem:[%s23892_s9 + $0x310] sm:$0xff] }
 0x830   : > { %16929 = vmatprep.subr.bf16.mxu1 %v16928_v11  ;;  %v16976_v36 = vpack.c.bf16 %v13318_v26, %v13317_v2  ;;  %v13350_v2 = vld [vmem:[%s23892_s9 + $0x418] sm:$0xff] }
 0x833   : > { %16931 = vmatpush3.bf16.msra.mxu1 %v16928_v11  ;;  %v13319_v11 = vld [vmem:[%s23892_s9 + $0x320] sm:$0xff] }
 0x834   : > { %16933 = vmatprep.subr.bf16.mxu1 %v16932_v47  ;;  %v16980_v56 = vpack.c.bf16 %v13320_v3, %v13319_v11  ;;  %v13352_v11 = vld [vmem:[%s23892_s9 + $0x428] sm:$0xff] }
 0x837   : > { %16935 = vmatpush3.bf16.msra.mxu1 %v16932_v47  ;;  %v13321_v47 = vld [vmem:[%s23892_s9 + $0x330] sm:$0xff] }
 0x838   : > { %16937 = vmatprep.subr.bf16.mxu1 %v16936_v61  ;;  %v16984_v38 = vpack.c.bf16 %v13322_v6, %v13321_v47  ;;  %v13354_v47 = vld [vmem:[%s23892_s9 + $0x438] sm:$0xff]  ;;  %v13356_v6 = vld [vmem:[%s23892_s9 + $0x448] sm:$0xff] }
 0x83b   : > { %16939 = vmatpush3.bf16.msra.mxu1 %v16936_v61  ;;  %v13323_v61 = vld [vmem:[%s23892_s9 + $0x340] sm:$0xff] }
 0x83c   : > { %16941 = vmatprep.subr.bf16.mxu1 %v16940_v59  ;;  %v16988_v23 = vpack.c.bf16 %v13324_v33, %v13323_v61  ;;  %v13358_v61 = vld [vmem:[%s23892_s9 + $0x458] sm:$0xff]  ;;  %v13360_v33 = vld [vmem:[%s23892_s9 + $0x468] sm:$0xff] }
 0x83e   : > { %15297 = vmatmul.mubr.f32.vlgmr.msra.gmra.mrb[24].mxu1 %v22254_v60 }
 0x83f   : > { %15299 = vmatprep.mubr.f32.mxu1 %v22265_v46  ;;  %16943 = vmatpush3.bf16.msra.mxu1 %v16940_v59  ;;  %v22621_v59 = vld [vmem:[#allocation7 + $0x82] sm:$0xff] }
 0x840   : > { %16945 = vmatprep.subr.bf16.mxu1 %v16944_v57 }
 0x842   : > { %15300 = vmatmul.mubr.f32.gmra.mrb[26].mxu1 %v22267_v24 }
 0x843   : > { %15302 = vmatprep.mubr.f32.mxu1 %v22277_v15  ;;  %16947 = vmatpush3.bf16.msra.mxu1 %v16944_v57  ;;  %v16992_v57 = vpack.c.bf16 %v13326_v32, %v13325_v18  ;;  %v13361_v18 = vld [vmem:[%s23892_s9 + $0x470] sm:$0xff] }
 0x844   : > { %16949 = vmatprep.subr.bf16.mxu1 %v16948_v44 }
 0x846   : > { %15303 = vmatmul.mubr.f32.gmra.mrb[28].mxu1 %v22279_v41 }
 0x847   : > { %15305 = vmatprep.mubr.f32.mxu1 %v22286_v1  ;;  %16951 = vmatpush3.bf16.msra.mxu1 %v16948_v44  ;;  %v16996_v44 = vpack.c.bf16 %v13328_v63, %v13327_v4  ;;  %v13365_v4 = vld [vmem:[%s23894_s11 + $0x48] sm:$0xff] }
 0x848   : > { %16953 = vmatprep.subr.bf16.mxu1 %v16952_v27 }
 0x84a   : > { %15306 = vmatmul.mubr.f32.gmra.mrb[30].mxu1 %v22543_v42 }
 0x84b   : > { %16955 = vmatpush3.bf16.msra.mxu1 %v16952_v27  ;;  %15340 = vmatprep.mubr.f32.mxu1 %v22391_v14  ;;  %v13312_v14 = vld [vmem:[%s23892_s9 + $0x2e8] sm:$0xff]  ;;  %v13331_v27 = vld [vmem:[%s23892_s9 + $0x380] sm:$0xff] }
 0x84c   : > { %16957 = vmatprep.subr.bf16.mxu1 %v16956_v5  ;;  %v16964_v8 = vpack.c.bf16 %v13312_v14, %v13311_v12  ;;  %v17004_v35 = vpack.c.bf16 %v13332_v9, %v13331_v27  ;;  %v13340_v12 = vld [vmem:[%s23892_s9 + $0x3c8] sm:$0xff]  ;;  %v13342_v14 = vld [vmem:[%s23892_s9 + $0x3d8] sm:$0xff]  ;;  %v13440_v27 = vld [vmem:[%s23894_s11 + $0xa0] sm:$0xff] }
 0x84d   : > { %v13443_v9 = vld [vmem:[%s23894_s11 + $0xb8] sm:$0xff] }
 0x84f   : > { %16959 = vmatpush3.bf16.msra.mxu1 %v16956_v5  ;;  %v13333_v5 = vld [vmem:[%s23892_s9 + $0x390] sm:$0xff] }
 0x850   : > { %16961 = vmatprep.subr.bf16.mxu1 %v16960_v17  ;;  %v17008_v28 = vpack.c.bf16 %v13334_v49, %v13333_v5  ;;  %v13371_v49 = vld [vmem:[%s23894_s11 + $0x78] sm:$0xff] }
 0x853   : > { %16963 = vmatpush3.bf16.msra.mxu1 %v16960_v17  ;;  %v13338_v17 = vld [vmem:[%s23892_s9 + $0x3b8] sm:$0xff] }
 0x854   : > { %16965 = vmatprep.subr.bf16.mxu1 %v16964_v8 }
 0x857   : > { %16967 = vmatpush3.bf16.msra.mxu1 %v16964_v8  ;;  %v13344_v8 = vld [vmem:[%s23892_s9 + $0x3e8] sm:$0xff] }
 0x858   : > { %16969 = vmatprep.subr.bf16.mxu1 %v16968_v50 }
 0x85b   : > { %16971 = vmatpush3.bf16.msra.mxu1 %v16968_v50  ;;  %v13347_v50 = vld [vmem:[%s23892_s9 + $0x400] sm:$0xff] }
 0x85c   : > { %16973 = vmatprep.subr.bf16.mxu1 %v16972_v55  ;;  %v17036_v13 = vpack.c.bf16 %v13348_v48, %v13347_v50  ;;  %v8743_v48 = vld [vmem:[%s23894_s11] sm:$0xff] }
 0x85e   : > { %15341 = vmatmul.mubr.f32.vlgmr.msra.gmra.mrb[24].mxu1 %v22400_v40 }
 0x85f   : > { %15343 = vmatprep.mubr.f32.mxu1 %v22403_v45  ;;  %16975 = vmatpush3.bf16.msra.mxu1 %v16972_v55  ;;  %v13349_v55 = vld [vmem:[%s23892_s9 + $0x410] sm:$0xff] }
 0x860   : > { %16977 = vmatprep.subr.bf16.mxu1 %v16976_v36  ;;  %v17040_v26 = vpack.c.bf16 %v13350_v2, %v13349_v55  ;;  %v8745_v2 = vld [vmem:[%s23894_s11 + $0x10] sm:$0xff] }
 0x862   : > { %15344 = vmatmul.mubr.f32.gmra.mrb[26].mxu1 %v22412_v10 }
 0x863   : > { %15346 = vmatprep.mubr.f32.mxu1 %v22415_v53  ;;  %16979 = vmatpush3.bf16.msra.mxu1 %v16976_v36  ;;  %v13351_v36 = vld [vmem:[%s23892_s9 + $0x420] sm:$0xff] }
 0x864   : > { %16981 = vmatprep.subr.bf16.mxu1 %v16980_v56  ;;  %v17044_v3 = vpack.c.bf16 %v13352_v11, %v13351_v36  ;;  %v8747_v11 = vld [vmem:[%s23894_s11 + $0x20] sm:$0xff] }
 0x866   : > { %15347 = vmatmul.mubr.f32.gmra.mrb[28].mxu1 %v22424_v7 }
 0x867   : > { %15349 = vmatprep.mubr.f32.mxu1 %v22427_v51  ;;  %16983 = vmatpush3.bf16.msra.mxu1 %v16980_v56  ;;  %v13353_v56 = vld [vmem:[%s23892_s9 + $0x430] sm:$0xff] }
 0x868   : > { %16985 = vmatprep.subr.bf16.mxu1 %v16984_v38 }
 0x86a   : > { %15350 = vmatmul.mubr.f32.gmra.mrb[30].mxu1 %v22621_v59 }
 0x86b   : > { %16987 = vmatpush3.bf16.msra.mxu1 %v16984_v38  ;;  %15384 = vmatprep.mubr.f32.mxu1 %v22331_v31  ;;  %v13330_v31 = vld [vmem:[%s23892_s9 + $0x378] sm:$0xff] }
 0x86c   : > { %16989 = vmatprep.subr.bf16.mxu1 %v16988_v23  ;;  %v17000_v34 = vpack.c.bf16 %v13330_v31, %v13329_v16  ;;  %v8354_v38 = vld [vmem:[#allocation7 + $0x91] sm:$0xff] }
 0x86d   : > { %v13367_v16 = vld [vmem:[%s23894_s11 + $0x58] sm:$0xff] }
 0x86f   : > { %16991 = vmatpush3.bf16.msra.mxu1 %v16988_v23 }
 0x870   : > { %16993 = vmatprep.subr.bf16.mxu1 %v16992_v57 }
 0x873   : > { %16995 = vmatpush3.bf16.msra.mxu1 %v16992_v57  ;;  %v13364_v57 = vld [vmem:[%s23894_s11 + $0x40] sm:$0xff] }
 0x874   : > { %16997 = vmatprep.subr.bf16.mxu1 %v16996_v44  ;;  %v17068_v63 = vpack.c.bf16 %v13365_v4, %v13364_v57 }
 0x877   : > { %16999 = vmatpush3.bf16.msra.mxu1 %v16996_v44  ;;  %v13366_v44 = vld [vmem:[%s23894_s11 + $0x50] sm:$0xff] }
 0x878   : > { %17001 = vmatprep.subr.bf16.mxu1 %v17000_v34  ;;  %v17072_v31 = vpack.c.bf16 %v13367_v16, %v13366_v44 }
 0x87b   : > { %17003 = vmatpush3.bf16.msra.mxu1 %v17000_v34  ;;  %v8492_v34 = vld [vmem:[#allocation7 + $0x92] sm:$0xff] }
 0x87c   : > { %17005 = vmatprep.subr.bf16.mxu1 %v17004_v35 }
 0x87e   : > { %15385 = vmatmul.mubr.f32.vlgmr.msra.gmra.mrb[24].mxu1 %v22334_v25  ;;  %v17016_v25 = vpack.c.bf16 %v13338_v17, %v13337_v54  ;;  %v13477_v54 = vld [vmem:[%s23894_s11 + $0xc8] sm:$0xff] }
 0x87f   : > { %15387 = vmatprep.mubr.f32.mxu1 %v22343_v58  ;;  %17007 = vmatpush3.bf16.msra.mxu1 %v17004_v35  ;;  %v13339_v58 = vld [vmem:[%s23892_s9 + $0x3c0] sm:$0xff]  ;;  %v13370_v35 = vld [vmem:[%s23894_s11 + $0x70] sm:$0xff] }
 0x880   : > { %17009 = vmatprep.subr.bf16.mxu1 %v17008_v28  ;;  %v8752_v17 = vld [vmem:[#allocation8 + $0x9] sm:$0xff] }
 0x882   : > { %15388 = vmatmul.mubr.f32.gmra.mrb[26].mxu1 %v22346_v19  ;;  %v17020_v19 = vpack.c.bf16 %v13340_v12, %v13339_v58  ;;  %v13478_v12 = vld [vmem:[%s23894_s11 + $0xd0] sm:$0xff] }
 0x883   : > { %15390 = vmatprep.mubr.f32.mxu1 %v22355_v21  ;;  %17011 = vmatpush3.bf16.msra.mxu1 %v17008_v28  ;;  %v13341_v21 = vld [vmem:[%s23892_s9 + $0x3d0] sm:$0xff]  ;;  %v17080_v28 = vpack.c.bf16 %v13371_v49, %v13370_v35 }
 0x884   : > { %17013 = vmatprep.subr.bf16.mxu1 %v17012_v0 }
 0x886   : > { %15391 = vmatmul.mubr.f32.gmra.mrb[28].mxu1 %v22358_v39  ;;  %v17024_v39 = vpack.c.bf16 %v13342_v14, %v13341_v21  ;;  %v13480_v14 = vld [vmem:[%s23894_s11 + $0xe0] sm:$0xff] }
 0x887   : > { %15393 = vmatprep.mubr.f32.mxu1 %v22485_v29  ;;  %17015 = vmatpush3.bf16.msra.mxu1 %v17012_v0  ;;  %v13343_v29 = vld [vmem:[%s23892_s9 + $0x3e0] sm:$0xff] }
 0x888   : > { %17017 = vmatprep.subr.bf16.mxu1 %v17016_v25  ;;  %v17028_v43 = vpack.c.bf16 %v13344_v8, %v13343_v29  ;;  %v13476_v0 = vld [vmem:[%s23894_s11 + $0xc0] sm:$0xff]  ;;  %v13482_v8 = vld [vmem:[%s23894_s11 + $0xf0] sm:$0xff] }
 0x889   : > { %v17116_v58 = vpack.c.bf16 %v13477_v54, %v13476_v0 }
 0x88a   : > { %15394 = vmatmul.mubr.f32.gmra.mrb[30].mxu1 %v22295_v20  ;;  %v13345_v20 = vld [vmem:[%s23892_s9 + $0x3f0] sm:$0xff] }
 0x88b   : > { %17019 = vmatpush3.bf16.msra.mxu1 %v17016_v25  ;;  %15428 = vmatprep.mubr.f32.mxu1 %v22254_v60  ;;  %v13346_v60 = vld [vmem:[%s23892_s9 + $0x3f8] sm:$0xff]  ;;  %v9435_v25 = vld [vmem:[#allocation8 + $0xa] sm:$0xff] }
 0x88c   : > { %17021 = vmatprep.subr.bf16.mxu1 %v17020_v19  ;;  %v17032_v30 = vpack.c.bf16 %v13346_v60, %v13345_v20  ;;  %v13516_v60 = vld [vmem:[%s23894_s11 + $0x100] sm:$0xff] }
 0x88f   : > { %17023 = vmatpush3.bf16.msra.mxu1 %v17020_v19  ;;  %v13479_v19 = vld [vmem:[%s23894_s11 + $0xd8] sm:$0xff] }
 0x890   : > { %17025 = vmatprep.subr.bf16.mxu1 %v17024_v39  ;;  %v17120_v21 = vpack.c.bf16 %v13479_v19, %v13478_v12 }
 0x893   : > { %17027 = vmatpush3.bf16.msra.mxu1 %v17024_v39  ;;  %v13481_v39 = vld [vmem:[%s23894_s11 + $0xe8] sm:$0xff] }
 0x894   : > { %17029 = vmatprep.subr.bf16.mxu1 %v17028_v43  ;;  %v17124_v29 = vpack.c.bf16 %v13481_v39, %v13480_v14 }
 0x897   : > { %17031 = vmatpush3.bf16.msra.mxu1 %v17028_v43  ;;  %v13483_v43 = vld [vmem:[%s23894_s11 + $0xf8] sm:$0xff] }
 0x898   : > { %17033 = vmatprep.subr.bf16.mxu1 %v17032_v30  ;;  %v17128_v20 = vpack.c.bf16 %v13483_v43, %v13482_v8 }
 0x89b   : > { %17035 = vmatpush3.bf16.msra.mxu1 %v17032_v30  ;;  %v13517_v30 = vld [vmem:[%s23894_s11 + $0x108] sm:$0xff] }
 0x89c   : > { %17037 = vmatprep.subr.bf16.mxu1 %v17036_v13  ;;  %v22838_v50 = vpack.c.bf16 %v13517_v30, %v13516_v60 }
 0x89e   : > { %15429 = vmatmul.mubr.f32.vlgmr.msra.gmra.mrb[24].mxu1 %v22265_v46  ;;  %v17048_v46 = vpack.c.bf16 %v13354_v47, %v13353_v56  ;;  %v8749_v47 = vld [vmem:[%s23894_s11 + $0x30] sm:$0xff] }
 0x89f   : > { %15431 = vmatprep.mubr.f32.mxu1 %v22267_v24  ;;  %17039 = vmatpush3.bf16.msra.mxu1 %v17036_v13  ;;  %v13355_v24 = vld [vmem:[%s23892_s9 + $0x440] sm:$0xff]  ;;  %v8744_v13 = vld [vmem:[%s23894_s11 + $0x8] sm:$0xff] }
 0x8a0   : > { %17041 = vmatprep.subr.bf16.mxu1 %v17040_v26  ;;  %v17084_v55 = vpack.c.bf16 %v8744_v13, %v8743_v48 }
 0x8a2   : > { %15432 = vmatmul.mubr.f32.gmra.mrb[26].mxu1 %v22277_v15  ;;  %v17052_v15 = vpack.c.bf16 %v13356_v6, %v13355_v24  ;;  %v13363_v6 = vld [vmem:[%s23893_s10] ss:$0 sm:$0xff] }
 0x8a3   : > { %15434 = vmatprep.mubr.f32.mxu1 %v22279_v41  ;;  %17043 = vmatpush3.bf16.msra.mxu1 %v17040_v26  ;;  %v13357_v41 = vld [vmem:[%s23892_s9 + $0x450] sm:$0xff]  ;;  %v8746_v26 = vld [vmem:[%s23894_s11 + $0x18] sm:$0xff] }
 0x8a4   : > { %17045 = vmatprep.subr.bf16.mxu1 %v17044_v3  ;;  %v17088_v36 = vpack.c.bf16 %v8746_v26, %v8745_v2 }
 0x8a6   : > { %15435 = vmatmul.mubr.f32.gmra.mrb[28].mxu1 %v22286_v1  ;;  %v17056_v1 = vpack.c.bf16 %v13358_v61, %v13357_v41 }
 0x8a7   : > { %15437 = vmatprep.mubr.f32.mxu1 %v22543_v42  ;;  %17047 = vmatpush3.bf16.msra.mxu1 %v17044_v3  ;;  %v13359_v42 = vld [vmem:[%s23892_s9 + $0x460] sm:$0xff]  ;;  %v8748_v3 = vld [vmem:[%s23894_s11 + $0x28] sm:$0xff] }
 0x8a8   : > { %17049 = vmatprep.subr.bf16.mxu1 %v17048_v46  ;;  %v17060_v23 = vpack.c.bf16 %v13360_v33, %v13359_v42  ;;  %v17092_v56 = vpack.c.bf16 %v8748_v3, %v8747_v11 }
 0x8aa   : > { %15438 = vmatmul.mubr.f32.gmra.mrb[30].mxu1 %v8354_v38 }
 0x8ab   : > { %17051 = vmatpush3.bf16.msra.mxu1 %v17048_v46  ;;  %15472 = vmatprep.mubr.f32.mxu1 %v22400_v40  ;;  %v13362_v40 = vld [vmem:[%s23892_s9 + $0x478] sm:$0xff] }
 0x8ac   : > { %17053 = vmatprep.subr.bf16.mxu1 %v17052_v15  ;;  %v17064_v32 = vpack.c.bf16 %v13362_v40, %v13361_v18  ;;  %v8750_v46 = vld [vmem:[%s23894_s11 + $0x38] sm:$0xff] }
 0x8ad   : > { %v17096_v24 = vpack.c.bf16 %v8750_v46, %v8749_v47 }
 0x8af   : > { %17055 = vmatpush3.bf16.msra.mxu1 %v17052_v15 }
 0x8b0   : > { %17057 = vmatprep.subr.bf16.mxu1 %v17056_v1 }
 0x8b3   : > { %17059 = vmatpush3.bf16.msra.mxu1 %v17056_v1 }
 0x8b4   : > { %17061 = vmatprep.subr.bf16.mxu1 %v17060_v23 }
 0x8b7   : > { %17063 = vmatpush3.bf16.msra.mxu1 %v17060_v23 }
 0x8b8   : > { %17065 = vmatprep.subr.bf16.mxu1 %v17064_v32 }
 0x8bb   : > { %17067 = vmatpush3.bf16.msra.mxu1 %v17064_v32 }
 0x8bc   : > { %17069 = vmatprep.subr.bf16.mxu1 %v17068_v63 }
 0x8be   : > { %15473 = vmatmul.mubr.f32.vlgmr.msra.gmra.mrb[24].mxu1 %v22403_v45  ;;  %v13441_v45 = vld [vmem:[%s23894_s11 + $0xa8] sm:$0xff] }
 0x8bf   : > { %15475 = vmatprep.mubr.f32.mxu1 %v22412_v10  ;;  %17071 = vmatpush3.bf16.msra.mxu1 %v17068_v63  ;;  %v13368_v10 = vld [vmem:[%s23894_s11 + $0x60] sm:$0xff] }
 0x8c0   : > { %17073 = vmatprep.subr.bf16.mxu1 %v17072_v31 }
 0x8c2   : > { %15476 = vmatmul.mubr.f32.gmra.mrb[26].mxu1 %v22415_v53  ;;  %v22781_v53 = vpack.c.bf16 %v13441_v45, %v13440_v27 }
 0x8c3   : > { %15478 = vmatprep.mubr.f32.mxu1 %v22424_v7  ;;  %17075 = vmatpush3.bf16.msra.mxu1 %v17072_v31  ;;  %v13369_v7 = vld [vmem:[%s23894_s11 + $0x68] sm:$0xff] }
 0x8c4   : > { %17109 = vmatprep.subr.bf16.mxu0 %v22781_v53 }
 0x8c5   : > { %17111 = vmatpush3.bf16.msra.mxu0 %v22781_v53 }
 0x8c6   : > { %15479 = vmatmul.mubr.f32.gmra.mrb[28].mxu1 %v22427_v51  ;;  %v17076_v51 = vpack.c.bf16 %v13369_v7, %v13368_v10 }
 0x8c7   : > { %15481 = vmatprep.mubr.f32.mxu1 %v22621_v59  ;;  %v13442_v59 = vld [vmem:[%s23894_s11 + $0xb0] sm:$0xff] }
 0x8c8   : > { %17077 = vmatprep.subr.bf16.mxu1 %v17076_v51  ;;  %v22797_v5 = vpack.c.bf16 %v13443_v9, %v13442_v59 }
 0x8c9   : > { %17079 = vmatpush3.bf16.msra.mxu1 %v17076_v51 }
 0x8ca   : > { %15482 = vmatmul.mubr.f32.gmra.mrb[30].mxu1 %v8492_v34  ;;  %17113 = vmatprep.subr.bf16.mxu0 %v22797_v5 }
 0x8cb   : > { %17081 = vmatprep.subr.bf16.mxu1 %v17080_v28  ;;  %17115 = vmatpush3.bf16.msra.mxu0 %v22797_v5 }
 0x8cc   : > { %15500 = vmatprep.mubr.msk.f32.mxu1 %vm441_vm0, %v8751_v62  ;;  %17117 = vmatprep.subr.bf16.mxu0 %v17116_v58 }
 0x8cd   : > { %17083 = vmatpush3.bf16.msra.mxu1 %v17080_v28 }
 0x8ce   : > { %15629 = vmatmul.mubr.msk.f32.vlgmr.msra.gmra.mrb[64].mxu0 %vm441_vm0, %v9435_v25  ;;  %17085 = vmatprep.subr.bf16.mxu1 %v17084_v55 }
 0x8cf   : > { %17119 = vmatpush3.bf16.msra.mxu0 %v17116_v58 }
 0x8d0   : > { %15501 = vmatmul.mubr.msk.f32.vlgmr.msra.gmra.mrb[32].mxu1 %vm441_vm0, %v8752_v17  ;;  %17121 = vmatprep.subr.bf16.mxu0 %v17120_v21 }
 0x8d1   : > { %17087 = vmatpush3.bf16.msra.mxu1 %v17084_v55 }
 0x8d2   : > { %17089 = vmatprep.subr.bf16.mxu1 %v17088_v36 }
 0x8d3   : > { %17123 = vmatpush3.bf16.msra.mxu0 %v17120_v21 }
 0x8d4   : > { %17125 = vmatprep.subr.bf16.mxu0 %v17124_v29 }
 0x8d5   : > { %17091 = vmatpush3.bf16.msra.mxu1 %v17088_v36 }
 0x8d6   : > { %17093 = vmatprep.subr.bf16.mxu1 %v17092_v56 }
 0x8d7   : > { %17127 = vmatpush3.bf16.msra.mxu0 %v17124_v29 }
 0x8d8   : > { %17129 = vmatprep.subr.bf16.mxu0 %v17128_v20 }
 0x8d9   : > { %17095 = vmatpush3.bf16.msra.mxu1 %v17092_v56 }
 0x8da   : > { %17097 = vmatprep.subr.bf16.mxu1 %v17096_v24 }
 0x8db   : > { %17131 = vmatpush3.bf16.msra.mxu0 %v17128_v20 }
 0x8dc   : > { %17133 = vmatprep.subr.bf16.mxu0 %v22838_v50 }
 0x8dd   : > { %17099 = vmatpush3.bf16.msra.mxu1 %v17096_v24 }
 0x8de   : > { %17212 = vmatprep.subr.bf16.mxu1 %v22559_v52 }
 0x991   : > { %v15474_v38 = vpop.f32.mrb[24].mxu1 }
 0x992   : > { %v8631_v15 = vadd.f32 %v15474_v38, %v13363_v6  ;;  %v8576_v41 = vpop.f32.mrb[25].mxu1 }
 0x993   : > { %v8630_v61 = vadd.f32 %v13363_v6, %v8576_v41  ;;  %v13519_v41 = vld [vmem:[%s23894_s11 + $0x118] sm:$0xff] }
 0x994   : > { %v8639_v1 = vmax.f32 %v8631_v15, 0.0 }
 0x995   : > { %v8638_v42 = vmax.f32 %v8630_v61, 0.0  ;;  %v15477_v33 = vpop.f32.mrb[26].mxu1 }
 0x996   : > { %8652 = vst [vmem:[#allocation8 + $0x49] ss:$2 sm:$0xff] %v8639_v1  ;;  %8654 = vst [vmem:[#allocation8 + $0x61] ss:$2 sm:$0xff] %v8639_v1  ;;  %v8633_v23 = vadd.f32 %v15477_v33, %v13363_v6  ;;  %v8586_v18 = vpop.f32.mrb[27].mxu1 }
 0x997   : > { %8684 = vst [vmem:[#allocation8 + $0x4a] ss:$2 sm:$0xff] %v8639_v1  ;;  %8686 = vst [vmem:[#allocation8 + $0x62] ss:$2 sm:$0xff] %v8639_v1  ;;  %v8632_v40 = vadd.f32 %v13363_v6, %v8586_v18 }
 0x998   : > { %8648 = vst [vmem:[#allocation8 + $0x19] ss:$2 sm:$0xff] %v8638_v42  ;;  %8650 = vst [vmem:[#allocation8 + $0x31] ss:$2 sm:$0xff] %v8638_v42  ;;  %v8641_v32 = vmax.f32 %v8633_v23, 0.0 }
 0x999   : > { %8680 = vst [vmem:[#allocation8 + $0x1a] ss:$2 sm:$0xff] %v8638_v42  ;;  %8682 = vst [vmem:[#allocation8 + $0x32] ss:$2 sm:$0xff] %v8638_v42  ;;  %v8640_v57 = vmax.f32 %v8632_v40, 0.0  ;;  %v15480_v4 = vpop.f32.mrb[28].mxu1 }
 0x99a   : > { %8660 = vst [vmem:[#allocation8 + $0xa9] ss:$2 sm:$0xff] %v8641_v32  ;;  %8662 = vst [vmem:[#allocation8 + $0xc1] ss:$2 sm:$0xff] %v8641_v32  ;;  %v8635_v63 = vadd.f32 %v15480_v4, %v13363_v6  ;;  %v8596_v44 = vpop.f32.mrb[29].mxu1  ;;  %v13520_v40 = vld [vmem:[%s23894_s11 + $0x120] sm:$0xff] }
 0x99b   : > { %8692 = vst [vmem:[#allocation8 + $0xaa] ss:$2 sm:$0xff] %v8641_v32  ;;  %8694 = vst [vmem:[#allocation8 + $0xc2] ss:$2 sm:$0xff] %v8641_v32  ;;  %v8634_v16 = vadd.f32 %v13363_v6, %v8596_v44  ;;  %v13521_v32 = vld [vmem:[%s23894_s11 + $0x128] sm:$0xff] }
 0x99c   : > { %8656 = vst [vmem:[#allocation8 + $0x79] ss:$2 sm:$0xff] %v8640_v57  ;;  %8658 = vst [vmem:[#allocation8 + $0x91] ss:$2 sm:$0xff] %v8640_v57  ;;  %v8643_v31 = vmax.f32 %v8635_v63, 0.0  ;;  %v17140_v44 = vpack.c.bf16 %v13521_v32, %v13520_v40 }
 0x99d   : > { %8688 = vst [vmem:[#allocation8 + $0x7a] ss:$2 sm:$0xff] %v8640_v57  ;;  %8690 = vst [vmem:[#allocation8 + $0x92] ss:$2 sm:$0xff] %v8640_v57  ;;  %v8642_v34 = vmax.f32 %v8634_v16, 0.0  ;;  %v15483_v27 = vpop.f32.mrb[30].mxu1 }
 0x99e   : > { %8668 = vst [vmem:[#allocation8 + $0x109] ss:$2 sm:$0xff] %v8643_v31  ;;  %8670 = vst [vmem:[#allocation8 + $0x121] ss:$2 sm:$0xff] %v8643_v31  ;;  %v8637_v45 = vadd.f32 %v15483_v27, %v13363_v6  ;;  %v8606_v10 = vpop.f32.mrb[31].mxu1  ;;  %v22901_v17 = vld [vmem:[#allocation8 + $0x49] sm:$0xff] }
 0x99f   : > { %8700 = vst [vmem:[#allocation8 + $0x10a] ss:$2 sm:$0xff] %v8643_v31  ;;  %8702 = vst [vmem:[#allocation8 + $0x122] ss:$2 sm:$0xff] %v8643_v31  ;;  %v8636_v9 = vadd.f32 %v13363_v6, %v8606_v10  ;;  %v22903_v25 = vld [vmem:[#allocation8 + $0x4a] sm:$0xff]  ;;  %v22911_v12 = vld [vmem:[#allocation8 + $0x52] sm:$0xff] }
 0x9a0   : > { %v22869_v7 = vld [vmem:[#allocation8 + $0x19] sm:$0xff]  ;;  %v22873_v59 = vld [vmem:[#allocation8 + $0x21] sm:$0xff]  ;;  %8664 = vst [vmem:[#allocation8 + $0xd9] ss:$2 sm:$0xff] %v8642_v34  ;;  %8666 = vst [vmem:[#allocation8 + $0xf1] ss:$2 sm:$0xff] %v8642_v34 }
 0x9a1   : > { %v22871_v51 = vld [vmem:[#allocation8 + $0x1a] sm:$0xff]  ;;  %8696 = vst [vmem:[#allocation8 + $0xda] ss:$2 sm:$0xff] %v8642_v34  ;;  %8698 = vst [vmem:[#allocation8 + $0xf2] ss:$2 sm:$0xff] %v8642_v34  ;;  %15503 = vmatprep.mubr.msk.f32.mxu1 %vm441_vm0, %v22869_v7  ;;  %v22879_v35 = vld [vmem:[#allocation8 + $0x22] sm:$0xff] }
 0x9a2   : > { %15631 = vmatprep.mubr.msk.f32.mxu0 %vm441_vm0, %v22871_v51  ;;  %v8645_v49 = vmax.f32 %v8637_v45, 0.0  ;;  %15504 = vmatmul.mubr.msk.f32.gmra.mrb[34].mxu1 %vm441_vm0, %v22873_v59  ;;  %v22885_v28 = vld [vmem:[#allocation8 + $0x31] sm:$0xff]  ;;  %v8644_v37 = vmax.f32 %v8636_v9, 0.0  ;;  %v22893_v0 = vld [vmem:[#allocation8 + $0x39] sm:$0xff]  ;;  %v22917_v19 = vld [vmem:[#allocation8 + $0x61] sm:$0xff] }
 0x9a3   : > { %15632 = vmatmul.mubr.msk.f32.gmra.mrb[66].mxu0 %vm441_vm0, %v22879_v35  ;;  %v22887_v62 = vld [vmem:[#allocation8 + $0x32] sm:$0xff]  ;;  %15506 = vmatprep.mubr.msk.f32.mxu1 %vm441_vm0, %v22885_v28  ;;  %v22895_v54 = vld [vmem:[#allocation8 + $0x3a] sm:$0xff]  ;;  %v22919_v21 = vld [vmem:[#allocation8 + $0x62] sm:$0xff] }
 0x9a4   : > { %15634 = vmatprep.mubr.msk.f32.mxu0 %vm441_vm0, %v22887_v62  ;;  %8676 = vst [vmem:[#allocation8 + $0x169] ss:$2 sm:$0xff] %v8645_v49  ;;  %8678 = vst [vmem:[#allocation8 + $0x181] ss:$2 sm:$0xff] %v8645_v49  ;;  %v22909_v58 = vld [vmem:[#allocation8 + $0x51] sm:$0xff]  ;;  %v22925_v14 = vld [vmem:[#allocation8 + $0x69] sm:$0xff] }
 0x9a5   : > { %8708 = vst [vmem:[#allocation8 + $0x16a] ss:$2 sm:$0xff] %v8645_v49  ;;  %8710 = vst [vmem:[#allocation8 + $0x182] ss:$2 sm:$0xff] %v8645_v49  ;;  %v22927_v39 = vld [vmem:[#allocation8 + $0x6a] sm:$0xff]  ;;  %v22933_v29 = vld [vmem:[#allocation8 + $0x79] sm:$0xff] }
 0x9a6   : > { %8672 = vst [vmem:[#allocation8 + $0x139] ss:$2 sm:$0xff] %v8644_v37  ;;  %8674 = vst [vmem:[#allocation8 + $0x151] ss:$2 sm:$0xff] %v8644_v37  ;;  %15507 = vmatmul.mubr.msk.f32.gmra.mrb[36].mxu1 %vm441_vm0, %v22893_v0  ;;  %v22935_v8 = vld [vmem:[#allocation8 + $0x7a] sm:$0xff]  ;;  %v22943_v20 = vld [vmem:[#allocation8 + $0x82] sm:$0xff] }
 0x9a7   : > { %8704 = vst [vmem:[#allocation8 + $0x13a] ss:$2 sm:$0xff] %v8644_v37  ;;  %8706 = vst [vmem:[#allocation8 + $0x152] ss:$2 sm:$0xff] %v8644_v37  ;;  %15635 = vmatmul.mubr.msk.f32.gmra.mrb[68].mxu0 %vm441_vm0, %v22895_v54  ;;  %15509 = vmatprep.mubr.msk.f32.mxu1 %vm441_vm0, %v22901_v17  ;;  %v22941_v43 = vld [vmem:[#allocation8 + $0x81] sm:$0xff]  ;;  %v22949_v60 = vld [vmem:[#allocation8 + $0x91] sm:$0xff] }
 0x9a8   : > { %15637 = vmatprep.mubr.msk.f32.mxu0 %vm441_vm0, %v22903_v25  ;;  %v22951_v30 = vld [vmem:[#allocation8 + $0x92] sm:$0xff]  ;;  %v22959_v13 = vld [vmem:[#allocation8 + $0x9a] sm:$0xff]  ;;  %v22965_v55 = vld [vmem:[#allocation8 + $0xa9] sm:$0xff] }
 0x9a9   : > { %v22957_v48 = vld [vmem:[#allocation8 + $0x99] sm:$0xff]  ;;  %24193 = vst [vmem:[#allocation14_spill] sm:$0xff] %v22959_v13  ;;  %v22967_v2 = vld [vmem:[#allocation8 + $0xaa] sm:$0xff]  ;;  %v22981_v11 = vld [vmem:[#allocation8 + $0xc1] sm:$0xff] }
 0x9aa   : > { %15510 = vmatmul.mubr.msk.f32.gmra.mrb[38].mxu1 %vm441_vm0, %v22909_v58  ;;  %24194 = vst [vmem:[#allocation33_spill] sm:$0xff] %v22967_v2  ;;  %v22973_v26 = vld [vmem:[#allocation8 + $0xb1] sm:$0xff]  ;;  %v22983_v3 = vld [vmem:[#allocation8 + $0xc2] sm:$0xff]  ;;  %v22997_v46 = vld [vmem:[#allocation8 + $0xd9] sm:$0xff] }
 0x9ab   : > { %15638 = vmatmul.mubr.msk.f32.gmra.mrb[70].mxu0 %vm441_vm0, %v22911_v12  ;;  %15512 = vmatprep.mubr.msk.f32.mxu1 %vm441_vm0, %v22917_v19  ;;  %v22975_v36 = vld [vmem:[#allocation8 + $0xb2] sm:$0xff]  ;;  %24196 = vst [vmem:[#allocation19_spill] sm:$0xff] %v22983_v3  ;;  %v22989_v56 = vld [vmem:[#allocation8 + $0xc9] sm:$0xff]  ;;  %v22999_v24 = vld [vmem:[#allocation8 + $0xda] sm:$0xff] }
 0x9ac   : > { %15640 = vmatprep.mubr.msk.f32.mxu0 %vm441_vm0, %v22919_v21  ;;  %24195 = vst [vmem:[#allocation34_spill] sm:$0xff] %v22975_v36  ;;  %v22991_v47 = vld [vmem:[#allocation8 + $0xca] sm:$0xff]  ;;  %24198 = vst [vmem:[#allocation15_spill] sm:$0xff] %v22999_v24  ;;  %v23008_v38 = vld [vmem:[#allocation8 + $0xe1] sm:$0xff] }
 0x9ad   : > { %24197 = vst [vmem:[#allocation20_spill] sm:$0xff] %v22991_v47  ;;  %v13518_v6 = vld [vmem:[%s23894_s11 + $0x110] sm:$0xff]  ;;  %v23010_v15 = vld [vmem:[#allocation8 + $0xe2] sm:$0xff]  ;;  %v23021_v1 = vld [vmem:[#allocation8 + $0x18] sm:$0xff] }
 0x9ae   : > { %15513 = vmatmul.mubr.msk.f32.gmra.mrb[40].mxu1 %vm441_vm0, %v22925_v14  ;;  %24199 = vst [vmem:[#allocation16_spill] sm:$0xff] %v23010_v15  ;;  %v23019_v61 = vld [vmem:[#allocation8 + $0xf1] sm:$0xff]  ;;  %v17136_v42 = vpack.c.bf16 %v13519_v41, %v13518_v6  ;;  %v23027_v33 = vld [vmem:[#allocation8 + $0xf9] sm:$0xff]  ;;  %v23035_v18 = vld [vmem:[#allocation8 + $0x109] sm:$0xff] }
 0x9af   : > { %15641 = vmatmul.mubr.msk.f32.gmra.mrb[72].mxu0 %vm441_vm0, %v22927_v39  ;;  %15515 = vmatprep.mubr.msk.f32.mxu1 %vm441_vm0, %v22933_v29  ;;  %v23029_v23 = vld [vmem:[#allocation8 + $0x20] sm:$0xff]  ;;  %v23046_v57 = vld [vmem:[#allocation8 + $0x30] sm:$0xff]  ;;  %v23052_v63 = vld [vmem:[#allocation8 + $0x38] sm:$0xff] }
 0x9b0   : > { %15643 = vmatprep.mubr.msk.f32.mxu0 %vm441_vm0, %v22935_v8  ;;  %v23050_v4 = vld [vmem:[#allocation8 + $0x111] sm:$0xff]  ;;  %v23063_v31 = vld [vmem:[#allocation8 + $0x48] sm:$0xff]  ;;  %v13556_v9 = vld [vmem:[%s23894_s11 + $0x140] sm:$0xff] }
 0x9b1   : > { %v13522_v16 = vld [vmem:[%s23894_s11 + $0x130] sm:$0xff]  ;;  %v13523_v34 = vld [vmem:[%s23894_s11 + $0x138] sm:$0xff]  ;;  %v23085_v37 = vld [vmem:[#allocation8 + $0x60] sm:$0xff] }
 0x9b2   : > { %15516 = vmatmul.mubr.msk.f32.gmra.mrb[42].mxu1 %vm441_vm0, %v22941_v43  ;;  %v23072_v27 = vld [vmem:[#allocation8 + $0x129] sm:$0xff]  ;;  %v17144_v10 = vpack.c.bf16 %v13523_v34, %v13522_v16  ;;  %v23083_v49 = vld [vmem:[#allocation8 + $0x139] sm:$0xff]  ;;  %24200 = vst [vmem:[#allocation35_spill] sm:$0xff] %v23085_v37  ;;  %v23094_v41 = vld [vmem:[#allocation8 + $0x141] sm:$0xff] }
 0x9b3   : > { %15644 = vmatmul.mubr.msk.f32.gmra.mrb[74].mxu0 %vm441_vm0, %v22943_v20  ;;  %15518 = vmatprep.mubr.msk.f32.mxu1 %vm441_vm0, %v22949_v60  ;;  %v23074_v45 = vld [vmem:[#allocation8 + $0x50] sm:$0xff]  ;;  %v13557_v6 = vld [vmem:[%s23894_s11 + $0x148] sm:$0xff]  ;;  %v23106_v16 = vld [vmem:[#allocation8 + $0x78] sm:$0xff] }
 0x9b4   : > { %15646 = vmatprep.mubr.msk.f32.mxu0 %vm441_vm0, %v22951_v30  ;;  %v23098_v40 = vpack.c.bf16 %v13557_v6, %v13556_v9  ;;  %v23104_v32 = vld [vmem:[#allocation8 + $0x151] sm:$0xff]  ;;  %24202 = vst [vmem:[#allocation53_spill] sm:$0xff] %v23106_v16  ;;  %v23114_v34 = vld [vmem:[#allocation8 + $0x80] sm:$0xff]  ;;  %v23121_v9 = vld [vmem:[#allocation8 + $0x169] sm:$0xff] }
 0x9b5   : > { %24203 = vst [vmem:[#allocation70_spill] sm:$0xff] %v23114_v34  ;;  %v23123_v6 = vld [vmem:[#allocation8 + $0x90] sm:$0xff] }
 0x9b6   : > { %15519 = vmatmul.mubr.msk.f32.gmra.mrb[44].mxu1 %vm441_vm0, %v22957_v48  ;;  %24204 = vst [vmem:[#allocation21_spill] sm:$0xff] %v23123_v6 }
 0x9b7   : > { %15647 = vmatmul.mubr.msk.f32.gmra.mrb[76].mxu0 %vm441_vm0, %v22959_v13  ;;  %15521 = vmatprep.mubr.msk.f32.mxu1 %vm441_vm0, %v22965_v55  ;;  %v23154_v13 = vld [vmem:[#allocation8 + $0xc8] sm:$0xff] }
 0x9b8   : > { %15649 = vmatprep.mubr.msk.f32.mxu0 %vm441_vm0, %v22967_v2  ;;  %v23147_v2 = vld [vmem:[#allocation8 + $0xc0] sm:$0xff]  ;;  %24209 = vst [vmem:[#allocation27_spill] sm:$0xff] %v23154_v13 }
 0x9b9   : > { %24208 = vst [vmem:[#allocation26_spill] sm:$0xff] %v23147_v2 }
 0x9ba   : > { %15522 = vmatmul.mubr.msk.f32.gmra.mrb[46].mxu1 %vm441_vm0, %v22973_v26 }
 0x9bb   : > { %15650 = vmatmul.mubr.msk.f32.gmra.mrb[78].mxu0 %vm441_vm0, %v22975_v36  ;;  %15524 = vmatprep.mubr.msk.f32.mxu1 %vm441_vm0, %v22981_v11  ;;  %v23142_v36 = vld [vmem:[#allocation8 + $0xb0] sm:$0xff] }
 0x9bc   : > { %15652 = vmatprep.mubr.msk.f32.mxu0 %vm441_vm0, %v22983_v3  ;;  %v8712_v3 = vld [vmem:[#allocation8 + $0x8] sm:$0xff]  ;;  %24207 = vst [vmem:[#allocation23_spill] sm:$0xff] %v23142_v36 }
 0x9be   : > { %15525 = vmatmul.mubr.msk.f32.gmra.mrb[48].mxu1 %vm441_vm0, %v22989_v56 }
 0x9bf   : > { %15653 = vmatmul.mubr.msk.f32.gmra.mrb[80].mxu0 %vm441_vm0, %v22991_v47  ;;  %15527 = vmatprep.mubr.msk.f32.mxu1 %vm441_vm0, %v22997_v46  ;;  %v23137_v47 = vld [vmem:[#allocation8 + $0xa8] sm:$0xff] }
 0x9c0   : > { %15655 = vmatprep.mubr.msk.f32.mxu0 %vm441_vm0, %v22999_v24  ;;  %v23131_v24 = vld [vmem:[#allocation8 + $0x98] sm:$0xff]  ;;  %24206 = vst [vmem:[#allocation22_spill] sm:$0xff] %v23137_v47 }
 0x9c1   : > { %24205 = vst [vmem:[#allocation25_spill] sm:$0xff] %v23131_v24 }
 0x9c2   : > { %15528 = vmatmul.mubr.msk.f32.gmra.mrb[50].mxu1 %vm441_vm0, %v23008_v38 }
 0x9c3   : > { %15656 = vmatmul.mubr.msk.f32.gmra.mrb[82].mxu0 %vm441_vm0, %v23010_v15  ;;  %15530 = vmatprep.mubr.msk.f32.mxu1 %vm441_vm0, %v23019_v61  ;;  %v23129_v15 = vld [vmem:[#allocation8 + $0x171] sm:$0xff] }
 0x9c4   : > { %15692 = vmatprep.mubr.msk.f32.mxu0 %vm441_vm0, %v23021_v1 }
 0x9c6   : > { %15531 = vmatmul.mubr.msk.f32.gmra.mrb[52].mxu1 %vm441_vm0, %v23027_v33 }
 0x9c7   : > { %15693 = vmatmul.mubr.msk.f32.vlgmr.msra.gmra.mrb[64].mxu0 %vm441_vm0, %v23029_v23  ;;  %15533 = vmatprep.mubr.msk.f32.mxu1 %vm441_vm0, %v23035_v18 }
 0x9c8   : > { %17135 = vmatpush3.bf16.msra.mxu0 %v22838_v50  ;;  %15695 = vmatprep.mubr.msk.f32.mxu0 %vm441_vm0, %v23046_v57  ;;  %v23061_v50 = vld [vmem:[#allocation8 + $0x121] sm:$0xff] }
 0x9c9   : > { %17137 = vmatprep.subr.bf16.mxu0 %v17136_v42 }
 0x9ca   : > { %15534 = vmatmul.mubr.msk.f32.gmra.mrb[54].mxu1 %vm441_vm0, %v23050_v4 }
 0x9cb   : > { %15696 = vmatmul.mubr.msk.f32.gmra.mrb[66].mxu0 %vm441_vm0, %v23052_v63  ;;  %15536 = vmatprep.mubr.msk.f32.mxu1 %vm441_vm0, %v23061_v50 }
 0x9cc   : > { %15698 = vmatprep.mubr.msk.f32.mxu0 %vm441_vm0, %v23063_v31  ;;  %17139 = vmatpush3.bf16.msra.mxu0 %v17136_v42  ;;  %v23096_v42 = vld [vmem:[#allocation8 + $0x68] sm:$0xff] }
 0x9cd   : > { %17141 = vmatprep.subr.bf16.mxu0 %v17140_v44  ;;  %24201 = vst [vmem:[#allocation36_spill] sm:$0xff] %v23096_v42 }
 0x9ce   : > { %15537 = vmatmul.mubr.msk.f32.gmra.mrb[56].mxu1 %vm441_vm0, %v23072_v27 }
 0x9cf   : > { %15699 = vmatmul.mubr.msk.f32.gmra.mrb[68].mxu0 %vm441_vm0, %v23074_v45  ;;  %15539 = vmatprep.mubr.msk.f32.mxu1 %vm441_vm0, %v23083_v49 }
 0x9d0   : > { %15701 = vmatprep.mubr.msk.f32.mxu0 %vm441_vm0, %v23085_v37  ;;  %17143 = vmatpush3.bf16.msra.mxu0 %v17140_v44  ;;  %v23112_v44 = vld [vmem:[#allocation8 + $0x159] sm:$0xff] }
 0x9d1   : > { %17145 = vmatprep.subr.bf16.mxu0 %v17144_v10 }
 0x9d2   : > { %15540 = vmatmul.mubr.msk.f32.gmra.mrb[58].mxu1 %vm441_vm0, %v23094_v41 }
 0x9d3   : > { %15702 = vmatmul.mubr.msk.f32.gmra.mrb[70].mxu0 %vm441_vm0, %v23096_v42  ;;  %15542 = vmatprep.mubr.msk.f32.mxu1 %vm441_vm0, %v23104_v32 }
 0x9d4   : > { %15704 = vmatprep.mubr.msk.f32.mxu0 %vm441_vm0, %v23106_v16  ;;  %17147 = vmatpush3.bf16.msra.mxu0 %v17144_v10  ;;  %v8711_v10 = vld [vmem:[#allocation8] sm:$0xff] }
 0x9d5   : > { %17149 = vmatprep.subr.bf16.mxu0 %v23098_v40 }
 0x9d6   : > { %15543 = vmatmul.mubr.msk.f32.gmra.mrb[60].mxu1 %vm441_vm0, %v23112_v44 }
 0x9d7   : > { %15705 = vmatmul.mubr.msk.f32.gmra.mrb[72].mxu0 %vm441_vm0, %v23114_v34  ;;  %15545 = vmatprep.mubr.msk.f32.mxu1 %vm441_vm0, %v23121_v9 }
 0x9d8   : > { %15707 = vmatprep.mubr.msk.f32.mxu0 %vm441_vm0, %v23123_v6 }
 0x9da   : > { %15546 = vmatmul.mubr.msk.f32.gmra.mrb[62].mxu1 %vm441_vm0, %v23129_v15 }
 0x9db   : > { %15708 = vmatmul.mubr.msk.f32.gmra.mrb[74].mxu0 %vm441_vm0, %v23131_v24  ;;  %15564 = vmatprep.mubr.msk.f32.mxu1 %vm441_vm0, %v8711_v10  ;;  %v23202_v10 = vld [vmem:[#allocation8 + $0x120] sm:$0xff] }
 0x9dc   : > { %15710 = vmatprep.mubr.msk.f32.mxu0 %vm441_vm0, %v23137_v47 }
 0x9de   : > { %15565 = vmatmul.mubr.msk.f32.vlgmr.msra.gmra.mrb[32].mxu1 %vm441_vm0, %v8712_v3  ;;  %v23161_v3 = vld [vmem:[#allocation8 + $0xd8] sm:$0xff] }
 0x9df   : > { %15711 = vmatmul.mubr.msk.f32.gmra.mrb[76].mxu0 %vm441_vm0, %v23142_v36  ;;  %15567 = vmatprep.mubr.msk.f32.mxu1 %vm441_vm0, %v23021_v1  ;;  %v23175_v1 = vld [vmem:[#allocation8 + $0xf0] sm:$0xff] }
 0x9e0   : > { %15713 = vmatprep.mubr.msk.f32.mxu0 %vm441_vm0, %v23147_v2  ;;  %17216 = vmatpush3.bf16.msra.mxu1 %v22559_v52  ;;  %v23168_v52 = vld [vmem:[#allocation8 + $0xe0] sm:$0xff] }
 0x9e1   : > { %17213 = vmatprep.subr.bf16.mxu1 %v22567_v22  ;;  %24210 = vst [vmem:[#allocation28_spill] sm:$0xff] %v23168_v52 }
 0x9e2   : > { %15568 = vmatmul.mubr.msk.f32.gmra.mrb[34].mxu1 %vm441_vm0, %v23029_v23  ;;  %v23189_v23 = vld [vmem:[#allocation8 + $0x108] sm:$0xff] }
 0x9e3   : > { %15714 = vmatmul.mubr.msk.f32.gmra.mrb[78].mxu0 %vm441_vm0, %v23154_v13  ;;  %15570 = vmatprep.mubr.msk.f32.mxu1 %vm441_vm0, %v23046_v57 }
 0x9e4   : > { %15716 = vmatprep.mubr.msk.f32.mxu0 %vm441_vm0, %v23161_v3  ;;  %17217 = vmatpush3.bf16.msra.mxu1 %v22567_v22  ;;  %v23182_v22 = vld [vmem:[#allocation8 + $0xf8] sm:$0xff] }
 0x9e5   : > { %17214 = vmatprep.subr.bf16.mxu1 %v22781_v53 }
 0x9e6   : > { %15571 = vmatmul.mubr.msk.f32.gmra.mrb[36].mxu1 %vm441_vm0, %v23052_v63 }
 0x9e7   : > { %15717 = vmatmul.mubr.msk.f32.gmra.mrb[80].mxu0 %vm441_vm0, %v23168_v52  ;;  %15573 = vmatprep.mubr.msk.f32.mxu1 %vm441_vm0, %v23063_v31 }
 0x9e8   : > { %15719 = vmatprep.mubr.msk.f32.mxu0 %vm441_vm0, %v23175_v1  ;;  %17218 = vmatpush3.bf16.msra.mxu1 %v22781_v53  ;;  %v23196_v53 = vld [vmem:[#allocation8 + $0x110] sm:$0xff] }
 0x9e9   : > { %17215 = vmatprep.subr.bf16.mxu1 %v22797_v5 }
 0x9ea   : > { %15574 = vmatmul.mubr.msk.f32.gmra.mrb[38].mxu1 %vm441_vm0, %v23074_v45 }
 0x9eb   : > { %15720 = vmatmul.mubr.msk.f32.gmra.mrb[82].mxu0 %vm441_vm0, %v23182_v22  ;;  %15576 = vmatprep.mubr.msk.f32.mxu1 %vm441_vm0, %v23085_v37  ;;  %v23208_v37 = vld [vmem:[#allocation8 + $0x128] sm:$0xff] }
 0x9ec   : > { %15722 = vmatprep.mubr.msk.f32.mxu0 %vm441_vm0, %v23189_v23  ;;  %17219 = vmatpush3.bf16.msra.mxu1 %v22797_v5  ;;  %v23214_v5 = vld [vmem:[#allocation8 + $0x138] sm:$0xff] }
 0x9ee   : > { %15577 = vmatmul.mubr.msk.f32.gmra.mrb[40].mxu1 %vm441_vm0, %v23096_v42  ;;  %v13558_v42 = vld [vmem:[%s23894_s11 + $0x150] sm:$0xff] }
 0x9ef   : > { %15723 = vmatmul.mubr.msk.f32.gmra.mrb[84].mxu0 %vm441_vm0, %v23196_v53  ;;  %15579 = vmatprep.mubr.msk.f32.mxu1 %vm441_vm0, %v23106_v16  ;;  %v23220_v16 = vld [vmem:[#allocation8 + $0x140] sm:$0xff] }
 0x9f0   : > { %15725 = vmatprep.mubr.msk.f32.mxu0 %vm441_vm0, %v23202_v10 }
 0x9f2   : > { %15580 = vmatmul.mubr.msk.f32.gmra.mrb[42].mxu1 %vm441_vm0, %v23114_v34  ;;  %v23226_v34 = vld [vmem:[#allocation8 + $0x150] sm:$0xff] }
 0x9f3   : > { %15726 = vmatmul.mubr.msk.f32.gmra.mrb[86].mxu0 %vm441_vm0, %v23208_v37  ;;  %15582 = vmatprep.mubr.msk.f32.mxu1 %vm441_vm0, %v23123_v6  ;;  %v23232_v6 = vld [vmem:[#allocation8 + $0x158] sm:$0xff] }
 0x9f4   : > { %15728 = vmatprep.mubr.msk.f32.mxu0 %vm441_vm0, %v23214_v5 }
 0x9f6   : > { %15583 = vmatmul.mubr.msk.f32.gmra.mrb[44].mxu1 %vm441_vm0, %v23131_v24  ;;  %v23238_v24 = vld [vmem:[#allocation8 + $0x168] sm:$0xff] }
 0x9f7   : > { %15729 = vmatmul.mubr.msk.f32.gmra.mrb[88].mxu0 %vm441_vm0, %v23220_v16  ;;  %15585 = vmatprep.mubr.msk.f32.mxu1 %vm441_vm0, %v23137_v47  ;;  %v23244_v47 = vld [vmem:[#allocation8 + $0x170] sm:$0xff] }
 0x9f8   : > { %15731 = vmatprep.mubr.msk.f32.mxu0 %vm441_vm0, %v23226_v34 }
 0x9fa   : > { %15586 = vmatmul.mubr.msk.f32.gmra.mrb[46].mxu1 %vm441_vm0, %v23142_v36  ;;  %v23250_v36 = vld [vmem:[#allocation8 + $0x180] sm:$0xff] }
 0x9fb   : > { %15732 = vmatmul.mubr.msk.f32.gmra.mrb[90].mxu0 %vm441_vm0, %v23232_v6  ;;  %15588 = vmatprep.mubr.msk.f32.mxu1 %vm441_vm0, %v23147_v2  ;;  %24211 = vst [vmem:[#allocation37_spill] sm:$0xff] %v23250_v36  ;;  %v23256_v2 = vld [vmem:[#allocation8 + $0x188] sm:$0xff] }
 0x9fc   : > { %15734 = vmatprep.mubr.msk.f32.mxu0 %vm441_vm0, %v23238_v24  ;;  %24212 = vst [vmem:[#allocation24_spill] sm:$0xff] %v23256_v2 }
 0x9fe   : > { %15589 = vmatmul.mubr.msk.f32.gmra.mrb[48].mxu1 %vm441_vm0, %v23154_v13  ;;  %v13559_v13 = vld [vmem:[%s23894_s11 + $0x158] sm:$0xff] }
 0x9ff   : > { %15735 = vmatmul.mubr.msk.f32.gmra.mrb[92].mxu0 %vm441_vm0, %v23244_v47  ;;  %15591 = vmatprep.mubr.msk.f32.mxu1 %vm441_vm0, %v23161_v3 }
 0xa00   : > { %15737 = vmatprep.mubr.msk.f32.mxu0 %vm441_vm0, %v23250_v36  ;;  %v17152_v36 = vpack.c.bf16 %v13559_v13, %v13558_v42  ;;  %v13563_v13 = vld [vmem:[%s23894_s11 + $0x178] sm:$0xff]  ;;  %v24218_v42 = vld [vmem:[#allocation15_spill] sm:$0xff] }
 0xa02   : > { %15592 = vmatmul.mubr.msk.f32.gmra.mrb[50].mxu1 %vm441_vm0, %v23168_v52  ;;  %v13560_v52 = vld [vmem:[%s23894_s11 + $0x160] sm:$0xff] }
 0xa03   : > { %15738 = vmatmul.mubr.msk.f32.gmra.mrb[94].mxu0 %vm441_vm0, %v23256_v2  ;;  %15594 = vmatprep.mubr.msk.f32.mxu1 %vm441_vm0, %v23175_v1  ;;  %v13561_v2 = vld [vmem:[%s23894_s11 + $0x168] sm:$0xff] }
 0xa04   : > { %15756 = vmatprep.mubr.msk.f32.mxu0 %vm441_vm0, %v22869_v7  ;;  %v17156_v7 = vpack.c.bf16 %v13561_v2, %v13560_v52  ;;  %v13597_v2 = vld [vmem:[%s23894_s11 + $0x188] sm:$0xff] }
 0xa06   : > { %15595 = vmatmul.mubr.msk.f32.gmra.mrb[52].mxu1 %vm441_vm0, %v23182_v22 }
 0xa07   : > { %15757 = vmatmul.mubr.msk.f32.vlgmr.msra.gmra.mrb[64].mxu0 %vm441_vm0, %v22873_v59  ;;  %15597 = vmatprep.mubr.msk.f32.mxu1 %vm441_vm0, %v23189_v23  ;;  %v13562_v59 = vld [vmem:[%s23894_s11 + $0x170] sm:$0xff] }
 0xa08   : > { %17151 = vmatpush3.bf16.msra.mxu0 %v23098_v40  ;;  %15759 = vmatprep.mubr.msk.f32.mxu0 %vm441_vm0, %v22885_v28  ;;  %v17160_v28 = vpack.c.bf16 %v13563_v13, %v13562_v59  ;;  %v23519_v40 = vld [vmem:[#allocation8 + $0x18a] sm:$0xff] }
 0xa09   : > { %17153 = vmatprep.subr.bf16.mxu0 %v17152_v36  ;;  %v13641_v59 = vld [vmem:[%s23894_s11 + $0x1e8] sm:$0xff] }
 0xa0a   : > { %15598 = vmatmul.mubr.msk.f32.gmra.mrb[54].mxu1 %vm441_vm0, %v23196_v53 }
 0xa0b   : > { %15760 = vmatmul.mubr.msk.f32.gmra.mrb[66].mxu0 %vm441_vm0, %v22893_v0  ;;  %15600 = vmatprep.mubr.msk.f32.mxu1 %vm441_vm0, %v23202_v10  ;;  %v13596_v0 = vld [vmem:[%s23894_s11 + $0x180] sm:$0xff] }
 0xa0c   : > { %15762 = vmatprep.mubr.msk.f32.mxu0 %vm441_vm0, %v22901_v17  ;;  %17155 = vmatpush3.bf16.msra.mxu0 %v17152_v36  ;;  %v23315_v17 = vpack.c.bf16 %v13597_v2, %v13596_v0  ;;  %v23392_v36 = vld [vmem:[#allocation8 + $0x15a] sm:$0xff]  ;;  %v13677_v2 = vld [vmem:[%s23894_s11 + $0x208] sm:$0xff] }
 0xa0d   : > { %17157 = vmatprep.subr.bf16.mxu0 %v17156_v7  ;;  %v24220_v0 = vld [vmem:[#allocation35_spill] sm:$0xff] }
 0xa0e   : > { %15601 = vmatmul.mubr.msk.f32.gmra.mrb[56].mxu1 %vm441_vm0, %v23208_v37 }
 0xa0f   : > { %15763 = vmatmul.mubr.msk.f32.gmra.mrb[68].mxu0 %vm441_vm0, %v22909_v58  ;;  %15603 = vmatprep.mubr.msk.f32.mxu1 %vm441_vm0, %v23214_v5  ;;  %v23338_v58 = vld [vmem:[#allocation8 + $0xf2] sm:$0xff] }
 0xa10   : > { %15765 = vmatprep.mubr.msk.f32.mxu0 %vm441_vm0, %v22917_v19  ;;  %17159 = vmatpush3.bf16.msra.mxu0 %v17156_v7  ;;  %v23344_v19 = vld [vmem:[#allocation8 + $0xfa] sm:$0xff] }
 0xa11   : > { %17161 = vmatprep.subr.bf16.mxu0 %v17160_v28  ;;  %v13640_v7 = vld [vmem:[%s23894_s11 + $0x1e0] sm:$0xff] }
 0xa12   : > { %15604 = vmatmul.mubr.msk.f32.gmra.mrb[58].mxu1 %vm441_vm0, %v23220_v16  ;;  %v17188_v13 = vpack.c.bf16 %v13641_v59, %v13640_v7  ;;  %v11408_v7 = vld [vmem:[#allocation8 + $0x51] sm:$0xff] }
 0xa13   : > { %15766 = vmatmul.mubr.msk.f32.gmra.mrb[70].mxu0 %vm441_vm0, %v22925_v14  ;;  %15606 = vmatprep.mubr.msk.f32.mxu1 %vm441_vm0, %v23226_v34  ;;  %v23350_v14 = vld [vmem:[#allocation8 + $0x10a] sm:$0xff] }
 0xa14   : > { %15768 = vmatprep.mubr.msk.f32.mxu0 %vm441_vm0, %v22933_v29  ;;  %17163 = vmatpush3.bf16.msra.mxu0 %v17160_v28  ;;  %v23356_v29 = vld [vmem:[#allocation8 + $0x112] sm:$0xff] }
 0xa15   : > { %17165 = vmatprep.subr.bf16.mxu0 %v23315_v17  ;;  %v13643_v28 = vld [vmem:[%s23894_s11 + $0x1f8] sm:$0xff]  ;;  %v13682_v59 = vld [vmem:[%s23894_s11 + $0x230] sm:$0xff] }
 0xa16   : > { %15607 = vmatmul.mubr.msk.f32.gmra.mrb[60].mxu1 %vm441_vm0, %v23232_v6 }
 0xa17   : > { %15769 = vmatmul.mubr.msk.f32.gmra.mrb[72].mxu0 %vm441_vm0, %v22941_v43  ;;  %15609 = vmatprep.mubr.msk.f32.mxu1 %vm441_vm0, %v23238_v24  ;;  %v23362_v43 = vld [vmem:[#allocation8 + $0x122] sm:$0xff] }
 0xa18   : > { %15771 = vmatprep.mubr.msk.f32.mxu0 %vm441_vm0, %v22949_v60  ;;  %v23368_v60 = vld [vmem:[#allocation8 + $0x12a] sm:$0xff] }
 0xa1a   : > { %15610 = vmatmul.mubr.msk.f32.gmra.mrb[62].mxu1 %vm441_vm0, %v23244_v47 }
 0xa1b   : > { %15772 = vmatmul.mubr.msk.f32.gmra.mrb[74].mxu0 %vm441_vm0, %v22957_v48  ;;  %15658 = vmatprep.mubr.msk.f32.mxu1 %vm441_vm0, %v23338_v58  ;;  %v23374_v48 = vld [vmem:[#allocation8 + $0x13a] sm:$0xff] }
 0xa1c   : > { %15774 = vmatprep.mubr.msk.f32.mxu0 %vm441_vm0, %v22965_v55  ;;  %v23380_v55 = vld [vmem:[#allocation8 + $0x142] sm:$0xff] }
 0xa1e   : > { %15659 = vmatmul.mubr.msk.f32.vlgmr.msra.gmra.mrb[52].mxu1 %vm441_vm0, %v23344_v19 }
 0xa1f   : > { %15775 = vmatmul.mubr.msk.f32.gmra.mrb[76].mxu0 %vm441_vm0, %v22973_v26  ;;  %15661 = vmatprep.mubr.msk.f32.mxu1 %vm441_vm0, %v23350_v14  ;;  %v23386_v26 = vld [vmem:[#allocation8 + $0x152] sm:$0xff] }
 0xa20   : > { %15777 = vmatprep.mubr.msk.f32.mxu0 %vm441_vm0, %v22981_v11  ;;  %v23398_v11 = vld [vmem:[#allocation8 + $0x16a] sm:$0xff] }
 0xa22   : > { %15662 = vmatmul.mubr.msk.f32.gmra.mrb[54].mxu1 %vm441_vm0, %v23356_v29 }
 0xa23   : > { %15778 = vmatmul.mubr.msk.f32.gmra.mrb[78].mxu0 %vm441_vm0, %v22989_v56  ;;  %15664 = vmatprep.mubr.msk.f32.mxu1 %vm441_vm0, %v23362_v43  ;;  %v23404_v56 = vld [vmem:[#allocation8 + $0x172] sm:$0xff] }
 0xa24   : > { %15780 = vmatprep.mubr.msk.f32.mxu0 %vm441_vm0, %v22997_v46  ;;  %v23422_v46 = vld [vmem:[#allocation8 + $0x181] sm:$0xff] }
 0xa26   : > { %15665 = vmatmul.mubr.msk.f32.gmra.mrb[56].mxu1 %vm441_vm0, %v23368_v60 }
 0xa27   : > { %15781 = vmatmul.mubr.msk.f32.gmra.mrb[80].mxu0 %vm441_vm0, %v23008_v38  ;;  %15667 = vmatprep.mubr.msk.f32.mxu1 %vm441_vm0, %v23374_v48  ;;  %v23426_v38 = vld [vmem:[#allocation8 + $0x189] sm:$0xff] }
 0xa28   : > { %15783 = vmatprep.mubr.msk.f32.mxu0 %vm441_vm0, %v23019_v61  ;;  %v13598_v61 = vld [vmem:[%s23894_s11 + $0x190] sm:$0xff] }
 0xa2a   : > { %15668 = vmatmul.mubr.msk.f32.gmra.mrb[58].mxu1 %vm441_vm0, %v23380_v55 }
 0xa2b   : > { %15784 = vmatmul.mubr.msk.f32.gmra.mrb[82].mxu0 %vm441_vm0, %v23027_v33  ;;  %15670 = vmatprep.mubr.msk.f32.mxu1 %vm441_vm0, %v23386_v26  ;;  %v13599_v33 = vld [vmem:[%s23894_s11 + $0x198] sm:$0xff] }
 0xa2c   : > { %15786 = vmatprep.mubr.msk.f32.mxu0 %vm441_vm0, %v23035_v18  ;;  %v17168_v18 = vpack.c.bf16 %v13599_v33, %v13598_v61  ;;  %v24222_v61 = vld [vmem:[#allocation53_spill] sm:$0xff]  ;;  %v24223_v33 = vld [vmem:[#allocation70_spill] sm:$0xff] }
 0xa2e   : > { %15671 = vmatmul.mubr.msk.f32.gmra.mrb[60].mxu1 %vm441_vm0, %v23392_v36 }
 0xa2f   : > { %15787 = vmatmul.mubr.msk.f32.gmra.mrb[84].mxu0 %vm441_vm0, %v23050_v4  ;;  %15673 = vmatprep.mubr.msk.f32.mxu1 %vm441_vm0, %v23398_v11  ;;  %v13600_v4 = vld [vmem:[%s23894_s11 + $0x1a0] sm:$0xff] }
 0xa30   : > { %15789 = vmatprep.mubr.msk.f32.mxu0 %vm441_vm0, %v23061_v50  ;;  %v13601_v50 = vld [vmem:[%s23894_s11 + $0x1a8] sm:$0xff] }
 0xa32   : > { %15674 = vmatmul.mubr.msk.f32.gmra.mrb[62].mxu1 %vm441_vm0, %v23404_v56 }
 0xa33   : > { %15790 = vmatmul.mubr.msk.f32.gmra.mrb[86].mxu0 %vm441_vm0, %v23072_v27  ;;  %v17172_v27 = vpack.c.bf16 %v13601_v50, %v13600_v4  ;;  %v24225_v4 = vld [vmem:[#allocation25_spill] sm:$0xff]  ;;  %v24226_v50 = vld [vmem:[#allocation22_spill] sm:$0xff] }
 0xa34   : > { %15792 = vmatprep.mubr.msk.f32.mxu0 %vm441_vm0, %v23083_v49  ;;  %v13603_v49 = vld [vmem:[%s23894_s11 + $0x1b8] sm:$0xff] }
 0xa37   : > { %15793 = vmatmul.mubr.msk.f32.gmra.mrb[88].mxu0 %vm441_vm0, %v23094_v41  ;;  %v13637_v41 = vld [vmem:[%s23894_s11 + $0x1c8] sm:$0xff] }
 0xa38   : > { %15795 = vmatprep.mubr.msk.f32.mxu0 %vm441_vm0, %v23104_v32  ;;  %v13638_v32 = vld [vmem:[%s23894_s11 + $0x1d0] sm:$0xff] }
 0xa3b   : > { %15796 = vmatmul.mubr.msk.f32.gmra.mrb[90].mxu0 %vm441_vm0, %v23112_v44  ;;  %v13639_v44 = vld [vmem:[%s23894_s11 + $0x1d8] sm:$0xff] }
 0xa3c   : > { %15798 = vmatprep.mubr.msk.f32.mxu0 %vm441_vm0, %v23121_v9  ;;  %v17184_v52 = vpack.c.bf16 %v13639_v44, %v13638_v32  ;;  %v11407_v32 = vld [vmem:[#allocation8 + $0x49] sm:$0xff] }
 0xa3f   : > { %15799 = vmatmul.mubr.msk.f32.gmra.mrb[92].mxu0 %vm441_vm0, %v23129_v15 }
 0xa40   : > { %15801 = vmatprep.mubr.msk.f32.mxu0 %vm441_vm0, %v23422_v46 }
 0xa43   : > { %15802 = vmatmul.mubr.msk.f32.gmra.mrb[94].mxu0 %vm441_vm0, %v23426_v38 }
 0xa44   : > { %15820 = vmatprep.mubr.msk.f32.mxu0 %vm441_vm0, %v22871_v51  ;;  %v13602_v51 = vld [vmem:[%s23894_s11 + $0x1b0] sm:$0xff] }
 0xa47   : > { %15821 = vmatmul.mubr.msk.f32.vlgmr.msra.gmra.mrb[64].mxu0 %vm441_vm0, %v22879_v35  ;;  %v17176_v35 = vpack.c.bf16 %v13603_v49, %v13602_v51  ;;  %v24228_v51 = vld [vmem:[#allocation26_spill] sm:$0xff]  ;;  %v24229_v49 = vld [vmem:[#allocation27_spill] sm:$0xff] }
 0xa48   : > { %17167 = vmatpush3.bf16.msra.mxu0 %v23315_v17  ;;  %15823 = vmatprep.mubr.msk.f32.mxu0 %vm441_vm0, %v22887_v62  ;;  %v13636_v62 = vld [vmem:[%s23894_s11 + $0x1c0] sm:$0xff]  ;;  %v24221_v17 = vld [vmem:[#allocation36_spill] sm:$0xff] }
 0xa49   : > { %17169 = vmatprep.subr.bf16.mxu0 %v17168_v18 }
 0xa4b   : > { %15824 = vmatmul.mubr.msk.f32.gmra.mrb[66].mxu0 %vm441_vm0, %v22895_v54  ;;  %v17180_v54 = vpack.c.bf16 %v13637_v41, %v13636_v62  ;;  %v24232_v62 = vld [vmem:[#allocation24_spill] sm:$0xff]  ;;  %v13679_v41 = vld [vmem:[%s23894_s11 + $0x218] sm:$0xff] }
 0xa4c   : > { %15826 = vmatprep.mubr.msk.f32.mxu0 %vm441_vm0, %v22903_v25  ;;  %17171 = vmatpush3.bf16.msra.mxu0 %v17168_v18  ;;  %v24213_v25 = vld [vmem:[#allocation14_spill] sm:$0xff]  ;;  %v24224_v18 = vld [vmem:[#allocation21_spill] sm:$0xff] }
 0xa4d   : > { %17173 = vmatprep.subr.bf16.mxu0 %v17172_v27 }
 0xa4f   : > { %15827 = vmatmul.mubr.msk.f32.gmra.mrb[68].mxu0 %vm441_vm0, %v22911_v12  ;;  %v24214_v12 = vld [vmem:[#allocation33_spill] sm:$0xff] }
 0xa50   : > { %15829 = vmatprep.mubr.msk.f32.mxu0 %vm441_vm0, %v22919_v21  ;;  %17175 = vmatpush3.bf16.msra.mxu0 %v17172_v27  ;;  %v24215_v21 = vld [vmem:[#allocation34_spill] sm:$0xff]  ;;  %v24227_v27 = vld [vmem:[#allocation23_spill] sm:$0xff] }
 0xa51   : > { %17177 = vmatprep.subr.bf16.mxu0 %v17176_v35 }
 0xa53   : > { %15830 = vmatmul.mubr.msk.f32.gmra.mrb[70].mxu0 %vm441_vm0, %v22927_v39  ;;  %v24216_v39 = vld [vmem:[#allocation19_spill] sm:$0xff] }
 0xa54   : > { %15832 = vmatprep.mubr.msk.f32.mxu0 %vm441_vm0, %v22935_v8  ;;  %17179 = vmatpush3.bf16.msra.mxu0 %v17176_v35  ;;  %v24217_v8 = vld [vmem:[#allocation20_spill] sm:$0xff] }
 0xa55   : > { %17181 = vmatprep.subr.bf16.mxu0 %v17180_v54  ;;  %v24230_v35 = vld [vmem:[#allocation28_spill] sm:$0xff] }
 0xa57   : > { %15833 = vmatmul.mubr.msk.f32.gmra.mrb[72].mxu0 %vm441_vm0, %v22943_v20  ;;  %v24219_v20 = vld [vmem:[#allocation16_spill] sm:$0xff] }
 0xa58   : > { %15835 = vmatprep.mubr.msk.f32.mxu0 %vm441_vm0, %v22951_v30  ;;  %v23515_v30 = vld [vmem:[#allocation8 + $0x182] sm:$0xff] }
 0xa5b   : > { %15836 = vmatmul.mubr.msk.f32.gmra.mrb[74].mxu0 %vm441_vm0, %v24213_v25  ;;  %v11405_v25 = vld [vmem:[#allocation8 + $0x31] sm:$0xff] }
 0xa5c   : > { %15838 = vmatprep.mubr.msk.f32.mxu0 %vm441_vm0, %v24214_v12 }
 0xa5f   : > { %15839 = vmatmul.mubr.msk.f32.gmra.mrb[76].mxu0 %vm441_vm0, %v24215_v21 }
 0xa60   : > { %15841 = vmatprep.mubr.msk.f32.mxu0 %vm441_vm0, %v24216_v39  ;;  %v11406_v39 = vld [vmem:[#allocation8 + $0x39] sm:$0xff] }
 0xa63   : > { %15842 = vmatmul.mubr.msk.f32.gmra.mrb[78].mxu0 %vm441_vm0, %v24217_v8  ;;  %v13680_v8 = vld [vmem:[%s23894_s11 + $0x220] sm:$0xff] }
 0xa64   : > { %15844 = vmatprep.mubr.msk.f32.mxu0 %vm441_vm0, %v24218_v42  ;;  %v13681_v42 = vld [vmem:[%s23894_s11 + $0x228] sm:$0xff] }
 0xa65   : > { %v17204_v44 = vpack.c.bf16 %v13681_v42, %v13680_v8  ;;  %v11427_v8 = vld [vmem:[#allocation8 + $0x139] sm:$0xff] }
 0xa67   : > { %15845 = vmatmul.mubr.msk.f32.gmra.mrb[80].mxu0 %vm441_vm0, %v24219_v20 }
 0xa68   : > { %15847 = vmatprep.mubr.msk.f32.mxu0 %vm441_vm0, %v23338_v58 }
 0xa6b   : > { %15848 = vmatmul.mubr.msk.f32.gmra.mrb[82].mxu0 %vm441_vm0, %v23344_v19 }
 0xa6c   : > { %15850 = vmatprep.mubr.msk.f32.mxu0 %vm441_vm0, %v23350_v14 }
 0xa6f   : > { %15851 = vmatmul.mubr.msk.f32.gmra.mrb[84].mxu0 %vm441_vm0, %v23356_v29 }
 0xa70   : > { %15853 = vmatprep.mubr.msk.f32.mxu0 %vm441_vm0, %v23362_v43 }
 0xa73   : > { %15854 = vmatmul.mubr.msk.f32.gmra.mrb[86].mxu0 %vm441_vm0, %v23368_v60 }
 0xa74   : > { %15856 = vmatprep.mubr.msk.f32.mxu0 %vm441_vm0, %v23374_v48 }
 0xa77   : > { %15857 = vmatmul.mubr.msk.f32.gmra.mrb[88].mxu0 %vm441_vm0, %v23380_v55 }
 0xa78   : > { %15859 = vmatprep.mubr.msk.f32.mxu0 %vm441_vm0, %v23386_v26 }
 0xa7b   : > { %15860 = vmatmul.mubr.msk.f32.gmra.mrb[90].mxu0 %vm441_vm0, %v23392_v36 }
 0xa7c   : > { %15862 = vmatprep.mubr.msk.f32.mxu0 %vm441_vm0, %v23398_v11 }
 0xa7f   : > { %15863 = vmatmul.mubr.msk.f32.gmra.mrb[92].mxu0 %vm441_vm0, %v23404_v56 }
 0xa80   : > { %15865 = vmatprep.mubr.msk.f32.mxu0 %vm441_vm0, %v23515_v30 }
 0xa83   : > { %15866 = vmatmul.mubr.msk.f32.gmra.mrb[94].mxu0 %vm441_vm0, %v23519_v40 }
 0xa84   : > { %15884 = vmatprep.mubr.msk.f32.mxu0 %vm441_vm0, %v23046_v57  ;;  %v13642_v57 = vld [vmem:[%s23894_s11 + $0x1f0] sm:$0xff] }
 0xa87   : > { %15885 = vmatmul.mubr.msk.f32.vlgmr.msra.gmra.mrb[64].mxu0 %vm441_vm0, %v23052_v63  ;;  %v17192_v63 = vpack.c.bf16 %v13643_v28, %v13642_v57  ;;  %v11409_v28 = vld [vmem:[#allocation8 + $0x61] sm:$0xff] }
 0xa88   : > { %17183 = vmatpush3.bf16.msra.mxu0 %v17180_v54  ;;  %15887 = vmatprep.mubr.msk.f32.mxu0 %vm441_vm0, %v23063_v31  ;;  %v13676_v31 = vld [vmem:[%s23894_s11 + $0x200] sm:$0xff] }
 0xa89   : > { %17185 = vmatprep.subr.bf16.mxu0 %v17184_v52 }
 0xa8b   : > { %15888 = vmatmul.mubr.msk.f32.gmra.mrb[66].mxu0 %vm441_vm0, %v23074_v45  ;;  %v17196_v45 = vpack.c.bf16 %v13677_v2, %v13676_v31  ;;  %v11410_v31 = vld [vmem:[#allocation8 + $0x69] sm:$0xff] }
 0xa8c   : > { %15890 = vmatprep.mubr.msk.f32.mxu0 %vm441_vm0, %v24220_v0  ;;  %17187 = vmatpush3.bf16.msra.mxu0 %v17184_v52 }
 0xa8d   : > { %17189 = vmatprep.subr.bf16.mxu0 %v17188_v13 }
 0xa8f   : > { %15891 = vmatmul.mubr.msk.f32.gmra.mrb[68].mxu0 %vm441_vm0, %v24221_v17  ;;  %v11411_v17 = vld [vmem:[#allocation8 + $0x79] sm:$0xff] }
 0xa90   : > { %15893 = vmatprep.mubr.msk.f32.mxu0 %vm441_vm0, %v24222_v61  ;;  %17191 = vmatpush3.bf16.msra.mxu0 %v17188_v13  ;;  %v13683_v13 = vld [vmem:[%s23894_s11 + $0x238] sm:$0xff] }
 0xa91   : > { %17193 = vmatprep.subr.bf16.mxu0 %v17192_v63  ;;  %v17208_v0 = vpack.c.bf16 %v13683_v13, %v13682_v59  ;;  %v11430_v13 = vld [vmem:[#allocation8 + $0x159] sm:$0xff] }
 0xa93   : > { %15894 = vmatmul.mubr.msk.f32.gmra.mrb[70].mxu0 %vm441_vm0, %v24223_v33 }
 0xa94   : > { %15896 = vmatprep.mubr.msk.f32.mxu0 %vm441_vm0, %v24224_v18  ;;  %17195 = vmatpush3.bf16.msra.mxu0 %v17192_v63  ;;  %v11413_v18 = vld [vmem:[#allocation8 + $0x91] sm:$0xff] }
 0xa95   : > { %17197 = vmatprep.subr.bf16.mxu0 %v17196_v45 }
 0xa97   : > { %15897 = vmatmul.mubr.msk.f32.gmra.mrb[72].mxu0 %vm441_vm0, %v24225_v4 }
 0xa98   : > { %15899 = vmatprep.mubr.msk.f32.mxu0 %vm441_vm0, %v24226_v50  ;;  %v11414_v50 = vld [vmem:[#allocation8 + $0x99] sm:$0xff] }
 0xa9b   : > { %15900 = vmatmul.mubr.msk.f32.gmra.mrb[74].mxu0 %vm441_vm0, %v24227_v27 }
 0xa9c   : > { %15902 = vmatprep.mubr.msk.f32.mxu0 %vm441_vm0, %v24228_v51  ;;  %v11415_v51 = vld [vmem:[#allocation8 + $0xa9] sm:$0xff] }
 0xa9f   : > { %15903 = vmatmul.mubr.msk.f32.gmra.mrb[76].mxu0 %vm441_vm0, %v24229_v49  ;;  %v11416_v49 = vld [vmem:[#allocation8 + $0xb1] sm:$0xff] }
 0xaa0   : > { %15905 = vmatprep.mubr.msk.f32.mxu0 %vm441_vm0, %v23161_v3 }
 0xaa3   : > { %15906 = vmatmul.mubr.msk.f32.gmra.mrb[78].mxu0 %vm441_vm0, %v24230_v35  ;;  %v11417_v35 = vld [vmem:[#allocation8 + $0xc1] sm:$0xff] }
 0xaa4   : > { %15908 = vmatprep.mubr.msk.f32.mxu0 %vm441_vm0, %v23175_v1 }
 0xaa7   : > { %15909 = vmatmul.mubr.msk.f32.gmra.mrb[80].mxu0 %vm441_vm0, %v23182_v22 }
 0xaa8   : > { %15911 = vmatprep.mubr.msk.f32.mxu0 %vm441_vm0, %v23189_v23 }
 0xaab   : > { %15912 = vmatmul.mubr.msk.f32.gmra.mrb[82].mxu0 %vm441_vm0, %v23196_v53 }
 0xaac   : > { %15914 = vmatprep.mubr.msk.f32.mxu0 %vm441_vm0, %v23202_v10 }
 0xaaf   : > { %15915 = vmatmul.mubr.msk.f32.gmra.mrb[84].mxu0 %vm441_vm0, %v23208_v37 }
 0xab0   : > { %15917 = vmatprep.mubr.msk.f32.mxu0 %vm441_vm0, %v23214_v5 }
 0xab1   : > { %v23593_v3 = vpop.f32.mrb[32].mxu1 }
 0xab2   : > { %v23597_v1 = vpop.f32.mrb[33].mxu1 }
 0xab3   : > { %15918 = vmatmul.mubr.msk.f32.gmra.mrb[86].mxu0 %vm441_vm0, %v23220_v16  ;;  %v24231_v16 = vld [vmem:[#allocation37_spill] sm:$0xff] }
 0xab4   : > { %15920 = vmatprep.mubr.msk.f32.mxu0 %vm441_vm0, %v23226_v34  ;;  %v11041_v34 = vld [vmem:[#allocation8 + $0x198] sm:$0xff] }
 0xab5   : > { %v23601_v22 = vpop.f32.mrb[34].mxu1 }
 0xab6   : > { %v23603_v23 = vpop.f32.mrb[35].mxu1 }
 0xab7   : > { %15921 = vmatmul.mubr.msk.f32.gmra.mrb[88].mxu0 %vm441_vm0, %v23232_v6 }
 0xab8   : > { %15923 = vmatprep.mubr.msk.f32.mxu0 %vm441_vm0, %v23238_v24  ;;  %v11042_v24 = vld [vmem:[#allocation8 + $0x1a0] sm:$0xff] }
 0xab9   : > { %v23609_v37 = vpop.f32.mrb[36].mxu1 }
 0xaba   : > { %v23611_v53 = vpop.f32.mrb[37].mxu1 }
 0xabb   : > { %15924 = vmatmul.mubr.msk.f32.gmra.mrb[90].mxu0 %vm441_vm0, %v23244_v47  ;;  %v13678_v47 = vld [vmem:[%s23894_s11 + $0x210] sm:$0xff] }
 0xabc   : > { %15926 = vmatprep.mubr.msk.f32.mxu0 %vm441_vm0, %v24231_v16  ;;  %v17200_v12 = vpack.c.bf16 %v13679_v41, %v13678_v47  ;;  %v11418_v16 = vld [vmem:[#allocation8 + $0xc9] sm:$0xff]  ;;  %v11422_v47 = vld [vmem:[#allocation8 + $0xf9] sm:$0xff] }
 0xabd   : > { %v23617_v10 = vpop.f32.mrb[38].mxu1  ;;  %v11423_v41 = vld [vmem:[#allocation8 + $0x109] sm:$0xff] }
 0xabe   : > { %v23619_v5 = vpop.f32.mrb[39].mxu1 }
 0xabf   : > { %15927 = vmatmul.mubr.msk.f32.gmra.mrb[92].mxu0 %vm441_vm0, %v24232_v62  ;;  %v11420_v62 = vld [vmem:[#allocation8 + $0xe1] sm:$0xff] }
 0xac0   : > { %15929 = vmatprep.mubr.msk.f32.mxu0 %vm441_vm0, %v11041_v34  ;;  %v11419_v34 = vld [vmem:[#allocation8 + $0xd9] sm:$0xff] }
 0xac1   : > { %v23624_v6 = vpop.f32.mrb[40].mxu1 }
 0xac2   : > { %v23632_v54 = vpop.f32.mrb[41].mxu1 }
 0xac3   : > { %15930 = vmatmul.mubr.msk.f32.gmra.mrb[94].mxu0 %vm441_vm0, %v11042_v24  ;;  %v11421_v24 = vld [vmem:[#allocation8 + $0xf1] sm:$0xff] }
 0xac4   : > { %15948 = vmatprep.mubr.msk.f32.mxu0 %vm441_vm0, %v11405_v25  ;;  %v11424_v25 = vld [vmem:[#allocation8 + $0x111] sm:$0xff] }
 0xac5   : > { %v23636_v21 = vpop.f32.mrb[42].mxu1 }
 0xac6   : > { %v23644_v20 = vpop.f32.mrb[43].mxu1 }
 0xac7   : > { %15949 = vmatmul.mubr.msk.f32.vlgmr.msra.gmra.mrb[64].mxu0 %vm441_vm0, %v11406_v39  ;;  %v11426_v39 = vld [vmem:[#allocation8 + $0x129] sm:$0xff] }
 0xac8   : > { %17199 = vmatpush3.bf16.msra.mxu0 %v17196_v45  ;;  %15951 = vmatprep.mubr.msk.f32.mxu0 %vm441_vm0, %v11407_v32  ;;  %v11412_v45 = vld [vmem:[#allocation8 + $0x81] sm:$0xff] }
 0xac9   : > { %17201 = vmatprep.subr.bf16.mxu0 %v17200_v12  ;;  %v23648_v52 = vpop.f32.mrb[44].mxu1  ;;  %v11428_v32 = vld [vmem:[#allocation8 + $0x141] sm:$0xff] }
 0xaca   : > { %v23656_v57 = vpop.f32.mrb[45].mxu1 }
 0xacb   : > { %15952 = vmatmul.mubr.msk.f32.gmra.mrb[66].mxu0 %vm441_vm0, %v11408_v7  ;;  %v11429_v7 = vld [vmem:[#allocation8 + $0x151] sm:$0xff] }
 0xacc   : > { %15954 = vmatprep.mubr.msk.f32.mxu0 %vm441_vm0, %v11409_v28  ;;  %17203 = vmatpush3.bf16.msra.mxu0 %v17200_v12  ;;  %v11425_v12 = vld [vmem:[#allocation8 + $0x121] sm:$0xff] }
 0xacd   : > { %17205 = vmatprep.subr.bf16.mxu0 %v17204_v44  ;;  %v23660_v63 = vpop.f32.mrb[46].mxu1 }
 0xace   : > { %v23662_v2 = vpop.f32.mrb[47].mxu1 }
 0xacf   : > { %15955 = vmatmul.mubr.msk.f32.gmra.mrb[68].mxu0 %vm441_vm0, %v11410_v31 }
 0xad0   : > { %15957 = vmatprep.mubr.msk.f32.mxu0 %vm441_vm0, %v11411_v17  ;;  %17207 = vmatpush3.bf16.msra.mxu0 %v17204_v44  ;;  %v11435_v17 = vld [vmem:[#allocation8 + $0x199] sm:$0xff] }
 0xad1   : > { %17209 = vmatprep.subr.bf16.mxu0 %v17208_v0  ;;  %v23666_v61 = vpop.f32.mrb[48].mxu1 }
 0xad2   : > { %v23668_v33 = vpop.f32.mrb[49].mxu1 }
 0xad3   : > { %15958 = vmatmul.mubr.msk.f32.gmra.mrb[70].mxu0 %vm441_vm0, %v11412_v45 }
 0xad4   : > { %15960 = vmatprep.mubr.msk.f32.mxu0 %vm441_vm0, %v11413_v18  ;;  %17211 = vmatpush3.bf16.msra.mxu0 %v17208_v0 }
 0xad5   : > { %v23672_v4 = vpop.f32.mrb[50].mxu1 }
 0xad6   : > { %v23674_v27 = vpop.f32.mrb[51].mxu1 }
 0xad7   : > { %15961 = vmatmul.mubr.msk.f32.gmra.mrb[72].mxu0 %vm441_vm0, %v11414_v50 }
 0xad8   : > { %15963 = vmatprep.mubr.msk.f32.mxu0 %vm441_vm0, %v11415_v51 }
 0xadb   : > { %15964 = vmatmul.mubr.msk.f32.gmra.mrb[74].mxu0 %vm441_vm0, %v11416_v49  ;;  %v11800_v49 = vld [vmem:[#allocation8 + $0x3a] sm:$0xff] }
 0xadc   : > { %15966 = vmatprep.mubr.msk.f32.mxu0 %vm441_vm0, %v11417_v35 }
 0xadf   : > { %15967 = vmatmul.mubr.msk.f32.gmra.mrb[76].mxu0 %vm441_vm0, %v11418_v16  ;;  %v11802_v16 = vld [vmem:[#allocation8 + $0x52] sm:$0xff] }
 0xae0   : > { %15969 = vmatprep.mubr.msk.f32.mxu0 %vm441_vm0, %v11419_v34  ;;  %v11803_v34 = vld [vmem:[#allocation8 + $0x62] sm:$0xff] }
 0xae3   : > { %15970 = vmatmul.mubr.msk.f32.gmra.mrb[78].mxu0 %vm441_vm0, %v11420_v62  ;;  %v11804_v62 = vld [vmem:[#allocation8 + $0x6a] sm:$0xff] }
 0xae4   : > { %15972 = vmatprep.mubr.msk.f32.mxu0 %vm441_vm0, %v11421_v24  ;;  %v11805_v24 = vld [vmem:[#allocation8 + $0x7a] sm:$0xff] }
 0xae7   : > { %15973 = vmatmul.mubr.msk.f32.gmra.mrb[80].mxu0 %vm441_vm0, %v11422_v47  ;;  %v11806_v47 = vld [vmem:[#allocation8 + $0x82] sm:$0xff] }
 0xae8   : > { %15975 = vmatprep.mubr.msk.f32.mxu0 %vm441_vm0, %v11423_v41  ;;  %v11807_v41 = vld [vmem:[#allocation8 + $0x92] sm:$0xff] }
 0xaeb   : > { %15976 = vmatmul.mubr.msk.f32.gmra.mrb[82].mxu0 %vm441_vm0, %v11424_v25  ;;  %v11808_v25 = vld [vmem:[#allocation8 + $0x9a] sm:$0xff] }
 0xaec   : > { %15978 = vmatprep.mubr.msk.f32.mxu0 %vm441_vm0, %v11425_v12  ;;  %v11809_v12 = vld [vmem:[#allocation8 + $0xaa] sm:$0xff] }
 0xaef   : > { %15979 = vmatmul.mubr.msk.f32.gmra.mrb[84].mxu0 %vm441_vm0, %v11426_v39  ;;  %v11810_v39 = vld [vmem:[#allocation8 + $0xb2] sm:$0xff] }
 0xaf0   : > { %15981 = vmatprep.mubr.msk.f32.mxu0 %vm441_vm0, %v11427_v8  ;;  %v11811_v8 = vld [vmem:[#allocation8 + $0xc2] sm:$0xff] }
 0xaf1   : > { %v23690_v42 = vpop.f32.mrb[52].mxu1 }
 0xaf2   : > { %v23692_v44 = vpop.f32.mrb[53].mxu1 }
 0xaf3   : > { %15982 = vmatmul.mubr.msk.f32.gmra.mrb[86].mxu0 %vm441_vm0, %v11428_v32  ;;  %v11812_v32 = vld [vmem:[#allocation8 + $0xca] sm:$0xff] }
 0xaf4   : > { %15984 = vmatprep.mubr.msk.f32.mxu0 %vm441_vm0, %v11429_v7  ;;  %v11813_v7 = vld [vmem:[#allocation8 + $0xda] sm:$0xff] }
 0xaf5   : > { %v23696_v59 = vpop.f32.mrb[54].mxu1 }
 0xaf6   : > { %v23698_v28 = vpop.f32.mrb[55].mxu1 }
 0xaf7   : > { %15985 = vmatmul.mubr.msk.f32.gmra.mrb[88].mxu0 %vm441_vm0, %v11430_v13  ;;  %v11814_v13 = vld [vmem:[#allocation8 + $0xe2] sm:$0xff] }
 0xaf8   : > { %15987 = vmatprep.mubr.msk.f32.mxu0 %vm441_vm0, %v23121_v9  ;;  %v11436_v9 = vld [vmem:[#allocation8 + $0x1a1] sm:$0xff] }
 0xaf9   : > { %v23703_v0 = vpop.f32.mrb[56].mxu1 }
 0xafa   : > { %v23705_v31 = vpop.f32.mrb[57].mxu1 }
 0xafb   : > { %15988 = vmatmul.mubr.msk.f32.gmra.mrb[90].mxu0 %vm441_vm0, %v23129_v15  ;;  %v11799_v15 = vld [vmem:[#allocation8 + $0x32] sm:$0xff] }
 0xafc   : > { %15990 = vmatprep.mubr.msk.f32.mxu0 %vm441_vm0, %v23422_v46 }
 0xafd   : > { %v23711_v45 = vpop.f32.mrb[58].mxu1 }
 0xafe   : > { %v23713_v18 = vpop.f32.mrb[59].mxu1 }
 0xaff   : > { %15991 = vmatmul.mubr.msk.f32.gmra.mrb[92].mxu0 %vm441_vm0, %v23426_v38  ;;  %v11801_v38 = vld [vmem:[#allocation8 + $0x4a] sm:$0xff] }
 0xb00   : > { %15993 = vmatprep.mubr.msk.f32.mxu0 %vm441_vm0, %v11435_v17 }
 0xb01   : > { %v23718_v50 = vpop.f32.mrb[60].mxu1 }
 0xb02   : > { %v23720_v51 = vpop.f32.mrb[61].mxu1 }
 0xb03   : > { %15994 = vmatmul.mubr.msk.f32.gmra.mrb[94].mxu0 %vm441_vm0, %v11436_v9 }
 0xb04   : > { %16012 = vmatprep.mubr.msk.f32.mxu0 %vm441_vm0, %v11799_v15 }
 0xb05   : > { %v23724_v46 = vpop.f32.mrb[62].mxu1 }
 0xb06   : > { %v23726_v35 = vpop.f32.mrb[63].mxu1 }
 0xb07   : > { %16013 = vmatmul.mubr.msk.f32.vlgmr.msra.gmra.mrb[64].mxu0 %vm441_vm0, %v11800_v49 }
 0xb08   : > { %16015 = vmatprep.mubr.msk.f32.mxu0 %vm441_vm0, %v11801_v38 }
 0xb0b   : > { %16016 = vmatmul.mubr.msk.f32.gmra.mrb[66].mxu0 %vm441_vm0, %v11802_v16 }
 0xb0c   : > { %16018 = vmatprep.mubr.msk.f32.mxu0 %vm441_vm0, %v11803_v34 }
 0xb0f   : > { %16019 = vmatmul.mubr.msk.f32.gmra.mrb[68].mxu0 %vm441_vm0, %v11804_v62 }
 0xb10   : > { %16021 = vmatprep.mubr.msk.f32.mxu0 %vm441_vm0, %v11805_v24 }
 0xb13   : > { %16022 = vmatmul.mubr.msk.f32.gmra.mrb[70].mxu0 %vm441_vm0, %v11806_v47 }
 0xb14   : > { %16024 = vmatprep.mubr.msk.f32.mxu0 %vm441_vm0, %v11807_v41 }
 0xb17   : > { %16025 = vmatmul.mubr.msk.f32.gmra.mrb[72].mxu0 %vm441_vm0, %v11808_v25 }
 0xb18   : > { %16027 = vmatprep.mubr.msk.f32.mxu0 %vm441_vm0, %v11809_v12 }
 0xb1b   : > { %16028 = vmatmul.mubr.msk.f32.gmra.mrb[74].mxu0 %vm441_vm0, %v11810_v39 }
 0xb1c   : > { %16030 = vmatprep.mubr.msk.f32.mxu0 %vm441_vm0, %v11811_v8 }
 0xb1f   : > { %16031 = vmatmul.mubr.msk.f32.gmra.mrb[76].mxu0 %vm441_vm0, %v11812_v32 }
 0xb20   : > { %16033 = vmatprep.mubr.msk.f32.mxu0 %vm441_vm0, %v11813_v7 }
 0xb23   : > { %16034 = vmatmul.mubr.msk.f32.gmra.mrb[78].mxu0 %vm441_vm0, %v11814_v13 }
 0xb24   : > { %16036 = vmatprep.mubr.msk.f32.mxu0 %vm441_vm0, %v23338_v58  ;;  %v11829_v58 = vld [vmem:[#allocation8 + $0x19a] sm:$0xff] }
 0xb27   : > { %16037 = vmatmul.mubr.msk.f32.gmra.mrb[80].mxu0 %vm441_vm0, %v23344_v19  ;;  %v11830_v19 = vld [vmem:[#allocation8 + $0x1a2] sm:$0xff] }
 0xb28   : > { %16039 = vmatprep.mubr.msk.f32.mxu0 %vm441_vm0, %v23350_v14 }
 0xb2b   : > { %16040 = vmatmul.mubr.msk.f32.gmra.mrb[82].mxu0 %vm441_vm0, %v23356_v29  ;;  %v23777_v29 = vld [vmem:[%s23895_s12] ss:$0 sm:$0xff] }
 0xb2c   : > { %16042 = vmatprep.mubr.msk.f32.mxu0 %vm441_vm0, %v23362_v43 }
 0xb2f   : > { %16043 = vmatmul.mubr.msk.f32.gmra.mrb[84].mxu0 %vm441_vm0, %v23368_v60 }
 0xb30   : > { %16045 = vmatprep.mubr.msk.f32.mxu0 %vm441_vm0, %v23374_v48 }
 0xb33   : > { %16046 = vmatmul.mubr.msk.f32.gmra.mrb[86].mxu0 %vm441_vm0, %v23380_v55 }
 0xb34   : > { %16048 = vmatprep.mubr.msk.f32.mxu0 %vm441_vm0, %v23386_v26 }
 0xb37   : > { %16049 = vmatmul.mubr.msk.f32.gmra.mrb[88].mxu0 %vm441_vm0, %v23392_v36 }
 0xb38   : > { %16051 = vmatprep.mubr.msk.f32.mxu0 %vm441_vm0, %v23398_v11 }
 0xb3b   : > { %16052 = vmatmul.mubr.msk.f32.gmra.mrb[90].mxu0 %vm441_vm0, %v23404_v56 }
 0xb3c   : > { %16054 = vmatprep.mubr.msk.f32.mxu0 %vm441_vm0, %v23515_v30 }
 0xb3f   : > { %16055 = vmatmul.mubr.msk.f32.gmra.mrb[92].mxu0 %vm441_vm0, %v23519_v40 }
 0xb40   : > { %16057 = vmatprep.mubr.msk.f32.mxu0 %vm441_vm0, %v11829_v58 }
 0xb43   : > { %16058 = vmatmul.mubr.msk.f32.gmra.mrb[94].mxu0 %vm441_vm0, %v11830_v19 }
 0xbda   : > { %v16014_v14 = vpop.f32.mrb[64].mxu0 }
 0xbdb   : > { %v17220_v43 = vadd.f32 %v16014_v14, %v23593_v3  ;;  %v12002_v60 = vpop.f32.mrb[65].mxu0 }
 0xbdc   : > { %v17221_v48 = vadd.f32 %v12002_v60, %v23597_v1 }
 0xbdd   : > { %v12201_v55 = vadd.f32 %v17220_v43, %v23777_v29 }
 0xbde   : > { %v12200_v26 = vadd.f32 %v17221_v48, %v23777_v29  ;;  %v16017_v36 = vpop.f32.mrb[66].mxu0 }
 0xbdf   : > { %12233 = vst [vmem:[%s23783_s18 + $0x8] sm:$0xff] %v12201_v55  ;;  %v17222_v11 = vadd.f32 %v16017_v36, %v23601_v22  ;;  %v12012_v56 = vpop.f32.mrb[67].mxu0 }
 0xbe0   : > { %12232 = vst [vmem:[%s23783_s18] sm:$0xff] %v12200_v26  ;;  %v17223_v30 = vadd.f32 %v12012_v56, %v23603_v23 }
 0xbe1   : > { %v12203_v40 = vadd.f32 %v17222_v11, %v23777_v29 }
 0xbe2   : > { %v12202_v3 = vadd.f32 %v17223_v30, %v23777_v29  ;;  %v16020_v17 = vpop.f32.mrb[68].mxu0 }
 0xbe3   : > { %12235 = vst [vmem:[%s23783_s18 + $0x18] sm:$0xff] %v12203_v40  ;;  %v17224_v1 = vadd.f32 %v16020_v17, %v23609_v37  ;;  %v12022_v9 = vpop.f32.mrb[69].mxu0 }
 0xbe4   : > { %12234 = vst [vmem:[%s23783_s18 + $0x10] sm:$0xff] %v12202_v3  ;;  %v17225_v15 = vadd.f32 %v12022_v9, %v23611_v53 }
 0xbe5   : > { %v12205_v22 = vadd.f32 %v17224_v1, %v23777_v29 }
 0xbe6   : > { %v12204_v49 = vadd.f32 %v17225_v15, %v23777_v29  ;;  %v16023_v38 = vpop.f32.mrb[70].mxu0 }
 0xbe7   : > { %12237 = vst [vmem:[%s23783_s18 + $0x28] sm:$0xff] %v12205_v22  ;;  %v17226_v23 = vadd.f32 %v16023_v38, %v23617_v10  ;;  %v12032_v16 = vpop.f32.mrb[71].mxu0 }
 0xbe8   : > { %12236 = vst [vmem:[%s23783_s18 + $0x20] sm:$0xff] %v12204_v49  ;;  %v17227_v34 = vadd.f32 %v12032_v16, %v23619_v5 }
 0xbe9   : > { %v12207_v37 = vadd.f32 %v17226_v23, %v23777_v29 }
 0xbea   : > { %v12206_v62 = vadd.f32 %v17227_v34, %v23777_v29  ;;  %v16026_v24 = vpop.f32.mrb[72].mxu0 }
 0xbeb   : > { %12239 = vst [vmem:[%s23783_s18 + $0x38] sm:$0xff] %v12207_v37  ;;  %v17228_v53 = vadd.f32 %v16026_v24, %v23624_v6  ;;  %v12042_v47 = vpop.f32.mrb[73].mxu0 }
 0xbec   : > { %12238 = vst [vmem:[%s23783_s18 + $0x30] sm:$0xff] %v12206_v62  ;;  %v17229_v41 = vadd.f32 %v12042_v47, %v23632_v54 }
 0xbed   : > { %v12209_v10 = vadd.f32 %v17228_v53, %v23777_v29 }
 0xbee   : > { %v12208_v25 = vadd.f32 %v17229_v41, %v23777_v29  ;;  %v16029_v12 = vpop.f32.mrb[74].mxu0 }
 0xbef   : > { %12241 = vst [vmem:[%s23783_s18 + $0x48] sm:$0xff] %v12209_v10  ;;  %v17230_v5 = vadd.f32 %v16029_v12, %v23636_v21  ;;  %v12052_v39 = vpop.f32.mrb[75].mxu0 }
 0xbf0   : > { %12240 = vst [vmem:[%s23783_s18 + $0x40] sm:$0xff] %v12208_v25  ;;  %v17231_v8 = vadd.f32 %v12052_v39, %v23644_v20 }
 0xbf1   : > { %v12211_v6 = vadd.f32 %v17230_v5, %v23777_v29 }
 0xbf2   : > { %v12210_v32 = vadd.f32 %v17231_v8, %v23777_v29  ;;  %v16032_v7 = vpop.f32.mrb[76].mxu0 }
 0xbf3   : > { %12243 = vst [vmem:[%s23783_s18 + $0x58] sm:$0xff] %v12211_v6  ;;  %v17232_v54 = vadd.f32 %v16032_v7, %v23648_v52  ;;  %v12062_v13 = vpop.f32.mrb[77].mxu0 }
 0xbf4   : > { %12242 = vst [vmem:[%s23783_s18 + $0x50] sm:$0xff] %v12210_v32  ;;  %v17233_v58 = vadd.f32 %v12062_v13, %v23656_v57 }
 0xbf5   : > { %v12213_v21 = vadd.f32 %v17232_v54, %v23777_v29 }
 0xbf6   : > { %v12212_v19 = vadd.f32 %v17233_v58, %v23777_v29  ;;  %v16035_v14 = vpop.f32.mrb[78].mxu0 }
 0xbf7   : > { %12245 = vst [vmem:[%s23783_s18 + $0x68] sm:$0xff] %v12213_v21  ;;  %v17234_v20 = vadd.f32 %v16035_v14, %v23660_v63  ;;  %v12072_v43 = vpop.f32.mrb[79].mxu0 }
 0xbf8   : > { %12244 = vst [vmem:[%s23783_s18 + $0x60] sm:$0xff] %v12212_v19  ;;  %v17235_v60 = vadd.f32 %v12072_v43, %v23662_v2 }
 0xbf9   : > { %v12215_v52 = vadd.f32 %v17234_v20, %v23777_v29 }
 0xbfa   : > { %v12214_v48 = vadd.f32 %v17235_v60, %v23777_v29  ;;  %v16038_v55 = vpop.f32.mrb[80].mxu0 }
 0xbfb   : > { %12247 = vst [vmem:[%s23783_s18 + $0x78] sm:$0xff] %v12215_v52  ;;  %v17236_v57 = vadd.f32 %v16038_v55, %v23666_v61  ;;  %v12082_v26 = vpop.f32.mrb[81].mxu0 }
 0xbfc   : > { %12246 = vst [vmem:[%s23783_s18 + $0x70] sm:$0xff] %v12214_v48  ;;  %v17237_v36 = vadd.f32 %v12082_v26, %v23668_v33 }
 0xbfd   : > { %v12217_v63 = vadd.f32 %v17236_v57, %v23777_v29 }
 0xbfe   : > { %v12216_v11 = vadd.f32 %v17237_v36, %v23777_v29  ;;  %v16041_v56 = vpop.f32.mrb[82].mxu0 }
 0xbff   : > { %12249 = vst [vmem:[%s23783_s18 + $0x88] sm:$0xff] %v12217_v63  ;;  %v17238_v2 = vadd.f32 %v16041_v56, %v23672_v4  ;;  %v12092_v30 = vpop.f32.mrb[83].mxu0 }
 0xc00   : > { %12248 = vst [vmem:[%s23783_s18 + $0x80] sm:$0xff] %v12216_v11  ;;  %v17239_v40 = vadd.f32 %v12092_v30, %v23674_v27 }
 0xc01   : > { %v12219_v61 = vadd.f32 %v17238_v2, %v23777_v29 }
 0xc02   : > { %v12218_v3 = vadd.f32 %v17239_v40, %v23777_v29  ;;  %v16044_v17 = vpop.f32.mrb[84].mxu0 }
 0xc03   : > { %12251 = vst [vmem:[%s23783_s18 + $0x98] sm:$0xff] %v12219_v61  ;;  %v17240_v33 = vadd.f32 %v16044_v17, %v23690_v42  ;;  %v12102_v1 = vpop.f32.mrb[85].mxu0 }
 0xc04   : > { %12250 = vst [vmem:[%s23783_s18 + $0x90] sm:$0xff] %v12218_v3  ;;  %v17241_v9 = vadd.f32 %v12102_v1, %v23692_v44 }
 0xc05   : > { %v12221_v4 = vadd.f32 %v17240_v33, %v23777_v29 }
 0xc06   : > { %v12220_v15 = vadd.f32 %v17241_v9, %v23777_v29  ;;  %v16047_v22 = vpop.f32.mrb[86].mxu0 }
 0xc07   : > { %12253 = vst [vmem:[%s23783_s18 + $0xa8] sm:$0xff] %v12221_v4  ;;  %v17242_v27 = vadd.f32 %v16047_v22, %v23696_v59  ;;  %v12112_v49 = vpop.f32.mrb[87].mxu0 }
 0xc08   : > { %12252 = vst [vmem:[%s23783_s18 + $0xa0] sm:$0xff] %v12220_v15  ;;  %v17243_v38 = vadd.f32 %v12112_v49, %v23698_v28 }
 0xc09   : > { %v12223_v42 = vadd.f32 %v17242_v27, %v23777_v29 }
 0xc0a   : > { %v12222_v23 = vadd.f32 %v17243_v38, %v23777_v29  ;;  %v16050_v16 = vpop.f32.mrb[88].mxu0 }
 0xc0b   : > { %12255 = vst [vmem:[%s23783_s18 + $0xb8] sm:$0xff] %v12223_v42  ;;  %v17244_v44 = vadd.f32 %v16050_v16, %v23703_v0  ;;  %v12122_v34 = vpop.f32.mrb[89].mxu0 }
 0xc0c   : > { %12254 = vst [vmem:[%s23783_s18 + $0xb0] sm:$0xff] %v12222_v23  ;;  %v17245_v37 = vadd.f32 %v12122_v34, %v23705_v31 }
 0xc0d   : > { %v12225_v59 = vadd.f32 %v17244_v44, %v23777_v29 }
 0xc0e   : > { %v12224_v62 = vadd.f32 %v17245_v37, %v23777_v29  ;;  %v16053_v24 = vpop.f32.mrb[90].mxu0 }
 0xc0f   : > { %12257 = vst [vmem:[%s23783_s18 + $0xc8] sm:$0xff] %v12225_v59  ;;  %v17246_v28 = vadd.f32 %v16053_v24, %v23711_v45  ;;  %v12132_v53 = vpop.f32.mrb[91].mxu0 }
 0xc10   : > { %12256 = vst [vmem:[%s23783_s18 + $0xc0] sm:$0xff] %v12224_v62  ;;  %v17247_v47 = vadd.f32 %v12132_v53, %v23713_v18 }
 0xc11   : > { %v12227_v0 = vadd.f32 %v17246_v28, %v23777_v29 }
 0xc12   : > { %v12226_v41 = vadd.f32 %v17247_v47, %v23777_v29  ;;  %v16056_v10 = vpop.f32.mrb[92].mxu0 }
 0xc13   : > { %12259 = vst [vmem:[%s23783_s18 + $0xd8] sm:$0xff] %v12227_v0  ;;  %v17248_v31 = vadd.f32 %v16056_v10, %v23718_v50  ;;  %v12142_v25 = vpop.f32.mrb[93].mxu0 }
 0xc14   : > { %12258 = vst [vmem:[%s23783_s18 + $0xd0] sm:$0xff] %v12226_v41  ;;  %v17249_v12 = vadd.f32 %v12142_v25, %v23720_v51 }
 0xc15   : > { %v12229_v45 = vadd.f32 %v17248_v31, %v23777_v29 }
 0xc16   : > { %v12228_v5 = vadd.f32 %v17249_v12, %v23777_v29  ;;  %v16059_v39 = vpop.f32.mrb[94].mxu0 }
 0xc17   : > { %12261 = vst [vmem:[%s23783_s18 + $0xe8] sm:$0xff] %v12229_v45  ;;  %v17250_v18 = vadd.f32 %v16059_v39, %v23724_v46  ;;  %v12152_v8 = vpop.f32.mrb[95].mxu0 }
 0xc18   : > { %12260 = vst [vmem:[%s23783_s18 + $0xe0] sm:$0xff] %v12228_v5  ;;  %v17251_v6 = vadd.f32 %v12152_v8, %v23726_v35 }
 0xc19   : > { %v12231_v32 = vadd.f32 %v17250_v18, %v23777_v29 }
 0xc1a   : > { %v12230_v50 = vadd.f32 %v17251_v6, %v23777_v29 }
 0xc1b   : > { %12263 = vst [vmem:[%s23783_s18 + $0xf8] sm:$0xff] %v12231_v32 }
 0xc1c   : > { %12262 = vst [vmem:[%s23783_s18 + $0xf0] sm:$0xff] %v12230_v50 }
 0xc1d PF: > { %s23_s25 = sadd.s32 1, %s17706_s25  }
 0xc1e   : > { %p20_p4 = scmp.ge.s32.totalorder %s23_s25, 4  }
 0xc20   :  { %22 = sbr.rel (!%p20_p4) target bundleno = 1 (0x1), region = 256 }

</bundles_post_ra>
